<compile_context>
chip_gen: v7x
topology: tpu7x:2x2x1
jax: 0.10.0
libtpu: 0.0.40
codegen_flags: <defaults>
</compile_context>

<pallas_src>
import jax
import jax.numpy as jnp
from jax.experimental import pallas as pl
from jax.experimental.pallas import tpu as pltpu

NC = 3
NDF = 64
EPS = 1e-5
SLOPE = 0.2
TAPS = 16                      # 4x4 spatial taps of the final valid conv
VMEM_LIMIT = 40 * 1024 * 1024  # explicit scoped-VMEM budget (fits v5e..v7x)


# ---------------------------------------------------------------------------
# Pallas kernels
# ---------------------------------------------------------------------------
def _matmul_leaky_kernel(x_ref, w_ref, o_ref):
    """One M-tile of LeakyReLU(X @ W); bf16 operands, f32 accumulate."""
    y = jnp.dot(x_ref[...], w_ref[...], preferred_element_type=jnp.float32)
    o_ref[...] = jnp.where(y >= 0, y, SLOPE * y).astype(o_ref.dtype)


def _conv_stats_kernel(x_ref, w_ref, raw_ref, sum_ref, sq_ref):
    """Conv-as-matmul for one M-tile.

    Writes the raw bf16 conv output plus this tile's per-channel sum and
    sum-of-squares (f32), so BatchNorm statistics can be finished with a tiny
    cross-tile reduction outside the kernel (M stays tileable -> bounded VMEM,
    M-parallel grid).
    """
    y = jnp.dot(x_ref[...], w_ref[...], preferred_element_type=jnp.float32)
    raw_ref[...] = y.astype(raw_ref.dtype)
    sum_ref[...] = jnp.sum(y, axis=0, keepdims=True).reshape(1, 1, -1)
    sq_ref[...] = jnp.sum(y * y, axis=0, keepdims=True).reshape(1, 1, -1)


def _scale_leaky_kernel(x_ref, s_ref, b_ref, o_ref):
    """Per-channel affine (folded BatchNorm) + LeakyReLU(0.2)."""
    y = x_ref[...].astype(jnp.float32) * s_ref[...] + b_ref[...]
    o_ref[...] = jnp.where(y >= 0, y, SLOPE * y).astype(o_ref.dtype)


def _head_kernel(x_ref, s_ref, b_ref, w5_ref, o_ref):
    """Layer-4 BN affine + LeakyReLU fused with layer 5 (4x4 valid conv,
    1 output channel) + Sigmoid, for a tile of whole images.

    x_ref is (tb*TAPS, 512) raw conv-4 output; the 1-channel conv is a
    broadcast multiply with the (TAPS, 512) w5 block followed by tap (sublane)
    and channel (lane) reductions -- no MXU matmul, no tiled w5rows / mask.
    """
    n_ch = x_ref.shape[-1]
    tb = o_ref.shape[0]
    y = x_ref[...].astype(jnp.float32) * s_ref[...] + b_ref[...]
    y = jnp.where(y >= 0, y, SLOPE * y)
    y3 = y.reshape(tb, TAPS, n_ch)                               # split rows
    per_tap = jnp.sum(y3 * w5_ref[...][None, :, :], axis=-1)     # (tb, TAPS)
    logit = jnp.sum(per_tap, axis=-1, keepdims=True)             # (tb, 1)
    o_ref[...] = 1.0 / (1.0 + jnp.exp(-logit))


# ---------------------------------------------------------------------------
# pallas_call wrappers
# ---------------------------------------------------------------------------
def _pick_tile(m, row_bytes, cap=8192, max_block_bytes=8 << 20):
    """Largest power-of-two tile <= cap that divides m and fits the budget."""
    for c in (8192, 4096, 2048, 1024, 512, 256, 128, 64, 32, 16, 8):
        if c <= cap and m % c == 0 and c * row_bytes <= max_block_bytes:
            return c
    return m


def _mosaic_params(*semantics):
    return pltpu.CompilerParams(dimension_semantics=semantics,
                                vmem_limit_bytes=VMEM_LIMIT)


def matmul_leaky(x, w):
    """LeakyReLU(x @ w): layer-1 conv (no BN).  x (M,K) bf16, w (K,N) bf16."""
    m, k = x.shape
    n = w.shape[1]
    tm = _pick_tile(m, k * 2, cap=8192)
    return pl.pallas_call(
        _matmul_leaky_kernel,
        out_shape=jax.ShapeDtypeStruct((m, n), jnp.bfloat16),
        grid_spec=pltpu.PrefetchScalarGridSpec(
            num_scalar_prefetch=0,
            grid=(m // tm,),
            in_specs=[pl.BlockSpec((tm, k), lambda i: (i, 0)),
                      pl.BlockSpec((k, n), lambda i: (0, 0))],
            out_specs=pl.BlockSpec((tm, n), lambda i: (i, 0))),
        compiler_params=_mosaic_params("parallel"),
    )(x, w)


def conv_stats(cols, w):
    """Conv matmul + per-M-tile BN partial sums.  Returns (raw, sums, sumsqs)."""
    m, k = cols.shape
    n = w.shape[1]
    tm = _pick_tile(m, k * 2, cap=2048)
    mt = m // tm
    return pl.pallas_call(
        _conv_stats_kernel,
        out_shape=(jax.ShapeDtypeStruct((m, n), jnp.bfloat16),
                   jax.ShapeDtypeStruct((mt, 1, n), jnp.float32),
                   jax.ShapeDtypeStruct((mt, 1, n), jnp.float32)),
        grid_spec=pltpu.PrefetchScalarGridSpec(
            num_scalar_prefetch=0,
            grid=(mt,),
            in_specs=[pl.BlockSpec((tm, k), lambda i: (i, 0)),
                      pl.BlockSpec((k, n), lambda i: (0, 0))],
            out_specs=[pl.BlockSpec((tm, n), lambda i: (i, 0)),
                       pl.BlockSpec((1, 1, n), lambda i: (i, 0, 0)),
                       pl.BlockSpec((1, 1, n), lambda i: (i, 0, 0))]),
        compiler_params=_mosaic_params("parallel"),
    )(cols, w)


def scale_leaky(raw, scale, shift):
    """BN affine (precomputed scale/shift) + LeakyReLU, M-tiled."""
    m, n = raw.shape
    tm = _pick_tile(m, n * 2, cap=4096)
    return pl.pallas_call(
        _scale_leaky_kernel,
        out_shape=jax.ShapeDtypeStruct((m, n), jnp.bfloat16),
        grid_spec=pltpu.PrefetchScalarGridSpec(
            num_scalar_prefetch=0,
            grid=(m // tm,),
            in_specs=[pl.BlockSpec((tm, n), lambda i: (i, 0)),
                      pl.BlockSpec((1, n), lambda i: (0, 0)),
                      pl.BlockSpec((1, n), lambda i: (0, 0))],
            out_specs=pl.BlockSpec((tm, n), lambda i: (i, 0))),
        compiler_params=_mosaic_params("parallel"),
    )(raw, scale, shift)


def head(raw4, scale, shift, w5block):
    """Layer-4 BN+LeakyReLU fused with the final 1-channel conv + Sigmoid."""
    m, n = raw4.shape                       # m = batch * TAPS
    b = m // TAPS
    tm = m
    for c in (4096, 2048, 1024, 512, 256, 128, 64, 32, 16):
        if c <= m and m % c == 0:
            tm = c
            break
    mt = m // tm
    tb = tm // TAPS
    return pl.pallas_call(
        _head_kernel,
        out_shape=jax.ShapeDtypeStruct((b, 1), jnp.float32),
        grid_spec=pltpu.PrefetchScalarGridSpec(
            num_scalar_prefetch=0,
            grid=(mt,),
            in_specs=[pl.BlockSpec((tm, n), lambda i: (i, 0)),
                      pl.BlockSpec((1, n), lambda i: (0, 0)),
                      pl.BlockSpec((1, n), lambda i: (0, 0)),
                      pl.BlockSpec((TAPS, n), lambda i: (0, 0))],
            out_specs=pl.BlockSpec((tb, 1), lambda i: (i, 0))),
        compiler_params=_mosaic_params("parallel"),
    )(raw4, scale, shift, w5block)


# ---------------------------------------------------------------------------
# JAX glue: im2col + weight layout + composition
# ---------------------------------------------------------------------------
def im2col(x, k, stride, pad):
    """x: (N, H, W, C) -> (N*Ho*Wo, k*k*C), feature order (kh, kw, c)."""
    n, h, w, c = x.shape
    if pad:
        x = jnp.pad(x, ((0, 0), (pad, pad), (pad, pad), (0, 0)))
    ho = (h + 2 * pad - k) // stride + 1
    wo = (w + 2 * pad - k) // stride + 1
    cols = []
    for kh in range(k):
        for kw in range(k):
            cols.append(
                x[:, kh:kh + stride * (ho - 1) + 1:stride,
                     kw:kw + stride * (wo - 1) + 1:stride, :])
    patches = jnp.concatenate(cols, axis=-1)          # (N, Ho, Wo, k*k*C)
    return patches.reshape(n * ho * wo, k * k * c), (n, ho, wo)


def _reshape_w(w_oihw):
    """OIHW -> (kh*kw*cin, cout) in (kh, kw, cin) feature order, bf16."""
    cout, cin, kh, kw = w_oihw.shape
    return jnp.transpose(w_oihw, (2, 3, 1, 0)).reshape(
        kh * kw * cin, cout).astype(jnp.bfloat16)


def _bn_scale_shift(sums, sumsqs, m, gamma, beta):
    """Finish training-mode BatchNorm stats from per-tile partial sums."""
    total = jnp.sum(sums, axis=(0, 1))                  # (N,) f32
    total_sq = jnp.sum(sumsqs, axis=(0, 1))
    mean = total / m
    var = jnp.maximum(total_sq / m - mean * mean, 0.0)  # clamp: no rsqrt NaN
    inv = jax.lax.rsqrt(var + EPS)
    scale = gamma * inv
    shift = beta - mean * scale
    return (scale.reshape(1, -1).astype(jnp.float32),
            shift.reshape(1, -1).astype(jnp.float32))


def _conv_bn_leaky_block(y_nhwc, w_oihw, gamma, beta):
    """Conv(4, 2, 1) + BatchNorm(train) + LeakyReLU for one middle layer."""
    n = y_nhwc.shape[0]
    cols, (_, ho, wo) = im2col(y_nhwc, 4, 2, 1)
    raw, s, q = conv_stats(cols, _reshape_w(w_oihw))
    scale, shift = _bn_scale_shift(s, q, cols.shape[0], gamma, beta)
    act = scale_leaky(raw, scale, shift)
    return act.reshape(n, ho, wo, w_oihw.shape[0])


def init_params(key):
    ks = jax.random.split(key, 5)

    def w(k, cout, cin):
        return 0.02 * jax.random.normal(k, (cout, cin, 4, 4), jnp.float32)

    return {
        "w1": w(ks[0], NDF, NC),
        "w2": w(ks[1], NDF * 2, NDF),
        "g2": jnp.ones((NDF * 2,), jnp.float32),
        "b2": jnp.zeros((NDF * 2,), jnp.float32),
        "w3": w(ks[2], NDF * 4, NDF * 2),
        "g3": jnp.ones((NDF * 4,), jnp.float32),
        "b3": jnp.zeros((NDF * 4,), jnp.float32),
        "w4": w(ks[3], NDF * 8, NDF * 4),
        "g4": jnp.ones((NDF * 8,), jnp.float32),
        "b4": jnp.zeros((NDF * 8,), jnp.float32),
        "w5": w(ks[4], 1, NDF * 8),
    }


@jax.jit
def discriminator_forward(x_nchw, params):
    """Input NCHW (N, 3, 64, 64) -> NCHW (N, 1, 1, 1), matching PyTorch."""
    x = jnp.transpose(x_nchw, (0, 2, 3, 1)).astype(jnp.bfloat16)   # NHWC bf16
    n = x.shape[0]

    # layer 1: Conv(3 -> 64, 4, 2, 1) + LeakyReLU(0.2), no BN.
    # Two output rows are packed per 128-lane row (block-diagonal weights and
    # free row-major reshapes) so the output HBM stores are lane-dense.
    cols, (_, ho, wo) = im2col(x, 4, 2, 1)                   # (n*1024, 48)
    m1, k1 = cols.shape
    w1m = _reshape_w(params["w1"])                           # (48, 64)
    w1blk = jnp.zeros((2 * k1, 2 * NDF), jnp.bfloat16)
    w1blk = w1blk.at[:k1, :NDF].set(w1m).at[k1:, NDF:].set(w1m)
    y = matmul_leaky(cols.reshape(m1 // 2, 2 * k1), w1blk)   # (m1/2, 128)
    y = y.reshape(n, ho, wo, NDF)

    # layers 2 / 3: Conv + BN + LeakyReLU (two-pass BN, M-tiled kernels).
    y = _conv_bn_leaky_block(y, params["w2"], params["g2"], params["b2"])
    y = _conv_bn_leaky_block(y, params["w3"], params["g3"], params["b3"])

    # layer 4 conv + BN partial stats, then the fused head: BN affine +
    # LeakyReLU + Conv(512 -> 1, 4x4 valid) + Sigmoid in one kernel.
    cols, _ = im2col(y, 4, 2, 1)                             # (n*16, 4096)
    raw4, s4, q4 = conv_stats(cols, _reshape_w(params["w4"]))
    scale4, shift4 = _bn_scale_shift(s4, q4, cols.shape[0],
                                     params["g4"], params["b4"])
    w5block = jnp.transpose(params["w5"], (2, 3, 1, 0)).reshape(
        TAPS, NDF * 8).astype(jnp.float32)                   # (16, 512)
    out = head(raw4, scale4, shift4, w5block)                # (n, 1)
    return out.reshape(n, 1, 1, 1)


if __name__ == "__main__":
    key = jax.random.PRNGKey(0)
    pkey, xkey = jax.random.split(key)
    params = init_params(pkey)
    # DCGAN discriminator requires 64x64 spatial input (final 4x4 valid conv).
    x = jax.random.normal(xkey, (2, NC, 64, 64), jnp.float32)
    out = discriminator_forward(x, params)
    out = jax.block_until_ready(out)
    assert out.shape == (2, 1, 1, 1), out.shape
    assert bool(jnp.all(jnp.isfinite(out)))
    assert bool(jnp.all((out >= 0.0) & (out <= 1.0)))
    print("KERNEL_OK")
</pallas_src>

<mosaic_0001>
module attributes {stable_mosaic.version = 11 : i64} {
  func.func @_matmul_leaky_kernel(%arg0: i32, %arg1: memref<1024x96xbf16, #tpu.memory_space<vmem>>, %arg2: memref<96x128xbf16, #tpu.memory_space<vmem>>, %arg3: memref<1024x128xbf16, #tpu.memory_space<vmem>>) attributes {dimension_semantics = [#tpu.dimension_semantics<parallel>], iteration_bounds = array<i64: 1>, scalar_prefetch = 0 : i64, scratch_operands = 0 : i64, tpu.core_type = #tpu.core_type<tc>, window_params = [{transform_indices = @transform_0, window_bounds = array<i64: 1024, 96>}, {pipeline_mode = #tpu.pipeline_mode<synchronous>, transform_indices = @transform_1, window_bounds = array<i64: 96, 128>}, {transform_indices = @transform_2, window_bounds = array<i64: 1024, 128>}]} {
    %c0 = arith.constant 0 : index
    %c0_0 = arith.constant 0 : index
    %0 = vector.load %arg1[%c0, %c0_0] : memref<1024x96xbf16, #tpu.memory_space<vmem>>, vector<1024x96xbf16>
    %c0_1 = arith.constant 0 : index
    %c0_2 = arith.constant 0 : index
    %1 = vector.load %arg2[%c0_1, %c0_2] : memref<96x128xbf16, #tpu.memory_space<vmem>>, vector<96x128xbf16>
    %cst = arith.constant dense<0.000000e+00> : vector<1024x128xf32>
    %2 = tpu.matmul %0, %1, %cst {dimension_numbers = #tpu.dot_dimension_numbers<[1], [0], [0], [1], [0, 0, 1, 1], [], []>} : vector<1024x96xbf16>, vector<96x128xbf16>, vector<1024x128xf32> -> vector<1024x128xf32>
    %cst_3 = arith.constant 0.000000e+00 : f32
    %3 = vector.broadcast %cst_3 : f32 to vector<1024x128xf32>
    %4 = arith.cmpf oge, %2, %3 : vector<1024x128xf32>
    %cst_4 = arith.constant 2.000000e-01 : f32
    %5 = vector.broadcast %cst_4 : f32 to vector<1024x128xf32>
    %6 = arith.mulf %5, %2 : vector<1024x128xf32>
    %7 = arith.select %4, %2, %6 : vector<1024x128xi1>, vector<1024x128xf32>
    %8 = arith.truncf %7 : vector<1024x128xf32> to vector<1024x128xbf16>
    %c0_5 = arith.constant 0 : index
    %c0_6 = arith.constant 0 : index
    %9 = vector.load %arg3[%c0_5, %c0_6] : memref<1024x128xbf16, #tpu.memory_space<vmem>>, vector<1024x128xbf16>
    tpu.vector_store %arg3[%c0_5, %c0_6], %8 {strides = array<i32>} : memref<1024x128xbf16, #tpu.memory_space<vmem>>, vector<1024x128xbf16>,
    return
  }
  func.func @transform_0(%arg0: i32) -> (i32, i32) {
    %c0_i32 = arith.constant 0 : i32
    %c0_i32_0 = arith.constant 0 : i32
    return %arg0, %c0_i32 : i32, i32
  }
  func.func @transform_1(%arg0: i32) -> (i32, i32) {
    %c0_i32 = arith.constant 0 : i32
    %c0_i32_0 = arith.constant 0 : i32
    %c0_i32_1 = arith.constant 0 : i32
    return %c0_i32, %c0_i32_0 : i32, i32
  }
  func.func @transform_2(%arg0: i32) -> (i32, i32) {
    %c0_i32 = arith.constant 0 : i32
    %c0_i32_0 = arith.constant 0 : i32
    return %arg0, %c0_i32 : i32, i32
  }
}

module attributes {stable_mosaic.version = 11 : i64} {
  func.func @_conv_stats_kernel(%arg0: i32, %arg1: memref<512x1024xbf16, #tpu.memory_space<vmem>>, %arg2: memref<1024x128xbf16, #tpu.memory_space<vmem>>, %arg3: memref<512x128xbf16, #tpu.memory_space<vmem>>, %arg4: memref<1x1x128xf32, #tpu.memory_space<vmem>>, %arg5: memref<1x1x128xf32, #tpu.memory_space<vmem>>) attributes {dimension_semantics = [#tpu.dimension_semantics<parallel>], iteration_bounds = array<i64: 1>, scalar_prefetch = 0 : i64, scratch_operands = 0 : i64, tpu.core_type = #tpu.core_type<tc>, window_params = [{transform_indices = @transform_0, window_bounds = array<i64: 512, 1024>}, {pipeline_mode = #tpu.pipeline_mode<synchronous>, transform_indices = @transform_1, window_bounds = array<i64: 1024, 128>}, {transform_indices = @transform_2, window_bounds = array<i64: 512, 128>}, {transform_indices = @transform_3, window_bounds = array<i64: 1, 1, 128>}, {transform_indices = @transform_4, window_bounds = array<i64: 1, 1, 128>}]} {
    %c0 = arith.constant 0 : index
    %c0_0 = arith.constant 0 : index
    %0 = vector.load %arg1[%c0, %c0_0] : memref<512x1024xbf16, #tpu.memory_space<vmem>>, vector<512x1024xbf16>
    %c0_1 = arith.constant 0 : index
    %c0_2 = arith.constant 0 : index
    %1 = vector.load %arg2[%c0_1, %c0_2] : memref<1024x128xbf16, #tpu.memory_space<vmem>>, vector<1024x128xbf16>
    %cst = arith.constant dense<0.000000e+00> : vector<512x128xf32>
    %2 = tpu.matmul %0, %1, %cst {dimension_numbers = #tpu.dot_dimension_numbers<[1], [0], [0], [1], [0, 0, 1, 1], [], []>} : vector<512x1024xbf16>, vector<1024x128xbf16>, vector<512x128xf32> -> vector<512x128xf32>
    %3 = arith.truncf %2 : vector<512x128xf32> to vector<512x128xbf16>
    %c0_3 = arith.constant 0 : index
    %c0_4 = arith.constant 0 : index
    %4 = vector.load %arg3[%c0_3, %c0_4] : memref<512x128xbf16, #tpu.memory_space<vmem>>, vector<512x128xbf16>
    tpu.vector_store %arg3[%c0_3, %c0_4], %3 {strides = array<i32>} : memref<512x128xbf16, #tpu.memory_space<vmem>>, vector<512x128xbf16>,
    %cst_5 = arith.constant dense<0.000000e+00> : vector<128xf32>
    %5 = vector.multi_reduction <add>, %2, %cst_5 [0] : vector<512x128xf32> to vector<128xf32>
    %6 = vector.shape_cast %5 : vector<128xf32> to vector<1x128xf32>
    %7 = vector.shape_cast %6 : vector<1x128xf32> to vector<1x1x128xf32>
    %c0_6 = arith.constant 0 : index
    %c0_7 = arith.constant 0 : index
    %c0_8 = arith.constant 0 : index
    %8 = vector.load %arg4[%c0_6, %c0_7, %c0_8] : memref<1x1x128xf32, #tpu.memory_space<vmem>>, vector<1x1x128xf32>
    tpu.vector_store %arg4[%c0_6, %c0_7, %c0_8], %7 {strides = array<i32>} : memref<1x1x128xf32, #tpu.memory_space<vmem>>, vector<1x1x128xf32>,
    %9 = arith.mulf %2, %2 : vector<512x128xf32>
    %cst_9 = arith.constant dense<0.000000e+00> : vector<128xf32>
    %10 = vector.multi_reduction <add>, %9, %cst_9 [0] : vector<512x128xf32> to vector<128xf32>
    %11 = vector.shape_cast %10 : vector<128xf32> to vector<1x128xf32>
    %12 = vector.shape_cast %11 : vector<1x128xf32> to vector<1x1x128xf32>
    %c0_10 = arith.constant 0 : index
    %c0_11 = arith.constant 0 : index
    %c0_12 = arith.constant 0 : index
    %13 = vector.load %arg5[%c0_10, %c0_11, %c0_12] : memref<1x1x128xf32, #tpu.memory_space<vmem>>, vector<1x1x128xf32>
    tpu.vector_store %arg5[%c0_10, %c0_11, %c0_12], %12 {strides = array<i32>} : memref<1x1x128xf32, #tpu.memory_space<vmem>>, vector<1x1x128xf32>,
    return
  }
  func.func @transform_0(%arg0: i32) -> (i32, i32) {
    %c0_i32 = arith.constant 0 : i32
    %c0_i32_0 = arith.constant 0 : i32
    return %arg0, %c0_i32 : i32, i32
  }
  func.func @transform_1(%arg0: i32) -> (i32, i32) {
    %c0_i32 = arith.constant 0 : i32
    %c0_i32_0 = arith.constant 0 : i32
    %c0_i32_1 = arith.constant 0 : i32
    return %c0_i32, %c0_i32_0 : i32, i32
  }
  func.func @transform_2(%arg0: i32) -> (i32, i32) {
    %c0_i32 = arith.constant 0 : i32
    %c0_i32_0 = arith.constant 0 : i32
    return %arg0, %c0_i32 : i32, i32
  }
  func.func @transform_3(%arg0: i32) -> (i32, i32, i32) {
    %c0_i32 = arith.constant 0 : i32
    %c0_i32_0 = arith.constant 0 : i32
    %c0_i32_1 = arith.constant 0 : i32
    return %arg0, %c0_i32, %c0_i32_0 : i32, i32, i32
  }
  func.func @transform_4(%arg0: i32) -> (i32, i32, i32) {
    %c0_i32 = arith.constant 0 : i32
    %c0_i32_0 = arith.constant 0 : i32
    %c0_i32_1 = arith.constant 0 : i32
    return %arg0, %c0_i32, %c0_i32_0 : i32, i32, i32
  }
}

module attributes {stable_mosaic.version = 11 : i64} {
  func.func @_scale_leaky_kernel(%arg0: i32, %arg1: memref<512x128xbf16, #tpu.memory_space<vmem>>, %arg2: memref<1x128xf32, #tpu.memory_space<vmem>>, %arg3: memref<1x128xf32, #tpu.memory_space<vmem>>, %arg4: memref<512x128xbf16, #tpu.memory_space<vmem>>) attributes {dimension_semantics = [#tpu.dimension_semantics<parallel>], iteration_bounds = array<i64: 1>, scalar_prefetch = 0 : i64, scratch_operands = 0 : i64, tpu.core_type = #tpu.core_type<tc>, window_params = [{transform_indices = @transform_0, window_bounds = array<i64: 512, 128>}, {pipeline_mode = #tpu.pipeline_mode<synchronous>, transform_indices = @transform_1, window_bounds = array<i64: 1, 128>}, {pipeline_mode = #tpu.pipeline_mode<synchronous>, transform_indices = @transform_2, window_bounds = array<i64: 1, 128>}, {transform_indices = @transform_3, window_bounds = array<i64: 512, 128>}]} {
    %c0 = arith.constant 0 : index
    %c0_0 = arith.constant 0 : index
    %0 = vector.load %arg1[%c0, %c0_0] : memref<512x128xbf16, #tpu.memory_space<vmem>>, vector<512x128xbf16>
    %1 = arith.extf %0 : vector<512x128xbf16> to vector<512x128xf32>
    %c0_1 = arith.constant 0 : index
    %c0_2 = arith.constant 0 : index
    %2 = vector.load %arg2[%c0_1, %c0_2] : memref<1x128xf32, #tpu.memory_space<vmem>>, vector<1x128xf32>
    %3 = vector.broadcast %2 : vector<1x128xf32> to vector<512x128xf32>
    %4 = arith.mulf %1, %3 : vector<512x128xf32>
    %c0_3 = arith.constant 0 : index
    %c0_4 = arith.constant 0 : index
    %5 = vector.load %arg3[%c0_3, %c0_4] : memref<1x128xf32, #tpu.memory_space<vmem>>, vector<1x128xf32>
    %6 = vector.broadcast %5 : vector<1x128xf32> to vector<512x128xf32>
    %7 = arith.addf %4, %6 : vector<512x128xf32>
    %cst = arith.constant 0.000000e+00 : f32
    %8 = vector.broadcast %cst : f32 to vector<512x128xf32>
    %9 = arith.cmpf oge, %7, %8 : vector<512x128xf32>
    %cst_5 = arith.constant 2.000000e-01 : f32
    %10 = vector.broadcast %cst_5 : f32 to vector<512x128xf32>
    %11 = arith.mulf %10, %7 : vector<512x128xf32>
    %12 = arith.select %9, %7, %11 : vector<512x128xi1>, vector<512x128xf32>
    %13 = arith.truncf %12 : vector<512x128xf32> to vector<512x128xbf16>
    %c0_6 = arith.constant 0 : index
    %c0_7 = arith.constant 0 : index
    %14 = vector.load %arg4[%c0_6, %c0_7] : memref<512x128xbf16, #tpu.memory_space<vmem>>, vector<512x128xbf16>
    tpu.vector_store %arg4[%c0_6, %c0_7], %13 {strides = array<i32>} : memref<512x128xbf16, #tpu.memory_space<vmem>>, vector<512x128xbf16>,
    return
  }
  func.func @transform_0(%arg0: i32) -> (i32, i32) {
    %c0_i32 = arith.constant 0 : i32
    %c0_i32_0 = arith.constant 0 : i32
    return %arg0, %c0_i32 : i32, i32
  }
  func.func @transform_1(%arg0: i32) -> (i32, i32) {
    %c0_i32 = arith.constant 0 : i32
    %c0_i32_0 = arith.constant 0 : i32
    %c0_i32_1 = arith.constant 0 : i32
    return %c0_i32, %c0_i32_0 : i32, i32
  }
  func.func @transform_2(%arg0: i32) -> (i32, i32) {
    %c0_i32 = arith.constant 0 : i32
    %c0_i32_0 = arith.constant 0 : i32
    %c0_i32_1 = arith.constant 0 : i32
    return %c0_i32, %c0_i32_0 : i32, i32
  }
  func.func @transform_3(%arg0: i32) -> (i32, i32) {
    %c0_i32 = arith.constant 0 : i32
    %c0_i32_0 = arith.constant 0 : i32
    return %arg0, %c0_i32 : i32, i32
  }
}

module attributes {stable_mosaic.version = 11 : i64} {
  func.func @_conv_stats_kernel(%arg0: i32, %arg1: memref<128x2048xbf16, #tpu.memory_space<vmem>>, %arg2: memref<2048x256xbf16, #tpu.memory_space<vmem>>, %arg3: memref<128x256xbf16, #tpu.memory_space<vmem>>, %arg4: memref<1x1x256xf32, #tpu.memory_space<vmem>>, %arg5: memref<1x1x256xf32, #tpu.memory_space<vmem>>) attributes {dimension_semantics = [#tpu.dimension_semantics<parallel>], iteration_bounds = array<i64: 1>, scalar_prefetch = 0 : i64, scratch_operands = 0 : i64, tpu.core_type = #tpu.core_type<tc>, window_params = [{transform_indices = @transform_0, window_bounds = array<i64: 128, 2048>}, {pipeline_mode = #tpu.pipeline_mode<synchronous>, transform_indices = @transform_1, window_bounds = array<i64: 2048, 256>}, {transform_indices = @transform_2, window_bounds = array<i64: 128, 256>}, {transform_indices = @transform_3, window_bounds = array<i64: 1, 1, 256>}, {transform_indices = @transform_4, window_bounds = array<i64: 1, 1, 256>}]} {
    %c0 = arith.constant 0 : index
    %c0_0 = arith.constant 0 : index
    %0 = vector.load %arg1[%c0, %c0_0] : memref<128x2048xbf16, #tpu.memory_space<vmem>>, vector<128x2048xbf16>
    %c0_1 = arith.constant 0 : index
    %c0_2 = arith.constant 0 : index
    %1 = vector.load %arg2[%c0_1, %c0_2] : memref<2048x256xbf16, #tpu.memory_space<vmem>>, vector<2048x256xbf16>
    %cst = arith.constant dense<0.000000e+00> : vector<128x256xf32>
    %2 = tpu.matmul %0, %1, %cst {dimension_numbers = #tpu.dot_dimension_numbers<[1], [0], [0], [1], [0, 0, 1, 1], [], []>} : vector<128x2048xbf16>, vector<2048x256xbf16>, vector<128x256xf32> -> vector<128x256xf32>
    %3 = arith.truncf %2 : vector<128x256xf32> to vector<128x256xbf16>
    %c0_3 = arith.constant 0 : index
    %c0_4 = arith.constant 0 : index
    %4 = vector.load %arg3[%c0_3, %c0_4] : memref<128x256xbf16, #tpu.memory_space<vmem>>, vector<128x256xbf16>
    tpu.vector_store %arg3[%c0_3, %c0_4], %3 {strides = array<i32>} : memref<128x256xbf16, #tpu.memory_space<vmem>>, vector<128x256xbf16>,
    %cst_5 = arith.constant dense<0.000000e+00> : vector<256xf32>
    %5 = vector.multi_reduction <add>, %2, %cst_5 [0] : vector<128x256xf32> to vector<256xf32>
    %6 = vector.shape_cast %5 : vector<256xf32> to vector<1x256xf32>
    %7 = vector.shape_cast %6 : vector<1x256xf32> to vector<1x1x256xf32>
    %c0_6 = arith.constant 0 : index
    %c0_7 = arith.constant 0 : index
    %c0_8 = arith.constant 0 : index
    %8 = vector.load %arg4[%c0_6, %c0_7, %c0_8] : memref<1x1x256xf32, #tpu.memory_space<vmem>>, vector<1x1x256xf32>
    tpu.vector_store %arg4[%c0_6, %c0_7, %c0_8], %7 {strides = array<i32>} : memref<1x1x256xf32, #tpu.memory_space<vmem>>, vector<1x1x256xf32>,
    %9 = arith.mulf %2, %2 : vector<128x256xf32>
    %cst_9 = arith.constant dense<0.000000e+00> : vector<256xf32>
    %10 = vector.multi_reduction <add>, %9, %cst_9 [0] : vector<128x256xf32> to vector<256xf32>
    %11 = vector.shape_cast %10 : vector<256xf32> to vector<1x256xf32>
    %12 = vector.shape_cast %11 : vector<1x256xf32> to vector<1x1x256xf32>
    %c0_10 = arith.constant 0 : index
    %c0_11 = arith.constant 0 : index
    %c0_12 = arith.constant 0 : index
    %13 = vector.load %arg5[%c0_10, %c0_11, %c0_12] : memref<1x1x256xf32, #tpu.memory_space<vmem>>, vector<1x1x256xf32>
    tpu.vector_store %arg5[%c0_10, %c0_11, %c0_12], %12 {strides = array<i32>} : memref<1x1x256xf32, #tpu.memory_space<vmem>>, vector<1x1x256xf32>,
    return
  }
  func.func @transform_0(%arg0: i32) -> (i32, i32) {
    %c0_i32 = arith.constant 0 : i32
    %c0_i32_0 = arith.constant 0 : i32
    return %arg0, %c0_i32 : i32, i32
  }
  func.func @transform_1(%arg0: i32) -> (i32, i32) {
    %c0_i32 = arith.constant 0 : i32
    %c0_i32_0 = arith.constant 0 : i32
    %c0_i32_1 = arith.constant 0 : i32
    return %c0_i32, %c0_i32_0 : i32, i32
  }
  func.func @transform_2(%arg0: i32) -> (i32, i32) {
    %c0_i32 = arith.constant 0 : i32
    %c0_i32_0 = arith.constant 0 : i32
    return %arg0, %c0_i32 : i32, i32
  }
  func.func @transform_3(%arg0: i32) -> (i32, i32, i32) {
    %c0_i32 = arith.constant 0 : i32
    %c0_i32_0 = arith.constant 0 : i32
    %c0_i32_1 = arith.constant 0 : i32
    return %arg0, %c0_i32, %c0_i32_0 : i32, i32, i32
  }
  func.func @transform_4(%arg0: i32) -> (i32, i32, i32) {
    %c0_i32 = arith.constant 0 : i32
    %c0_i32_0 = arith.constant 0 : i32
    %c0_i32_1 = arith.constant 0 : i32
    return %arg0, %c0_i32, %c0_i32_0 : i32, i32, i32
  }
}

module attributes {stable_mosaic.version = 11 : i64} {
  func.func @_scale_leaky_kernel(%arg0: i32, %arg1: memref<128x256xbf16, #tpu.memory_space<vmem>>, %arg2: memref<1x256xf32, #tpu.memory_space<vmem>>, %arg3: memref<1x256xf32, #tpu.memory_space<vmem>>, %arg4: memref<128x256xbf16, #tpu.memory_space<vmem>>) attributes {dimension_semantics = [#tpu.dimension_semantics<parallel>], iteration_bounds = array<i64: 1>, scalar_prefetch = 0 : i64, scratch_operands = 0 : i64, tpu.core_type = #tpu.core_type<tc>, window_params = [{transform_indices = @transform_0, window_bounds = array<i64: 128, 256>}, {pipeline_mode = #tpu.pipeline_mode<synchronous>, transform_indices = @transform_1, window_bounds = array<i64: 1, 256>}, {pipeline_mode = #tpu.pipeline_mode<synchronous>, transform_indices = @transform_2, window_bounds = array<i64: 1, 256>}, {transform_indices = @transform_3, window_bounds = array<i64: 128, 256>}]} {
    %c0 = arith.constant 0 : index
    %c0_0 = arith.constant 0 : index
    %0 = vector.load %arg1[%c0, %c0_0] : memref<128x256xbf16, #tpu.memory_space<vmem>>, vector<128x256xbf16>
    %1 = arith.extf %0 : vector<128x256xbf16> to vector<128x256xf32>
    %c0_1 = arith.constant 0 : index
    %c0_2 = arith.constant 0 : index
    %2 = vector.load %arg2[%c0_1, %c0_2] : memref<1x256xf32, #tpu.memory_space<vmem>>, vector<1x256xf32>
    %3 = vector.broadcast %2 : vector<1x256xf32> to vector<128x256xf32>
    %4 = arith.mulf %1, %3 : vector<128x256xf32>
    %c0_3 = arith.constant 0 : index
    %c0_4 = arith.constant 0 : index
    %5 = vector.load %arg3[%c0_3, %c0_4] : memref<1x256xf32, #tpu.memory_space<vmem>>, vector<1x256xf32>
    %6 = vector.broadcast %5 : vector<1x256xf32> to vector<128x256xf32>
    %7 = arith.addf %4, %6 : vector<128x256xf32>
    %cst = arith.constant 0.000000e+00 : f32
    %8 = vector.broadcast %cst : f32 to vector<128x256xf32>
    %9 = arith.cmpf oge, %7, %8 : vector<128x256xf32>
    %cst_5 = arith.constant 2.000000e-01 : f32
    %10 = vector.broadcast %cst_5 : f32 to vector<128x256xf32>
    %11 = arith.mulf %10, %7 : vector<128x256xf32>
    %12 = arith.select %9, %7, %11 : vector<128x256xi1>, vector<128x256xf32>
    %13 = arith.truncf %12 : vector<128x256xf32> to vector<128x256xbf16>
    %c0_6 = arith.constant 0 : index
    %c0_7 = arith.constant 0 : index
    %14 = vector.load %arg4[%c0_6, %c0_7] : memref<128x256xbf16, #tpu.memory_space<vmem>>, vector<128x256xbf16>
    tpu.vector_store %arg4[%c0_6, %c0_7], %13 {strides = array<i32>} : memref<128x256xbf16, #tpu.memory_space<vmem>>, vector<128x256xbf16>,
    return
  }
  func.func @transform_0(%arg0: i32) -> (i32, i32) {
    %c0_i32 = arith.constant 0 : i32
    %c0_i32_0 = arith.constant 0 : i32
    return %arg0, %c0_i32 : i32, i32
  }
  func.func @transform_1(%arg0: i32) -> (i32, i32) {
    %c0_i32 = arith.constant 0 : i32
    %c0_i32_0 = arith.constant 0 : i32
    %c0_i32_1 = arith.constant 0 : i32
    return %c0_i32, %c0_i32_0 : i32, i32
  }
  func.func @transform_2(%arg0: i32) -> (i32, i32) {
    %c0_i32 = arith.constant 0 : i32
    %c0_i32_0 = arith.constant 0 : i32
    %c0_i32_1 = arith.constant 0 : i32
    return %c0_i32, %c0_i32_0 : i32, i32
  }
  func.func @transform_3(%arg0: i32) -> (i32, i32) {
    %c0_i32 = arith.constant 0 : i32
    %c0_i32_0 = arith.constant 0 : i32
    return %arg0, %c0_i32 : i32, i32
  }
}

module attributes {stable_mosaic.version = 11 : i64} {
  func.func @_conv_stats_kernel(%arg0: i32, %arg1: memref<32x4096xbf16, #tpu.memory_space<vmem>>, %arg2: memref<4096x512xbf16, #tpu.memory_space<vmem>>, %arg3: memref<32x512xbf16, #tpu.memory_space<vmem>>, %arg4: memref<1x1x512xf32, #tpu.memory_space<vmem>>, %arg5: memref<1x1x512xf32, #tpu.memory_space<vmem>>) attributes {dimension_semantics = [#tpu.dimension_semantics<parallel>], iteration_bounds = array<i64: 1>, scalar_prefetch = 0 : i64, scratch_operands = 0 : i64, tpu.core_type = #tpu.core_type<tc>, window_params = [{transform_indices = @transform_0, window_bounds = array<i64: 32, 4096>}, {pipeline_mode = #tpu.pipeline_mode<synchronous>, transform_indices = @transform_1, window_bounds = array<i64: 4096, 512>}, {transform_indices = @transform_2, window_bounds = array<i64: 32, 512>}, {transform_indices = @transform_3, window_bounds = array<i64: 1, 1, 512>}, {transform_indices = @transform_4, window_bounds = array<i64: 1, 1, 512>}]} {
    %c0 = arith.constant 0 : index
    %c0_0 = arith.constant 0 : index
    %0 = vector.load %arg1[%c0, %c0_0] : memref<32x4096xbf16, #tpu.memory_space<vmem>>, vector<32x4096xbf16>
    %c0_1 = arith.constant 0 : index
    %c0_2 = arith.constant 0 : index
    %1 = vector.load %arg2[%c0_1, %c0_2] : memref<4096x512xbf16, #tpu.memory_space<vmem>>, vector<4096x512xbf16>
    %cst = arith.constant dense<0.000000e+00> : vector<32x512xf32>
    %2 = tpu.matmul %0, %1, %cst {dimension_numbers = #tpu.dot_dimension_numbers<[1], [0], [0], [1], [0, 0, 1, 1], [], []>} : vector<32x4096xbf16>, vector<4096x512xbf16>, vector<32x512xf32> -> vector<32x512xf32>
    %3 = arith.truncf %2 : vector<32x512xf32> to vector<32x512xbf16>
    %c0_3 = arith.constant 0 : index
    %c0_4 = arith.constant 0 : index
    %4 = vector.load %arg3[%c0_3, %c0_4] : memref<32x512xbf16, #tpu.memory_space<vmem>>, vector<32x512xbf16>
    tpu.vector_store %arg3[%c0_3, %c0_4], %3 {strides = array<i32>} : memref<32x512xbf16, #tpu.memory_space<vmem>>, vector<32x512xbf16>,
    %cst_5 = arith.constant dense<0.000000e+00> : vector<512xf32>
    %5 = vector.multi_reduction <add>, %2, %cst_5 [0] : vector<32x512xf32> to vector<512xf32>
    %6 = vector.shape_cast %5 : vector<512xf32> to vector<1x512xf32>
    %7 = vector.shape_cast %6 : vector<1x512xf32> to vector<1x1x512xf32>
    %c0_6 = arith.constant 0 : index
    %c0_7 = arith.constant 0 : index
    %c0_8 = arith.constant 0 : index
    %8 = vector.load %arg4[%c0_6, %c0_7, %c0_8] : memref<1x1x512xf32, #tpu.memory_space<vmem>>, vector<1x1x512xf32>
    tpu.vector_store %arg4[%c0_6, %c0_7, %c0_8], %7 {strides = array<i32>} : memref<1x1x512xf32, #tpu.memory_space<vmem>>, vector<1x1x512xf32>,
    %9 = arith.mulf %2, %2 : vector<32x512xf32>
    %cst_9 = arith.constant dense<0.000000e+00> : vector<512xf32>
    %10 = vector.multi_reduction <add>, %9, %cst_9 [0] : vector<32x512xf32> to vector<512xf32>
    %11 = vector.shape_cast %10 : vector<512xf32> to vector<1x512xf32>
    %12 = vector.shape_cast %11 : vector<1x512xf32> to vector<1x1x512xf32>
    %c0_10 = arith.constant 0 : index
    %c0_11 = arith.constant 0 : index
    %c0_12 = arith.constant 0 : index
    %13 = vector.load %arg5[%c0_10, %c0_11, %c0_12] : memref<1x1x512xf32, #tpu.memory_space<vmem>>, vector<1x1x512xf32>
    tpu.vector_store %arg5[%c0_10, %c0_11, %c0_12], %12 {strides = array<i32>} : memref<1x1x512xf32, #tpu.memory_space<vmem>>, vector<1x1x512xf32>,
    return
  }
  func.func @transform_0(%arg0: i32) -> (i32, i32) {
    %c0_i32 = arith.constant 0 : i32
    %c0_i32_0 = arith.constant 0 : i32
    return %arg0, %c0_i32 : i32, i32
  }
  func.func @transform_1(%arg0: i32) -> (i32, i32) {
    %c0_i32 = arith.constant 0 : i32
    %c0_i32_0 = arith.constant 0 : i32
    %c0_i32_1 = arith.constant 0 : i32
    return %c0_i32, %c0_i32_0 : i32, i32
  }
  func.func @transform_2(%arg0: i32) -> (i32, i32) {
    %c0_i32 = arith.constant 0 : i32
    %c0_i32_0 = arith.constant 0 : i32
    return %arg0, %c0_i32 : i32, i32
  }
  func.func @transform_3(%arg0: i32) -> (i32, i32, i32) {
    %c0_i32 = arith.constant 0 : i32
    %c0_i32_0 = arith.constant 0 : i32
    %c0_i32_1 = arith.constant 0 : i32
    return %arg0, %c0_i32, %c0_i32_0 : i32, i32, i32
  }
  func.func @transform_4(%arg0: i32) -> (i32, i32, i32) {
    %c0_i32 = arith.constant 0 : i32
    %c0_i32_0 = arith.constant 0 : i32
    %c0_i32_1 = arith.constant 0 : i32
    return %arg0, %c0_i32, %c0_i32_0 : i32, i32, i32
  }
}

module attributes {stable_mosaic.version = 11 : i64} {
  func.func @_head_kernel(%arg0: i32, %arg1: memref<32x512xbf16, #tpu.memory_space<vmem>>, %arg2: memref<1x512xf32, #tpu.memory_space<vmem>>, %arg3: memref<1x512xf32, #tpu.memory_space<vmem>>, %arg4: memref<16x512xf32, #tpu.memory_space<vmem>>, %arg5: memref<2x1xf32, #tpu.memory_space<vmem>>) attributes {dimension_semantics = [#tpu.dimension_semantics<parallel>], iteration_bounds = array<i64: 1>, scalar_prefetch = 0 : i64, scratch_operands = 0 : i64, tpu.core_type = #tpu.core_type<tc>, window_params = [{transform_indices = @transform_0, window_bounds = array<i64: 32, 512>}, {pipeline_mode = #tpu.pipeline_mode<synchronous>, transform_indices = @transform_1, window_bounds = array<i64: 1, 512>}, {pipeline_mode = #tpu.pipeline_mode<synchronous>, transform_indices = @transform_2, window_bounds = array<i64: 1, 512>}, {pipeline_mode = #tpu.pipeline_mode<synchronous>, transform_indices = @transform_3, window_bounds = array<i64: 16, 512>}, {transform_indices = @transform_4, window_bounds = array<i64: 2, 1>}]} {
    %c0 = arith.constant 0 : index
    %c0_0 = arith.constant 0 : index
    %0 = vector.load %arg1[%c0, %c0_0] : memref<32x512xbf16, #tpu.memory_space<vmem>>, vector<32x512xbf16>
    %1 = arith.extf %0 : vector<32x512xbf16> to vector<32x512xf32>
    %c0_1 = arith.constant 0 : index
    %c0_2 = arith.constant 0 : index
    %2 = vector.load %arg2[%c0_1, %c0_2] : memref<1x512xf32, #tpu.memory_space<vmem>>, vector<1x512xf32>
    %3 = vector.broadcast %2 : vector<1x512xf32> to vector<32x512xf32>
    %4 = arith.mulf %1, %3 : vector<32x512xf32>
    %c0_3 = arith.constant 0 : index
    %c0_4 = arith.constant 0 : index
    %5 = vector.load %arg3[%c0_3, %c0_4] : memref<1x512xf32, #tpu.memory_space<vmem>>, vector<1x512xf32>
    %6 = vector.broadcast %5 : vector<1x512xf32> to vector<32x512xf32>
    %7 = arith.addf %4, %6 : vector<32x512xf32>
    %cst = arith.constant 0.000000e+00 : f32
    %8 = vector.broadcast %cst : f32 to vector<32x512xf32>
    %9 = arith.cmpf oge, %7, %8 : vector<32x512xf32>
    %cst_5 = arith.constant 2.000000e-01 : f32
    %10 = vector.broadcast %cst_5 : f32 to vector<32x512xf32>
    %11 = arith.mulf %10, %7 : vector<32x512xf32>
    %12 = arith.select %9, %7, %11 : vector<32x512xi1>, vector<32x512xf32>
    %13 = vector.shape_cast %12 : vector<32x512xf32> to vector<2x16x512xf32>
    %c0_6 = arith.constant 0 : index
    %c0_7 = arith.constant 0 : index
    %14 = vector.load %arg4[%c0_6, %c0_7] : memref<16x512xf32, #tpu.memory_space<vmem>>, vector<16x512xf32>
    %15 = vector.shape_cast %14 : vector<16x512xf32> to vector<1x16x512xf32>
    %16 = vector.broadcast %15 : vector<1x16x512xf32> to vector<2x16x512xf32>
    %17 = arith.mulf %13, %16 : vector<2x16x512xf32>
    %cst_8 = arith.constant dense<0.000000e+00> : vector<2x16xf32>
    %18 = vector.multi_reduction <add>, %17, %cst_8 [2] : vector<2x16x512xf32> to vector<2x16xf32>
    %cst_9 = arith.constant dense<0.000000e+00> : vector<2xf32>
    %19 = vector.multi_reduction <add>, %18, %cst_9 [1] : vector<2x16xf32> to vector<2xf32>
    %20 = vector.shape_cast %19 : vector<2xf32> to vector<2x1xf32>
    %cst_10 = arith.constant 0.000000e+00 : f32
    %21 = vector.broadcast %cst_10 : f32 to vector<2x1xf32>
    %22 = arith.subf %21, %20 : vector<2x1xf32>
    %23 = math.exp %22 : vector<2x1xf32>
    %cst_11 = arith.constant 1.000000e+00 : f32
    %24 = vector.broadcast %cst_11 : f32 to vector<2x1xf32>
    %25 = arith.addf %24, %23 : vector<2x1xf32>
    %cst_12 = arith.constant 1.000000e+00 : f32
    %26 = vector.broadcast %cst_12 : f32 to vector<2x1xf32>
    %27 = arith.divf %26, %25 : vector<2x1xf32>
    %c0_13 = arith.constant 0 : index
    %c0_14 = arith.constant 0 : index
    %28 = vector.load %arg5[%c0_13, %c0_14] : memref<2x1xf32, #tpu.memory_space<vmem>>, vector<2x1xf32>
    tpu.vector_store %arg5[%c0_13, %c0_14], %27 {strides = array<i32>} : memref<2x1xf32, #tpu.memory_space<vmem>>, vector<2x1xf32>,
    return
  }
  func.func @transform_0(%arg0: i32) -> (i32, i32) {
    %c0_i32 = arith.constant 0 : i32
    %c0_i32_0 = arith.constant 0 : i32
    return %arg0, %c0_i32 : i32, i32
  }
  func.func @transform_1(%arg0: i32) -> (i32, i32) {
    %c0_i32 = arith.constant 0 : i32
    %c0_i32_0 = arith.constant 0 : i32
    %c0_i32_1 = arith.constant 0 : i32
    return %c0_i32, %c0_i32_0 : i32, i32
  }
  func.func @transform_2(%arg0: i32) -> (i32, i32) {
    %c0_i32 = arith.constant 0 : i32
    %c0_i32_0 = arith.constant 0 : i32
    %c0_i32_1 = arith.constant 0 : i32
    return %c0_i32, %c0_i32_0 : i32, i32
  }
  func.func @transform_3(%arg0: i32) -> (i32, i32) {
    %c0_i32 = arith.constant 0 : i32
    %c0_i32_0 = arith.constant 0 : i32
    %c0_i32_1 = arith.constant 0 : i32
    return %c0_i32, %c0_i32_0 : i32, i32
  }
  func.func @transform_4(%arg0: i32) -> (i32, i32) {
    %c0_i32 = arith.constant 0 : i32
    %c0_i32_0 = arith.constant 0 : i32
    return %arg0, %c0_i32 : i32, i32
  }
}

</mosaic_0001>

<bundles_post_ra>
// kernel: discriminator_forward.7
= control target key start
LH: loop header
LB: loop body
LE: loop exit
PB: predicated region body
PF: predicated region fallthrough
CT: control target
= control target key end

     0   :  { %vm508_vm0 = vcmask 785408   ;;  %s3835_s1 = inlined_call_operand.vmem [shape: bf16[96,128], index: 1, kind: input, shape index: {}]   ;;  %s3836_s0 = inlined_call_operand.vmem [shape: bf16[1024,96], index: 0, kind: input, shape index: {}]   ;;  %s3837_s2 = inlined_call_operand.vmem [shape: bf16[1024,128], index: 2, kind: output, shape index: {}]  }
   0x1   :  { %v3269_v0 = vld [vmem:[%s3835_s1] sm:$0xff]   ;;  %v3270_v1 = vld [vmem:[%s3835_s1 + $0x8] sm:$0xff]   ;;  %v3271_v2 = vld [vmem:[%s3835_s1 + $0x10] sm:$0xff]  }
   0x2   :  { %3117 = vmatprep.subr.bf16.mxu0 %v3269_v0  ;;  %3257 = vmatprep.subr.bf16.mxu1 %v3269_v0  ;;  %v3275_v3 = vld [vmem:[%s3836_s0] sm:$0xff]   ;;  %v3272_v5 = vld [vmem:[%s3835_s1 + $0x18] sm:$0xff]   ;;  %v3274_v7 = vld [vmem:[%s3835_s1 + $0x28] sm:$0xff]  }
   0x3   :  { %3118 = vmatpush3.bf16.msra.mxu0 %v3269_v0  ;;  %3263 = vmatpush3.bf16.msra.mxu1 %v3269_v0  ;;  %v3276_v4 = vld [vmem:[%s3836_s0 + $0x100] sm:$0xff]   ;;  %v3277_v8 = vld [vmem:[%s3836_s0 + $0x8] sm:$0xff]   ;;  %v3279_v10 = vld [vmem:[%s3836_s0 + $0x10] sm:$0xff]  }
   0x4   :  { %3119 = vmatprep.subr.bf16.mxu0 %v3270_v1  ;;  %3258 = vmatprep.subr.bf16.mxu1 %v3270_v1  ;;  %v3273_v6 = vld [vmem:[%s3835_s1 + $0x20] sm:$0xff]   ;;  %v3278_v9 = vld [vmem:[%s3836_s0 + $0x108] sm:$0xff]   ;;  %v3280_v11 = vld [vmem:[%s3836_s0 + $0x110] sm:$0xff]  }
   0x5   :  { %3129 = vmatprep.mubr.msk.bf16.mxu0 %vm508_vm0, %v3275_v3  ;;  %3193 = vmatprep.mubr.msk.bf16.mxu1 %vm508_vm0, %v3276_v4  ;;  %v3281_v12 = vld [vmem:[%s3836_s0 + $0x18] sm:$0xff]   ;;  %v3283_v14 = vld [vmem:[%s3836_s0 + $0x20] sm:$0xff]   ;;  %v3285_v16 = vld [vmem:[%s3836_s0 + $0x28] sm:$0xff]  }
   0x6   :  { %v3282_v13 = vld [vmem:[%s3836_s0 + $0x118] sm:$0xff]   ;;  %v3284_v15 = vld [vmem:[%s3836_s0 + $0x120] sm:$0xff]   ;;  %v3286_v17 = vld [vmem:[%s3836_s0 + $0x128] sm:$0xff]  }
   0x7   :  { %3120 = vmatpush3.bf16.msra.mxu0 %v3270_v1  ;;  %3264 = vmatpush3.bf16.msra.mxu1 %v3270_v1  ;;  %v3287_v18 = vld [vmem:[%s3836_s0 + $0x30] sm:$0xff]   ;;  %v3289_v20 = vld [vmem:[%s3836_s0 + $0x38] sm:$0xff]   ;;  %v3291_v22 = vld [vmem:[%s3836_s0 + $0x40] sm:$0xff]  }
   0x8   :  { %3121 = vmatprep.subr.bf16.mxu0 %v3271_v2  ;;  %3259 = vmatprep.subr.bf16.mxu1 %v3271_v2  ;;  %v3288_v19 = vld [vmem:[%s3836_s0 + $0x130] sm:$0xff]   ;;  %v3290_v21 = vld [vmem:[%s3836_s0 + $0x138] sm:$0xff]   ;;  %v3292_v23 = vld [vmem:[%s3836_s0 + $0x140] sm:$0xff]  }
   0x9   :  { %v3293_v24 = vld [vmem:[%s3836_s0 + $0x48] sm:$0xff]   ;;  %v3295_v26 = vld [vmem:[%s3836_s0 + $0x50] sm:$0xff]   ;;  %v3297_v28 = vld [vmem:[%s3836_s0 + $0x58] sm:$0xff]  }
   0xa   :  { %v3294_v25 = vld [vmem:[%s3836_s0 + $0x148] sm:$0xff]   ;;  %v3296_v27 = vld [vmem:[%s3836_s0 + $0x150] sm:$0xff]   ;;  %v3298_v29 = vld [vmem:[%s3836_s0 + $0x158] sm:$0xff]  }
   0xb   :  { %3122 = vmatpush3.bf16.msra.mxu0 %v3271_v2  ;;  %3265 = vmatpush3.bf16.msra.mxu1 %v3271_v2  ;;  %v3299_v30 = vld [vmem:[%s3836_s0 + $0x60] sm:$0xff]   ;;  %v3301_v32 = vld [vmem:[%s3836_s0 + $0x68] sm:$0xff]   ;;  %v3303_v34 = vld [vmem:[%s3836_s0 + $0x70] sm:$0xff]  }
   0xc   :  { %3123 = vmatprep.subr.bf16.mxu0 %v3272_v5  ;;  %3260 = vmatprep.subr.bf16.mxu1 %v3272_v5  ;;  %v3300_v31 = vld [vmem:[%s3836_s0 + $0x160] sm:$0xff]   ;;  %v3302_v33 = vld [vmem:[%s3836_s0 + $0x168] sm:$0xff]   ;;  %v3304_v35 = vld [vmem:[%s3836_s0 + $0x170] sm:$0xff]  }
   0xd   :  { %v3305_v36 = vld [vmem:[%s3836_s0 + $0x78] sm:$0xff]   ;;  %v3307_v38 = vld [vmem:[%s3836_s0 + $0x80] sm:$0xff]   ;;  %v3309_v40 = vld [vmem:[%s3836_s0 + $0x88] sm:$0xff]  }
   0xe   :  { %v3306_v37 = vld [vmem:[%s3836_s0 + $0x178] sm:$0xff]   ;;  %v3308_v39 = vld [vmem:[%s3836_s0 + $0x180] sm:$0xff]   ;;  %v3310_v41 = vld [vmem:[%s3836_s0 + $0x188] sm:$0xff]  }
   0xf   :  { %3124 = vmatpush3.bf16.msra.mxu0 %v3272_v5  ;;  %3266 = vmatpush3.bf16.msra.mxu1 %v3272_v5  ;;  %v3311_v42 = vld [vmem:[%s3836_s0 + $0x90] sm:$0xff]   ;;  %v3313_v44 = vld [vmem:[%s3836_s0 + $0x98] sm:$0xff]   ;;  %v3315_v46 = vld [vmem:[%s3836_s0 + $0xa0] sm:$0xff]  }
  0x10   :  { %3125 = vmatprep.subr.bf16.mxu0 %v3273_v6  ;;  %3261 = vmatprep.subr.bf16.mxu1 %v3273_v6  ;;  %v3312_v43 = vld [vmem:[%s3836_s0 + $0x190] sm:$0xff]   ;;  %v3314_v45 = vld [vmem:[%s3836_s0 + $0x198] sm:$0xff]   ;;  %v3316_v47 = vld [vmem:[%s3836_s0 + $0x1a0] sm:$0xff]  }
  0x11   :  { %v3317_v48 = vld [vmem:[%s3836_s0 + $0xa8] sm:$0xff]   ;;  %v3319_v50 = vld [vmem:[%s3836_s0 + $0xb0] sm:$0xff]   ;;  %v3321_v52 = vld [vmem:[%s3836_s0 + $0xb8] sm:$0xff]  }
  0x12   :  { %v3318_v49 = vld [vmem:[%s3836_s0 + $0x1a8] sm:$0xff]   ;;  %v3320_v51 = vld [vmem:[%s3836_s0 + $0x1b0] sm:$0xff]   ;;  %v3322_v53 = vld [vmem:[%s3836_s0 + $0x1b8] sm:$0xff]  }
  0x13   :  { %3126 = vmatpush3.bf16.msra.mxu0 %v3273_v6  ;;  %3267 = vmatpush3.bf16.msra.mxu1 %v3273_v6  ;;  %v3323_v54 = vld [vmem:[%s3836_s0 + $0xc0] sm:$0xff]   ;;  %v3325_v56 = vld [vmem:[%s3836_s0 + $0xc8] sm:$0xff]   ;;  %v3327_v58 = vld [vmem:[%s3836_s0 + $0xd0] sm:$0xff]  }
  0x14   :  { %3127 = vmatprep.subr.bf16.mxu0 %v3274_v7  ;;  %3262 = vmatprep.subr.bf16.mxu1 %v3274_v7  ;;  %v3324_v55 = vld [vmem:[%s3836_s0 + $0x1c0] sm:$0xff]   ;;  %v3326_v57 = vld [vmem:[%s3836_s0 + $0x1c8] sm:$0xff]   ;;  %v3328_v59 = vld [vmem:[%s3836_s0 + $0x1d0] sm:$0xff]  }
  0x15   :  { %v3329_v60 = vld [vmem:[%s3836_s0 + $0xd8] sm:$0xff]   ;;  %v3331_v62 = vld [vmem:[%s3836_s0 + $0xe0] sm:$0xff]   ;;  %v3333_v0 = vld [vmem:[%s3836_s0 + $0xe8] sm:$0xff]  }
  0x16   :  { %v3330_v61 = vld [vmem:[%s3836_s0 + $0x1d8] sm:$0xff]   ;;  %v3332_v63 = vld [vmem:[%s3836_s0 + $0x1e0] sm:$0xff]   ;;  %v3334_v1 = vld [vmem:[%s3836_s0 + $0x1e8] sm:$0xff]  }
  0x17   :  { %3128 = vmatpush3.bf16.msra.mxu0 %v3274_v7  ;;  %3268 = vmatpush3.bf16.msra.mxu1 %v3274_v7  ;;  %v3335_v2 = vld [vmem:[%s3836_s0 + $0xf0] sm:$0xff]   ;;  %v3337_v4 = vld [vmem:[%s3836_s0 + $0xf8] sm:$0xff]  }
  0x18   :  { %v3336_v3 = vld [vmem:[%s3836_s0 + $0x1f0] sm:$0xff]   ;;  %v3338_v5 = vld [vmem:[%s3836_s0 + $0x1f8] sm:$0xff]  }
  0x1a   :  { %3130 = vmatmul.mubr.msk.bf16.vlgmr.msra.gmra.mrb[0].mxu0 %vm508_vm0, %v3277_v8  ;;  %3194 = vmatmul.mubr.msk.bf16.vlgmr.msra.gmra.mrb[0].mxu1 %vm508_vm0, %v3278_v9 }
  0x1b   :  { %3133 = vmatprep.mubr.msk.bf16.mxu0 %vm508_vm0, %v3279_v10  ;;  %3197 = vmatprep.mubr.msk.bf16.mxu1 %vm508_vm0, %v3280_v11 }
  0x22   :  { %3134 = vmatmul.mubr.msk.bf16.gmra.mrb[4].mxu0 %vm508_vm0, %v3281_v12  ;;  %3198 = vmatmul.mubr.msk.bf16.gmra.mrb[4].mxu1 %vm508_vm0, %v3282_v13 }
  0x23   :  { %3137 = vmatprep.mubr.msk.bf16.mxu0 %vm508_vm0, %v3283_v14  ;;  %3201 = vmatprep.mubr.msk.bf16.mxu1 %vm508_vm0, %v3284_v15 }
  0x2a   :  { %3138 = vmatmul.mubr.msk.bf16.gmra.mrb[8].mxu0 %vm508_vm0, %v3285_v16  ;;  %3202 = vmatmul.mubr.msk.bf16.gmra.mrb[8].mxu1 %vm508_vm0, %v3286_v17 }
  0x2b   :  { %3141 = vmatprep.mubr.msk.bf16.mxu0 %vm508_vm0, %v3287_v18  ;;  %3205 = vmatprep.mubr.msk.bf16.mxu1 %vm508_vm0, %v3288_v19 }
  0x32   :  { %3142 = vmatmul.mubr.msk.bf16.gmra.mrb[12].mxu0 %vm508_vm0, %v3289_v20  ;;  %3206 = vmatmul.mubr.msk.bf16.gmra.mrb[12].mxu1 %vm508_vm0, %v3290_v21 }
  0x33   :  { %3145 = vmatprep.mubr.msk.bf16.mxu0 %vm508_vm0, %v3291_v22  ;;  %3209 = vmatprep.mubr.msk.bf16.mxu1 %vm508_vm0, %v3292_v23 }
  0x3a   :  { %3146 = vmatmul.mubr.msk.bf16.gmra.mrb[16].mxu0 %vm508_vm0, %v3293_v24  ;;  %3210 = vmatmul.mubr.msk.bf16.gmra.mrb[16].mxu1 %vm508_vm0, %v3294_v25 }
  0x3b   :  { %3149 = vmatprep.mubr.msk.bf16.mxu0 %vm508_vm0, %v3295_v26  ;;  %3213 = vmatprep.mubr.msk.bf16.mxu1 %vm508_vm0, %v3296_v27 }
  0x42   :  { %3150 = vmatmul.mubr.msk.bf16.gmra.mrb[20].mxu0 %vm508_vm0, %v3297_v28  ;;  %3214 = vmatmul.mubr.msk.bf16.gmra.mrb[20].mxu1 %vm508_vm0, %v3298_v29 }
  0x43   :  { %3153 = vmatprep.mubr.msk.bf16.mxu0 %vm508_vm0, %v3299_v30  ;;  %3217 = vmatprep.mubr.msk.bf16.mxu1 %vm508_vm0, %v3300_v31 }
  0x4a   :  { %3154 = vmatmul.mubr.msk.bf16.gmra.mrb[24].mxu0 %vm508_vm0, %v3301_v32  ;;  %3218 = vmatmul.mubr.msk.bf16.gmra.mrb[24].mxu1 %vm508_vm0, %v3302_v33 }
  0x4b   :  { %3157 = vmatprep.mubr.msk.bf16.mxu0 %vm508_vm0, %v3303_v34  ;;  %3221 = vmatprep.mubr.msk.bf16.mxu1 %vm508_vm0, %v3304_v35 }
  0x52   :  { %3158 = vmatmul.mubr.msk.bf16.gmra.mrb[28].mxu0 %vm508_vm0, %v3305_v36  ;;  %3222 = vmatmul.mubr.msk.bf16.gmra.mrb[28].mxu1 %vm508_vm0, %v3306_v37 }
  0x53   :  { %3161 = vmatprep.mubr.msk.bf16.mxu0 %vm508_vm0, %v3307_v38  ;;  %3225 = vmatprep.mubr.msk.bf16.mxu1 %vm508_vm0, %v3308_v39 }
  0x5a   :  { %3162 = vmatmul.mubr.msk.bf16.gmra.mrb[32].mxu0 %vm508_vm0, %v3309_v40  ;;  %3226 = vmatmul.mubr.msk.bf16.gmra.mrb[32].mxu1 %vm508_vm0, %v3310_v41 }
  0x5b   :  { %3165 = vmatprep.mubr.msk.bf16.mxu0 %vm508_vm0, %v3311_v42  ;;  %3229 = vmatprep.mubr.msk.bf16.mxu1 %vm508_vm0, %v3312_v43 }
  0x62   :  { %3166 = vmatmul.mubr.msk.bf16.gmra.mrb[36].mxu0 %vm508_vm0, %v3313_v44  ;;  %3230 = vmatmul.mubr.msk.bf16.gmra.mrb[36].mxu1 %vm508_vm0, %v3314_v45 }
  0x63   :  { %3169 = vmatprep.mubr.msk.bf16.mxu0 %vm508_vm0, %v3315_v46  ;;  %3233 = vmatprep.mubr.msk.bf16.mxu1 %vm508_vm0, %v3316_v47 }
  0x6a   :  { %3170 = vmatmul.mubr.msk.bf16.gmra.mrb[40].mxu0 %vm508_vm0, %v3317_v48  ;;  %3234 = vmatmul.mubr.msk.bf16.gmra.mrb[40].mxu1 %vm508_vm0, %v3318_v49 }
  0x6b   :  { %3173 = vmatprep.mubr.msk.bf16.mxu0 %vm508_vm0, %v3319_v50  ;;  %3237 = vmatprep.mubr.msk.bf16.mxu1 %vm508_vm0, %v3320_v51 }
  0x72   :  { %3174 = vmatmul.mubr.msk.bf16.gmra.mrb[44].mxu0 %vm508_vm0, %v3321_v52  ;;  %3238 = vmatmul.mubr.msk.bf16.gmra.mrb[44].mxu1 %vm508_vm0, %v3322_v53 }
  0x73   :  { %3177 = vmatprep.mubr.msk.bf16.mxu0 %vm508_vm0, %v3323_v54  ;;  %3241 = vmatprep.mubr.msk.bf16.mxu1 %vm508_vm0, %v3324_v55 }
  0x7a   :  { %3178 = vmatmul.mubr.msk.bf16.gmra.mrb[48].mxu0 %vm508_vm0, %v3325_v56  ;;  %3242 = vmatmul.mubr.msk.bf16.gmra.mrb[48].mxu1 %vm508_vm0, %v3326_v57 }
  0x7b   :  { %3181 = vmatprep.mubr.msk.bf16.mxu0 %vm508_vm0, %v3327_v58  ;;  %3245 = vmatprep.mubr.msk.bf16.mxu1 %vm508_vm0, %v3328_v59 }
  0x82   :  { %3182 = vmatmul.mubr.msk.bf16.gmra.mrb[52].mxu0 %vm508_vm0, %v3329_v60  ;;  %3246 = vmatmul.mubr.msk.bf16.gmra.mrb[52].mxu1 %vm508_vm0, %v3330_v61 }
  0x83   :  { %3185 = vmatprep.mubr.msk.bf16.mxu0 %vm508_vm0, %v3331_v62  ;;  %3249 = vmatprep.mubr.msk.bf16.mxu1 %vm508_vm0, %v3332_v63 }
  0x8a   :  { %3186 = vmatmul.mubr.msk.bf16.gmra.mrb[56].mxu0 %vm508_vm0, %v3333_v0  ;;  %3250 = vmatmul.mubr.msk.bf16.gmra.mrb[56].mxu1 %vm508_vm0, %v3334_v1 }
  0x8b   :  { %3189 = vmatprep.mubr.msk.bf16.mxu0 %vm508_vm0, %v3335_v2  ;;  %3253 = vmatprep.mubr.msk.bf16.mxu1 %vm508_vm0, %v3336_v3 }
  0x92   :  { %3190 = vmatmul.mubr.msk.bf16.gmra.mrb[60].mxu0 %vm508_vm0, %v3337_v4  ;;  %3254 = vmatmul.mubr.msk.bf16.gmra.mrb[60].mxu1 %vm508_vm0, %v3338_v5 }
  0xed   :  { %v3131_v6 = vpop.f32.mrb[0].mxu0  ;;  %v3195_v7 = vpop.f32.mrb[0].mxu1 }
  0xee   :  { %vm1248_vm1 = vcmp.ge.f32.partialorder %v3131_v6, 0.0  ;;  %v1376_v8 = vmul.f32 0.2, %v3131_v6  ;;  %v1440_v9 = vmul.f32 0.2, %v3195_v7  ;;  %vm1312_vm2 = vcmp.ge.f32.partialorder %v3195_v7, 0.0 }
  0xef   :  { %v735_v10 = vpop.f32.mrb[1].mxu0  ;;  %v991_v11 = vpop.f32.mrb[1].mxu1 }
  0xf0   :  { %v1374_v12 = vmul.f32 0.2, %v735_v10  ;;  %v3132_v13 = vpop.f32.mrb[2].mxu0  ;;  %v3196_v14 = vpop.f32.mrb[2].mxu1  ;;  %v1504_v15 = vsel %vm1248_vm1, %v3131_v6, %v1376_v8  ;;  %v1438_v16 = vmul.f32 0.2, %v991_v11  ;;  %v1568_v18 = vsel %vm1312_vm2, %v3195_v7, %v1440_v9 }
  0xf1   :  { %vm1249_vm3 = vcmp.ge.f32.partialorder %v3132_v13, 0.0  ;;  %v1377_v17 = vmul.f32 0.2, %v3132_v13  ;;  %vm1246_vm4 = vcmp.ge.f32.partialorder %v735_v10, 0.0  ;;  %vm1313_vm5 = vcmp.ge.f32.partialorder %v3196_v14, 0.0  ;;  %v738_v20 = vpop.f32.mrb[3].mxu0 }
  0xf2   :  { %v1441_v19 = vmul.f32 0.2, %v3196_v14  ;;  %v994_v21 = vpop.f32.mrb[3].mxu1  ;;  %vm1310_vm6 = vcmp.ge.f32.partialorder %v991_v11, 0.0  ;;  %vm1247_vm7 = vcmp.ge.f32.partialorder %v738_v20, 0.0  ;;  %v1502_v27 = vsel %vm1246_vm4, %v735_v10, %v1374_v12 }
  0xf3   :  { %v1505_v22 = vsel %vm1249_vm3, %v3132_v13, %v1377_v17  ;;  %v1375_v23 = vmul.f32 0.2, %v738_v20  ;;  %vm1311_vm8 = vcmp.ge.f32.partialorder %v994_v21, 0.0  ;;  %v1439_v26 = vmul.f32 0.2, %v994_v21 }
  0xf4   :  { %v2672_v24 = vpack.c.bf16 %v1505_v22, %v1504_v15  ;;  %v1569_v25 = vsel %vm1313_vm5, %v3196_v14, %v1441_v19  ;;  %v1566_v32 = vsel %vm1310_vm6, %v991_v11, %v1438_v16 }
  0xf5   :  { %v2832_v28 = vpack.c.bf16 %v1569_v25, %v1568_v18  ;;  %v1503_v29 = vsel %vm1247_vm7, %v738_v20, %v1375_v23  ;;  %v3135_v30 = vpop.f32.mrb[4].mxu0  ;;  %v3199_v31 = vpop.f32.mrb[4].mxu1  ;;  %v1567_v34 = vsel %vm1311_vm8, %v994_v21, %v1439_v26 }
  0xf6   :  { %2984 = vst [vmem:[%s3837_s2 + $0x8] sm:$0xff] %v2672_v24   ;;  %v2667_v33 = vpack.c.bf16 %v1503_v29, %v1502_v27  ;;  %v1380_v35 = vmul.f32 0.2, %v3135_v30  ;;  %v751_v36 = vpop.f32.mrb[5].mxu0  ;;  %v1007_v37 = vpop.f32.mrb[5].mxu1  ;;  %v2827_v38 = vpack.c.bf16 %v1567_v34, %v1566_v32  ;;  %vm1252_vm9 = vcmp.ge.f32.partialorder %v3135_v30, 0.0 }
  0xf7   :  { %3016 = vst [vmem:[%s3837_s2 + $0x108] sm:$0xff] %v2832_v28   ;;  %v1444_v39 = vmul.f32 0.2, %v3199_v31  ;;  %v3136_v40 = vpop.f32.mrb[6].mxu0  ;;  %v3200_v41 = vpop.f32.mrb[6].mxu1  ;;  %vm1316_vm10 = vcmp.ge.f32.partialorder %v3199_v31, 0.0 }
  0xf8   :  { %2668 = vst [vmem:[%s3837_s2] sm:$0xff] %v2667_v33   ;;  %v1378_v42 = vmul.f32 0.2, %v751_v36  ;;  %v1442_v43 = vmul.f32 0.2, %v1007_v37  ;;  %v754_v44 = vpop.f32.mrb[7].mxu0  ;;  %3015 = vst [vmem:[%s3837_s2 + $0x100] sm:$0xff] %v2827_v38   ;;  %v1508_v47 = vsel %vm1252_vm9, %v3135_v30, %v1380_v35 }
  0xf9   :  { %vm1250_vm11 = vcmp.ge.f32.partialorder %v751_v36, 0.0  ;;  %vm1253_vm12 = vcmp.ge.f32.partialorder %v3136_v40, 0.0  ;;  %v1381_v45 = vmul.f32 0.2, %v3136_v40  ;;  %vm1317_vm13 = vcmp.ge.f32.partialorder %v3200_v41, 0.0  ;;  %v1010_v46 = vpop.f32.mrb[7].mxu1 }
  0xfa   :  { %vm1314_vm14 = vcmp.ge.f32.partialorder %v1007_v37, 0.0  ;;  %v1445_v48 = vmul.f32 0.2, %v3200_v41  ;;  %vm1251_vm15 = vcmp.ge.f32.partialorder %v754_v44, 0.0  ;;  %v1379_v50 = vmul.f32 0.2, %v754_v44 }
  0xfb   :  { %v1509_v49 = vsel %vm1253_vm12, %v3136_v40, %v1381_v45  ;;  %vm1315_vm0 = vcmp.ge.f32.partialorder %v1010_v46, 0.0  ;;  %v1443_v51 = vmul.f32 0.2, %v1010_v46  ;;  %v1572_v52 = vsel %vm1316_vm10, %v3199_v31, %v1444_v39 }
  0xfc   :  { %v1506_v53 = vsel %vm1250_vm11, %v751_v36, %v1378_v42  ;;  %v2682_v54 = vpack.c.bf16 %v1509_v49, %v1508_v47  ;;  %v1573_v55 = vsel %vm1317_vm13, %v3200_v41, %v1445_v48  ;;  %v1570_v56 = vsel %vm1314_vm14, %v1007_v37, %v1442_v43 }
  0xfd   :  { %v2842_v57 = vpack.c.bf16 %v1573_v55, %v1572_v52  ;;  %v1507_v58 = vsel %vm1251_vm15, %v754_v44, %v1379_v50  ;;  %v1571_v59 = vsel %vm1315_vm0, %v1010_v46, %v1443_v51  ;;  %v3139_v60 = vpop.f32.mrb[8].mxu0  ;;  %v3203_v61 = vpop.f32.mrb[8].mxu1 }
  0xfe   :  { %2986 = vst [vmem:[%s3837_s2 + $0x18] sm:$0xff] %v2682_v54   ;;  %v2677_v62 = vpack.c.bf16 %v1507_v58, %v1506_v53  ;;  %v2837_v63 = vpack.c.bf16 %v1571_v59, %v1570_v56  ;;  %vm1256_vm1 = vcmp.ge.f32.partialorder %v3139_v60, 0.0  ;;  %v1384_v0 = vmul.f32 0.2, %v3139_v60  ;;  %v767_v1 = vpop.f32.mrb[9].mxu0  ;;  %v1023_v2 = vpop.f32.mrb[9].mxu1 }
  0xff   :  { %3018 = vst [vmem:[%s3837_s2 + $0x118] sm:$0xff] %v2842_v57   ;;  %vm1320_vm2 = vcmp.ge.f32.partialorder %v3203_v61, 0.0  ;;  %v1448_v3 = vmul.f32 0.2, %v3203_v61  ;;  %v1382_v4 = vmul.f32 0.2, %v767_v1 }
 0x100   :  { %2985 = vst [vmem:[%s3837_s2 + $0x10] sm:$0xff] %v2677_v62   ;;  %3017 = vst [vmem:[%s3837_s2 + $0x110] sm:$0xff] %v2837_v63   ;;  %v1446_v5 = vmul.f32 0.2, %v1023_v2  ;;  %v3140_v6 = vpop.f32.mrb[10].mxu0  ;;  %v3204_v7 = vpop.f32.mrb[10].mxu1  ;;  %v1512_v8 = vsel %vm1256_vm1, %v3139_v60, %v1384_v0 }
 0x101   :  { %vm1254_vm3 = vcmp.ge.f32.partialorder %v767_v1, 0.0  ;;  %vm1257_vm4 = vcmp.ge.f32.partialorder %v3140_v6, 0.0  ;;  %v1385_v9 = vmul.f32 0.2, %v3140_v6  ;;  %v770_v10 = vpop.f32.mrb[11].mxu0  ;;  %v1026_v11 = vpop.f32.mrb[11].mxu1  ;;  %v1576_v16 = vsel %vm1320_vm2, %v3203_v61, %v1448_v3 }
 0x102   :  { %vm1318_vm5 = vcmp.ge.f32.partialorder %v1023_v2, 0.0  ;;  %vm1321_vm6 = vcmp.ge.f32.partialorder %v3204_v7, 0.0  ;;  %v1449_v12 = vmul.f32 0.2, %v3204_v7  ;;  %vm1255_vm7 = vcmp.ge.f32.partialorder %v770_v10, 0.0 }
 0x103   :  { %v1513_v13 = vsel %vm1257_vm4, %v3140_v6, %v1385_v9  ;;  %v1383_v14 = vmul.f32 0.2, %v770_v10  ;;  %vm1319_vm8 = vcmp.ge.f32.partialorder %v1026_v11, 0.0  ;;  %v1447_v15 = vmul.f32 0.2, %v1026_v11 }
 0x104   :  { %v1510_v17 = vsel %vm1254_vm3, %v767_v1, %v1382_v4  ;;  %v2692_v18 = vpack.c.bf16 %v1513_v13, %v1512_v8  ;;  %v1577_v19 = vsel %vm1321_vm6, %v3204_v7, %v1449_v12  ;;  %v1574_v20 = vsel %vm1318_vm5, %v1023_v2, %v1446_v5 }
 0x105   :  { %v2852_v21 = vpack.c.bf16 %v1577_v19, %v1576_v16  ;;  %v1511_v22 = vsel %vm1255_vm7, %v770_v10, %v1383_v14  ;;  %v1575_v23 = vsel %vm1319_vm8, %v1026_v11, %v1447_v15  ;;  %v3143_v24 = vpop.f32.mrb[12].mxu0  ;;  %v3207_v25 = vpop.f32.mrb[12].mxu1 }
 0x106   :  { %2988 = vst [vmem:[%s3837_s2 + $0x28] sm:$0xff] %v2692_v18   ;;  %v2687_v26 = vpack.c.bf16 %v1511_v22, %v1510_v17  ;;  %v2847_v27 = vpack.c.bf16 %v1575_v23, %v1574_v20  ;;  %vm1260_vm9 = vcmp.ge.f32.partialorder %v3143_v24, 0.0  ;;  %v1388_v28 = vmul.f32 0.2, %v3143_v24  ;;  %v783_v29 = vpop.f32.mrb[13].mxu0  ;;  %v1039_v30 = vpop.f32.mrb[13].mxu1 }
 0x107   :  { %3020 = vst [vmem:[%s3837_s2 + $0x128] sm:$0xff] %v2852_v21   ;;  %vm1324_vm10 = vcmp.ge.f32.partialorder %v3207_v25, 0.0  ;;  %v1452_v31 = vmul.f32 0.2, %v3207_v25  ;;  %v1386_v32 = vmul.f32 0.2, %v783_v29 }
 0x108   :  { %2987 = vst [vmem:[%s3837_s2 + $0x20] sm:$0xff] %v2687_v26   ;;  %3019 = vst [vmem:[%s3837_s2 + $0x120] sm:$0xff] %v2847_v27   ;;  %v1450_v33 = vmul.f32 0.2, %v1039_v30  ;;  %v3144_v34 = vpop.f32.mrb[14].mxu0  ;;  %v3208_v35 = vpop.f32.mrb[14].mxu1  ;;  %v1516_v36 = vsel %vm1260_vm9, %v3143_v24, %v1388_v28 }
 0x109   :  { %vm1258_vm11 = vcmp.ge.f32.partialorder %v783_v29, 0.0  ;;  %vm1261_vm12 = vcmp.ge.f32.partialorder %v3144_v34, 0.0  ;;  %v1389_v37 = vmul.f32 0.2, %v3144_v34  ;;  %v786_v38 = vpop.f32.mrb[15].mxu0  ;;  %v1042_v39 = vpop.f32.mrb[15].mxu1  ;;  %v1580_v44 = vsel %vm1324_vm10, %v3207_v25, %v1452_v31 }
 0x10a   :  { %vm1322_vm13 = vcmp.ge.f32.partialorder %v1039_v30, 0.0  ;;  %vm1325_vm14 = vcmp.ge.f32.partialorder %v3208_v35, 0.0  ;;  %v1453_v40 = vmul.f32 0.2, %v3208_v35  ;;  %vm1259_vm15 = vcmp.ge.f32.partialorder %v786_v38, 0.0 }
 0x10b   :  { %v1517_v41 = vsel %vm1261_vm12, %v3144_v34, %v1389_v37  ;;  %v1387_v42 = vmul.f32 0.2, %v786_v38  ;;  %vm1323_vm0 = vcmp.ge.f32.partialorder %v1042_v39, 0.0  ;;  %v1451_v43 = vmul.f32 0.2, %v1042_v39 }
 0x10c   :  { %v1514_v45 = vsel %vm1258_vm11, %v783_v29, %v1386_v32  ;;  %v2702_v46 = vpack.c.bf16 %v1517_v41, %v1516_v36  ;;  %v1581_v47 = vsel %vm1325_vm14, %v3208_v35, %v1453_v40  ;;  %v1578_v48 = vsel %vm1322_vm13, %v1039_v30, %v1450_v33 }
 0x10d   :  { %v2862_v49 = vpack.c.bf16 %v1581_v47, %v1580_v44  ;;  %v1515_v50 = vsel %vm1259_vm15, %v786_v38, %v1387_v42  ;;  %v1579_v51 = vsel %vm1323_vm0, %v1042_v39, %v1451_v43  ;;  %v3147_v52 = vpop.f32.mrb[16].mxu0  ;;  %v3211_v53 = vpop.f32.mrb[16].mxu1 }
 0x10e   :  { %2990 = vst [vmem:[%s3837_s2 + $0x38] sm:$0xff] %v2702_v46   ;;  %v2697_v54 = vpack.c.bf16 %v1515_v50, %v1514_v45  ;;  %v2857_v55 = vpack.c.bf16 %v1579_v51, %v1578_v48  ;;  %vm1264_vm1 = vcmp.ge.f32.partialorder %v3147_v52, 0.0  ;;  %v1392_v56 = vmul.f32 0.2, %v3147_v52  ;;  %v799_v57 = vpop.f32.mrb[17].mxu0  ;;  %v1055_v58 = vpop.f32.mrb[17].mxu1 }
 0x10f   :  { %3022 = vst [vmem:[%s3837_s2 + $0x138] sm:$0xff] %v2862_v49   ;;  %vm1328_vm2 = vcmp.ge.f32.partialorder %v3211_v53, 0.0  ;;  %v1456_v59 = vmul.f32 0.2, %v3211_v53  ;;  %v1390_v60 = vmul.f32 0.2, %v799_v57 }
 0x110   :  { %2989 = vst [vmem:[%s3837_s2 + $0x30] sm:$0xff] %v2697_v54   ;;  %3021 = vst [vmem:[%s3837_s2 + $0x130] sm:$0xff] %v2857_v55   ;;  %v1454_v61 = vmul.f32 0.2, %v1055_v58  ;;  %v3148_v62 = vpop.f32.mrb[18].mxu0  ;;  %v3212_v63 = vpop.f32.mrb[18].mxu1  ;;  %v1520_v0 = vsel %vm1264_vm1, %v3147_v52, %v1392_v56 }
 0x111   :  { %vm1262_vm3 = vcmp.ge.f32.partialorder %v799_v57, 0.0  ;;  %vm1265_vm4 = vcmp.ge.f32.partialorder %v3148_v62, 0.0  ;;  %v1393_v1 = vmul.f32 0.2, %v3148_v62  ;;  %v802_v2 = vpop.f32.mrb[19].mxu0  ;;  %v1058_v3 = vpop.f32.mrb[19].mxu1  ;;  %v1584_v8 = vsel %vm1328_vm2, %v3211_v53, %v1456_v59 }
 0x112   :  { %vm1326_vm5 = vcmp.ge.f32.partialorder %v1055_v58, 0.0  ;;  %vm1329_vm6 = vcmp.ge.f32.partialorder %v3212_v63, 0.0  ;;  %v1457_v4 = vmul.f32 0.2, %v3212_v63  ;;  %vm1263_vm7 = vcmp.ge.f32.partialorder %v802_v2, 0.0 }
 0x113   :  { %v1521_v5 = vsel %vm1265_vm4, %v3148_v62, %v1393_v1  ;;  %v1391_v6 = vmul.f32 0.2, %v802_v2  ;;  %vm1327_vm8 = vcmp.ge.f32.partialorder %v1058_v3, 0.0  ;;  %v1455_v7 = vmul.f32 0.2, %v1058_v3 }
 0x114   :  { %v1518_v9 = vsel %vm1262_vm3, %v799_v57, %v1390_v60  ;;  %v2712_v10 = vpack.c.bf16 %v1521_v5, %v1520_v0  ;;  %v1585_v11 = vsel %vm1329_vm6, %v3212_v63, %v1457_v4  ;;  %v1582_v12 = vsel %vm1326_vm5, %v1055_v58, %v1454_v61 }
 0x115   :  { %v2872_v13 = vpack.c.bf16 %v1585_v11, %v1584_v8  ;;  %v1519_v14 = vsel %vm1263_vm7, %v802_v2, %v1391_v6  ;;  %v1583_v15 = vsel %vm1327_vm8, %v1058_v3, %v1455_v7  ;;  %v3151_v16 = vpop.f32.mrb[20].mxu0  ;;  %v3215_v17 = vpop.f32.mrb[20].mxu1 }
 0x116   :  { %2992 = vst [vmem:[%s3837_s2 + $0x48] sm:$0xff] %v2712_v10   ;;  %v2707_v18 = vpack.c.bf16 %v1519_v14, %v1518_v9  ;;  %v2867_v19 = vpack.c.bf16 %v1583_v15, %v1582_v12  ;;  %vm1268_vm9 = vcmp.ge.f32.partialorder %v3151_v16, 0.0  ;;  %v1396_v20 = vmul.f32 0.2, %v3151_v16  ;;  %v815_v21 = vpop.f32.mrb[21].mxu0  ;;  %v1071_v22 = vpop.f32.mrb[21].mxu1 }
 0x117   :  { %3024 = vst [vmem:[%s3837_s2 + $0x148] sm:$0xff] %v2872_v13   ;;  %vm1332_vm10 = vcmp.ge.f32.partialorder %v3215_v17, 0.0  ;;  %v1460_v23 = vmul.f32 0.2, %v3215_v17  ;;  %v1394_v24 = vmul.f32 0.2, %v815_v21 }
 0x118   :  { %2991 = vst [vmem:[%s3837_s2 + $0x40] sm:$0xff] %v2707_v18   ;;  %3023 = vst [vmem:[%s3837_s2 + $0x140] sm:$0xff] %v2867_v19   ;;  %v1458_v25 = vmul.f32 0.2, %v1071_v22  ;;  %v3152_v26 = vpop.f32.mrb[22].mxu0  ;;  %v3216_v27 = vpop.f32.mrb[22].mxu1  ;;  %v1524_v28 = vsel %vm1268_vm9, %v3151_v16, %v1396_v20 }
 0x119   :  { %vm1266_vm11 = vcmp.ge.f32.partialorder %v815_v21, 0.0  ;;  %vm1269_vm12 = vcmp.ge.f32.partialorder %v3152_v26, 0.0  ;;  %v1397_v29 = vmul.f32 0.2, %v3152_v26  ;;  %v818_v30 = vpop.f32.mrb[23].mxu0  ;;  %v1074_v31 = vpop.f32.mrb[23].mxu1  ;;  %v1588_v36 = vsel %vm1332_vm10, %v3215_v17, %v1460_v23 }
 0x11a   :  { %vm1330_vm13 = vcmp.ge.f32.partialorder %v1071_v22, 0.0  ;;  %vm1333_vm14 = vcmp.ge.f32.partialorder %v3216_v27, 0.0  ;;  %v1461_v32 = vmul.f32 0.2, %v3216_v27  ;;  %vm1267_vm15 = vcmp.ge.f32.partialorder %v818_v30, 0.0 }
 0x11b   :  { %v1525_v33 = vsel %vm1269_vm12, %v3152_v26, %v1397_v29  ;;  %v1395_v34 = vmul.f32 0.2, %v818_v30  ;;  %vm1331_vm0 = vcmp.ge.f32.partialorder %v1074_v31, 0.0  ;;  %v1459_v35 = vmul.f32 0.2, %v1074_v31 }
 0x11c   :  { %v1522_v37 = vsel %vm1266_vm11, %v815_v21, %v1394_v24  ;;  %v2722_v38 = vpack.c.bf16 %v1525_v33, %v1524_v28  ;;  %v1589_v39 = vsel %vm1333_vm14, %v3216_v27, %v1461_v32  ;;  %v1586_v40 = vsel %vm1330_vm13, %v1071_v22, %v1458_v25 }
 0x11d   :  { %v2882_v41 = vpack.c.bf16 %v1589_v39, %v1588_v36  ;;  %v1523_v42 = vsel %vm1267_vm15, %v818_v30, %v1395_v34  ;;  %v1587_v43 = vsel %vm1331_vm0, %v1074_v31, %v1459_v35  ;;  %v3155_v44 = vpop.f32.mrb[24].mxu0  ;;  %v3219_v45 = vpop.f32.mrb[24].mxu1 }
 0x11e   :  { %2994 = vst [vmem:[%s3837_s2 + $0x58] sm:$0xff] %v2722_v38   ;;  %v2717_v46 = vpack.c.bf16 %v1523_v42, %v1522_v37  ;;  %v2877_v47 = vpack.c.bf16 %v1587_v43, %v1586_v40  ;;  %vm1272_vm1 = vcmp.ge.f32.partialorder %v3155_v44, 0.0  ;;  %v1400_v48 = vmul.f32 0.2, %v3155_v44  ;;  %v831_v49 = vpop.f32.mrb[25].mxu0  ;;  %v1087_v50 = vpop.f32.mrb[25].mxu1 }
 0x11f   :  { %3026 = vst [vmem:[%s3837_s2 + $0x158] sm:$0xff] %v2882_v41   ;;  %vm1336_vm2 = vcmp.ge.f32.partialorder %v3219_v45, 0.0  ;;  %v1464_v51 = vmul.f32 0.2, %v3219_v45  ;;  %v1398_v52 = vmul.f32 0.2, %v831_v49 }
 0x120   :  { %2993 = vst [vmem:[%s3837_s2 + $0x50] sm:$0xff] %v2717_v46   ;;  %3025 = vst [vmem:[%s3837_s2 + $0x150] sm:$0xff] %v2877_v47   ;;  %v1462_v53 = vmul.f32 0.2, %v1087_v50  ;;  %v3156_v54 = vpop.f32.mrb[26].mxu0  ;;  %v3220_v55 = vpop.f32.mrb[26].mxu1  ;;  %v1528_v56 = vsel %vm1272_vm1, %v3155_v44, %v1400_v48 }
 0x121   :  { %vm1270_vm3 = vcmp.ge.f32.partialorder %v831_v49, 0.0  ;;  %vm1273_vm4 = vcmp.ge.f32.partialorder %v3156_v54, 0.0  ;;  %v1401_v57 = vmul.f32 0.2, %v3156_v54  ;;  %v834_v58 = vpop.f32.mrb[27].mxu0  ;;  %v1090_v59 = vpop.f32.mrb[27].mxu1  ;;  %v1592_v0 = vsel %vm1336_vm2, %v3219_v45, %v1464_v51 }
 0x122   :  { %vm1334_vm5 = vcmp.ge.f32.partialorder %v1087_v50, 0.0  ;;  %vm1337_vm6 = vcmp.ge.f32.partialorder %v3220_v55, 0.0  ;;  %v1465_v60 = vmul.f32 0.2, %v3220_v55  ;;  %vm1271_vm7 = vcmp.ge.f32.partialorder %v834_v58, 0.0 }
 0x123   :  { %v1529_v61 = vsel %vm1273_vm4, %v3156_v54, %v1401_v57  ;;  %v1399_v62 = vmul.f32 0.2, %v834_v58  ;;  %vm1335_vm8 = vcmp.ge.f32.partialorder %v1090_v59, 0.0  ;;  %v1463_v63 = vmul.f32 0.2, %v1090_v59 }
 0x124   :  { %v1526_v1 = vsel %vm1270_vm3, %v831_v49, %v1398_v52  ;;  %v2732_v2 = vpack.c.bf16 %v1529_v61, %v1528_v56  ;;  %v1593_v3 = vsel %vm1337_vm6, %v3220_v55, %v1465_v60  ;;  %v1590_v4 = vsel %vm1334_vm5, %v1087_v50, %v1462_v53 }
 0x125   :  { %v2892_v5 = vpack.c.bf16 %v1593_v3, %v1592_v0  ;;  %v1527_v6 = vsel %vm1271_vm7, %v834_v58, %v1399_v62  ;;  %v1591_v7 = vsel %vm1335_vm8, %v1090_v59, %v1463_v63  ;;  %v3159_v8 = vpop.f32.mrb[28].mxu0  ;;  %v3223_v9 = vpop.f32.mrb[28].mxu1 }
 0x126   :  { %2996 = vst [vmem:[%s3837_s2 + $0x68] sm:$0xff] %v2732_v2   ;;  %v2727_v10 = vpack.c.bf16 %v1527_v6, %v1526_v1  ;;  %v2887_v11 = vpack.c.bf16 %v1591_v7, %v1590_v4  ;;  %vm1276_vm9 = vcmp.ge.f32.partialorder %v3159_v8, 0.0  ;;  %v1404_v12 = vmul.f32 0.2, %v3159_v8  ;;  %v847_v13 = vpop.f32.mrb[29].mxu0  ;;  %v1103_v14 = vpop.f32.mrb[29].mxu1 }
 0x127   :  { %3028 = vst [vmem:[%s3837_s2 + $0x168] sm:$0xff] %v2892_v5   ;;  %vm1340_vm10 = vcmp.ge.f32.partialorder %v3223_v9, 0.0  ;;  %v1468_v15 = vmul.f32 0.2, %v3223_v9  ;;  %v1402_v16 = vmul.f32 0.2, %v847_v13 }
 0x128   :  { %2995 = vst [vmem:[%s3837_s2 + $0x60] sm:$0xff] %v2727_v10   ;;  %3027 = vst [vmem:[%s3837_s2 + $0x160] sm:$0xff] %v2887_v11   ;;  %v1466_v17 = vmul.f32 0.2, %v1103_v14  ;;  %v3160_v18 = vpop.f32.mrb[30].mxu0  ;;  %v3224_v19 = vpop.f32.mrb[30].mxu1  ;;  %v1532_v20 = vsel %vm1276_vm9, %v3159_v8, %v1404_v12 }
 0x129   :  { %vm1274_vm11 = vcmp.ge.f32.partialorder %v847_v13, 0.0  ;;  %vm1277_vm12 = vcmp.ge.f32.partialorder %v3160_v18, 0.0  ;;  %v1405_v21 = vmul.f32 0.2, %v3160_v18  ;;  %v850_v22 = vpop.f32.mrb[31].mxu0  ;;  %v1106_v23 = vpop.f32.mrb[31].mxu1  ;;  %v1596_v28 = vsel %vm1340_vm10, %v3223_v9, %v1468_v15 }
 0x12a   :  { %vm1338_vm13 = vcmp.ge.f32.partialorder %v1103_v14, 0.0  ;;  %vm1341_vm14 = vcmp.ge.f32.partialorder %v3224_v19, 0.0  ;;  %v1469_v24 = vmul.f32 0.2, %v3224_v19  ;;  %vm1275_vm15 = vcmp.ge.f32.partialorder %v850_v22, 0.0 }
 0x12b   :  { %v1533_v25 = vsel %vm1277_vm12, %v3160_v18, %v1405_v21  ;;  %v1403_v26 = vmul.f32 0.2, %v850_v22  ;;  %vm1339_vm0 = vcmp.ge.f32.partialorder %v1106_v23, 0.0  ;;  %v1467_v27 = vmul.f32 0.2, %v1106_v23 }
 0x12c   :  { %v1530_v29 = vsel %vm1274_vm11, %v847_v13, %v1402_v16  ;;  %v2742_v30 = vpack.c.bf16 %v1533_v25, %v1532_v20  ;;  %v1597_v31 = vsel %vm1341_vm14, %v3224_v19, %v1469_v24  ;;  %v1594_v32 = vsel %vm1338_vm13, %v1103_v14, %v1466_v17 }
 0x12d   :  { %v2902_v33 = vpack.c.bf16 %v1597_v31, %v1596_v28  ;;  %v1531_v34 = vsel %vm1275_vm15, %v850_v22, %v1403_v26  ;;  %v1595_v35 = vsel %vm1339_vm0, %v1106_v23, %v1467_v27  ;;  %v3163_v36 = vpop.f32.mrb[32].mxu0  ;;  %v3227_v37 = vpop.f32.mrb[32].mxu1 }
 0x12e   :  { %2998 = vst [vmem:[%s3837_s2 + $0x78] sm:$0xff] %v2742_v30   ;;  %v2737_v38 = vpack.c.bf16 %v1531_v34, %v1530_v29  ;;  %v2897_v39 = vpack.c.bf16 %v1595_v35, %v1594_v32  ;;  %vm1280_vm1 = vcmp.ge.f32.partialorder %v3163_v36, 0.0  ;;  %v1408_v40 = vmul.f32 0.2, %v3163_v36  ;;  %v863_v41 = vpop.f32.mrb[33].mxu0  ;;  %v1119_v42 = vpop.f32.mrb[33].mxu1 }
 0x12f   :  { %3030 = vst [vmem:[%s3837_s2 + $0x178] sm:$0xff] %v2902_v33   ;;  %vm1344_vm2 = vcmp.ge.f32.partialorder %v3227_v37, 0.0  ;;  %v1472_v43 = vmul.f32 0.2, %v3227_v37  ;;  %v1406_v44 = vmul.f32 0.2, %v863_v41 }
 0x130   :  { %2997 = vst [vmem:[%s3837_s2 + $0x70] sm:$0xff] %v2737_v38   ;;  %3029 = vst [vmem:[%s3837_s2 + $0x170] sm:$0xff] %v2897_v39   ;;  %v1470_v45 = vmul.f32 0.2, %v1119_v42  ;;  %v3164_v46 = vpop.f32.mrb[34].mxu0  ;;  %v3228_v47 = vpop.f32.mrb[34].mxu1  ;;  %v1536_v48 = vsel %vm1280_vm1, %v3163_v36, %v1408_v40 }
 0x131   :  { %vm1278_vm3 = vcmp.ge.f32.partialorder %v863_v41, 0.0  ;;  %vm1281_vm4 = vcmp.ge.f32.partialorder %v3164_v46, 0.0  ;;  %v1409_v49 = vmul.f32 0.2, %v3164_v46  ;;  %v866_v50 = vpop.f32.mrb[35].mxu0  ;;  %v1122_v51 = vpop.f32.mrb[35].mxu1  ;;  %v1600_v56 = vsel %vm1344_vm2, %v3227_v37, %v1472_v43 }
 0x132   :  { %vm1342_vm5 = vcmp.ge.f32.partialorder %v1119_v42, 0.0  ;;  %vm1345_vm6 = vcmp.ge.f32.partialorder %v3228_v47, 0.0  ;;  %v1473_v52 = vmul.f32 0.2, %v3228_v47  ;;  %vm1279_vm7 = vcmp.ge.f32.partialorder %v866_v50, 0.0 }
 0x133   :  { %v1537_v53 = vsel %vm1281_vm4, %v3164_v46, %v1409_v49  ;;  %v1407_v54 = vmul.f32 0.2, %v866_v50  ;;  %vm1343_vm8 = vcmp.ge.f32.partialorder %v1122_v51, 0.0  ;;  %v1471_v55 = vmul.f32 0.2, %v1122_v51 }
 0x134   :  { %v1534_v57 = vsel %vm1278_vm3, %v863_v41, %v1406_v44  ;;  %v2752_v58 = vpack.c.bf16 %v1537_v53, %v1536_v48  ;;  %v1601_v59 = vsel %vm1345_vm6, %v3228_v47, %v1473_v52  ;;  %v1598_v60 = vsel %vm1342_vm5, %v1119_v42, %v1470_v45 }
 0x135   :  { %v2912_v61 = vpack.c.bf16 %v1601_v59, %v1600_v56  ;;  %v1535_v62 = vsel %vm1279_vm7, %v866_v50, %v1407_v54  ;;  %v1599_v63 = vsel %vm1343_vm8, %v1122_v51, %v1471_v55  ;;  %v3167_v0 = vpop.f32.mrb[36].mxu0  ;;  %v3231_v1 = vpop.f32.mrb[36].mxu1 }
 0x136   :  { %3000 = vst [vmem:[%s3837_s2 + $0x88] sm:$0xff] %v2752_v58   ;;  %v2747_v2 = vpack.c.bf16 %v1535_v62, %v1534_v57  ;;  %v2907_v3 = vpack.c.bf16 %v1599_v63, %v1598_v60  ;;  %vm1284_vm9 = vcmp.ge.f32.partialorder %v3167_v0, 0.0  ;;  %v1412_v4 = vmul.f32 0.2, %v3167_v0  ;;  %v879_v5 = vpop.f32.mrb[37].mxu0  ;;  %v1135_v6 = vpop.f32.mrb[37].mxu1 }
 0x137   :  { %3032 = vst [vmem:[%s3837_s2 + $0x188] sm:$0xff] %v2912_v61   ;;  %vm1348_vm10 = vcmp.ge.f32.partialorder %v3231_v1, 0.0  ;;  %v1476_v7 = vmul.f32 0.2, %v3231_v1  ;;  %v1410_v8 = vmul.f32 0.2, %v879_v5 }
 0x138   :  { %2999 = vst [vmem:[%s3837_s2 + $0x80] sm:$0xff] %v2747_v2   ;;  %3031 = vst [vmem:[%s3837_s2 + $0x180] sm:$0xff] %v2907_v3   ;;  %v1474_v9 = vmul.f32 0.2, %v1135_v6  ;;  %v3168_v10 = vpop.f32.mrb[38].mxu0  ;;  %v3232_v11 = vpop.f32.mrb[38].mxu1  ;;  %v1540_v12 = vsel %vm1284_vm9, %v3167_v0, %v1412_v4 }
 0x139   :  { %vm1282_vm11 = vcmp.ge.f32.partialorder %v879_v5, 0.0  ;;  %vm1285_vm12 = vcmp.ge.f32.partialorder %v3168_v10, 0.0  ;;  %v1413_v13 = vmul.f32 0.2, %v3168_v10  ;;  %v882_v14 = vpop.f32.mrb[39].mxu0  ;;  %v1138_v15 = vpop.f32.mrb[39].mxu1  ;;  %v1604_v20 = vsel %vm1348_vm10, %v3231_v1, %v1476_v7 }
 0x13a   :  { %vm1346_vm13 = vcmp.ge.f32.partialorder %v1135_v6, 0.0  ;;  %vm1349_vm14 = vcmp.ge.f32.partialorder %v3232_v11, 0.0  ;;  %v1477_v16 = vmul.f32 0.2, %v3232_v11  ;;  %vm1283_vm15 = vcmp.ge.f32.partialorder %v882_v14, 0.0 }
 0x13b   :  { %v1541_v17 = vsel %vm1285_vm12, %v3168_v10, %v1413_v13  ;;  %v1411_v18 = vmul.f32 0.2, %v882_v14  ;;  %vm1347_vm0 = vcmp.ge.f32.partialorder %v1138_v15, 0.0  ;;  %v1475_v19 = vmul.f32 0.2, %v1138_v15 }
 0x13c   :  { %v1538_v21 = vsel %vm1282_vm11, %v879_v5, %v1410_v8  ;;  %v2762_v22 = vpack.c.bf16 %v1541_v17, %v1540_v12  ;;  %v1605_v23 = vsel %vm1349_vm14, %v3232_v11, %v1477_v16  ;;  %v1602_v24 = vsel %vm1346_vm13, %v1135_v6, %v1474_v9 }
 0x13d   :  { %v2922_v25 = vpack.c.bf16 %v1605_v23, %v1604_v20  ;;  %v1539_v26 = vsel %vm1283_vm15, %v882_v14, %v1411_v18  ;;  %v1603_v27 = vsel %vm1347_vm0, %v1138_v15, %v1475_v19  ;;  %v3171_v28 = vpop.f32.mrb[40].mxu0  ;;  %v3235_v29 = vpop.f32.mrb[40].mxu1 }
 0x13e   :  { %3002 = vst [vmem:[%s3837_s2 + $0x98] sm:$0xff] %v2762_v22   ;;  %v2757_v30 = vpack.c.bf16 %v1539_v26, %v1538_v21  ;;  %v2917_v31 = vpack.c.bf16 %v1603_v27, %v1602_v24  ;;  %vm1288_vm1 = vcmp.ge.f32.partialorder %v3171_v28, 0.0  ;;  %v1416_v32 = vmul.f32 0.2, %v3171_v28  ;;  %v895_v33 = vpop.f32.mrb[41].mxu0  ;;  %v1151_v34 = vpop.f32.mrb[41].mxu1 }
 0x13f   :  { %3034 = vst [vmem:[%s3837_s2 + $0x198] sm:$0xff] %v2922_v25   ;;  %vm1352_vm2 = vcmp.ge.f32.partialorder %v3235_v29, 0.0  ;;  %v1480_v35 = vmul.f32 0.2, %v3235_v29  ;;  %v1414_v36 = vmul.f32 0.2, %v895_v33 }
 0x140   :  { %3001 = vst [vmem:[%s3837_s2 + $0x90] sm:$0xff] %v2757_v30   ;;  %3033 = vst [vmem:[%s3837_s2 + $0x190] sm:$0xff] %v2917_v31   ;;  %v1478_v37 = vmul.f32 0.2, %v1151_v34  ;;  %v3172_v38 = vpop.f32.mrb[42].mxu0  ;;  %v3236_v39 = vpop.f32.mrb[42].mxu1  ;;  %v1544_v40 = vsel %vm1288_vm1, %v3171_v28, %v1416_v32 }
 0x141   :  { %vm1286_vm3 = vcmp.ge.f32.partialorder %v895_v33, 0.0  ;;  %vm1289_vm4 = vcmp.ge.f32.partialorder %v3172_v38, 0.0  ;;  %v1417_v41 = vmul.f32 0.2, %v3172_v38  ;;  %v898_v42 = vpop.f32.mrb[43].mxu0  ;;  %v1154_v43 = vpop.f32.mrb[43].mxu1  ;;  %v1608_v48 = vsel %vm1352_vm2, %v3235_v29, %v1480_v35 }
 0x142   :  { %vm1350_vm5 = vcmp.ge.f32.partialorder %v1151_v34, 0.0  ;;  %vm1353_vm6 = vcmp.ge.f32.partialorder %v3236_v39, 0.0  ;;  %v1481_v44 = vmul.f32 0.2, %v3236_v39  ;;  %vm1287_vm7 = vcmp.ge.f32.partialorder %v898_v42, 0.0 }
 0x143   :  { %v1545_v45 = vsel %vm1289_vm4, %v3172_v38, %v1417_v41  ;;  %v1415_v46 = vmul.f32 0.2, %v898_v42  ;;  %vm1351_vm8 = vcmp.ge.f32.partialorder %v1154_v43, 0.0  ;;  %v1479_v47 = vmul.f32 0.2, %v1154_v43 }
 0x144   :  { %v1542_v49 = vsel %vm1286_vm3, %v895_v33, %v1414_v36  ;;  %v2772_v50 = vpack.c.bf16 %v1545_v45, %v1544_v40  ;;  %v1609_v51 = vsel %vm1353_vm6, %v3236_v39, %v1481_v44  ;;  %v1606_v52 = vsel %vm1350_vm5, %v1151_v34, %v1478_v37 }
 0x145   :  { %v2932_v53 = vpack.c.bf16 %v1609_v51, %v1608_v48  ;;  %v1543_v54 = vsel %vm1287_vm7, %v898_v42, %v1415_v46  ;;  %v1607_v55 = vsel %vm1351_vm8, %v1154_v43, %v1479_v47  ;;  %v3175_v56 = vpop.f32.mrb[44].mxu0  ;;  %v3239_v57 = vpop.f32.mrb[44].mxu1 }
 0x146   :  { %3004 = vst [vmem:[%s3837_s2 + $0xa8] sm:$0xff] %v2772_v50   ;;  %v2767_v58 = vpack.c.bf16 %v1543_v54, %v1542_v49  ;;  %v2927_v59 = vpack.c.bf16 %v1607_v55, %v1606_v52  ;;  %vm1292_vm9 = vcmp.ge.f32.partialorder %v3175_v56, 0.0  ;;  %v1420_v60 = vmul.f32 0.2, %v3175_v56  ;;  %v911_v61 = vpop.f32.mrb[45].mxu0  ;;  %v1167_v62 = vpop.f32.mrb[45].mxu1 }
 0x147   :  { %3036 = vst [vmem:[%s3837_s2 + $0x1a8] sm:$0xff] %v2932_v53   ;;  %vm1356_vm10 = vcmp.ge.f32.partialorder %v3239_v57, 0.0  ;;  %v1484_v63 = vmul.f32 0.2, %v3239_v57  ;;  %v1418_v0 = vmul.f32 0.2, %v911_v61 }
 0x148   :  { %3003 = vst [vmem:[%s3837_s2 + $0xa0] sm:$0xff] %v2767_v58   ;;  %3035 = vst [vmem:[%s3837_s2 + $0x1a0] sm:$0xff] %v2927_v59   ;;  %v1482_v1 = vmul.f32 0.2, %v1167_v62  ;;  %v3176_v2 = vpop.f32.mrb[46].mxu0  ;;  %v3240_v3 = vpop.f32.mrb[46].mxu1  ;;  %v1548_v4 = vsel %vm1292_vm9, %v3175_v56, %v1420_v60 }
 0x149   :  { %vm1290_vm11 = vcmp.ge.f32.partialorder %v911_v61, 0.0  ;;  %vm1293_vm12 = vcmp.ge.f32.partialorder %v3176_v2, 0.0  ;;  %v1421_v5 = vmul.f32 0.2, %v3176_v2  ;;  %v914_v6 = vpop.f32.mrb[47].mxu0  ;;  %v1170_v7 = vpop.f32.mrb[47].mxu1  ;;  %v1612_v12 = vsel %vm1356_vm10, %v3239_v57, %v1484_v63 }
 0x14a   :  { %vm1354_vm13 = vcmp.ge.f32.partialorder %v1167_v62, 0.0  ;;  %vm1357_vm14 = vcmp.ge.f32.partialorder %v3240_v3, 0.0  ;;  %v1485_v8 = vmul.f32 0.2, %v3240_v3  ;;  %vm1291_vm15 = vcmp.ge.f32.partialorder %v914_v6, 0.0 }
 0x14b   :  { %v1549_v9 = vsel %vm1293_vm12, %v3176_v2, %v1421_v5  ;;  %v1419_v10 = vmul.f32 0.2, %v914_v6  ;;  %vm1355_vm0 = vcmp.ge.f32.partialorder %v1170_v7, 0.0  ;;  %v1483_v11 = vmul.f32 0.2, %v1170_v7 }
 0x14c   :  { %v1546_v13 = vsel %vm1290_vm11, %v911_v61, %v1418_v0  ;;  %v2782_v14 = vpack.c.bf16 %v1549_v9, %v1548_v4  ;;  %v1613_v15 = vsel %vm1357_vm14, %v3240_v3, %v1485_v8  ;;  %v1610_v16 = vsel %vm1354_vm13, %v1167_v62, %v1482_v1 }
 0x14d   :  { %v2942_v17 = vpack.c.bf16 %v1613_v15, %v1612_v12  ;;  %v1547_v18 = vsel %vm1291_vm15, %v914_v6, %v1419_v10  ;;  %v1611_v19 = vsel %vm1355_vm0, %v1170_v7, %v1483_v11  ;;  %v3179_v20 = vpop.f32.mrb[48].mxu0  ;;  %v3243_v21 = vpop.f32.mrb[48].mxu1 }
 0x14e   :  { %3006 = vst [vmem:[%s3837_s2 + $0xb8] sm:$0xff] %v2782_v14   ;;  %v2777_v22 = vpack.c.bf16 %v1547_v18, %v1546_v13  ;;  %v2937_v23 = vpack.c.bf16 %v1611_v19, %v1610_v16  ;;  %vm1296_vm1 = vcmp.ge.f32.partialorder %v3179_v20, 0.0  ;;  %v1424_v24 = vmul.f32 0.2, %v3179_v20  ;;  %v927_v25 = vpop.f32.mrb[49].mxu0  ;;  %v1183_v26 = vpop.f32.mrb[49].mxu1 }
 0x14f   :  { %3038 = vst [vmem:[%s3837_s2 + $0x1b8] sm:$0xff] %v2942_v17   ;;  %vm1360_vm2 = vcmp.ge.f32.partialorder %v3243_v21, 0.0  ;;  %v1488_v27 = vmul.f32 0.2, %v3243_v21  ;;  %v1422_v28 = vmul.f32 0.2, %v927_v25 }
 0x150   :  { %3005 = vst [vmem:[%s3837_s2 + $0xb0] sm:$0xff] %v2777_v22   ;;  %3037 = vst [vmem:[%s3837_s2 + $0x1b0] sm:$0xff] %v2937_v23   ;;  %v1486_v29 = vmul.f32 0.2, %v1183_v26  ;;  %v3180_v30 = vpop.f32.mrb[50].mxu0  ;;  %v3244_v31 = vpop.f32.mrb[50].mxu1  ;;  %v1552_v32 = vsel %vm1296_vm1, %v3179_v20, %v1424_v24 }
 0x151   :  { %vm1294_vm3 = vcmp.ge.f32.partialorder %v927_v25, 0.0  ;;  %vm1297_vm4 = vcmp.ge.f32.partialorder %v3180_v30, 0.0  ;;  %v1425_v33 = vmul.f32 0.2, %v3180_v30  ;;  %v930_v34 = vpop.f32.mrb[51].mxu0  ;;  %v1186_v35 = vpop.f32.mrb[51].mxu1  ;;  %v1616_v40 = vsel %vm1360_vm2, %v3243_v21, %v1488_v27 }
 0x152   :  { %vm1358_vm5 = vcmp.ge.f32.partialorder %v1183_v26, 0.0  ;;  %vm1361_vm6 = vcmp.ge.f32.partialorder %v3244_v31, 0.0  ;;  %v1489_v36 = vmul.f32 0.2, %v3244_v31  ;;  %vm1295_vm7 = vcmp.ge.f32.partialorder %v930_v34, 0.0 }
 0x153   :  { %v1553_v37 = vsel %vm1297_vm4, %v3180_v30, %v1425_v33  ;;  %v1423_v38 = vmul.f32 0.2, %v930_v34  ;;  %vm1359_vm8 = vcmp.ge.f32.partialorder %v1186_v35, 0.0  ;;  %v1487_v39 = vmul.f32 0.2, %v1186_v35 }
 0x154   :  { %v1550_v41 = vsel %vm1294_vm3, %v927_v25, %v1422_v28  ;;  %v2792_v42 = vpack.c.bf16 %v1553_v37, %v1552_v32  ;;  %v1617_v43 = vsel %vm1361_vm6, %v3244_v31, %v1489_v36  ;;  %v1614_v44 = vsel %vm1358_vm5, %v1183_v26, %v1486_v29 }
 0x155   :  { %v2952_v45 = vpack.c.bf16 %v1617_v43, %v1616_v40  ;;  %v1551_v46 = vsel %vm1295_vm7, %v930_v34, %v1423_v38  ;;  %v1615_v47 = vsel %vm1359_vm8, %v1186_v35, %v1487_v39  ;;  %v3183_v48 = vpop.f32.mrb[52].mxu0  ;;  %v3247_v49 = vpop.f32.mrb[52].mxu1 }
 0x156   :  { %3008 = vst [vmem:[%s3837_s2 + $0xc8] sm:$0xff] %v2792_v42   ;;  %v2787_v50 = vpack.c.bf16 %v1551_v46, %v1550_v41  ;;  %v2947_v51 = vpack.c.bf16 %v1615_v47, %v1614_v44  ;;  %vm1300_vm9 = vcmp.ge.f32.partialorder %v3183_v48, 0.0  ;;  %v1428_v52 = vmul.f32 0.2, %v3183_v48  ;;  %v943_v53 = vpop.f32.mrb[53].mxu0  ;;  %v1199_v54 = vpop.f32.mrb[53].mxu1 }
 0x157   :  { %3040 = vst [vmem:[%s3837_s2 + $0x1c8] sm:$0xff] %v2952_v45   ;;  %vm1364_vm10 = vcmp.ge.f32.partialorder %v3247_v49, 0.0  ;;  %v1492_v55 = vmul.f32 0.2, %v3247_v49  ;;  %v1426_v56 = vmul.f32 0.2, %v943_v53 }
 0x158   :  { %3007 = vst [vmem:[%s3837_s2 + $0xc0] sm:$0xff] %v2787_v50   ;;  %3039 = vst [vmem:[%s3837_s2 + $0x1c0] sm:$0xff] %v2947_v51   ;;  %v1490_v57 = vmul.f32 0.2, %v1199_v54  ;;  %v3184_v58 = vpop.f32.mrb[54].mxu0  ;;  %v3248_v59 = vpop.f32.mrb[54].mxu1  ;;  %v1556_v60 = vsel %vm1300_vm9, %v3183_v48, %v1428_v52 }
 0x159   :  { %vm1298_vm11 = vcmp.ge.f32.partialorder %v943_v53, 0.0  ;;  %vm1301_vm12 = vcmp.ge.f32.partialorder %v3184_v58, 0.0  ;;  %v1429_v61 = vmul.f32 0.2, %v3184_v58  ;;  %v946_v62 = vpop.f32.mrb[55].mxu0  ;;  %v1202_v63 = vpop.f32.mrb[55].mxu1  ;;  %v1620_v4 = vsel %vm1364_vm10, %v3247_v49, %v1492_v55 }
 0x15a   :  { %vm1362_vm13 = vcmp.ge.f32.partialorder %v1199_v54, 0.0  ;;  %vm1365_vm14 = vcmp.ge.f32.partialorder %v3248_v59, 0.0  ;;  %v1493_v0 = vmul.f32 0.2, %v3248_v59  ;;  %vm1299_vm15 = vcmp.ge.f32.partialorder %v946_v62, 0.0 }
 0x15b   :  { %v1557_v1 = vsel %vm1301_vm12, %v3184_v58, %v1429_v61  ;;  %v1427_v2 = vmul.f32 0.2, %v946_v62  ;;  %vm1363_vm0 = vcmp.ge.f32.partialorder %v1202_v63, 0.0  ;;  %v1491_v3 = vmul.f32 0.2, %v1202_v63 }
 0x15c   :  { %v1554_v5 = vsel %vm1298_vm11, %v943_v53, %v1426_v56  ;;  %v2802_v6 = vpack.c.bf16 %v1557_v1, %v1556_v60  ;;  %v1621_v7 = vsel %vm1365_vm14, %v3248_v59, %v1493_v0  ;;  %v1618_v8 = vsel %vm1362_vm13, %v1199_v54, %v1490_v57 }
 0x15d   :  { %v2962_v9 = vpack.c.bf16 %v1621_v7, %v1620_v4  ;;  %v1555_v10 = vsel %vm1299_vm15, %v946_v62, %v1427_v2  ;;  %v1619_v11 = vsel %vm1363_vm0, %v1202_v63, %v1491_v3  ;;  %v3187_v12 = vpop.f32.mrb[56].mxu0  ;;  %v3251_v13 = vpop.f32.mrb[56].mxu1 }
 0x15e   :  { %3010 = vst [vmem:[%s3837_s2 + $0xd8] sm:$0xff] %v2802_v6   ;;  %v2797_v14 = vpack.c.bf16 %v1555_v10, %v1554_v5  ;;  %v2957_v15 = vpack.c.bf16 %v1619_v11, %v1618_v8  ;;  %vm1304_vm1 = vcmp.ge.f32.partialorder %v3187_v12, 0.0  ;;  %v1432_v16 = vmul.f32 0.2, %v3187_v12  ;;  %v959_v17 = vpop.f32.mrb[57].mxu0  ;;  %v1215_v18 = vpop.f32.mrb[57].mxu1 }
 0x15f   :  { %3042 = vst [vmem:[%s3837_s2 + $0x1d8] sm:$0xff] %v2962_v9   ;;  %vm1368_vm2 = vcmp.ge.f32.partialorder %v3251_v13, 0.0  ;;  %v1496_v19 = vmul.f32 0.2, %v3251_v13  ;;  %v1430_v20 = vmul.f32 0.2, %v959_v17 }
 0x160   :  { %3009 = vst [vmem:[%s3837_s2 + $0xd0] sm:$0xff] %v2797_v14   ;;  %3041 = vst [vmem:[%s3837_s2 + $0x1d0] sm:$0xff] %v2957_v15   ;;  %v1494_v21 = vmul.f32 0.2, %v1215_v18  ;;  %v3188_v22 = vpop.f32.mrb[58].mxu0  ;;  %v3252_v23 = vpop.f32.mrb[58].mxu1  ;;  %v1560_v24 = vsel %vm1304_vm1, %v3187_v12, %v1432_v16 }
 0x161   :  { %vm1302_vm3 = vcmp.ge.f32.partialorder %v959_v17, 0.0  ;;  %vm1305_vm4 = vcmp.ge.f32.partialorder %v3188_v22, 0.0  ;;  %v1433_v25 = vmul.f32 0.2, %v3188_v22  ;;  %v962_v26 = vpop.f32.mrb[59].mxu0  ;;  %v1218_v27 = vpop.f32.mrb[59].mxu1  ;;  %v1624_v32 = vsel %vm1368_vm2, %v3251_v13, %v1496_v19 }
 0x162   :  { %vm1366_vm5 = vcmp.ge.f32.partialorder %v1215_v18, 0.0  ;;  %vm1369_vm6 = vcmp.ge.f32.partialorder %v3252_v23, 0.0  ;;  %v1497_v28 = vmul.f32 0.2, %v3252_v23  ;;  %vm1303_vm7 = vcmp.ge.f32.partialorder %v962_v26, 0.0 }
 0x163   :  { %v1561_v29 = vsel %vm1305_vm4, %v3188_v22, %v1433_v25  ;;  %v1431_v30 = vmul.f32 0.2, %v962_v26  ;;  %vm1367_vm8 = vcmp.ge.f32.partialorder %v1218_v27, 0.0  ;;  %v1495_v31 = vmul.f32 0.2, %v1218_v27 }
 0x164   :  { %v1558_v33 = vsel %vm1302_vm3, %v959_v17, %v1430_v20  ;;  %v2812_v34 = vpack.c.bf16 %v1561_v29, %v1560_v24  ;;  %v1625_v35 = vsel %vm1369_vm6, %v3252_v23, %v1497_v28  ;;  %v1622_v36 = vsel %vm1366_vm5, %v1215_v18, %v1494_v21 }
 0x165   :  { %v2972_v37 = vpack.c.bf16 %v1625_v35, %v1624_v32  ;;  %v1559_v38 = vsel %vm1303_vm7, %v962_v26, %v1431_v30  ;;  %v1623_v39 = vsel %vm1367_vm8, %v1218_v27, %v1495_v31  ;;  %v3191_v40 = vpop.f32.mrb[60].mxu0  ;;  %v3255_v41 = vpop.f32.mrb[60].mxu1 }
 0x166   :  { %3012 = vst [vmem:[%s3837_s2 + $0xe8] sm:$0xff] %v2812_v34   ;;  %v2807_v42 = vpack.c.bf16 %v1559_v38, %v1558_v33  ;;  %v2967_v43 = vpack.c.bf16 %v1623_v39, %v1622_v36  ;;  %vm1308_vm9 = vcmp.ge.f32.partialorder %v3191_v40, 0.0  ;;  %v1436_v44 = vmul.f32 0.2, %v3191_v40  ;;  %v975_v45 = vpop.f32.mrb[61].mxu0  ;;  %v1231_v46 = vpop.f32.mrb[61].mxu1 }
 0x167   :  { %3044 = vst [vmem:[%s3837_s2 + $0x1e8] sm:$0xff] %v2972_v37   ;;  %vm1372_vm10 = vcmp.ge.f32.partialorder %v3255_v41, 0.0  ;;  %v1500_v47 = vmul.f32 0.2, %v3255_v41  ;;  %v1434_v48 = vmul.f32 0.2, %v975_v45 }
 0x168   :  { %3011 = vst [vmem:[%s3837_s2 + $0xe0] sm:$0xff] %v2807_v42   ;;  %3043 = vst [vmem:[%s3837_s2 + $0x1e0] sm:$0xff] %v2967_v43   ;;  %v1498_v49 = vmul.f32 0.2, %v1231_v46  ;;  %v3192_v50 = vpop.f32.mrb[62].mxu0  ;;  %v3256_v51 = vpop.f32.mrb[62].mxu1  ;;  %v1564_v52 = vsel %vm1308_vm9, %v3191_v40, %v1436_v44 }
 0x169   :  { %vm1306_vm11 = vcmp.ge.f32.partialorder %v975_v45, 0.0  ;;  %vm1309_vm12 = vcmp.ge.f32.partialorder %v3192_v50, 0.0  ;;  %v1437_v53 = vmul.f32 0.2, %v3192_v50  ;;  %v978_v54 = vpop.f32.mrb[63].mxu0  ;;  %v1234_v55 = vpop.f32.mrb[63].mxu1  ;;  %v1628_v60 = vsel %vm1372_vm10, %v3255_v41, %v1500_v47 }
 0x16a   :  { %vm1370_vm13 = vcmp.ge.f32.partialorder %v1231_v46, 0.0  ;;  %vm1373_vm14 = vcmp.ge.f32.partialorder %v3256_v51, 0.0  ;;  %v1501_v56 = vmul.f32 0.2, %v3256_v51  ;;  %vm1307_vm15 = vcmp.ge.f32.partialorder %v978_v54, 0.0 }
 0x16b   :  { %v1565_v57 = vsel %vm1309_vm12, %v3192_v50, %v1437_v53  ;;  %v1435_v58 = vmul.f32 0.2, %v978_v54  ;;  %vm1371_vm0 = vcmp.ge.f32.partialorder %v1234_v55, 0.0  ;;  %v1499_v59 = vmul.f32 0.2, %v1234_v55 }
 0x16c   :  { %v1562_v61 = vsel %vm1306_vm11, %v975_v45, %v1434_v48  ;;  %v2822_v62 = vpack.c.bf16 %v1565_v57, %v1564_v52  ;;  %v1629_v63 = vsel %vm1373_vm14, %v3256_v51, %v1501_v56  ;;  %v1626_v0 = vsel %vm1370_vm13, %v1231_v46, %v1498_v49 }
 0x16d   :  { %v2982_v1 = vpack.c.bf16 %v1629_v63, %v1628_v60  ;;  %v1563_v2 = vsel %vm1307_vm15, %v978_v54, %v1435_v58  ;;  %v1627_v3 = vsel %vm1371_vm0, %v1234_v55, %v1499_v59 }
 0x16e   :  { %3014 = vst [vmem:[%s3837_s2 + $0xf8] sm:$0xff] %v2822_v62   ;;  %v2817_v4 = vpack.c.bf16 %v1563_v2, %v1562_v61  ;;  %v2977_v5 = vpack.c.bf16 %v1627_v3, %v1626_v0 }
 0x16f   :  { %3046 = vst [vmem:[%s3837_s2 + $0x1f8] sm:$0xff] %v2982_v1  }
 0x170   :  { %3013 = vst [vmem:[%s3837_s2 + $0xf0] sm:$0xff] %v2817_v4   ;;  %3045 = vst [vmem:[%s3837_s2 + $0x1f0] sm:$0xff] %v2977_v5  }

// kernel: discriminator_forward.9
= control target key start
LH: loop header
LB: loop body
LE: loop exit
PB: predicated region body
PF: predicated region fallthrough
CT: control target
= control target key end

     0   :  { %s1631_s0 = inlined_call_operand.vmem [shape: bf16[512,128], index: 0, kind: input, shape index: {}]   ;;  %s1632_s1 = inlined_call_operand.vmem [shape: f32[1,128], index: 1, kind: input, shape index: {}]   ;;  %s1633_s2 = inlined_call_operand.vmem [shape: f32[1,128], index: 2, kind: input, shape index: {}]   ;;  %s1634_s3 = inlined_call_operand.vmem [shape: bf16[512,128], index: 3, kind: output, shape index: {}]  }
   0x1   :  { %v931_v0 = vld [vmem:[%s1631_s0] sm:$0xff]   ;;  %v1218_v4 = vld [vmem:[%s1631_s0 + $0x8] sm:$0xff]   ;;  %v1219_v5 = vld [vmem:[%s1631_s0 + $0x10] sm:$0xff]  }
   0x2   :  { %v1306_v1 = vld [vmem:[%s1632_s1] ss:$0 sm:$0xff]  ;;  %v932_v2 = vunpack.c.l.bf16 %v931_v0  ;;  %v933_v3 = vunpack.c.h.bf16 %v931_v0  ;;  %v1220_v6 = vld [vmem:[%s1631_s0 + $0x18] sm:$0xff]   ;;  %v936_v8 = vunpack.c.l.bf16 %v1218_v4  ;;  %v937_v9 = vunpack.c.h.bf16 %v1218_v4  ;;  %v1222_v35 = vld [vmem:[%s1631_s0 + $0x28] sm:$0xff]  }
   0x3   :  { %v1320_v7 = vld [vmem:[%s1633_s2] ss:$0 sm:$0xff]  ;;  %v940_v10 = vunpack.c.l.bf16 %v1219_v5  ;;  %v941_v11 = vunpack.c.h.bf16 %v1219_v5  ;;  %v944_v14 = vunpack.c.l.bf16 %v1220_v6  ;;  %v945_v15 = vunpack.c.h.bf16 %v1220_v6  ;;  %v1223_v48 = vld [vmem:[%s1631_s0 + $0x30] sm:$0xff]   ;;  %v1224_v4 = vld [vmem:[%s1631_s0 + $0x38] sm:$0xff]  }
   0x4   :  { %v149_v12 = vmul.f32 %v932_v2, %v1306_v1  ;;  %v150_v13 = vmul.f32 %v933_v3, %v1306_v1  ;;  %v151_v16 = vmul.f32 %v936_v8, %v1306_v1  ;;  %v152_v17 = vmul.f32 %v937_v9, %v1306_v1  ;;  %v1221_v34 = vld [vmem:[%s1631_s0 + $0x20] sm:$0xff]  }
   0x5   :  { %v153_v18 = vmul.f32 %v940_v10, %v1306_v1  ;;  %v154_v19 = vmul.f32 %v941_v11, %v1306_v1  ;;  %v155_v22 = vmul.f32 %v944_v14, %v1306_v1  ;;  %v156_v23 = vmul.f32 %v945_v15, %v1306_v1  ;;  %v1225_v15 = vld [vmem:[%s1631_s0 + $0x40] sm:$0xff]  }
   0x6   :  { %v220_v20 = vadd.f32 %v1320_v7, %v149_v12  ;;  %v221_v21 = vadd.f32 %v1320_v7, %v150_v13  ;;  %v222_v24 = vadd.f32 %v1320_v7, %v151_v16  ;;  %v223_v25 = vadd.f32 %v1320_v7, %v152_v17 }
   0x7   :  { %v224_v26 = vadd.f32 %v1320_v7, %v153_v18  ;;  %v225_v27 = vadd.f32 %v1320_v7, %v154_v19  ;;  %v226_v42 = vadd.f32 %v1320_v7, %v155_v22  ;;  %v227_v43 = vadd.f32 %v1320_v7, %v156_v23 }
   0x8   :  { %vm284_vm0 = vcmp.ge.f32.partialorder %v220_v20, 0.0  ;;  %vm285_vm1 = vcmp.ge.f32.partialorder %v221_v21, 0.0  ;;  %v348_v28 = vmul.f32 0.2, %v220_v20  ;;  %v349_v29 = vmul.f32 0.2, %v221_v21 }
   0x9   :  { %vm286_vm2 = vcmp.ge.f32.partialorder %v222_v24, 0.0  ;;  %vm287_vm3 = vcmp.ge.f32.partialorder %v223_v25, 0.0  ;;  %v350_v30 = vmul.f32 0.2, %v222_v24  ;;  %v351_v31 = vmul.f32 0.2, %v223_v25 }
   0xa   :  { %v412_v32 = vsel %vm284_vm0, %v220_v20, %v348_v28  ;;  %v413_v33 = vsel %vm285_vm1, %v221_v21, %v349_v29  ;;  %vm288_vm4 = vcmp.ge.f32.partialorder %v224_v26, 0.0  ;;  %vm289_vm5 = vcmp.ge.f32.partialorder %v225_v27, 0.0 }
   0xb   :  { %v1061_v36 = vpack.c.bf16 %v413_v33, %v412_v32  ;;  %v414_v37 = vsel %vm286_vm2, %v222_v24, %v350_v30  ;;  %v415_v38 = vsel %vm287_vm3, %v223_v25, %v351_v31  ;;  %v352_v39 = vmul.f32 0.2, %v224_v26 }
   0xc   :  { %v1066_v40 = vpack.c.bf16 %v415_v38, %v414_v37  ;;  %v353_v41 = vmul.f32 0.2, %v225_v27  ;;  %v948_v45 = vunpack.c.l.bf16 %v1221_v34  ;;  %v949_v46 = vunpack.c.h.bf16 %v1221_v34 }
   0xd   :  { %1062 = vst [vmem:[%s1634_s3] sm:$0xff] %v1061_v36   ;;  %v416_v44 = vsel %vm288_vm4, %v224_v26, %v352_v39  ;;  %v952_v47 = vunpack.c.l.bf16 %v1222_v35  ;;  %vm290_vm6 = vcmp.ge.f32.partialorder %v226_v42, 0.0  ;;  %vm291_vm7 = vcmp.ge.f32.partialorder %v227_v43, 0.0  ;;  %v1226_v26 = vld [vmem:[%s1631_s0 + $0x48] sm:$0xff]  }
   0xe   :  { %1249 = vst [vmem:[%s1634_s3 + $0x8] sm:$0xff] %v1066_v40   ;;  %v417_v49 = vsel %vm289_vm5, %v225_v27, %v353_v41  ;;  %v354_v50 = vmul.f32 0.2, %v226_v42  ;;  %v355_v52 = vmul.f32 0.2, %v227_v43  ;;  %v157_v53 = vmul.f32 %v948_v45, %v1306_v1  ;;  %v1227_v27 = vld [vmem:[%s1631_s0 + $0x50] sm:$0xff]  }
   0xf   :  { %v1071_v51 = vpack.c.bf16 %v417_v49, %v416_v44  ;;  %v158_v54 = vmul.f32 %v949_v46, %v1306_v1  ;;  %v953_v56 = vunpack.c.h.bf16 %v1222_v35  ;;  %v159_v57 = vmul.f32 %v952_v47, %v1306_v1 }
  0x10   :  { %v418_v55 = vsel %vm290_vm6, %v226_v42, %v354_v50  ;;  %v956_v58 = vunpack.c.l.bf16 %v1223_v48  ;;  %v419_v59 = vsel %vm291_vm7, %v227_v43, %v355_v52  ;;  %v228_v60 = vadd.f32 %v1320_v7, %v157_v53 }
  0x11   :  { %1250 = vst [vmem:[%s1634_s3 + $0x10] sm:$0xff] %v1071_v51   ;;  %v229_v61 = vadd.f32 %v1320_v7, %v158_v54  ;;  %v957_v62 = vunpack.c.h.bf16 %v1223_v48  ;;  %v1076_v63 = vpack.c.bf16 %v419_v59, %v418_v55  ;;  %v160_v0 = vmul.f32 %v953_v56, %v1306_v1  ;;  %v1228_v55 = vld [vmem:[%s1631_s0 + $0x58] sm:$0xff]  }
  0x12   :  { %v230_v2 = vadd.f32 %v1320_v7, %v159_v57  ;;  %v161_v3 = vmul.f32 %v956_v58, %v1306_v1  ;;  %vm292_vm8 = vcmp.ge.f32.partialorder %v228_v60, 0.0  ;;  %v356_v5 = vmul.f32 0.2, %v228_v60 }
  0x13   :  { %vm293_vm9 = vcmp.ge.f32.partialorder %v229_v61, 0.0  ;;  %v357_v6 = vmul.f32 0.2, %v229_v61  ;;  %1251 = vst [vmem:[%s1634_s3 + $0x18] sm:$0xff] %v1076_v63   ;;  %v231_v8 = vadd.f32 %v1320_v7, %v160_v0  ;;  %v162_v10 = vmul.f32 %v957_v62, %v1306_v1 }
  0x14   :  { %vm294_vm10 = vcmp.ge.f32.partialorder %v230_v2, 0.0  ;;  %v358_v9 = vmul.f32 0.2, %v230_v2  ;;  %v420_v11 = vsel %vm292_vm8, %v228_v60, %v356_v5  ;;  %v232_v13 = vadd.f32 %v1320_v7, %v161_v3  ;;  %v1229_v60 = vld [vmem:[%s1631_s0 + $0x60] sm:$0xff]  }
  0x15   :  { %v421_v12 = vsel %vm293_vm9, %v229_v61, %v357_v6  ;;  %v960_v14 = vunpack.c.l.bf16 %v1224_v4  ;;  %vm295_vm11 = vcmp.ge.f32.partialorder %v231_v8, 0.0  ;;  %v359_v17 = vmul.f32 0.2, %v231_v8 }
  0x16   :  { %v1081_v16 = vpack.c.bf16 %v421_v12, %v420_v11  ;;  %v422_v18 = vsel %vm294_vm10, %v230_v2, %v358_v9  ;;  %v233_v19 = vadd.f32 %v1320_v7, %v162_v10  ;;  %vm296_vm12 = vcmp.ge.f32.partialorder %v232_v13, 0.0  ;;  %v1230_v9 = vld [vmem:[%s1631_s0 + $0x68] sm:$0xff]  }
  0x17   :  { %v360_v20 = vmul.f32 0.2, %v232_v13  ;;  %v961_v21 = vunpack.c.h.bf16 %v1224_v4  ;;  %v423_v22 = vsel %vm295_vm11, %v231_v8, %v359_v17  ;;  %v163_v23 = vmul.f32 %v960_v14, %v1306_v1 }
  0x18   :  { %1252 = vst [vmem:[%s1634_s3 + $0x20] sm:$0xff] %v1081_v16   ;;  %v964_v24 = vunpack.c.l.bf16 %v1225_v15  ;;  %v965_v25 = vunpack.c.h.bf16 %v1225_v15  ;;  %v1086_v28 = vpack.c.bf16 %v423_v22, %v422_v18  ;;  %vm297_vm13 = vcmp.ge.f32.partialorder %v233_v19, 0.0 }
  0x19   :  { %v361_v29 = vmul.f32 0.2, %v233_v19  ;;  %v424_v30 = vsel %vm296_vm12, %v232_v13, %v360_v20  ;;  %v164_v31 = vmul.f32 %v961_v21, %v1306_v1  ;;  %v234_v32 = vadd.f32 %v1320_v7, %v163_v23 }
  0x1a   :  { %v165_v33 = vmul.f32 %v964_v24, %v1306_v1  ;;  %v166_v34 = vmul.f32 %v965_v25, %v1306_v1  ;;  %1253 = vst [vmem:[%s1634_s3 + $0x28] sm:$0xff] %v1086_v28   ;;  %v968_v36 = vunpack.c.l.bf16 %v1226_v26  ;;  %v969_v37 = vunpack.c.h.bf16 %v1226_v26  ;;  %v1231_v28 = vld [vmem:[%s1631_s0 + $0x70] sm:$0xff]  }
  0x1b   :  { %v425_v35 = vsel %vm297_vm13, %v233_v19, %v361_v29  ;;  %v972_v38 = vunpack.c.l.bf16 %v1227_v27  ;;  %v235_v40 = vadd.f32 %v1320_v7, %v164_v31  ;;  %vm298_vm14 = vcmp.ge.f32.partialorder %v234_v32, 0.0 }
  0x1c   :  { %v1091_v39 = vpack.c.bf16 %v425_v35, %v424_v30  ;;  %v362_v41 = vmul.f32 0.2, %v234_v32  ;;  %v236_v42 = vadd.f32 %v1320_v7, %v165_v33  ;;  %v237_v43 = vadd.f32 %v1320_v7, %v166_v34 }
  0x1d   :  { %v167_v44 = vmul.f32 %v968_v36, %v1306_v1  ;;  %v168_v45 = vmul.f32 %v969_v37, %v1306_v1  ;;  %vm299_vm15 = vcmp.ge.f32.partialorder %v235_v40, 0.0  ;;  %v363_v46 = vmul.f32 0.2, %v235_v40  ;;  %v1232_v37 = vld [vmem:[%s1631_s0 + $0x78] sm:$0xff]  }
  0x1e   :  { %1254 = vst [vmem:[%s1634_s3 + $0x30] sm:$0xff] %v1091_v39   ;;  %v426_v47 = vsel %vm298_vm14, %v234_v32, %v362_v41  ;;  %v973_v48 = vunpack.c.h.bf16 %v1227_v27  ;;  %vm300_vm0 = vcmp.ge.f32.partialorder %v236_v42, 0.0  ;;  %vm301_vm1 = vcmp.ge.f32.partialorder %v237_v43, 0.0 }
  0x1f   :  { %v364_v49 = vmul.f32 0.2, %v236_v42  ;;  %v365_v50 = vmul.f32 0.2, %v237_v43  ;;  %v427_v51 = vsel %vm299_vm15, %v235_v40, %v363_v46  ;;  %v238_v52 = vadd.f32 %v1320_v7, %v167_v44 }
  0x20   :  { %v239_v53 = vadd.f32 %v1320_v7, %v168_v45  ;;  %v169_v54 = vmul.f32 %v972_v38, %v1306_v1  ;;  %v1096_v56 = vpack.c.bf16 %v427_v51, %v426_v47  ;;  %v170_v59 = vmul.f32 %v973_v48, %v1306_v1 }
  0x21   :  { %v428_v57 = vsel %vm300_vm0, %v236_v42, %v364_v49  ;;  %v429_v58 = vsel %vm301_vm1, %v237_v43, %v365_v50  ;;  %vm302_vm2 = vcmp.ge.f32.partialorder %v238_v52, 0.0  ;;  %v366_v62 = vmul.f32 0.2, %v238_v52  ;;  %v1233_v42 = vld [vmem:[%s1631_s0 + $0x80] sm:$0xff]   ;;  %v1234_v50 = vld [vmem:[%s1631_s0 + $0x88] sm:$0xff]  }
  0x22   :  { %v1101_v61 = vpack.c.bf16 %v429_v58, %v428_v57  ;;  %vm303_vm3 = vcmp.ge.f32.partialorder %v239_v53, 0.0  ;;  %1255 = vst [vmem:[%s1634_s3 + $0x38] sm:$0xff] %v1096_v56   ;;  %v367_v63 = vmul.f32 0.2, %v239_v53  ;;  %v240_v0 = vadd.f32 %v1320_v7, %v169_v54 }
  0x23   :  { %v241_v2 = vadd.f32 %v1320_v7, %v170_v59  ;;  %v976_v3 = vunpack.c.l.bf16 %v1228_v55  ;;  %v430_v4 = vsel %vm302_vm2, %v238_v52, %v366_v62  ;;  %v977_v5 = vunpack.c.h.bf16 %v1228_v55 }
  0x24   :  { %1256 = vst [vmem:[%s1634_s3 + $0x40] sm:$0xff] %v1101_v61   ;;  %v980_v6 = vunpack.c.l.bf16 %v1229_v60  ;;  %v981_v8 = vunpack.c.h.bf16 %v1229_v60  ;;  %v431_v10 = vsel %vm303_vm3, %v239_v53, %v367_v63  ;;  %vm304_vm4 = vcmp.ge.f32.partialorder %v240_v0, 0.0 }
  0x25   :  { %vm305_vm5 = vcmp.ge.f32.partialorder %v241_v2, 0.0  ;;  %v368_v11 = vmul.f32 0.2, %v240_v0  ;;  %v1106_v12 = vpack.c.bf16 %v431_v10, %v430_v4  ;;  %v369_v13 = vmul.f32 0.2, %v241_v2 }
  0x26   :  { %v171_v14 = vmul.f32 %v976_v3, %v1306_v1  ;;  %v172_v15 = vmul.f32 %v977_v5, %v1306_v1  ;;  %v173_v17 = vmul.f32 %v980_v6, %v1306_v1  ;;  %v174_v18 = vmul.f32 %v981_v8, %v1306_v1 }
  0x27   :  { %v432_v16 = vsel %vm304_vm4, %v240_v0, %v368_v11  ;;  %v984_v19 = vunpack.c.l.bf16 %v1230_v9  ;;  %1257 = vst [vmem:[%s1634_s3 + $0x48] sm:$0xff] %v1106_v12   ;;  %v433_v20 = vsel %vm305_vm5, %v241_v2, %v369_v13  ;;  %v985_v23 = vunpack.c.h.bf16 %v1230_v9 }
  0x28   :  { %v242_v21 = vadd.f32 %v1320_v7, %v171_v14  ;;  %v243_v22 = vadd.f32 %v1320_v7, %v172_v15  ;;  %v1111_v24 = vpack.c.bf16 %v433_v20, %v432_v16  ;;  %v244_v25 = vadd.f32 %v1320_v7, %v173_v17  ;;  %v1235_v15 = vld [vmem:[%s1631_s0 + $0x90] sm:$0xff]   ;;  %v1236_v20 = vld [vmem:[%s1631_s0 + $0x98] sm:$0xff]  }
  0x29   :  { %v245_v26 = vadd.f32 %v1320_v7, %v174_v18  ;;  %v175_v27 = vmul.f32 %v984_v19, %v1306_v1  ;;  %v176_v35 = vmul.f32 %v985_v23, %v1306_v1  ;;  %v988_v41 = vunpack.c.l.bf16 %v1231_v28 }
  0x2a   :  { %vm306_vm6 = vcmp.ge.f32.partialorder %v242_v21, 0.0  ;;  %vm307_vm7 = vcmp.ge.f32.partialorder %v243_v22, 0.0  ;;  %v370_v29 = vmul.f32 0.2, %v242_v21  ;;  %v371_v30 = vmul.f32 0.2, %v243_v22 }
  0x2b   :  { %1258 = vst [vmem:[%s1634_s3 + $0x50] sm:$0xff] %v1111_v24   ;;  %vm308_vm8 = vcmp.ge.f32.partialorder %v244_v25, 0.0  ;;  %vm309_vm9 = vcmp.ge.f32.partialorder %v245_v26, 0.0  ;;  %v372_v31 = vmul.f32 0.2, %v244_v25  ;;  %v246_v36 = vadd.f32 %v1320_v7, %v175_v27 }
  0x2c   :  { %v373_v32 = vmul.f32 0.2, %v245_v26  ;;  %v434_v33 = vsel %vm306_vm6, %v242_v21, %v370_v29  ;;  %v435_v34 = vsel %vm307_vm7, %v243_v22, %v371_v30  ;;  %v247_v44 = vadd.f32 %v1320_v7, %v176_v35  ;;  %v1237_v21 = vld [vmem:[%s1631_s0 + $0xa0] sm:$0xff]  }
  0x2d   :  { %v1116_v38 = vpack.c.bf16 %v435_v34, %v434_v33  ;;  %v436_v39 = vsel %vm308_vm8, %v244_v25, %v372_v31  ;;  %vm310_vm10 = vcmp.ge.f32.partialorder %v246_v36, 0.0  ;;  %v374_v45 = vmul.f32 0.2, %v246_v36 }
  0x2e   :  { %v437_v40 = vsel %vm309_vm9, %v245_v26, %v373_v32  ;;  %v989_v46 = vunpack.c.h.bf16 %v1231_v28  ;;  %v177_v47 = vmul.f32 %v988_v41, %v1306_v1  ;;  %v992_v48 = vunpack.c.l.bf16 %v1232_v37 }
  0x2f   :  { %v1121_v43 = vpack.c.bf16 %v437_v40, %v436_v39  ;;  %1259 = vst [vmem:[%s1634_s3 + $0x58] sm:$0xff] %v1116_v38   ;;  %v993_v49 = vunpack.c.h.bf16 %v1232_v37  ;;  %vm311_vm11 = vcmp.ge.f32.partialorder %v247_v44, 0.0  ;;  %v375_v51 = vmul.f32 0.2, %v247_v44  ;;  %v1238_v40 = vld [vmem:[%s1631_s0 + $0xa8] sm:$0xff]  }
  0x30   :  { %v438_v52 = vsel %vm310_vm10, %v246_v36, %v374_v45  ;;  %v996_v53 = vunpack.c.l.bf16 %v1233_v42  ;;  %v178_v54 = vmul.f32 %v989_v46, %v1306_v1  ;;  %v248_v55 = vadd.f32 %v1320_v7, %v177_v47 }
  0x31   :  { %1260 = vst [vmem:[%s1634_s3 + $0x60] sm:$0xff] %v1121_v43   ;;  %v179_v56 = vmul.f32 %v992_v48, %v1306_v1  ;;  %v180_v57 = vmul.f32 %v993_v49, %v1306_v1  ;;  %v439_v58 = vsel %vm311_vm11, %v247_v44, %v375_v51  ;;  %v997_v59 = vunpack.c.h.bf16 %v1233_v42 }
  0x32   :  { %v181_v60 = vmul.f32 %v996_v53, %v1306_v1  ;;  %v1000_v61 = vunpack.c.l.bf16 %v1234_v50  ;;  %v1126_v62 = vpack.c.bf16 %v439_v58, %v438_v52  ;;  %v249_v63 = vadd.f32 %v1320_v7, %v178_v54 }
  0x33   :  { %vm312_vm12 = vcmp.ge.f32.partialorder %v248_v55, 0.0  ;;  %v376_v0 = vmul.f32 0.2, %v248_v55  ;;  %v250_v2 = vadd.f32 %v1320_v7, %v179_v56  ;;  %v251_v3 = vadd.f32 %v1320_v7, %v180_v57 }
  0x34   :  { %v182_v4 = vmul.f32 %v997_v59, %v1306_v1  ;;  %v252_v5 = vadd.f32 %v1320_v7, %v181_v60  ;;  %1261 = vst [vmem:[%s1634_s3 + $0x68] sm:$0xff] %v1126_v62   ;;  %vm313_vm13 = vcmp.ge.f32.partialorder %v249_v63, 0.0  ;;  %v377_v6 = vmul.f32 0.2, %v249_v63 }
  0x35   :  { %v440_v8 = vsel %vm312_vm12, %v248_v55, %v376_v0  ;;  %v1001_v9 = vunpack.c.h.bf16 %v1234_v50  ;;  %vm314_vm14 = vcmp.ge.f32.partialorder %v250_v2, 0.0  ;;  %vm315_vm15 = vcmp.ge.f32.partialorder %v251_v3, 0.0  ;;  %v1239_v0 = vld [vmem:[%s1631_s0 + $0xb0] sm:$0xff]  }
  0x36   :  { %v378_v10 = vmul.f32 0.2, %v250_v2  ;;  %v379_v11 = vmul.f32 0.2, %v251_v3  ;;  %v441_v12 = vsel %vm313_vm13, %v249_v63, %v377_v6  ;;  %v253_v13 = vadd.f32 %v1320_v7, %v182_v4 }
  0x37   :  { %vm316_vm0 = vcmp.ge.f32.partialorder %v252_v5, 0.0  ;;  %v380_v14 = vmul.f32 0.2, %v252_v5  ;;  %v1131_v16 = vpack.c.bf16 %v441_v12, %v440_v8  ;;  %v183_v19 = vmul.f32 %v1000_v61, %v1306_v1 }
  0x38   :  { %v442_v17 = vsel %vm314_vm14, %v250_v2, %v378_v10  ;;  %v443_v18 = vsel %vm315_vm15, %v251_v3, %v379_v11  ;;  %vm317_vm1 = vcmp.ge.f32.partialorder %v253_v13, 0.0  ;;  %v381_v23 = vmul.f32 0.2, %v253_v13  ;;  %v1240_v2 = vld [vmem:[%s1631_s0 + $0xb8] sm:$0xff]  }
  0x39   :  { %v1136_v22 = vpack.c.bf16 %v443_v18, %v442_v17  ;;  %v444_v24 = vsel %vm316_vm0, %v252_v5, %v380_v14  ;;  %1262 = vst [vmem:[%s1634_s3 + $0x70] sm:$0xff] %v1131_v16   ;;  %v184_v25 = vmul.f32 %v1001_v9, %v1306_v1  ;;  %v254_v26 = vadd.f32 %v1320_v7, %v183_v19  ;;  %v1241_v18 = vld [vmem:[%s1631_s0 + $0xc0] sm:$0xff]  }
  0x3a   :  { %v1004_v27 = vunpack.c.l.bf16 %v1235_v15  ;;  %v1005_v28 = vunpack.c.h.bf16 %v1235_v15  ;;  %v445_v29 = vsel %vm317_vm1, %v253_v13, %v381_v23  ;;  %v1008_v30 = vunpack.c.l.bf16 %v1236_v20 }
  0x3b   :  { %1263 = vst [vmem:[%s1634_s3 + $0x78] sm:$0xff] %v1136_v22   ;;  %v1009_v31 = vunpack.c.h.bf16 %v1236_v20  ;;  %v1012_v32 = vunpack.c.l.bf16 %v1237_v21  ;;  %v1141_v33 = vpack.c.bf16 %v445_v29, %v444_v24  ;;  %v255_v34 = vadd.f32 %v1320_v7, %v184_v25 }
  0x3c   :  { %vm318_vm2 = vcmp.ge.f32.partialorder %v254_v26, 0.0  ;;  %v382_v35 = vmul.f32 0.2, %v254_v26  ;;  %v185_v36 = vmul.f32 %v1004_v27, %v1306_v1  ;;  %v186_v37 = vmul.f32 %v1005_v28, %v1306_v1 }
  0x3d   :  { %v187_v38 = vmul.f32 %v1008_v30, %v1306_v1  ;;  %v188_v39 = vmul.f32 %v1009_v31, %v1306_v1  ;;  %1264 = vst [vmem:[%s1634_s3 + $0x80] sm:$0xff] %v1141_v33   ;;  %vm319_vm3 = vcmp.ge.f32.partialorder %v255_v34, 0.0  ;;  %v383_v41 = vmul.f32 0.2, %v255_v34 }
  0x3e   :  { %v446_v42 = vsel %vm318_vm2, %v254_v26, %v382_v35  ;;  %v1013_v43 = vunpack.c.h.bf16 %v1237_v21  ;;  %v256_v44 = vadd.f32 %v1320_v7, %v185_v36  ;;  %v257_v45 = vadd.f32 %v1320_v7, %v186_v37  ;;  %v1242_v36 = vld [vmem:[%s1631_s0 + $0xc8] sm:$0xff]  }
  0x3f   :  { %v258_v46 = vadd.f32 %v1320_v7, %v187_v38  ;;  %v259_v47 = vadd.f32 %v1320_v7, %v188_v39  ;;  %v447_v48 = vsel %vm319_vm3, %v255_v34, %v383_v41  ;;  %v189_v49 = vmul.f32 %v1012_v32, %v1306_v1 }
  0x40   :  { %v190_v50 = vmul.f32 %v1013_v43, %v1306_v1  ;;  %v1016_v51 = vunpack.c.l.bf16 %v1238_v40  ;;  %v1146_v52 = vpack.c.bf16 %v447_v48, %v446_v42  ;;  %vm320_vm4 = vcmp.ge.f32.partialorder %v256_v44, 0.0  ;;  %v1243_v42 = vld [vmem:[%s1631_s0 + $0xd0] sm:$0xff]  }
  0x41   :  { %vm321_vm5 = vcmp.ge.f32.partialorder %v257_v45, 0.0  ;;  %v384_v53 = vmul.f32 0.2, %v256_v44  ;;  %v385_v54 = vmul.f32 0.2, %v257_v45  ;;  %vm322_vm6 = vcmp.ge.f32.partialorder %v258_v46, 0.0 }
  0x42   :  { %vm323_vm7 = vcmp.ge.f32.partialorder %v259_v47, 0.0  ;;  %v386_v55 = vmul.f32 0.2, %v258_v46  ;;  %1265 = vst [vmem:[%s1634_s3 + $0x88] sm:$0xff] %v1146_v52   ;;  %v387_v57 = vmul.f32 0.2, %v259_v47  ;;  %v260_v58 = vadd.f32 %v1320_v7, %v189_v49 }
  0x43   :  { %v448_v56 = vsel %vm320_vm4, %v256_v44, %v384_v53  ;;  %v261_v59 = vadd.f32 %v1320_v7, %v190_v50  ;;  %v449_v60 = vsel %vm321_vm5, %v257_v45, %v385_v54  ;;  %v1017_v62 = vunpack.c.h.bf16 %v1238_v40 }
  0x44   :  { %v450_v61 = vsel %vm322_vm6, %v258_v46, %v386_v55  ;;  %v191_v63 = vmul.f32 %v1016_v51, %v1306_v1  ;;  %v1151_v3 = vpack.c.bf16 %v449_v60, %v448_v56  ;;  %v451_v4 = vsel %vm323_vm7, %v259_v47, %v387_v57  ;;  %v1244_v55 = vld [vmem:[%s1631_s0 + $0xd8] sm:$0xff]  }
  0x45   :  { %vm324_vm8 = vcmp.ge.f32.partialorder %v260_v58, 0.0  ;;  %vm325_vm9 = vcmp.ge.f32.partialorder %v261_v59, 0.0  ;;  %v1156_v5 = vpack.c.bf16 %v451_v4, %v450_v61  ;;  %v388_v6 = vmul.f32 0.2, %v260_v58 }
  0x46   :  { %v389_v8 = vmul.f32 0.2, %v261_v59  ;;  %v192_v9 = vmul.f32 %v1017_v62, %v1306_v1  ;;  %1266 = vst [vmem:[%s1634_s3 + $0x90] sm:$0xff] %v1151_v3   ;;  %v262_v10 = vadd.f32 %v1320_v7, %v191_v63  ;;  %v1020_v11 = vunpack.c.l.bf16 %v1239_v0 }
  0x47   :  { %v1021_v12 = vunpack.c.h.bf16 %v1239_v0  ;;  %v1024_v13 = vunpack.c.l.bf16 %v1240_v2  ;;  %1267 = vst [vmem:[%s1634_s3 + $0x98] sm:$0xff] %v1156_v5   ;;  %v452_v14 = vsel %vm324_vm8, %v260_v58, %v388_v6  ;;  %v1025_v17 = vunpack.c.h.bf16 %v1240_v2 }
  0x48   :  { %v453_v15 = vsel %vm325_vm9, %v261_v59, %v389_v8  ;;  %v263_v16 = vadd.f32 %v1320_v7, %v192_v9  ;;  %vm326_vm10 = vcmp.ge.f32.partialorder %v262_v10, 0.0  ;;  %v390_v20 = vmul.f32 0.2, %v262_v10 }
  0x49   :  { %v1161_v19 = vpack.c.bf16 %v453_v15, %v452_v14  ;;  %v193_v21 = vmul.f32 %v1020_v11, %v1306_v1  ;;  %v194_v23 = vmul.f32 %v1021_v12, %v1306_v1  ;;  %v195_v24 = vmul.f32 %v1024_v13, %v1306_v1  ;;  %v1246_v14 = vld [vmem:[%s1631_s0 + $0xe8] sm:$0xff]  }
  0x4a   :  { %vm327_vm11 = vcmp.ge.f32.partialorder %v263_v16, 0.0  ;;  %v391_v22 = vmul.f32 0.2, %v263_v16  ;;  %v454_v25 = vsel %vm326_vm10, %v262_v10, %v390_v20  ;;  %v196_v27 = vmul.f32 %v1025_v17, %v1306_v1  ;;  %v1245_v10 = vld [vmem:[%s1631_s0 + $0xe0] sm:$0xff]  }
  0x4b   :  { %1268 = vst [vmem:[%s1634_s3 + $0xa0] sm:$0xff] %v1161_v19   ;;  %v264_v26 = vadd.f32 %v1320_v7, %v193_v21  ;;  %v1028_v28 = vunpack.c.l.bf16 %v1241_v18  ;;  %v265_v30 = vadd.f32 %v1320_v7, %v194_v23  ;;  %v266_v31 = vadd.f32 %v1320_v7, %v195_v24 }
  0x4c   :  { %v455_v29 = vsel %vm327_vm11, %v263_v16, %v391_v22  ;;  %v1029_v32 = vunpack.c.h.bf16 %v1241_v18  ;;  %v267_v35 = vadd.f32 %v1320_v7, %v196_v27  ;;  %v1032_v46 = vunpack.c.l.bf16 %v1242_v36 }
  0x4d   :  { %v1166_v33 = vpack.c.bf16 %v455_v29, %v454_v25  ;;  %vm328_vm12 = vcmp.ge.f32.partialorder %v264_v26, 0.0  ;;  %v392_v34 = vmul.f32 0.2, %v264_v26  ;;  %vm329_vm13 = vcmp.ge.f32.partialorder %v265_v30, 0.0 }
  0x4e   :  { %v393_v37 = vmul.f32 0.2, %v265_v30  ;;  %vm330_vm14 = vcmp.ge.f32.partialorder %v266_v31, 0.0  ;;  %v394_v38 = vmul.f32 0.2, %v266_v31  ;;  %vm331_vm15 = vcmp.ge.f32.partialorder %v267_v35, 0.0 }
  0x4f   :  { %1269 = vst [vmem:[%s1634_s3 + $0xa8] sm:$0xff] %v1166_v33   ;;  %v456_v39 = vsel %vm328_vm12, %v264_v26, %v392_v34  ;;  %v395_v40 = vmul.f32 0.2, %v267_v35  ;;  %v197_v41 = vmul.f32 %v1028_v28, %v1306_v1  ;;  %v198_v45 = vmul.f32 %v1029_v32, %v1306_v1 }
  0x50   :  { %v457_v43 = vsel %vm329_vm13, %v265_v30, %v393_v37  ;;  %v458_v44 = vsel %vm330_vm14, %v266_v31, %v394_v38  ;;  %v1033_v50 = vunpack.c.h.bf16 %v1242_v36  ;;  %v199_v53 = vmul.f32 %v1032_v46, %v1306_v1  ;;  %v1247_v30 = vld [vmem:[%s1631_s0 + $0xf0] sm:$0xff]  }
  0x51   :  { %v1171_v47 = vpack.c.bf16 %v457_v43, %v456_v39  ;;  %v459_v48 = vsel %vm331_vm15, %v267_v35, %v395_v40  ;;  %v268_v49 = vadd.f32 %v1320_v7, %v197_v41  ;;  %v269_v52 = vadd.f32 %v1320_v7, %v198_v45 }
  0x52   :  { %v1176_v51 = vpack.c.bf16 %v459_v48, %v458_v44  ;;  %v1036_v54 = vunpack.c.l.bf16 %v1243_v42  ;;  %v200_v57 = vmul.f32 %v1033_v50, %v1306_v1  ;;  %v1037_v58 = vunpack.c.h.bf16 %v1243_v42  ;;  %v1248_v44 = vld [vmem:[%s1631_s0 + $0xf8] sm:$0xff]  }
  0x53   :  { %1270 = vst [vmem:[%s1634_s3 + $0xb0] sm:$0xff] %v1171_v47   ;;  %vm332_vm0 = vcmp.ge.f32.partialorder %v268_v49, 0.0  ;;  %v396_v56 = vmul.f32 0.2, %v268_v49  ;;  %vm333_vm1 = vcmp.ge.f32.partialorder %v269_v52, 0.0  ;;  %v270_v60 = vadd.f32 %v1320_v7, %v199_v53 }
  0x54   :  { %1271 = vst [vmem:[%s1634_s3 + $0xb8] sm:$0xff] %v1176_v51   ;;  %v397_v59 = vmul.f32 0.2, %v269_v52  ;;  %v201_v61 = vmul.f32 %v1036_v54, %v1306_v1  ;;  %v271_v63 = vadd.f32 %v1320_v7, %v200_v57  ;;  %v202_v0 = vmul.f32 %v1037_v58, %v1306_v1 }
  0x55   :  { %v460_v62 = vsel %vm332_vm0, %v268_v49, %v396_v56  ;;  %v1040_v2 = vunpack.c.l.bf16 %v1244_v55  ;;  %vm334_vm2 = vcmp.ge.f32.partialorder %v270_v60, 0.0  ;;  %v398_v4 = vmul.f32 0.2, %v270_v60 }
  0x56   :  { %v461_v3 = vsel %vm333_vm1, %v269_v52, %v397_v59  ;;  %v272_v5 = vadd.f32 %v1320_v7, %v201_v61  ;;  %vm335_vm3 = vcmp.ge.f32.partialorder %v271_v63, 0.0  ;;  %v399_v8 = vmul.f32 0.2, %v271_v63 }
  0x57   :  { %v1181_v6 = vpack.c.bf16 %v461_v3, %v460_v62  ;;  %v273_v9 = vadd.f32 %v1320_v7, %v202_v0  ;;  %v462_v11 = vsel %vm334_vm2, %v270_v60, %v398_v4  ;;  %v1041_v13 = vunpack.c.h.bf16 %v1244_v55 }
  0x58   :  { %vm336_vm4 = vcmp.ge.f32.partialorder %v272_v5, 0.0  ;;  %v400_v12 = vmul.f32 0.2, %v272_v5  ;;  %v463_v15 = vsel %vm335_vm3, %v271_v63, %v399_v8  ;;  %v203_v17 = vmul.f32 %v1040_v2, %v1306_v1 }
  0x59   :  { %1272 = vst [vmem:[%s1634_s3 + $0xc0] sm:$0xff] %v1181_v6   ;;  %vm337_vm5 = vcmp.ge.f32.partialorder %v273_v9, 0.0  ;;  %v401_v16 = vmul.f32 0.2, %v273_v9  ;;  %v1186_v18 = vpack.c.bf16 %v463_v15, %v462_v11  ;;  %v204_v20 = vmul.f32 %v1041_v13, %v1306_v1 }
  0x5a   :  { %v464_v19 = vsel %vm336_vm4, %v272_v5, %v400_v12  ;;  %v1044_v21 = vunpack.c.l.bf16 %v1245_v10  ;;  %v274_v23 = vadd.f32 %v1320_v7, %v203_v17  ;;  %v1045_v24 = vunpack.c.h.bf16 %v1245_v10 }
  0x5b   :  { %v465_v22 = vsel %vm337_vm5, %v273_v9, %v401_v16  ;;  %v1048_v25 = vunpack.c.l.bf16 %v1246_v14  ;;  %1273 = vst [vmem:[%s1634_s3 + $0xc8] sm:$0xff] %v1186_v18   ;;  %v275_v27 = vadd.f32 %v1320_v7, %v204_v20  ;;  %v1049_v29 = vunpack.c.h.bf16 %v1246_v14 }
  0x5c   :  { %v1191_v26 = vpack.c.bf16 %v465_v22, %v464_v19  ;;  %v205_v28 = vmul.f32 %v1044_v21, %v1306_v1  ;;  %vm338_vm6 = vcmp.ge.f32.partialorder %v274_v23, 0.0  ;;  %v402_v31 = vmul.f32 0.2, %v274_v23 }
  0x5d   :  { %v206_v32 = vmul.f32 %v1045_v24, %v1306_v1  ;;  %v207_v33 = vmul.f32 %v1048_v25, %v1306_v1  ;;  %vm339_vm7 = vcmp.ge.f32.partialorder %v275_v27, 0.0  ;;  %v403_v34 = vmul.f32 0.2, %v275_v27 }
  0x5e   :  { %1274 = vst [vmem:[%s1634_s3 + $0xd0] sm:$0xff] %v1191_v26   ;;  %v276_v35 = vadd.f32 %v1320_v7, %v205_v28  ;;  %v208_v36 = vmul.f32 %v1049_v29, %v1306_v1  ;;  %v466_v37 = vsel %vm338_vm6, %v274_v23, %v402_v31  ;;  %v1052_v40 = vunpack.c.l.bf16 %v1247_v30 }
  0x5f   :  { %v277_v38 = vadd.f32 %v1320_v7, %v206_v32  ;;  %v278_v39 = vadd.f32 %v1320_v7, %v207_v33  ;;  %v467_v41 = vsel %vm339_vm7, %v275_v27, %v403_v34  ;;  %v1053_v51 = vunpack.c.h.bf16 %v1247_v30 }
  0x60   :  { %vm340_vm8 = vcmp.ge.f32.partialorder %v276_v35, 0.0  ;;  %v404_v42 = vmul.f32 0.2, %v276_v35  ;;  %v279_v43 = vadd.f32 %v1320_v7, %v208_v36  ;;  %v1196_v45 = vpack.c.bf16 %v467_v41, %v466_v37 }
  0x61   :  { %vm341_vm9 = vcmp.ge.f32.partialorder %v277_v38, 0.0  ;;  %v405_v46 = vmul.f32 0.2, %v277_v38  ;;  %vm342_vm10 = vcmp.ge.f32.partialorder %v278_v39, 0.0  ;;  %v406_v48 = vmul.f32 0.2, %v278_v39 }
  0x62   :  { %v468_v47 = vsel %vm340_vm8, %v276_v35, %v404_v42  ;;  %vm343_vm11 = vcmp.ge.f32.partialorder %v279_v43, 0.0  ;;  %v407_v49 = vmul.f32 0.2, %v279_v43  ;;  %1275 = vst [vmem:[%s1634_s3 + $0xd8] sm:$0xff] %v1196_v45   ;;  %v209_v52 = vmul.f32 %v1052_v40, %v1306_v1 }
  0x63   :  { %v469_v50 = vsel %vm341_vm9, %v277_v38, %v405_v46  ;;  %v1056_v53 = vunpack.c.l.bf16 %v1248_v44  ;;  %v470_v55 = vsel %vm342_vm10, %v278_v39, %v406_v48  ;;  %v1057_v57 = vunpack.c.h.bf16 %v1248_v44 }
  0x64   :  { %v1201_v54 = vpack.c.bf16 %v469_v50, %v468_v47  ;;  %v471_v56 = vsel %vm343_vm11, %v279_v43, %v407_v49  ;;  %v210_v59 = vmul.f32 %v1053_v51, %v1306_v1  ;;  %v280_v60 = vadd.f32 %v1320_v7, %v209_v52 }
  0x65   :  { %v1206_v58 = vpack.c.bf16 %v471_v56, %v470_v55  ;;  %v211_v61 = vmul.f32 %v1056_v53, %v1306_v1  ;;  %v212_v62 = vmul.f32 %v1057_v57, %v1306_v1 }
  0x66   :  { %1276 = vst [vmem:[%s1634_s3 + $0xe0] sm:$0xff] %v1201_v54   ;;  %v281_v63 = vadd.f32 %v1320_v7, %v210_v59  ;;  %vm344_vm12 = vcmp.ge.f32.partialorder %v280_v60, 0.0  ;;  %v408_v0 = vmul.f32 0.2, %v280_v60 }
  0x67   :  { %1277 = vst [vmem:[%s1634_s3 + $0xe8] sm:$0xff] %v1206_v58   ;;  %v282_v2 = vadd.f32 %v1320_v7, %v211_v61  ;;  %v283_v3 = vadd.f32 %v1320_v7, %v212_v62 }
  0x68   :  { %vm345_vm13 = vcmp.ge.f32.partialorder %v281_v63, 0.0  ;;  %v409_v4 = vmul.f32 0.2, %v281_v63  ;;  %v472_v5 = vsel %vm344_vm12, %v280_v60, %v408_v0 }
  0x69   :  { %vm346_vm14 = vcmp.ge.f32.partialorder %v282_v2, 0.0  ;;  %vm347_vm15 = vcmp.ge.f32.partialorder %v283_v3, 0.0  ;;  %v410_v6 = vmul.f32 0.2, %v282_v2  ;;  %v411_v8 = vmul.f32 0.2, %v283_v3 }
  0x6a   :  { %v473_v1 = vsel %vm345_vm13, %v281_v63, %v409_v4 }
  0x6b   :  { %v1211_v9 = vpack.c.bf16 %v473_v1, %v472_v5  ;;  %v474_v10 = vsel %vm346_vm14, %v282_v2, %v410_v6  ;;  %v475_v11 = vsel %vm347_vm15, %v283_v3, %v411_v8 }
  0x6c   :  { %v1216_v12 = vpack.c.bf16 %v475_v11, %v474_v10 }
  0x6d   :  { %1278 = vst [vmem:[%s1634_s3 + $0xf0] sm:$0xff] %v1211_v9  }
  0x6e   :  { %1279 = vst [vmem:[%s1634_s3 + $0xf8] sm:$0xff] %v1216_v12  }

// kernel: discriminator_forward.8
= control target key start
LH: loop header
LB: loop body
LE: loop exit
PB: predicated region body
PF: predicated region fallthrough
CT: control target
= control target key end

     0   :  { %v4779_v0 = vmov 0   ;;  %s5947_s1 = inlined_call_operand.vmem [shape: bf16[1024,128], index: 1, kind: input, shape index: {}]   ;;  %s5948_s0 = inlined_call_operand.vmem [shape: bf16[512,1024], index: 0, kind: input, shape index: {}]   ;;  %s5949_s2 = inlined_call_operand.vmem [shape: bf16[512,128], index: 2, kind: output, shape index: {0}]   ;;  %s5950_s3 = inlined_call_operand.vmem [shape: f32[1,1,128], index: 3, kind: output, shape index: {1}]   ;;  %s5951_s4 = inlined_call_operand.vmem [shape: f32[1,1,128], index: 4, kind: output, shape index: {2}]  }
   0x1   :  { %2063 = vmatprep.subr.bf16.mxu1 %v4779_v0  ;;  %2641 = vmatprep.subr.bf16.mxu0 %v4779_v0  ;;  %v4715_v1 = vld [vmem:[%s5947_s1] sm:$0xff]   ;;  %v4717_v3 = vld [vmem:[%s5947_s1 + $0x8] sm:$0xff]   ;;  %v4719_v5 = vld [vmem:[%s5947_s1 + $0x10] sm:$0xff]  }
   0x2   :  { %v4716_v2 = vld [vmem:[%s5947_s1 + $0x100] sm:$0xff]   ;;  %2064 = vmatpush1.bf16.msra.mxu1 %v4715_v1  ;;  %v4718_v4 = vld [vmem:[%s5947_s1 + $0x108] sm:$0xff]   ;;  %v4720_v6 = vld [vmem:[%s5947_s1 + $0x110] sm:$0xff]  }
   0x3   :  { %2642 = vmatpush1.bf16.msra.mxu0 %v4716_v2  ;;  %2065 = vmatprep.subr.bf16.mxu1 %v4779_v0  ;;  %v4721_v7 = vld [vmem:[%s5947_s1 + $0x18] sm:$0xff]   ;;  %v4723_v9 = vld [vmem:[%s5947_s1 + $0x20] sm:$0xff]   ;;  %v4725_v11 = vld [vmem:[%s5947_s1 + $0x28] sm:$0xff]  }
   0x4   :  { %2643 = vmatprep.subr.bf16.mxu0 %v4779_v0  ;;  %v4722_v8 = vld [vmem:[%s5947_s1 + $0x118] sm:$0xff]   ;;  %v4724_v10 = vld [vmem:[%s5947_s1 + $0x120] sm:$0xff]   ;;  %v4726_v12 = vld [vmem:[%s5947_s1 + $0x128] sm:$0xff]  }
   0x5   :  { %v4727_v13 = vld [vmem:[%s5947_s1 + $0x30] sm:$0xff]   ;;  %v4729_v15 = vld [vmem:[%s5947_s1 + $0x38] sm:$0xff]   ;;  %v4731_v17 = vld [vmem:[%s5947_s1 + $0x40] sm:$0xff]  }
   0x6   :  { %2066 = vmatpush1.bf16.msra.mxu1 %v4717_v3  ;;  %v4728_v14 = vld [vmem:[%s5947_s1 + $0x130] sm:$0xff]   ;;  %v4730_v16 = vld [vmem:[%s5947_s1 + $0x138] sm:$0xff]   ;;  %v4732_v18 = vld [vmem:[%s5947_s1 + $0x140] sm:$0xff]  }
   0x7   :  { %2644 = vmatpush1.bf16.msra.mxu0 %v4718_v4  ;;  %2067 = vmatprep.subr.bf16.mxu1 %v4779_v0  ;;  %v4880_v19 = vld [vmem:[%s5948_s0] sm:$0xff]  ;;  %v4890_v21 = vld [vmem:[%s5948_s0 + $0x10] sm:$0xff]  ;;  %v4733_v24 = vld [vmem:[%s5947_s1 + $0x48] sm:$0xff]  }
   0x8   :  { %2645 = vmatprep.subr.bf16.mxu0 %v4779_v0  ;;  %v4885_v20 = vld [vmem:[%s5948_s0 + $0x20] sm:$0xff]  ;;  %v4897_v23 = vld [vmem:[%s5948_s0 + $0x30] sm:$0xff]  ;;  %v4734_v26 = vld [vmem:[%s5947_s1 + $0x148] sm:$0xff]  }
   0x9   :  { %v3756_v22 = vcombine.high %v4880_v19, %v4885_v20  ;;  %v3760_v25 = vcombine.high %v4890_v21, %v4897_v23  ;;  %v4735_v27 = vld [vmem:[%s5947_s1 + $0x50] sm:$0xff]   ;;  %v4737_v29 = vld [vmem:[%s5947_s1 + $0x58] sm:$0xff]   ;;  %v4739_v31 = vld [vmem:[%s5947_s1 + $0x60] sm:$0xff]   ;;  %v3755_v42 = vcombine.low %v4880_v19, %v4885_v20  ;;  %v3759_v44 = vcombine.low %v4890_v21, %v4897_v23 }
   0xa   :  { %2068 = vmatpush1.bf16.msra.mxu1 %v4719_v5  ;;  %v4736_v28 = vld [vmem:[%s5947_s1 + $0x150] sm:$0xff]   ;;  %v4738_v30 = vld [vmem:[%s5947_s1 + $0x158] sm:$0xff]   ;;  %v4740_v32 = vld [vmem:[%s5947_s1 + $0x160] sm:$0xff]  }
   0xb   :  { %2646 = vmatpush1.bf16.msra.mxu0 %v4720_v6  ;;  %2069 = vmatprep.subr.bf16.mxu1 %v4779_v0  ;;  %v4741_v33 = vld [vmem:[%s5947_s1 + $0x68] sm:$0xff]   ;;  %v4743_v35 = vld [vmem:[%s5947_s1 + $0x70] sm:$0xff]   ;;  %v4745_v37 = vld [vmem:[%s5947_s1 + $0x78] sm:$0xff]  }
   0xc   :  { %2647 = vmatprep.subr.bf16.mxu0 %v4779_v0  ;;  %2095 = vmatprep.mubr.bf16.mxu1 %v3756_v22  ;;  %v4742_v34 = vld [vmem:[%s5947_s1 + $0x168] sm:$0xff]   ;;  %v4744_v36 = vld [vmem:[%s5947_s1 + $0x170] sm:$0xff]   ;;  %v4746_v38 = vld [vmem:[%s5947_s1 + $0x178] sm:$0xff]  }
   0xd   :  { %2673 = vmatprep.mubr.bf16.mxu0 %v3760_v25  ;;  %v23_v39 = vld [vmem:[%s5948_s0 + $0x40] sm:$0xff]  ;;  %v25_v41 = vld [vmem:[%s5948_s0 + $0x50] sm:$0xff]  ;;  %v4749_v51 = vld [vmem:[%s5947_s1 + $0x88] sm:$0xff]  }
   0xe   :  { %2070 = vmatpush1.bf16.msra.mxu1 %v4721_v7  ;;  %v27_v40 = vld [vmem:[%s5948_s0 + $0x60] sm:$0xff]  ;;  %v29_v43 = vld [vmem:[%s5948_s0 + $0x70] sm:$0xff]  ;;  %v4750_v52 = vld [vmem:[%s5947_s1 + $0x188] sm:$0xff]  }
   0xf   :  { %2648 = vmatpush1.bf16.msra.mxu0 %v4722_v8  ;;  %2071 = vmatprep.subr.bf16.mxu1 %v4779_v0  ;;  %v4747_v45 = vld [vmem:[%s5947_s1 + $0x80] sm:$0xff]   ;;  %v3764_v47 = vcombine.high %v23_v39, %v27_v40  ;;  %v3768_v48 = vcombine.high %v25_v41, %v29_v43  ;;  %v33_v53 = vld [vmem:[%s5948_s0 + $0x90] sm:$0xff]  ;;  %v3763_v55 = vcombine.low %v23_v39, %v27_v40  ;;  %v4753_v2 = vld [vmem:[%s5947_s1 + $0x98] sm:$0xff]  }
  0x10   :  { %2649 = vmatprep.subr.bf16.mxu0 %v4779_v0  ;;  %v4748_v46 = vld [vmem:[%s5947_s1 + $0x180] sm:$0xff]   ;;  %v37_v54 = vld [vmem:[%s5948_s0 + $0xb0] sm:$0xff]  ;;  %v3767_v56 = vcombine.low %v25_v41, %v29_v43  ;;  %v4754_v3 = vld [vmem:[%s5947_s1 + $0x198] sm:$0xff]  }
  0x11   :  { %v31_v49 = vld [vmem:[%s5948_s0 + $0x80] sm:$0xff]  ;;  %v3776_v58 = vcombine.high %v33_v53, %v37_v54  ;;  %v4751_v59 = vld [vmem:[%s5947_s1 + $0x90] sm:$0xff]   ;;  %v3775_v6 = vcombine.low %v33_v53, %v37_v54  ;;  %v4766_v39 = vld [vmem:[%s5947_s1 + $0x1c8] sm:$0xff]  }
  0x12   :  { %2072 = vmatpush1.bf16.msra.mxu1 %v4723_v9  ;;  %v35_v50 = vld [vmem:[%s5948_s0 + $0xa0] sm:$0xff]  ;;  %v4752_v60 = vld [vmem:[%s5947_s1 + $0x190] sm:$0xff]   ;;  %v4769_v54 = vld [vmem:[%s5947_s1 + $0xd8] sm:$0xff]  }
  0x13   :  { %2650 = vmatpush1.bf16.msra.mxu0 %v4724_v10  ;;  %2073 = vmatprep.subr.bf16.mxu1 %v4779_v0  ;;  %v3772_v57 = vcombine.high %v31_v49, %v35_v50  ;;  %v39_v61 = vld [vmem:[%s5948_s0 + $0xc0] sm:$0xff]  ;;  %v41_v63 = vld [vmem:[%s5948_s0 + $0xd0] sm:$0xff]  ;;  %v3771_v4 = vcombine.low %v31_v49, %v35_v50 }
  0x14   :  { %2651 = vmatprep.subr.bf16.mxu0 %v4779_v0  ;;  %v43_v62 = vld [vmem:[%s5948_s0 + $0xe0] sm:$0xff]  ;;  %v45_v1 = vld [vmem:[%s5948_s0 + $0xf0] sm:$0xff] }
  0x15   :  { %v4755_v5 = vld [vmem:[%s5947_s1 + $0xa0] sm:$0xff]   ;;  %v3780_v7 = vcombine.high %v39_v61, %v43_v62  ;;  %v3784_v9 = vcombine.high %v41_v63, %v45_v1  ;;  %v4759_v20 = vld [vmem:[%s5947_s1 + $0xb0] sm:$0xff]  }
  0x16   :  { %2074 = vmatpush1.bf16.msra.mxu1 %v4725_v11  ;;  %v4756_v8 = vld [vmem:[%s5947_s1 + $0x1a0] sm:$0xff]   ;;  %v4760_v21 = vld [vmem:[%s5947_s1 + $0x1b0] sm:$0xff]  }
  0x17   :  { %2652 = vmatpush1.bf16.msra.mxu0 %v4726_v12  ;;  %2075 = vmatprep.subr.bf16.mxu1 %v4779_v0  ;;  %v47_v10 = vld [vmem:[%s5948_s0 + $0x100] sm:$0xff]  ;;  %v49_v12 = vld [vmem:[%s5948_s0 + $0x110] sm:$0xff] }
  0x18   :  { %2653 = vmatprep.subr.bf16.mxu0 %v4779_v0  ;;  %v51_v11 = vld [vmem:[%s5948_s0 + $0x120] sm:$0xff]  ;;  %v57_v25 = vld [vmem:[%s5948_s0 + $0x150] sm:$0xff] }
  0x19   :  { %v55_v22 = vld [vmem:[%s5948_s0 + $0x140] sm:$0xff]  ;;  %v77_v49 = vld [vmem:[%s5948_s0 + $0x1f0] sm:$0xff] }
  0x1a   :  { %2076 = vmatpush1.bf16.msra.mxu1 %v4727_v13  ;;  %v53_v13 = vld [vmem:[%s5948_s0 + $0x130] sm:$0xff]  ;;  %v59_v23 = vld [vmem:[%s5948_s0 + $0x160] sm:$0xff] }
  0x1b   :  { %2654 = vmatpush1.bf16.msra.mxu0 %v4728_v14  ;;  %2077 = vmatprep.subr.bf16.mxu1 %v4779_v0  ;;  %v4757_v14 = vld [vmem:[%s5947_s1 + $0xa8] sm:$0xff]   ;;  %v3792_v19 = vcombine.high %v49_v12, %v53_v13  ;;  %v3795_v40 = vcombine.low %v55_v22, %v59_v23 }
  0x1c   :  { %2655 = vmatprep.subr.bf16.mxu0 %v4779_v0 }
  0x1e   :  { %2078 = vmatpush1.bf16.msra.mxu1 %v4729_v15  ;;  %v4758_v15 = vld [vmem:[%s5947_s1 + $0x1a8] sm:$0xff]  }
  0x1f   :  { %2656 = vmatpush1.bf16.msra.mxu0 %v4730_v16  ;;  %2079 = vmatprep.subr.bf16.mxu1 %v4779_v0  ;;  %v3779_v16 = vcombine.low %v39_v61, %v43_v62 }
  0x20   :  { %2657 = vmatprep.subr.bf16.mxu0 %v4779_v0 }
  0x22   :  { %2080 = vmatpush1.bf16.msra.mxu1 %v4731_v17  ;;  %v3783_v17 = vcombine.low %v41_v63, %v45_v1  ;;  %v87_v1 = vld [vmem:[%s5948_s0 + $0x240] sm:$0xff] }
  0x23   :  { %2658 = vmatpush1.bf16.msra.mxu0 %v4732_v18  ;;  %2081 = vmatprep.subr.bf16.mxu1 %v4779_v0  ;;  %v3788_v18 = vcombine.high %v47_v10, %v51_v11 }
  0x24   :  { %2659 = vmatprep.subr.bf16.mxu0 %v4779_v0 }
  0x26   :  { %2082 = vmatpush1.bf16.msra.mxu1 %v4733_v24  ;;  %v4761_v24 = vld [vmem:[%s5947_s1 + $0xb8] sm:$0xff]  }
  0x27   :  { %2660 = vmatpush1.bf16.msra.mxu0 %v4734_v26  ;;  %2083 = vmatprep.subr.bf16.mxu1 %v4779_v0  ;;  %v61_v26 = vld [vmem:[%s5948_s0 + $0x170] sm:$0xff] }
  0x28   :  { %2661 = vmatprep.subr.bf16.mxu0 %v4779_v0  ;;  %v3799_v41 = vcombine.low %v57_v25, %v61_v26 }
  0x2a   :  { %2084 = vmatpush1.bf16.msra.mxu1 %v4735_v27  ;;  %v4762_v27 = vld [vmem:[%s5947_s1 + $0x1b8] sm:$0xff]  }
  0x2b   :  { %2662 = vmatpush1.bf16.msra.mxu0 %v4736_v28  ;;  %2085 = vmatprep.subr.bf16.mxu1 %v4779_v0  ;;  %v3787_v28 = vcombine.low %v47_v10, %v51_v11  ;;  %v4772_v10 = vld [vmem:[%s5947_s1 + $0x1e0] sm:$0xff]  }
  0x2c   :  { %2663 = vmatprep.subr.bf16.mxu0 %v4779_v0  ;;  %v95_v11 = vld [vmem:[%s5948_s0 + $0x280] sm:$0xff] }
  0x2e   :  { %2086 = vmatpush1.bf16.msra.mxu1 %v4737_v29  ;;  %v3791_v29 = vcombine.low %v49_v12, %v53_v13  ;;  %v99_v12 = vld [vmem:[%s5948_s0 + $0x2a0] sm:$0xff]  ;;  %v97_v13 = vld [vmem:[%s5948_s0 + $0x290] sm:$0xff] }
  0x2f   :  { %2664 = vmatpush1.bf16.msra.mxu0 %v4738_v30  ;;  %2087 = vmatprep.subr.bf16.mxu1 %v4779_v0  ;;  %v3796_v30 = vcombine.high %v55_v22, %v59_v23  ;;  %v109_v22 = vld [vmem:[%s5948_s0 + $0x2f0] sm:$0xff]  ;;  %v3835_v23 = vcombine.low %v95_v11, %v99_v12 }
  0x30   :  { %2665 = vmatprep.subr.bf16.mxu0 %v4779_v0 }
  0x32   :  { %2088 = vmatpush1.bf16.msra.mxu1 %v4739_v31  ;;  %v3800_v31 = vcombine.high %v57_v25, %v61_v26 }
  0x33   :  { %2666 = vmatpush1.bf16.msra.mxu0 %v4740_v32  ;;  %2089 = vmatprep.subr.bf16.mxu1 %v4779_v0  ;;  %v4763_v32 = vld [vmem:[%s5947_s1 + $0xc0] sm:$0xff]  }
  0x34   :  { %2667 = vmatprep.subr.bf16.mxu0 %v4779_v0 }
  0x36   :  { %2090 = vmatpush1.bf16.msra.mxu1 %v4741_v33  ;;  %v4764_v33 = vld [vmem:[%s5947_s1 + $0x1c0] sm:$0xff]  }
  0x37   :  { %2668 = vmatpush1.bf16.msra.mxu0 %v4742_v34  ;;  %2091 = vmatprep.subr.bf16.mxu1 %v4779_v0  ;;  %v63_v34 = vld [vmem:[%s5948_s0 + $0x180] sm:$0xff] }
  0x38   :  { %2669 = vmatprep.subr.bf16.mxu0 %v4779_v0 }
  0x3a   :  { %2092 = vmatpush1.bf16.msra.mxu1 %v4743_v35  ;;  %v67_v35 = vld [vmem:[%s5948_s0 + $0x1a0] sm:$0xff] }
  0x3b   :  { %2670 = vmatpush1.bf16.msra.mxu0 %v4744_v36  ;;  %2093 = vmatprep.subr.bf16.mxu1 %v4779_v0  ;;  %v4765_v36 = vld [vmem:[%s5947_s1 + $0xc8] sm:$0xff]   ;;  %v3803_v50 = vcombine.low %v63_v34, %v67_v35 }
  0x3c   :  { %2671 = vmatprep.subr.bf16.mxu0 %v4779_v0 }
  0x3e   :  { %2094 = vmatpush1.bf16.msra.mxu1 %v4745_v37  ;;  %v65_v37 = vld [vmem:[%s5948_s0 + $0x190] sm:$0xff] }
  0x3f   :  { %2672 = vmatpush1.bf16.msra.mxu0 %v4746_v38  ;;  %2352 = vmatprep.subr.bf16.mxu1 %v4779_v0  ;;  %v69_v38 = vld [vmem:[%s5948_s0 + $0x1b0] sm:$0xff] }
  0x40   :  { %2930 = vmatprep.subr.bf16.mxu0 %v4779_v0  ;;  %v3808_v43 = vcombine.high %v65_v37, %v69_v38 }
  0x41   :  { %2096 = vmatmul.mubr.bf16.vlgmr.msra.gmra.mrb[0].mxu1 %v3755_v42  ;;  %v3804_v42 = vcombine.high %v63_v34, %v67_v35 }
  0x42   :  { %2674 = vmatmul.mubr.bf16.vlgmr.msra.gmra.mrb[0].mxu0 %v3759_v44  ;;  %2353 = vmatpush1.bf16.msra.mxu1 %v4747_v45  ;;  %v4767_v44 = vld [vmem:[%s5947_s1 + $0xd0] sm:$0xff]  }
  0x43   :  { %2931 = vmatpush1.bf16.msra.mxu0 %v4748_v46  ;;  %2103 = vmatprep.mubr.bf16.mxu1 %v3764_v47  ;;  %v4768_v45 = vld [vmem:[%s5947_s1 + $0x1d0] sm:$0xff]   ;;  %v71_v46 = vld [vmem:[%s5948_s0 + $0x1c0] sm:$0xff] }
  0x44   :  { %2681 = vmatprep.mubr.bf16.mxu0 %v3768_v48  ;;  %2354 = vmatprep.subr.bf16.mxu1 %v4779_v0  ;;  %v75_v47 = vld [vmem:[%s5948_s0 + $0x1e0] sm:$0xff]  ;;  %v73_v48 = vld [vmem:[%s5948_s0 + $0x1d0] sm:$0xff] }
  0x45   :  { %2932 = vmatprep.subr.bf16.mxu0 %v4779_v0  ;;  %v3816_v53 = vcombine.high %v73_v48, %v77_v49  ;;  %v3815_v61 = vcombine.low %v73_v48, %v77_v49  ;;  %v131_v48 = vld [vmem:[%s5948_s0 + $0x3a0] sm:$0xff]  ;;  %v129_v49 = vld [vmem:[%s5948_s0 + $0x390] sm:$0xff] }
  0x46   :  { %2355 = vmatpush1.bf16.msra.mxu1 %v4749_v51  ;;  %v3807_v51 = vcombine.low %v65_v37, %v69_v38  ;;  %v119_v37 = vld [vmem:[%s5948_s0 + $0x340] sm:$0xff] }
  0x47   :  { %2933 = vmatpush1.bf16.msra.mxu0 %v4750_v52  ;;  %2356 = vmatprep.subr.bf16.mxu1 %v4779_v0  ;;  %v3812_v52 = vcombine.high %v71_v46, %v75_v47  ;;  %v123_v38 = vld [vmem:[%s5948_s0 + $0x360] sm:$0xff] }
  0x48   :  { %2934 = vmatprep.subr.bf16.mxu0 %v4779_v0 }
  0x49   :  { %2104 = vmatmul.mubr.bf16.gmra.mrb[4].mxu1 %v3763_v55  ;;  %v4770_v55 = vld [vmem:[%s5947_s1 + $0x1d8] sm:$0xff]  }
  0x4a   :  { %2682 = vmatmul.mubr.bf16.gmra.mrb[4].mxu0 %v3767_v56  ;;  %2111 = vmatprep.mubr.bf16.mxu1 %v3772_v57  ;;  %v79_v56 = vld [vmem:[%s5948_s0 + $0x200] sm:$0xff] }
  0x4b   :  { %2689 = vmatprep.mubr.bf16.mxu0 %v3776_v58  ;;  %2357 = vmatpush1.bf16.msra.mxu1 %v4751_v59  ;;  %v83_v57 = vld [vmem:[%s5948_s0 + $0x220] sm:$0xff]  ;;  %v81_v58 = vld [vmem:[%s5948_s0 + $0x210] sm:$0xff] }
  0x4c   :  { %2935 = vmatpush1.bf16.msra.mxu0 %v4752_v60  ;;  %2358 = vmatprep.subr.bf16.mxu1 %v4779_v0  ;;  %v85_v59 = vld [vmem:[%s5948_s0 + $0x230] sm:$0xff]  ;;  %v3811_v60 = vcombine.low %v71_v46, %v75_v47  ;;  %v3820_v62 = vcombine.high %v79_v56, %v83_v57  ;;  %v127_v47 = vld [vmem:[%s5948_s0 + $0x380] sm:$0xff] }
  0x4d   :  { %2936 = vmatprep.subr.bf16.mxu0 %v4779_v0  ;;  %v3824_v63 = vcombine.high %v81_v58, %v85_v59  ;;  %v4776_v46 = vld [vmem:[%s5947_s1 + $0x1f0] sm:$0xff]  }
  0x4f   :  { %2359 = vmatpush1.bf16.msra.mxu1 %v4753_v2  ;;  %v91_v2 = vld [vmem:[%s5948_s0 + $0x260] sm:$0xff] }
  0x50   :  { %2937 = vmatpush1.bf16.msra.mxu0 %v4754_v3  ;;  %2360 = vmatprep.subr.bf16.mxu1 %v4779_v0  ;;  %v89_v3 = vld [vmem:[%s5948_s0 + $0x250] sm:$0xff] }
  0x51   :  { %2112 = vmatmul.mubr.bf16.gmra.mrb[8].mxu1 %v3771_v4  ;;  %2938 = vmatprep.subr.bf16.mxu0 %v4779_v0  ;;  %v93_v4 = vld [vmem:[%s5948_s0 + $0x270] sm:$0xff] }
  0x52   :  { %2690 = vmatmul.mubr.bf16.gmra.mrb[8].mxu0 %v3775_v6  ;;  %2119 = vmatprep.mubr.bf16.mxu1 %v3780_v7  ;;  %v3823_v6 = vcombine.low %v81_v58, %v85_v59  ;;  %v3828_v7 = vcombine.high %v87_v1, %v91_v2  ;;  %v3867_v58 = vcombine.low %v127_v47, %v131_v48 }
  0x53   :  { %2697 = vmatprep.mubr.bf16.mxu0 %v3784_v9  ;;  %2361 = vmatpush1.bf16.msra.mxu1 %v4755_v5  ;;  %v3819_v5 = vcombine.low %v79_v56, %v83_v57  ;;  %v4771_v9 = vld [vmem:[%s5947_s1 + $0xe0] sm:$0xff]   ;;  %v137_v57 = vld [vmem:[%s5948_s0 + $0x3d0] sm:$0xff] }
  0x54   :  { %2939 = vmatpush1.bf16.msra.mxu0 %v4756_v8  ;;  %2362 = vmatprep.subr.bf16.mxu1 %v4779_v0  ;;  %v3832_v8 = vcombine.high %v89_v3, %v93_v4  ;;  %v139_v56 = vld [vmem:[%s5948_s0 + $0x3e0] sm:$0xff] }
  0x55   :  { %2940 = vmatprep.subr.bf16.mxu0 %v4779_v0 }
  0x57   :  { %2363 = vmatpush1.bf16.msra.mxu1 %v4757_v14  ;;  %v101_v14 = vld [vmem:[%s5948_s0 + $0x2b0] sm:$0xff] }
  0x58   :  { %2941 = vmatpush1.bf16.msra.mxu0 %v4758_v15  ;;  %2364 = vmatprep.subr.bf16.mxu1 %v4779_v0  ;;  %v3827_v15 = vcombine.low %v87_v1, %v91_v2  ;;  %v143_v1 = vld [vmem:[%s5948_s0 + $0x400] sm:$0xff] }
  0x59   :  { %2120 = vmatmul.mubr.bf16.gmra.mrb[12].mxu1 %v3779_v16  ;;  %2942 = vmatprep.subr.bf16.mxu0 %v4779_v0  ;;  %v3831_v16 = vcombine.low %v89_v3, %v93_v4  ;;  %v147_v2 = vld [vmem:[%s5948_s0 + $0x420] sm:$0xff]  ;;  %v145_v3 = vld [vmem:[%s5948_s0 + $0x410] sm:$0xff] }
  0x5a   :  { %2698 = vmatmul.mubr.bf16.gmra.mrb[12].mxu0 %v3783_v17  ;;  %2127 = vmatprep.mubr.bf16.mxu1 %v3788_v18  ;;  %v3836_v17 = vcombine.high %v95_v11, %v99_v12  ;;  %v3840_v18 = vcombine.high %v97_v13, %v101_v14  ;;  %v149_v4 = vld [vmem:[%s5948_s0 + $0x430] sm:$0xff] }
  0x5b   :  { %2705 = vmatprep.mubr.bf16.mxu0 %v3792_v19  ;;  %2365 = vmatpush1.bf16.msra.mxu1 %v4759_v20  ;;  %v103_v19 = vld [vmem:[%s5948_s0 + $0x2c0] sm:$0xff]  ;;  %v153_v11 = vld [vmem:[%s5948_s0 + $0x450] sm:$0xff] }
  0x5c   :  { %2943 = vmatpush1.bf16.msra.mxu0 %v4760_v21  ;;  %2366 = vmatprep.subr.bf16.mxu1 %v4779_v0  ;;  %v107_v20 = vld [vmem:[%s5948_s0 + $0x2e0] sm:$0xff]  ;;  %v105_v21 = vld [vmem:[%s5948_s0 + $0x2d0] sm:$0xff] }
  0x5d   :  { %2944 = vmatprep.subr.bf16.mxu0 %v4779_v0  ;;  %v3844_v25 = vcombine.high %v103_v19, %v107_v20  ;;  %v3848_v26 = vcombine.high %v105_v21, %v109_v22  ;;  %v3847_v34 = vcombine.low %v105_v21, %v109_v22  ;;  %v157_v12 = vld [vmem:[%s5948_s0 + $0x470] sm:$0xff] }
  0x5e   :  { %v3895_v22 = vcombine.low %v153_v11, %v157_v12 }
  0x5f   :  { %2367 = vmatpush1.bf16.msra.mxu1 %v4761_v24  ;;  %v3839_v24 = vcombine.low %v97_v13, %v101_v14  ;;  %v3883_v13 = vcombine.low %v143_v1, %v147_v2  ;;  %v3887_v14 = vcombine.low %v145_v3, %v149_v4 }
  0x60   :  { %2945 = vmatpush1.bf16.msra.mxu0 %v4762_v27  ;;  %2368 = vmatprep.subr.bf16.mxu1 %v4779_v0  ;;  %v4773_v27 = vld [vmem:[%s5947_s1 + $0xe8] sm:$0xff]  }
  0x61   :  { %2128 = vmatmul.mubr.bf16.gmra.mrb[16].mxu1 %v3787_v28  ;;  %2946 = vmatprep.subr.bf16.mxu0 %v4779_v0  ;;  %v4774_v28 = vld [vmem:[%s5947_s1 + $0x1e8] sm:$0xff]  }
  0x62   :  { %2706 = vmatmul.mubr.bf16.gmra.mrb[16].mxu0 %v3791_v29  ;;  %2135 = vmatprep.mubr.bf16.mxu1 %v3796_v30  ;;  %v111_v29 = vld [vmem:[%s5948_s0 + $0x300] sm:$0xff] }
  0x63   :  { %2713 = vmatprep.mubr.bf16.mxu0 %v3800_v31  ;;  %2369 = vmatpush1.bf16.msra.mxu1 %v4763_v32  ;;  %v115_v30 = vld [vmem:[%s5948_s0 + $0x320] sm:$0xff]  ;;  %v113_v31 = vld [vmem:[%s5948_s0 + $0x310] sm:$0xff] }
  0x64   :  { %2947 = vmatpush1.bf16.msra.mxu0 %v4764_v33  ;;  %2370 = vmatprep.subr.bf16.mxu1 %v4779_v0  ;;  %v117_v32 = vld [vmem:[%s5948_s0 + $0x330] sm:$0xff]  ;;  %v3843_v33 = vcombine.low %v103_v19, %v107_v20  ;;  %v3852_v35 = vcombine.high %v111_v29, %v115_v30 }
  0x65   :  { %2948 = vmatprep.subr.bf16.mxu0 %v4779_v0  ;;  %v161_v19 = vld [vmem:[%s5948_s0 + $0x490] sm:$0xff] }
  0x66   :  { %v165_v20 = vld [vmem:[%s5948_s0 + $0x4b0] sm:$0xff] }
  0x67   :  { %2371 = vmatpush1.bf16.msra.mxu1 %v4765_v36  ;;  %v3856_v36 = vcombine.high %v113_v31, %v117_v32 }
  0x68   :  { %2949 = vmatpush1.bf16.msra.mxu0 %v4766_v39  ;;  %2372 = vmatprep.subr.bf16.mxu1 %v4779_v0  ;;  %v121_v39 = vld [vmem:[%s5948_s0 + $0x350] sm:$0xff] }
  0x69   :  { %2136 = vmatmul.mubr.bf16.gmra.mrb[20].mxu1 %v3795_v40  ;;  %2950 = vmatprep.subr.bf16.mxu0 %v4779_v0  ;;  %v125_v40 = vld [vmem:[%s5948_s0 + $0x370] sm:$0xff] }
  0x6a   :  { %2714 = vmatmul.mubr.bf16.gmra.mrb[20].mxu0 %v3799_v41  ;;  %2143 = vmatprep.mubr.bf16.mxu1 %v3804_v42  ;;  %v3851_v41 = vcombine.low %v111_v29, %v115_v30  ;;  %v3855_v42 = vcombine.low %v113_v31, %v117_v32  ;;  %v3903_v30 = vcombine.low %v161_v19, %v165_v20 }
  0x6b   :  { %2721 = vmatprep.mubr.bf16.mxu0 %v3808_v43  ;;  %2373 = vmatpush1.bf16.msra.mxu1 %v4767_v44  ;;  %v3860_v43 = vcombine.high %v119_v37, %v123_v38  ;;  %v3864_v44 = vcombine.high %v121_v39, %v125_v40 }
  0x6c   :  { %2951 = vmatpush1.bf16.msra.mxu0 %v4768_v45  ;;  %2374 = vmatprep.subr.bf16.mxu1 %v4779_v0  ;;  %v4775_v45 = vld [vmem:[%s5947_s1 + $0xf0] sm:$0xff]  }
  0x6d   :  { %2952 = vmatprep.subr.bf16.mxu0 %v4779_v0 }
  0x6f   :  { %2375 = vmatpush1.bf16.msra.mxu1 %v4769_v54 }
  0x70   :  { %2953 = vmatpush1.bf16.msra.mxu0 %v4770_v55  ;;  %2376 = vmatprep.subr.bf16.mxu1 %v4779_v0  ;;  %v135_v55 = vld [vmem:[%s5948_s0 + $0x3c0] sm:$0xff] }
  0x71   :  { %2144 = vmatmul.mubr.bf16.gmra.mrb[24].mxu1 %v3803_v50  ;;  %2954 = vmatprep.subr.bf16.mxu0 %v4779_v0  ;;  %v133_v50 = vld [vmem:[%s5948_s0 + $0x3b0] sm:$0xff] }
  0x72   :  { %2722 = vmatmul.mubr.bf16.gmra.mrb[24].mxu0 %v3807_v51  ;;  %2151 = vmatprep.mubr.bf16.mxu1 %v3812_v52  ;;  %v3859_v51 = vcombine.low %v119_v37, %v123_v38  ;;  %v3863_v52 = vcombine.low %v121_v39, %v125_v40  ;;  %v3872_v54 = vcombine.high %v129_v49, %v133_v50 }
  0x73   :  { %2729 = vmatprep.mubr.bf16.mxu0 %v3816_v53  ;;  %2377 = vmatpush1.bf16.msra.mxu1 %v4771_v9  ;;  %v3868_v53 = vcombine.high %v127_v47, %v131_v48  ;;  %v3871_v59 = vcombine.low %v129_v49, %v133_v50  ;;  %v151_v9 = vld [vmem:[%s5948_s0 + $0x440] sm:$0xff] }
  0x74   :  { %2955 = vmatpush1.bf16.msra.mxu0 %v4772_v10  ;;  %2378 = vmatprep.subr.bf16.mxu1 %v4779_v0  ;;  %v155_v10 = vld [vmem:[%s5948_s0 + $0x460] sm:$0xff] }
  0x75   :  { %2956 = vmatprep.subr.bf16.mxu0 %v4779_v0  ;;  %v3891_v21 = vcombine.low %v151_v9, %v155_v10  ;;  %v191_v49 = vld [vmem:[%s5948_s0 + $0x580] sm:$0xff] }
  0x76   :  { %v195_v50 = vld [vmem:[%s5948_s0 + $0x5a0] sm:$0xff] }
  0x77   :  { %2379 = vmatpush1.bf16.msra.mxu1 %v4773_v27  ;;  %v169_v27 = vld [vmem:[%s5948_s0 + $0x4d0] sm:$0xff] }
  0x78   :  { %2957 = vmatpush1.bf16.msra.mxu0 %v4774_v28  ;;  %2380 = vmatprep.subr.bf16.mxu1 %v4779_v0  ;;  %v173_v28 = vld [vmem:[%s5948_s0 + $0x4f0] sm:$0xff] }
  0x79   :  { %2152 = vmatmul.mubr.bf16.gmra.mrb[28].mxu1 %v3811_v60  ;;  %2958 = vmatprep.subr.bf16.mxu0 %v4779_v0  ;;  %v3876_v60 = vcombine.high %v135_v55, %v139_v56  ;;  %v3912_v32 = vcombine.high %v169_v27, %v173_v28  ;;  %v3911_v38 = vcombine.low %v169_v27, %v173_v28  ;;  %v233_v27 = vld [vmem:[%s5948_s0 + $0x6d0] sm:$0xff] }
  0x7a   :  { %2730 = vmatmul.mubr.bf16.gmra.mrb[28].mxu0 %v3815_v61  ;;  %2159 = vmatprep.mubr.bf16.mxu1 %v3820_v62  ;;  %v4777_v62 = vld [vmem:[%s5947_s1 + $0xf8] sm:$0xff]   ;;  %v237_v28 = vld [vmem:[%s5948_s0 + $0x6f0] sm:$0xff] }
  0x7b   :  { %2737 = vmatprep.mubr.bf16.mxu0 %v3824_v63  ;;  %2381 = vmatpush1.bf16.msra.mxu1 %v4775_v45  ;;  %v4778_v63 = vld [vmem:[%s5947_s1 + $0x1f8] sm:$0xff]  }
  0x7c   :  { %2959 = vmatpush1.bf16.msra.mxu0 %v4776_v46  ;;  %2382 = vmatprep.subr.bf16.mxu1 %v4779_v0 }
  0x7d   :  { %2960 = vmatprep.subr.bf16.mxu0 %v4779_v0  ;;  %v141_v0 = vld [vmem:[%s5948_s0 + $0x3f0] sm:$0xff] }
  0x7e   :  { %v3880_v61 = vcombine.high %v137_v57, %v141_v0 }
  0x7f   :  { %2383 = vmatpush1.bf16.msra.mxu1 %v4777_v62 }
  0x80   :  { %2961 = vmatpush1.bf16.msra.mxu0 %v4778_v63 }
  0x81   :  { %2160 = vmatmul.mubr.bf16.gmra.mrb[32].mxu1 %v3819_v5  ;;  %v3875_v5 = vcombine.low %v135_v55, %v139_v56  ;;  %v3932_v55 = vcombine.high %v191_v49, %v195_v50 }
  0x82   :  { %2738 = vmatmul.mubr.bf16.gmra.mrb[32].mxu0 %v3823_v6  ;;  %2167 = vmatprep.mubr.bf16.mxu1 %v3828_v7  ;;  %v3879_v6 = vcombine.low %v137_v57, %v141_v0  ;;  %v3884_v7 = vcombine.high %v143_v1, %v147_v2  ;;  %v199_v57 = vld [vmem:[%s5948_s0 + $0x5c0] sm:$0xff] }
  0x83   :  { %2745 = vmatprep.mubr.bf16.mxu0 %v3832_v8  ;;  %v3888_v8 = vcombine.high %v145_v3, %v149_v4  ;;  %v203_v0 = vld [vmem:[%s5948_s0 + $0x5e0] sm:$0xff]  ;;  %v209_v3 = vld [vmem:[%s5948_s0 + $0x610] sm:$0xff] }
  0x84   :  { %v3940_v62 = vcombine.high %v199_v57, %v203_v0  ;;  %v207_v1 = vld [vmem:[%s5948_s0 + $0x600] sm:$0xff]  ;;  %v213_v4 = vld [vmem:[%s5948_s0 + $0x630] sm:$0xff] }
  0x85   :  { %v211_v2 = vld [vmem:[%s5948_s0 + $0x620] sm:$0xff] }
  0x89   :  { %2168 = vmatmul.mubr.bf16.gmra.mrb[36].mxu1 %v3827_v15  ;;  %v3892_v15 = vcombine.high %v151_v9, %v155_v10  ;;  %v215_v9 = vld [vmem:[%s5948_s0 + $0x640] sm:$0xff] }
  0x8a   :  { %2746 = vmatmul.mubr.bf16.gmra.mrb[36].mxu0 %v3831_v16  ;;  %2175 = vmatprep.mubr.bf16.mxu1 %v3836_v17  ;;  %v3896_v16 = vcombine.high %v153_v11, %v157_v12  ;;  %v159_v17 = vld [vmem:[%s5948_s0 + $0x480] sm:$0xff]  ;;  %v217_v11 = vld [vmem:[%s5948_s0 + $0x650] sm:$0xff] }
  0x8b   :  { %2753 = vmatprep.mubr.bf16.mxu0 %v3840_v18  ;;  %v163_v18 = vld [vmem:[%s5948_s0 + $0x4a0] sm:$0xff]  ;;  %v221_v12 = vld [vmem:[%s5948_s0 + $0x670] sm:$0xff] }
  0x8c   :  { %v3899_v29 = vcombine.low %v159_v17, %v163_v18  ;;  %v219_v10 = vld [vmem:[%s5948_s0 + $0x660] sm:$0xff] }
  0x91   :  { %2176 = vmatmul.mubr.bf16.gmra.mrb[40].mxu1 %v3835_v23  ;;  %v3900_v23 = vcombine.high %v159_v17, %v163_v18  ;;  %v223_v17 = vld [vmem:[%s5948_s0 + $0x680] sm:$0xff] }
  0x92   :  { %2754 = vmatmul.mubr.bf16.gmra.mrb[40].mxu0 %v3839_v24  ;;  %2183 = vmatprep.mubr.bf16.mxu1 %v3844_v25  ;;  %v3904_v24 = vcombine.high %v161_v19, %v165_v20  ;;  %v167_v25 = vld [vmem:[%s5948_s0 + $0x4c0] sm:$0xff]  ;;  %v225_v19 = vld [vmem:[%s5948_s0 + $0x690] sm:$0xff] }
  0x93   :  { %2761 = vmatprep.mubr.bf16.mxu0 %v3848_v26  ;;  %v171_v26 = vld [vmem:[%s5948_s0 + $0x4e0] sm:$0xff]  ;;  %v229_v20 = vld [vmem:[%s5948_s0 + $0x6b0] sm:$0xff] }
  0x94   :  { %v3908_v31 = vcombine.high %v167_v25, %v171_v26  ;;  %v3907_v37 = vcombine.low %v167_v25, %v171_v26  ;;  %v227_v18 = vld [vmem:[%s5948_s0 + $0x6a0] sm:$0xff] }
  0x95   :  { %v231_v25 = vld [vmem:[%s5948_s0 + $0x6c0] sm:$0xff] }
  0x96   :  { %v235_v26 = vld [vmem:[%s5948_s0 + $0x6e0] sm:$0xff] }
  0x99   :  { %2184 = vmatmul.mubr.bf16.gmra.mrb[44].mxu1 %v3843_v33  ;;  %v175_v33 = vld [vmem:[%s5948_s0 + $0x500] sm:$0xff] }
  0x9a   :  { %2762 = vmatmul.mubr.bf16.gmra.mrb[44].mxu0 %v3847_v34  ;;  %2191 = vmatprep.mubr.bf16.mxu1 %v3852_v35  ;;  %v179_v34 = vld [vmem:[%s5948_s0 + $0x520] sm:$0xff]  ;;  %v177_v35 = vld [vmem:[%s5948_s0 + $0x510] sm:$0xff] }
  0x9b   :  { %2769 = vmatprep.mubr.bf16.mxu0 %v3856_v36  ;;  %v181_v36 = vld [vmem:[%s5948_s0 + $0x530] sm:$0xff]  ;;  %v3916_v39 = vcombine.high %v175_v33, %v179_v34  ;;  %v3915_v45 = vcombine.low %v175_v33, %v179_v34  ;;  %v239_v33 = vld [vmem:[%s5948_s0 + $0x700] sm:$0xff] }
  0x9c   :  { %v3920_v40 = vcombine.high %v177_v35, %v181_v36  ;;  %v3919_v46 = vcombine.low %v177_v35, %v181_v36  ;;  %v243_v34 = vld [vmem:[%s5948_s0 + $0x720] sm:$0xff]  ;;  %v241_v35 = vld [vmem:[%s5948_s0 + $0x710] sm:$0xff] }
  0x9d   :  { %v245_v36 = vld [vmem:[%s5948_s0 + $0x730] sm:$0xff] }
  0xa1   :  { %2192 = vmatmul.mubr.bf16.gmra.mrb[48].mxu1 %v3851_v41  ;;  %v183_v41 = vld [vmem:[%s5948_s0 + $0x540] sm:$0xff] }
  0xa2   :  { %2770 = vmatmul.mubr.bf16.gmra.mrb[48].mxu0 %v3855_v42  ;;  %2199 = vmatprep.mubr.bf16.mxu1 %v3860_v43  ;;  %v187_v42 = vld [vmem:[%s5948_s0 + $0x560] sm:$0xff]  ;;  %v185_v43 = vld [vmem:[%s5948_s0 + $0x550] sm:$0xff] }
  0xa3   :  { %2777 = vmatprep.mubr.bf16.mxu0 %v3864_v44  ;;  %v189_v44 = vld [vmem:[%s5948_s0 + $0x570] sm:$0xff]  ;;  %v3924_v47 = vcombine.high %v183_v41, %v187_v42 }
  0xa4   :  { %v3928_v48 = vcombine.high %v185_v43, %v189_v44 }
  0xa9   :  { %2200 = vmatmul.mubr.bf16.gmra.mrb[52].mxu1 %v3859_v51  ;;  %v193_v51 = vld [vmem:[%s5948_s0 + $0x590] sm:$0xff] }
  0xaa   :  { %2778 = vmatmul.mubr.bf16.gmra.mrb[52].mxu0 %v3863_v52  ;;  %2207 = vmatprep.mubr.bf16.mxu1 %v3868_v53  ;;  %v197_v52 = vld [vmem:[%s5948_s0 + $0x5b0] sm:$0xff]  ;;  %v3923_v53 = vcombine.low %v183_v41, %v187_v42  ;;  %v247_v41 = vld [vmem:[%s5948_s0 + $0x740] sm:$0xff] }
  0xab   :  { %2785 = vmatprep.mubr.bf16.mxu0 %v3872_v54  ;;  %v3927_v54 = vcombine.low %v185_v43, %v189_v44  ;;  %v3936_v56 = vcombine.high %v193_v51, %v197_v52  ;;  %v251_v42 = vld [vmem:[%s5948_s0 + $0x760] sm:$0xff]  ;;  %v249_v43 = vld [vmem:[%s5948_s0 + $0x750] sm:$0xff] }
  0xac   :  { %v253_v44 = vld [vmem:[%s5948_s0 + $0x770] sm:$0xff] }
  0xb1   :  { %2208 = vmatmul.mubr.bf16.gmra.mrb[56].mxu1 %v3867_v58  ;;  %v201_v58 = vld [vmem:[%s5948_s0 + $0x5d0] sm:$0xff] }
  0xb2   :  { %2786 = vmatmul.mubr.bf16.gmra.mrb[56].mxu0 %v3871_v59  ;;  %2215 = vmatprep.mubr.bf16.mxu1 %v3876_v60  ;;  %v205_v59 = vld [vmem:[%s5948_s0 + $0x5f0] sm:$0xff]  ;;  %v3931_v60 = vcombine.low %v191_v49, %v195_v50  ;;  %v255_v49 = vld [vmem:[%s5948_s0 + $0x780] sm:$0xff] }
  0xb3   :  { %2793 = vmatprep.mubr.bf16.mxu0 %v3880_v61  ;;  %v3935_v61 = vcombine.low %v193_v51, %v197_v52  ;;  %v3944_v63 = vcombine.high %v201_v58, %v205_v59  ;;  %v259_v50 = vld [vmem:[%s5948_s0 + $0x7a0] sm:$0xff]  ;;  %v257_v51 = vld [vmem:[%s5948_s0 + $0x790] sm:$0xff] }
  0xb4   :  { %v261_v52 = vld [vmem:[%s5948_s0 + $0x7b0] sm:$0xff] }
  0xb9   :  { %2216 = vmatmul.mubr.bf16.gmra.mrb[60].mxu1 %v3875_v5  ;;  %v3939_v5 = vcombine.low %v199_v57, %v203_v0  ;;  %v263_v57 = vld [vmem:[%s5948_s0 + $0x7c0] sm:$0xff] }
  0xba   :  { %2794 = vmatmul.mubr.bf16.gmra.mrb[60].mxu0 %v3879_v6  ;;  %2223 = vmatprep.mubr.bf16.mxu1 %v3884_v7  ;;  %v3943_v6 = vcombine.low %v201_v58, %v205_v59  ;;  %v3948_v7 = vcombine.high %v207_v1, %v211_v2  ;;  %v267_v0 = vld [vmem:[%s5948_s0 + $0x7e0] sm:$0xff]  ;;  %v265_v58 = vld [vmem:[%s5948_s0 + $0x7d0] sm:$0xff] }
  0xbb   :  { %2801 = vmatprep.mubr.bf16.mxu0 %v3888_v8  ;;  %v3952_v8 = vcombine.high %v209_v3, %v213_v4  ;;  %v269_v59 = vld [vmem:[%s5948_s0 + $0x7f0] sm:$0xff] }
  0xc1   :  { %2224 = vmatmul.mubr.bf16.gmra.mrb[64].mxu1 %v3883_v13  ;;  %v3947_v13 = vcombine.low %v207_v1, %v211_v2  ;;  %v16_v1 = vld [vmem:[%s5948_s0 + $0x8] sm:$0xff] }
  0xc2   :  { %2802 = vmatmul.mubr.bf16.gmra.mrb[64].mxu0 %v3887_v14  ;;  %2231 = vmatprep.mubr.bf16.mxu1 %v3892_v15  ;;  %v3951_v14 = vcombine.low %v209_v3, %v213_v4  ;;  %v3956_v15 = vcombine.high %v215_v9, %v219_v10  ;;  %v20_v2 = vld [vmem:[%s5948_s0 + $0x28] sm:$0xff]  ;;  %v18_v3 = vld [vmem:[%s5948_s0 + $0x18] sm:$0xff] }
  0xc3   :  { %2809 = vmatprep.mubr.bf16.mxu0 %v3896_v16  ;;  %v3960_v16 = vcombine.high %v217_v11, %v221_v12  ;;  %v22_v4 = vld [vmem:[%s5948_s0 + $0x38] sm:$0xff] }
  0xc9   :  { %2232 = vmatmul.mubr.bf16.gmra.mrb[68].mxu1 %v3891_v21  ;;  %v3955_v21 = vcombine.low %v215_v9, %v219_v10  ;;  %v24_v9 = vld [vmem:[%s5948_s0 + $0x48] sm:$0xff] }
  0xca   :  { %2810 = vmatmul.mubr.bf16.gmra.mrb[68].mxu0 %v3895_v22  ;;  %2239 = vmatprep.mubr.bf16.mxu1 %v3900_v23  ;;  %v3959_v22 = vcombine.low %v217_v11, %v221_v12  ;;  %v3964_v23 = vcombine.high %v223_v17, %v227_v18  ;;  %v28_v10 = vld [vmem:[%s5948_s0 + $0x68] sm:$0xff]  ;;  %v26_v11 = vld [vmem:[%s5948_s0 + $0x58] sm:$0xff] }
  0xcb   :  { %2817 = vmatprep.mubr.bf16.mxu0 %v3904_v24  ;;  %v3968_v24 = vcombine.high %v225_v19, %v229_v20  ;;  %v30_v12 = vld [vmem:[%s5948_s0 + $0x78] sm:$0xff] }
  0xd1   :  { %2240 = vmatmul.mubr.bf16.gmra.mrb[72].mxu1 %v3899_v29  ;;  %v3963_v29 = vcombine.low %v223_v17, %v227_v18  ;;  %v32_v17 = vld [vmem:[%s5948_s0 + $0x88] sm:$0xff] }
  0xd2   :  { %2818 = vmatmul.mubr.bf16.gmra.mrb[72].mxu0 %v3903_v30  ;;  %2247 = vmatprep.mubr.bf16.mxu1 %v3908_v31  ;;  %v3967_v30 = vcombine.low %v225_v19, %v229_v20  ;;  %v3972_v31 = vcombine.high %v231_v25, %v235_v26  ;;  %v36_v18 = vld [vmem:[%s5948_s0 + $0xa8] sm:$0xff]  ;;  %v34_v19 = vld [vmem:[%s5948_s0 + $0x98] sm:$0xff] }
  0xd3   :  { %2825 = vmatprep.mubr.bf16.mxu0 %v3912_v32  ;;  %v3976_v32 = vcombine.high %v233_v27, %v237_v28  ;;  %v38_v20 = vld [vmem:[%s5948_s0 + $0xb8] sm:$0xff] }
  0xd9   :  { %2248 = vmatmul.mubr.bf16.gmra.mrb[76].mxu1 %v3907_v37  ;;  %v3971_v37 = vcombine.low %v231_v25, %v235_v26  ;;  %v40_v25 = vld [vmem:[%s5948_s0 + $0xc8] sm:$0xff] }
  0xda   :  { %2826 = vmatmul.mubr.bf16.gmra.mrb[76].mxu0 %v3911_v38  ;;  %2255 = vmatprep.mubr.bf16.mxu1 %v3916_v39  ;;  %v3975_v38 = vcombine.low %v233_v27, %v237_v28  ;;  %v3980_v39 = vcombine.high %v239_v33, %v243_v34  ;;  %v44_v26 = vld [vmem:[%s5948_s0 + $0xe8] sm:$0xff]  ;;  %v42_v27 = vld [vmem:[%s5948_s0 + $0xd8] sm:$0xff] }
  0xdb   :  { %2833 = vmatprep.mubr.bf16.mxu0 %v3920_v40  ;;  %v3984_v40 = vcombine.high %v241_v35, %v245_v36  ;;  %v46_v28 = vld [vmem:[%s5948_s0 + $0xf8] sm:$0xff] }
  0xe1   :  { %2256 = vmatmul.mubr.bf16.gmra.mrb[80].mxu1 %v3915_v45  ;;  %v3979_v45 = vcombine.low %v239_v33, %v243_v34  ;;  %v48_v33 = vld [vmem:[%s5948_s0 + $0x108] sm:$0xff] }
  0xe2   :  { %2834 = vmatmul.mubr.bf16.gmra.mrb[80].mxu0 %v3919_v46  ;;  %2263 = vmatprep.mubr.bf16.mxu1 %v3924_v47  ;;  %v3983_v46 = vcombine.low %v241_v35, %v245_v36  ;;  %v3988_v47 = vcombine.high %v247_v41, %v251_v42  ;;  %v52_v34 = vld [vmem:[%s5948_s0 + $0x128] sm:$0xff]  ;;  %v50_v35 = vld [vmem:[%s5948_s0 + $0x118] sm:$0xff] }
  0xe3   :  { %2841 = vmatprep.mubr.bf16.mxu0 %v3928_v48  ;;  %v3992_v48 = vcombine.high %v249_v43, %v253_v44  ;;  %v54_v36 = vld [vmem:[%s5948_s0 + $0x138] sm:$0xff] }
  0xe9   :  { %2264 = vmatmul.mubr.bf16.gmra.mrb[84].mxu1 %v3923_v53  ;;  %v3987_v53 = vcombine.low %v247_v41, %v251_v42  ;;  %v56_v41 = vld [vmem:[%s5948_s0 + $0x148] sm:$0xff] }
  0xea   :  { %2842 = vmatmul.mubr.bf16.gmra.mrb[84].mxu0 %v3927_v54  ;;  %2271 = vmatprep.mubr.bf16.mxu1 %v3932_v55  ;;  %v3991_v54 = vcombine.low %v249_v43, %v253_v44  ;;  %v3996_v55 = vcombine.high %v255_v49, %v259_v50  ;;  %v60_v42 = vld [vmem:[%s5948_s0 + $0x168] sm:$0xff]  ;;  %v58_v43 = vld [vmem:[%s5948_s0 + $0x158] sm:$0xff] }
  0xeb   :  { %2849 = vmatprep.mubr.bf16.mxu0 %v3936_v56  ;;  %v4000_v56 = vcombine.high %v257_v51, %v261_v52  ;;  %v62_v44 = vld [vmem:[%s5948_s0 + $0x178] sm:$0xff] }
  0xf1   :  { %2272 = vmatmul.mubr.bf16.gmra.mrb[88].mxu1 %v3931_v60  ;;  %v3995_v60 = vcombine.low %v255_v49, %v259_v50  ;;  %v64_v49 = vld [vmem:[%s5948_s0 + $0x188] sm:$0xff] }
  0xf2   :  { %2850 = vmatmul.mubr.bf16.gmra.mrb[88].mxu0 %v3935_v61  ;;  %2279 = vmatprep.mubr.bf16.mxu1 %v3940_v62  ;;  %v3999_v61 = vcombine.low %v257_v51, %v261_v52  ;;  %v4004_v62 = vcombine.high %v263_v57, %v267_v0  ;;  %v68_v50 = vld [vmem:[%s5948_s0 + $0x1a8] sm:$0xff]  ;;  %v66_v51 = vld [vmem:[%s5948_s0 + $0x198] sm:$0xff] }
  0xf3   :  { %2857 = vmatprep.mubr.bf16.mxu0 %v3944_v63  ;;  %v4008_v63 = vcombine.high %v265_v58, %v269_v59  ;;  %v70_v52 = vld [vmem:[%s5948_s0 + $0x1b8] sm:$0xff] }
  0xf9   :  { %2280 = vmatmul.mubr.bf16.gmra.mrb[92].mxu1 %v3939_v5  ;;  %v4003_v5 = vcombine.low %v263_v57, %v267_v0  ;;  %v72_v57 = vld [vmem:[%s5948_s0 + $0x1c8] sm:$0xff] }
  0xfa   :  { %2858 = vmatmul.mubr.bf16.gmra.mrb[92].mxu0 %v3943_v6  ;;  %2287 = vmatprep.mubr.bf16.mxu1 %v3948_v7  ;;  %v4007_v6 = vcombine.low %v265_v58, %v269_v59  ;;  %v3758_v7 = vcombine.high %v16_v1, %v20_v2  ;;  %v76_v0 = vld [vmem:[%s5948_s0 + $0x1e8] sm:$0xff]  ;;  %v74_v58 = vld [vmem:[%s5948_s0 + $0x1d8] sm:$0xff] }
  0xfb   :  { %2865 = vmatprep.mubr.bf16.mxu0 %v3952_v8  ;;  %v3762_v8 = vcombine.high %v18_v3, %v22_v4  ;;  %v78_v59 = vld [vmem:[%s5948_s0 + $0x1f8] sm:$0xff] }
 0x101   :  { %2288 = vmatmul.mubr.bf16.gmra.mrb[96].mxu1 %v3947_v13  ;;  %v3757_v13 = vcombine.low %v16_v1, %v20_v2  ;;  %v80_v1 = vld [vmem:[%s5948_s0 + $0x208] sm:$0xff] }
 0x102   :  { %2866 = vmatmul.mubr.bf16.gmra.mrb[96].mxu0 %v3951_v14  ;;  %2295 = vmatprep.mubr.bf16.mxu1 %v3956_v15  ;;  %v3761_v14 = vcombine.low %v18_v3, %v22_v4  ;;  %v3766_v15 = vcombine.high %v24_v9, %v28_v10  ;;  %v84_v2 = vld [vmem:[%s5948_s0 + $0x228] sm:$0xff]  ;;  %v82_v3 = vld [vmem:[%s5948_s0 + $0x218] sm:$0xff] }
 0x103   :  { %2873 = vmatprep.mubr.bf16.mxu0 %v3960_v16  ;;  %v3770_v16 = vcombine.high %v26_v11, %v30_v12  ;;  %v86_v4 = vld [vmem:[%s5948_s0 + $0x238] sm:$0xff] }
 0x109   :  { %2296 = vmatmul.mubr.bf16.gmra.mrb[100].mxu1 %v3955_v21  ;;  %v3765_v21 = vcombine.low %v24_v9, %v28_v10  ;;  %v88_v9 = vld [vmem:[%s5948_s0 + $0x248] sm:$0xff] }
 0x10a   :  { %2874 = vmatmul.mubr.bf16.gmra.mrb[100].mxu0 %v3959_v22  ;;  %2303 = vmatprep.mubr.bf16.mxu1 %v3964_v23  ;;  %v3769_v22 = vcombine.low %v26_v11, %v30_v12  ;;  %v3774_v23 = vcombine.high %v32_v17, %v36_v18  ;;  %v92_v10 = vld [vmem:[%s5948_s0 + $0x268] sm:$0xff]  ;;  %v90_v11 = vld [vmem:[%s5948_s0 + $0x258] sm:$0xff] }
 0x10b   :  { %2881 = vmatprep.mubr.bf16.mxu0 %v3968_v24  ;;  %v3778_v24 = vcombine.high %v34_v19, %v38_v20  ;;  %v94_v12 = vld [vmem:[%s5948_s0 + $0x278] sm:$0xff] }
 0x111   :  { %2304 = vmatmul.mubr.bf16.gmra.mrb[104].mxu1 %v3963_v29  ;;  %v3773_v29 = vcombine.low %v32_v17, %v36_v18  ;;  %v96_v17 = vld [vmem:[%s5948_s0 + $0x288] sm:$0xff] }
 0x112   :  { %2882 = vmatmul.mubr.bf16.gmra.mrb[104].mxu0 %v3967_v30  ;;  %2311 = vmatprep.mubr.bf16.mxu1 %v3972_v31  ;;  %v3777_v30 = vcombine.low %v34_v19, %v38_v20  ;;  %v3782_v31 = vcombine.high %v40_v25, %v44_v26  ;;  %v100_v18 = vld [vmem:[%s5948_s0 + $0x2a8] sm:$0xff]  ;;  %v98_v19 = vld [vmem:[%s5948_s0 + $0x298] sm:$0xff] }
 0x113   :  { %2889 = vmatprep.mubr.bf16.mxu0 %v3976_v32  ;;  %v3786_v32 = vcombine.high %v42_v27, %v46_v28  ;;  %v102_v20 = vld [vmem:[%s5948_s0 + $0x2b8] sm:$0xff] }
 0x119   :  { %2312 = vmatmul.mubr.bf16.gmra.mrb[108].mxu1 %v3971_v37  ;;  %v3781_v37 = vcombine.low %v40_v25, %v44_v26  ;;  %v104_v25 = vld [vmem:[%s5948_s0 + $0x2c8] sm:$0xff] }
 0x11a   :  { %2890 = vmatmul.mubr.bf16.gmra.mrb[108].mxu0 %v3975_v38  ;;  %2319 = vmatprep.mubr.bf16.mxu1 %v3980_v39  ;;  %v3785_v38 = vcombine.low %v42_v27, %v46_v28  ;;  %v3790_v39 = vcombine.high %v48_v33, %v52_v34  ;;  %v108_v26 = vld [vmem:[%s5948_s0 + $0x2e8] sm:$0xff]  ;;  %v106_v27 = vld [vmem:[%s5948_s0 + $0x2d8] sm:$0xff] }
 0x11b   :  { %2897 = vmatprep.mubr.bf16.mxu0 %v3984_v40  ;;  %v3794_v40 = vcombine.high %v50_v35, %v54_v36  ;;  %v110_v28 = vld [vmem:[%s5948_s0 + $0x2f8] sm:$0xff] }
 0x121   :  { %2320 = vmatmul.mubr.bf16.gmra.mrb[112].mxu1 %v3979_v45  ;;  %v3789_v45 = vcombine.low %v48_v33, %v52_v34  ;;  %v112_v33 = vld [vmem:[%s5948_s0 + $0x308] sm:$0xff] }
 0x122   :  { %2898 = vmatmul.mubr.bf16.gmra.mrb[112].mxu0 %v3983_v46  ;;  %2327 = vmatprep.mubr.bf16.mxu1 %v3988_v47  ;;  %v3793_v46 = vcombine.low %v50_v35, %v54_v36  ;;  %v3798_v47 = vcombine.high %v56_v41, %v60_v42  ;;  %v116_v34 = vld [vmem:[%s5948_s0 + $0x328] sm:$0xff]  ;;  %v114_v35 = vld [vmem:[%s5948_s0 + $0x318] sm:$0xff] }
 0x123   :  { %2905 = vmatprep.mubr.bf16.mxu0 %v3992_v48  ;;  %v3802_v48 = vcombine.high %v58_v43, %v62_v44  ;;  %v118_v36 = vld [vmem:[%s5948_s0 + $0x338] sm:$0xff] }
 0x129   :  { %2328 = vmatmul.mubr.bf16.gmra.mrb[116].mxu1 %v3987_v53  ;;  %v3797_v53 = vcombine.low %v56_v41, %v60_v42  ;;  %v120_v41 = vld [vmem:[%s5948_s0 + $0x348] sm:$0xff] }
 0x12a   :  { %2906 = vmatmul.mubr.bf16.gmra.mrb[116].mxu0 %v3991_v54  ;;  %2335 = vmatprep.mubr.bf16.mxu1 %v3996_v55  ;;  %v3801_v54 = vcombine.low %v58_v43, %v62_v44  ;;  %v3806_v55 = vcombine.high %v64_v49, %v68_v50  ;;  %v124_v42 = vld [vmem:[%s5948_s0 + $0x368] sm:$0xff]  ;;  %v122_v43 = vld [vmem:[%s5948_s0 + $0x358] sm:$0xff] }
 0x12b   :  { %2913 = vmatprep.mubr.bf16.mxu0 %v4000_v56  ;;  %v3810_v56 = vcombine.high %v66_v51, %v70_v52  ;;  %v126_v44 = vld [vmem:[%s5948_s0 + $0x378] sm:$0xff] }
 0x131   :  { %2336 = vmatmul.mubr.bf16.gmra.mrb[120].mxu1 %v3995_v60  ;;  %v3805_v60 = vcombine.low %v64_v49, %v68_v50  ;;  %v128_v49 = vld [vmem:[%s5948_s0 + $0x388] sm:$0xff] }
 0x132   :  { %2914 = vmatmul.mubr.bf16.gmra.mrb[120].mxu0 %v3999_v61  ;;  %2343 = vmatprep.mubr.bf16.mxu1 %v4004_v62  ;;  %v3809_v61 = vcombine.low %v66_v51, %v70_v52  ;;  %v3814_v62 = vcombine.high %v72_v57, %v76_v0  ;;  %v132_v50 = vld [vmem:[%s5948_s0 + $0x3a8] sm:$0xff]  ;;  %v130_v51 = vld [vmem:[%s5948_s0 + $0x398] sm:$0xff] }
 0x133   :  { %2921 = vmatprep.mubr.bf16.mxu0 %v4008_v63  ;;  %v3818_v63 = vcombine.high %v74_v58, %v78_v59  ;;  %v134_v52 = vld [vmem:[%s5948_s0 + $0x3b8] sm:$0xff] }
 0x139   :  { %2344 = vmatmul.mubr.bf16.gmra.mrb[124].mxu1 %v4003_v5  ;;  %v3813_v5 = vcombine.low %v72_v57, %v76_v0  ;;  %v136_v57 = vld [vmem:[%s5948_s0 + $0x3c8] sm:$0xff] }
 0x13a   :  { %2922 = vmatmul.mubr.bf16.gmra.mrb[124].mxu0 %v4007_v6  ;;  %2384 = vmatprep.mubr.bf16.mxu1 %v3758_v7  ;;  %v3817_v6 = vcombine.low %v74_v58, %v78_v59  ;;  %v3822_v7 = vcombine.high %v80_v1, %v84_v2  ;;  %v140_v0 = vld [vmem:[%s5948_s0 + $0x3e8] sm:$0xff]  ;;  %v138_v58 = vld [vmem:[%s5948_s0 + $0x3d8] sm:$0xff] }
 0x13b   :  { %2962 = vmatprep.mubr.bf16.mxu0 %v3762_v8  ;;  %v3826_v8 = vcombine.high %v82_v3, %v86_v4  ;;  %v142_v59 = vld [vmem:[%s5948_s0 + $0x3f8] sm:$0xff] }
 0x141   :  { %2385 = vmatmul.mubr.bf16.vlgmr.msra.gmra.mrb[0].mxu1 %v3757_v13  ;;  %v3821_v13 = vcombine.low %v80_v1, %v84_v2  ;;  %v144_v1 = vld [vmem:[%s5948_s0 + $0x408] sm:$0xff] }
 0x142   :  { %2963 = vmatmul.mubr.bf16.vlgmr.msra.gmra.mrb[0].mxu0 %v3761_v14  ;;  %2392 = vmatprep.mubr.bf16.mxu1 %v3766_v15  ;;  %v3825_v14 = vcombine.low %v82_v3, %v86_v4  ;;  %v3830_v15 = vcombine.high %v88_v9, %v92_v10  ;;  %v148_v2 = vld [vmem:[%s5948_s0 + $0x428] sm:$0xff]  ;;  %v146_v3 = vld [vmem:[%s5948_s0 + $0x418] sm:$0xff] }
 0x143   :  { %2970 = vmatprep.mubr.bf16.mxu0 %v3770_v16  ;;  %v3834_v16 = vcombine.high %v90_v11, %v94_v12  ;;  %v150_v4 = vld [vmem:[%s5948_s0 + $0x438] sm:$0xff] }
 0x149   :  { %2393 = vmatmul.mubr.bf16.gmra.mrb[4].mxu1 %v3765_v21  ;;  %v3829_v21 = vcombine.low %v88_v9, %v92_v10  ;;  %v152_v9 = vld [vmem:[%s5948_s0 + $0x448] sm:$0xff] }
 0x14a   :  { %2971 = vmatmul.mubr.bf16.gmra.mrb[4].mxu0 %v3769_v22  ;;  %2400 = vmatprep.mubr.bf16.mxu1 %v3774_v23  ;;  %v3833_v22 = vcombine.low %v90_v11, %v94_v12  ;;  %v3838_v23 = vcombine.high %v96_v17, %v100_v18  ;;  %v156_v10 = vld [vmem:[%s5948_s0 + $0x468] sm:$0xff]  ;;  %v154_v11 = vld [vmem:[%s5948_s0 + $0x458] sm:$0xff] }
 0x14b   :  { %2978 = vmatprep.mubr.bf16.mxu0 %v3778_v24  ;;  %v3842_v24 = vcombine.high %v98_v19, %v102_v20  ;;  %v158_v12 = vld [vmem:[%s5948_s0 + $0x478] sm:$0xff] }
 0x151   :  { %2401 = vmatmul.mubr.bf16.gmra.mrb[8].mxu1 %v3773_v29  ;;  %v3837_v29 = vcombine.low %v96_v17, %v100_v18  ;;  %v160_v17 = vld [vmem:[%s5948_s0 + $0x488] sm:$0xff] }
 0x152   :  { %2979 = vmatmul.mubr.bf16.gmra.mrb[8].mxu0 %v3777_v30  ;;  %2408 = vmatprep.mubr.bf16.mxu1 %v3782_v31  ;;  %v3841_v30 = vcombine.low %v98_v19, %v102_v20  ;;  %v3846_v31 = vcombine.high %v104_v25, %v108_v26  ;;  %v164_v18 = vld [vmem:[%s5948_s0 + $0x4a8] sm:$0xff]  ;;  %v162_v19 = vld [vmem:[%s5948_s0 + $0x498] sm:$0xff] }
 0x153   :  { %2986 = vmatprep.mubr.bf16.mxu0 %v3786_v32  ;;  %v3850_v32 = vcombine.high %v106_v27, %v110_v28  ;;  %v166_v20 = vld [vmem:[%s5948_s0 + $0x4b8] sm:$0xff] }
 0x159   :  { %2409 = vmatmul.mubr.bf16.gmra.mrb[12].mxu1 %v3781_v37  ;;  %v3845_v37 = vcombine.low %v104_v25, %v108_v26  ;;  %v168_v25 = vld [vmem:[%s5948_s0 + $0x4c8] sm:$0xff] }
 0x15a   :  { %2987 = vmatmul.mubr.bf16.gmra.mrb[12].mxu0 %v3785_v38  ;;  %2416 = vmatprep.mubr.bf16.mxu1 %v3790_v39  ;;  %v3849_v38 = vcombine.low %v106_v27, %v110_v28  ;;  %v3854_v39 = vcombine.high %v112_v33, %v116_v34  ;;  %v172_v26 = vld [vmem:[%s5948_s0 + $0x4e8] sm:$0xff]  ;;  %v170_v27 = vld [vmem:[%s5948_s0 + $0x4d8] sm:$0xff] }
 0x15b   :  { %2994 = vmatprep.mubr.bf16.mxu0 %v3794_v40  ;;  %v3858_v40 = vcombine.high %v114_v35, %v118_v36  ;;  %v174_v28 = vld [vmem:[%s5948_s0 + $0x4f8] sm:$0xff] }
 0x161   :  { %2417 = vmatmul.mubr.bf16.gmra.mrb[16].mxu1 %v3789_v45  ;;  %v3853_v45 = vcombine.low %v112_v33, %v116_v34  ;;  %v176_v33 = vld [vmem:[%s5948_s0 + $0x508] sm:$0xff] }
 0x162   :  { %2995 = vmatmul.mubr.bf16.gmra.mrb[16].mxu0 %v3793_v46  ;;  %2424 = vmatprep.mubr.bf16.mxu1 %v3798_v47  ;;  %v3857_v46 = vcombine.low %v114_v35, %v118_v36  ;;  %v3862_v47 = vcombine.high %v120_v41, %v124_v42  ;;  %v180_v34 = vld [vmem:[%s5948_s0 + $0x528] sm:$0xff]  ;;  %v178_v35 = vld [vmem:[%s5948_s0 + $0x518] sm:$0xff] }
 0x163   :  { %3002 = vmatprep.mubr.bf16.mxu0 %v3802_v48  ;;  %v3866_v48 = vcombine.high %v122_v43, %v126_v44  ;;  %v182_v36 = vld [vmem:[%s5948_s0 + $0x538] sm:$0xff] }
 0x169   :  { %2425 = vmatmul.mubr.bf16.gmra.mrb[20].mxu1 %v3797_v53  ;;  %v3861_v53 = vcombine.low %v120_v41, %v124_v42  ;;  %v184_v41 = vld [vmem:[%s5948_s0 + $0x548] sm:$0xff] }
 0x16a   :  { %3003 = vmatmul.mubr.bf16.gmra.mrb[20].mxu0 %v3801_v54  ;;  %2432 = vmatprep.mubr.bf16.mxu1 %v3806_v55  ;;  %v3865_v54 = vcombine.low %v122_v43, %v126_v44  ;;  %v3870_v55 = vcombine.high %v128_v49, %v132_v50  ;;  %v188_v42 = vld [vmem:[%s5948_s0 + $0x568] sm:$0xff]  ;;  %v186_v43 = vld [vmem:[%s5948_s0 + $0x558] sm:$0xff] }
 0x16b   :  { %3010 = vmatprep.mubr.bf16.mxu0 %v3810_v56  ;;  %v3874_v56 = vcombine.high %v130_v51, %v134_v52  ;;  %v190_v44 = vld [vmem:[%s5948_s0 + $0x578] sm:$0xff] }
 0x171   :  { %2433 = vmatmul.mubr.bf16.gmra.mrb[24].mxu1 %v3805_v60  ;;  %v3869_v60 = vcombine.low %v128_v49, %v132_v50  ;;  %v192_v49 = vld [vmem:[%s5948_s0 + $0x588] sm:$0xff] }
 0x172   :  { %3011 = vmatmul.mubr.bf16.gmra.mrb[24].mxu0 %v3809_v61  ;;  %2440 = vmatprep.mubr.bf16.mxu1 %v3814_v62  ;;  %v3873_v61 = vcombine.low %v130_v51, %v134_v52  ;;  %v3878_v62 = vcombine.high %v136_v57, %v140_v0  ;;  %v196_v50 = vld [vmem:[%s5948_s0 + $0x5a8] sm:$0xff]  ;;  %v194_v51 = vld [vmem:[%s5948_s0 + $0x598] sm:$0xff] }
 0x173   :  { %3018 = vmatprep.mubr.bf16.mxu0 %v3818_v63  ;;  %v3882_v63 = vcombine.high %v138_v58, %v142_v59  ;;  %v198_v52 = vld [vmem:[%s5948_s0 + $0x5b8] sm:$0xff] }
 0x179   :  { %2441 = vmatmul.mubr.bf16.gmra.mrb[28].mxu1 %v3813_v5  ;;  %v3877_v5 = vcombine.low %v136_v57, %v140_v0  ;;  %v200_v57 = vld [vmem:[%s5948_s0 + $0x5c8] sm:$0xff] }
 0x17a   :  { %3019 = vmatmul.mubr.bf16.gmra.mrb[28].mxu0 %v3817_v6  ;;  %2448 = vmatprep.mubr.bf16.mxu1 %v3822_v7  ;;  %v3881_v6 = vcombine.low %v138_v58, %v142_v59  ;;  %v3886_v7 = vcombine.high %v144_v1, %v148_v2  ;;  %v204_v0 = vld [vmem:[%s5948_s0 + $0x5e8] sm:$0xff]  ;;  %v202_v58 = vld [vmem:[%s5948_s0 + $0x5d8] sm:$0xff] }
 0x17b   :  { %3026 = vmatprep.mubr.bf16.mxu0 %v3826_v8  ;;  %v3890_v8 = vcombine.high %v146_v3, %v150_v4  ;;  %v206_v59 = vld [vmem:[%s5948_s0 + $0x5f8] sm:$0xff] }
 0x181   :  { %2449 = vmatmul.mubr.bf16.gmra.mrb[32].mxu1 %v3821_v13  ;;  %v3885_v13 = vcombine.low %v144_v1, %v148_v2  ;;  %v208_v1 = vld [vmem:[%s5948_s0 + $0x608] sm:$0xff] }
 0x182   :  { %3027 = vmatmul.mubr.bf16.gmra.mrb[32].mxu0 %v3825_v14  ;;  %2456 = vmatprep.mubr.bf16.mxu1 %v3830_v15  ;;  %v3889_v14 = vcombine.low %v146_v3, %v150_v4  ;;  %v3894_v15 = vcombine.high %v152_v9, %v156_v10  ;;  %v212_v2 = vld [vmem:[%s5948_s0 + $0x628] sm:$0xff]  ;;  %v210_v3 = vld [vmem:[%s5948_s0 + $0x618] sm:$0xff] }
 0x183   :  { %3034 = vmatprep.mubr.bf16.mxu0 %v3834_v16  ;;  %v3898_v16 = vcombine.high %v154_v11, %v158_v12  ;;  %v214_v4 = vld [vmem:[%s5948_s0 + $0x638] sm:$0xff] }
 0x189   :  { %2457 = vmatmul.mubr.bf16.gmra.mrb[36].mxu1 %v3829_v21  ;;  %v3893_v21 = vcombine.low %v152_v9, %v156_v10  ;;  %v216_v9 = vld [vmem:[%s5948_s0 + $0x648] sm:$0xff] }
 0x18a   :  { %3035 = vmatmul.mubr.bf16.gmra.mrb[36].mxu0 %v3833_v22  ;;  %2464 = vmatprep.mubr.bf16.mxu1 %v3838_v23  ;;  %v3897_v22 = vcombine.low %v154_v11, %v158_v12  ;;  %v3902_v23 = vcombine.high %v160_v17, %v164_v18  ;;  %v220_v10 = vld [vmem:[%s5948_s0 + $0x668] sm:$0xff]  ;;  %v218_v11 = vld [vmem:[%s5948_s0 + $0x658] sm:$0xff] }
 0x18b   :  { %3042 = vmatprep.mubr.bf16.mxu0 %v3842_v24  ;;  %v3906_v24 = vcombine.high %v162_v19, %v166_v20  ;;  %v222_v12 = vld [vmem:[%s5948_s0 + $0x678] sm:$0xff] }
 0x191   :  { %2465 = vmatmul.mubr.bf16.gmra.mrb[40].mxu1 %v3837_v29  ;;  %v3901_v29 = vcombine.low %v160_v17, %v164_v18  ;;  %v224_v17 = vld [vmem:[%s5948_s0 + $0x688] sm:$0xff] }
 0x192   :  { %3043 = vmatmul.mubr.bf16.gmra.mrb[40].mxu0 %v3841_v30  ;;  %2472 = vmatprep.mubr.bf16.mxu1 %v3846_v31  ;;  %v3905_v30 = vcombine.low %v162_v19, %v166_v20  ;;  %v3910_v31 = vcombine.high %v168_v25, %v172_v26  ;;  %v228_v18 = vld [vmem:[%s5948_s0 + $0x6a8] sm:$0xff]  ;;  %v226_v19 = vld [vmem:[%s5948_s0 + $0x698] sm:$0xff] }
 0x193   :  { %3050 = vmatprep.mubr.bf16.mxu0 %v3850_v32  ;;  %v3914_v32 = vcombine.high %v170_v27, %v174_v28  ;;  %v230_v20 = vld [vmem:[%s5948_s0 + $0x6b8] sm:$0xff] }
 0x199   :  { %2473 = vmatmul.mubr.bf16.gmra.mrb[44].mxu1 %v3845_v37  ;;  %v3909_v37 = vcombine.low %v168_v25, %v172_v26  ;;  %v232_v25 = vld [vmem:[%s5948_s0 + $0x6c8] sm:$0xff] }
 0x19a   :  { %3051 = vmatmul.mubr.bf16.gmra.mrb[44].mxu0 %v3849_v38  ;;  %2480 = vmatprep.mubr.bf16.mxu1 %v3854_v39  ;;  %v3913_v38 = vcombine.low %v170_v27, %v174_v28  ;;  %v3918_v39 = vcombine.high %v176_v33, %v180_v34  ;;  %v236_v26 = vld [vmem:[%s5948_s0 + $0x6e8] sm:$0xff]  ;;  %v234_v27 = vld [vmem:[%s5948_s0 + $0x6d8] sm:$0xff] }
 0x19b   :  { %3058 = vmatprep.mubr.bf16.mxu0 %v3858_v40  ;;  %v3922_v40 = vcombine.high %v178_v35, %v182_v36  ;;  %v238_v28 = vld [vmem:[%s5948_s0 + $0x6f8] sm:$0xff] }
 0x1a1   :  { %2481 = vmatmul.mubr.bf16.gmra.mrb[48].mxu1 %v3853_v45  ;;  %v3917_v45 = vcombine.low %v176_v33, %v180_v34  ;;  %v240_v33 = vld [vmem:[%s5948_s0 + $0x708] sm:$0xff] }
 0x1a2   :  { %3059 = vmatmul.mubr.bf16.gmra.mrb[48].mxu0 %v3857_v46  ;;  %2488 = vmatprep.mubr.bf16.mxu1 %v3862_v47  ;;  %v3921_v46 = vcombine.low %v178_v35, %v182_v36  ;;  %v3926_v47 = vcombine.high %v184_v41, %v188_v42  ;;  %v244_v34 = vld [vmem:[%s5948_s0 + $0x728] sm:$0xff]  ;;  %v242_v36 = vld [vmem:[%s5948_s0 + $0x718] sm:$0xff] }
 0x1a3   :  { %3066 = vmatprep.mubr.bf16.mxu0 %v3866_v48  ;;  %v3930_v48 = vcombine.high %v186_v43, %v190_v44 }
 0x1a9   :  { %2489 = vmatmul.mubr.bf16.gmra.mrb[52].mxu1 %v3861_v53  ;;  %v3925_v53 = vcombine.low %v184_v41, %v188_v42 }
 0x1aa   :  { %3067 = vmatmul.mubr.bf16.gmra.mrb[52].mxu0 %v3865_v54  ;;  %2496 = vmatprep.mubr.bf16.mxu1 %v3870_v55  ;;  %v3929_v54 = vcombine.low %v186_v43, %v190_v44  ;;  %v3934_v55 = vcombine.high %v192_v49, %v196_v50  ;;  %v3977_v44 = vcombine.low %v234_v27, %v238_v28 }
 0x1ab   :  { %3074 = vmatprep.mubr.bf16.mxu0 %v3874_v56  ;;  %v3938_v56 = vcombine.high %v194_v51, %v198_v52 }
 0x1b1   :  { %2497 = vmatmul.mubr.bf16.gmra.mrb[56].mxu1 %v3869_v60  ;;  %v3933_v60 = vcombine.low %v192_v49, %v196_v50 }
 0x1b2   :  { %3075 = vmatmul.mubr.bf16.gmra.mrb[56].mxu0 %v3873_v61  ;;  %2504 = vmatprep.mubr.bf16.mxu1 %v3878_v62  ;;  %v3937_v61 = vcombine.low %v194_v51, %v198_v52  ;;  %v3942_v62 = vcombine.high %v200_v57, %v204_v0 }
 0x1b3   :  { %3082 = vmatprep.mubr.bf16.mxu0 %v3882_v63  ;;  %v3946_v63 = vcombine.high %v202_v58, %v206_v59 }
 0x1b9   :  { %2505 = vmatmul.mubr.bf16.gmra.mrb[60].mxu1 %v3877_v5  ;;  %v3941_v5 = vcombine.low %v200_v57, %v204_v0  ;;  %v252_v0 = vld [vmem:[%s5948_s0 + $0x768] sm:$0xff] }
 0x1ba   :  { %3083 = vmatmul.mubr.bf16.gmra.mrb[60].mxu0 %v3881_v6  ;;  %2512 = vmatprep.mubr.bf16.mxu1 %v3886_v7  ;;  %v3945_v6 = vcombine.low %v202_v58, %v206_v59  ;;  %v3950_v7 = vcombine.high %v208_v1, %v212_v2  ;;  %v250_v58 = vld [vmem:[%s5948_s0 + $0x758] sm:$0xff] }
 0x1bb   :  { %3090 = vmatprep.mubr.bf16.mxu0 %v3890_v8  ;;  %v3954_v8 = vcombine.high %v210_v3, %v214_v4  ;;  %v254_v59 = vld [vmem:[%s5948_s0 + $0x778] sm:$0xff] }
 0x1c1   :  { %2513 = vmatmul.mubr.bf16.gmra.mrb[64].mxu1 %v3885_v13  ;;  %v3949_v13 = vcombine.low %v208_v1, %v212_v2 }
 0x1c2   :  { %3091 = vmatmul.mubr.bf16.gmra.mrb[64].mxu0 %v3889_v14  ;;  %2520 = vmatprep.mubr.bf16.mxu1 %v3894_v15  ;;  %v3953_v14 = vcombine.low %v210_v3, %v214_v4  ;;  %v3958_v15 = vcombine.high %v216_v9, %v220_v10 }
 0x1c3   :  { %3098 = vmatprep.mubr.bf16.mxu0 %v3898_v16  ;;  %v3962_v16 = vcombine.high %v218_v11, %v222_v12 }
 0x1c9   :  { %2521 = vmatmul.mubr.bf16.gmra.mrb[68].mxu1 %v3893_v21  ;;  %v3957_v21 = vcombine.low %v216_v9, %v220_v10 }
 0x1ca   :  { %3099 = vmatmul.mubr.bf16.gmra.mrb[68].mxu0 %v3897_v22  ;;  %2528 = vmatprep.mubr.bf16.mxu1 %v3902_v23  ;;  %v3961_v22 = vcombine.low %v218_v11, %v222_v12  ;;  %v3966_v23 = vcombine.high %v224_v17, %v228_v18 }
 0x1cb   :  { %3106 = vmatprep.mubr.bf16.mxu0 %v3906_v24  ;;  %v3970_v24 = vcombine.high %v226_v19, %v230_v20 }
 0x1d1   :  { %2529 = vmatmul.mubr.bf16.gmra.mrb[72].mxu1 %v3901_v29  ;;  %v3965_v29 = vcombine.low %v224_v17, %v228_v18 }
 0x1d2   :  { %3107 = vmatmul.mubr.bf16.gmra.mrb[72].mxu0 %v3905_v30  ;;  %2536 = vmatprep.mubr.bf16.mxu1 %v3910_v31  ;;  %v3969_v30 = vcombine.low %v226_v19, %v230_v20  ;;  %v3974_v31 = vcombine.high %v232_v25, %v236_v26  ;;  %v260_v19 = vld [vmem:[%s5948_s0 + $0x7a8] sm:$0xff]  ;;  %v258_v20 = vld [vmem:[%s5948_s0 + $0x798] sm:$0xff] }
 0x1d3   :  { %3114 = vmatprep.mubr.bf16.mxu0 %v3914_v32  ;;  %v3978_v32 = vcombine.high %v234_v27, %v238_v28  ;;  %v3993_v28 = vcombine.low %v250_v58, %v254_v59 }
 0x1d9   :  { %2537 = vmatmul.mubr.bf16.gmra.mrb[76].mxu1 %v3909_v37  ;;  %v246_v37 = vld [vmem:[%s5948_s0 + $0x738] sm:$0xff] }
 0x1da   :  { %3115 = vmatmul.mubr.bf16.gmra.mrb[76].mxu0 %v3913_v38  ;;  %2544 = vmatprep.mubr.bf16.mxu1 %v3918_v39  ;;  %v3985_v3 = vcombine.low %v242_v36, %v246_v37 }
 0x1db   :  { %3122 = vmatprep.mubr.bf16.mxu0 %v3922_v40  ;;  %v3973_v40 = vcombine.low %v232_v25, %v236_v26 }
 0x1e1   :  { %2545 = vmatmul.mubr.bf16.gmra.mrb[80].mxu1 %v3917_v45  ;;  %v3982_v45 = vcombine.high %v240_v33, %v244_v34 }
 0x1e2   :  { %3123 = vmatmul.mubr.bf16.gmra.mrb[80].mxu0 %v3921_v46  ;;  %2552 = vmatprep.mubr.bf16.mxu1 %v3926_v47 }
 0x1e3   :  { %3130 = vmatprep.mubr.bf16.mxu0 %v3930_v48  ;;  %v3986_v48 = vcombine.high %v242_v36, %v246_v37 }
 0x1e9   :  { %2553 = vmatmul.mubr.bf16.gmra.mrb[84].mxu1 %v3925_v53 }
 0x1ea   :  { %3131 = vmatmul.mubr.bf16.gmra.mrb[84].mxu0 %v3929_v54  ;;  %2560 = vmatprep.mubr.bf16.mxu1 %v3934_v55  ;;  %v248_v55 = vld [vmem:[%s5948_s0 + $0x748] sm:$0xff] }
 0x1eb   :  { %3138 = vmatprep.mubr.bf16.mxu0 %v3938_v56 }
 0x1f1   :  { %2561 = vmatmul.mubr.bf16.gmra.mrb[88].mxu1 %v3933_v60 }
 0x1f2   :  { %3139 = vmatmul.mubr.bf16.gmra.mrb[88].mxu0 %v3937_v61  ;;  %2568 = vmatprep.mubr.bf16.mxu1 %v3942_v62  ;;  %v3981_v62 = vcombine.low %v240_v33, %v244_v34 }
 0x1f3   :  { %3146 = vmatprep.mubr.bf16.mxu0 %v3946_v63 }
 0x1f9   :  { %2569 = vmatmul.mubr.bf16.gmra.mrb[92].mxu1 %v3941_v5 }
 0x1fa   :  { %3147 = vmatmul.mubr.bf16.gmra.mrb[92].mxu0 %v3945_v6  ;;  %2576 = vmatprep.mubr.bf16.mxu1 %v3950_v7  ;;  %v3990_v6 = vcombine.high %v248_v55, %v252_v0  ;;  %v3994_v7 = vcombine.high %v250_v58, %v254_v59 }
 0x1fb   :  { %3154 = vmatprep.mubr.bf16.mxu0 %v3954_v8 }
 0x201   :  { %2577 = vmatmul.mubr.bf16.gmra.mrb[96].mxu1 %v3949_v13 }
 0x202   :  { %3155 = vmatmul.mubr.bf16.gmra.mrb[96].mxu0 %v3953_v14  ;;  %2584 = vmatprep.mubr.bf16.mxu1 %v3958_v15 }
 0x203   :  { %3162 = vmatprep.mubr.bf16.mxu0 %v3962_v16  ;;  %v256_v16 = vld [vmem:[%s5948_s0 + $0x788] sm:$0xff] }
 0x209   :  { %2585 = vmatmul.mubr.bf16.gmra.mrb[100].mxu1 %v3957_v21  ;;  %v262_v21 = vld [vmem:[%s5948_s0 + $0x7b8] sm:$0xff] }
 0x20a   :  { %3163 = vmatmul.mubr.bf16.gmra.mrb[100].mxu0 %v3961_v22  ;;  %2592 = vmatprep.mubr.bf16.mxu1 %v3966_v23 }
 0x20b   :  { %3170 = vmatprep.mubr.bf16.mxu0 %v3970_v24  ;;  %v3989_v24 = vcombine.low %v248_v55, %v252_v0 }
 0x211   :  { %2593 = vmatmul.mubr.bf16.gmra.mrb[104].mxu1 %v3965_v29 }
 0x212   :  { %3171 = vmatmul.mubr.bf16.gmra.mrb[104].mxu0 %v3969_v30  ;;  %2600 = vmatprep.mubr.bf16.mxu1 %v3974_v31  ;;  %v3998_v31 = vcombine.high %v256_v16, %v260_v19 }
 0x213   :  { %3178 = vmatprep.mubr.bf16.mxu0 %v3978_v32  ;;  %v4002_v32 = vcombine.high %v258_v20, %v262_v21 }
 0x214   :  { %v2386_v35 = vpop.f32.mrb[0].mxu1 }
 0x215   :  { %v2964_v38 = vpop.f32.mrb[0].mxu0  ;;  %v2388_v39 = vpop.f32.mrb[1].mxu1 }
 0x216   :  { %v4394_v41 = vadd.f32 %v2964_v38, %v2386_v35  ;;  %v2966_v42 = vpop.f32.mrb[1].mxu0  ;;  %v2389_v43 = vpop.f32.mrb[2].mxu1 }
 0x217   :  { %v2967_v46 = vpop.f32.mrb[2].mxu0  ;;  %v2391_v47 = vpop.f32.mrb[3].mxu1 }
 0x218   :  { %v4395_v49 = vadd.f32 %v2967_v46, %v2389_v43  ;;  %v2969_v50 = vpop.f32.mrb[3].mxu0  ;;  %v3609_v51 = vmul.f32 %v4394_v41, %v4394_v41  ;;  %v270_v46 = vld [vmem:[%s5948_s0 + $0x7f8] sm:$0xff] }
 0x219   :  { %2601 = vmatmul.mubr.bf16.gmra.mrb[108].mxu1 %v3973_v40 }
 0x21a   :  { %v4206_v52 = vpack.c.bf16 %v4395_v49, %v4394_v41  ;;  %v3539_v53 = vadd.f32 %v4395_v49, %v4394_v41  ;;  %v3610_v54 = vmul.f32 %v4395_v49, %v4395_v49  ;;  %3179 = vmatmul.mubr.bf16.gmra.mrb[108].mxu0 %v3977_v44  ;;  %2608 = vmatprep.mubr.bf16.mxu1 %v3982_v45  ;;  %v264_v41 = vld [vmem:[%s5948_s0 + $0x7c8] sm:$0xff]  ;;  %v266_v45 = vld [vmem:[%s5948_s0 + $0x7d8] sm:$0xff] }
 0x21b   :  { %3186 = vmatprep.mubr.bf16.mxu0 %v3986_v48  ;;  %v268_v44 = vld [vmem:[%s5948_s0 + $0x7e8] sm:$0xff]  ;;  %v3997_v49 = vcombine.low %v256_v16, %v260_v19 }
 0x21c   :  { %4207 = vst [vmem:[%s5949_s2] sm:$0xff] %v4206_v52   ;;  %v3673_v56 = vadd.f32 %v3610_v54, %v3609_v51  ;;  %v2394_v57 = vpop.f32.mrb[4].mxu1 }
 0x21d   :  { %v2972_v60 = vpop.f32.mrb[4].mxu0  ;;  %v2396_v61 = vpop.f32.mrb[5].mxu1 }
 0x21e   :  { %v4396_v63 = vadd.f32 %v2972_v60, %v2394_v57  ;;  %v2974_v1 = vpop.f32.mrb[5].mxu0  ;;  %v2397_v2 = vpop.f32.mrb[6].mxu1  ;;  %v4010_v57 = vcombine.high %v266_v45, %v270_v46 }
 0x21f   :  { %v2975_v4 = vpop.f32.mrb[6].mxu0  ;;  %v2399_v5 = vpop.f32.mrb[7].mxu1 }
 0x220   :  { %v3540_v8 = vadd.f32 %v4396_v63, %v3539_v53  ;;  %v3611_v9 = vmul.f32 %v4396_v63, %v4396_v63  ;;  %v4397_v10 = vadd.f32 %v2975_v4, %v2397_v2  ;;  %v2977_v11 = vpop.f32.mrb[7].mxu0  ;;  %v4001_v53 = vcombine.low %v258_v20, %v262_v21 }
 0x221   :  { %2609 = vmatmul.mubr.bf16.gmra.mrb[112].mxu1 %v3981_v62 }
 0x222   :  { %v3674_v12 = vadd.f32 %v3673_v56, %v3611_v9  ;;  %v4211_v13 = vpack.c.bf16 %v4397_v10, %v4396_v63  ;;  %v3541_v14 = vadd.f32 %v4397_v10, %v3540_v8  ;;  %v3612_v15 = vmul.f32 %v4397_v10, %v4397_v10  ;;  %3187 = vmatmul.mubr.bf16.gmra.mrb[112].mxu0 %v3985_v3 }
 0x223   :  { %2616 = vmatprep.mubr.bf16.mxu1 %v3990_v6  ;;  %3194 = vmatprep.mubr.bf16.mxu0 %v3994_v7  ;;  %v4006_v56 = vcombine.high %v264_v41, %v268_v44  ;;  %v4005_v6 = vcombine.low %v264_v41, %v268_v44  ;;  %v4009_v10 = vcombine.low %v266_v45, %v270_v46 }
 0x224   :  { %4363 = vst [vmem:[%s5949_s2 + $0x8] sm:$0xff] %v4211_v13   ;;  %v3675_v17 = vadd.f32 %v3674_v12, %v3612_v15  ;;  %v2402_v18 = vpop.f32.mrb[8].mxu1 }
 0x225   :  { %v2980_v22 = vpop.f32.mrb[8].mxu0  ;;  %v2404_v23 = vpop.f32.mrb[9].mxu1 }
 0x226   :  { %v4398_v25 = vadd.f32 %v2980_v22, %v2402_v18  ;;  %v2982_v26 = vpop.f32.mrb[9].mxu0  ;;  %v2405_v27 = vpop.f32.mrb[10].mxu1 }
 0x227   :  { %v2983_v29 = vpop.f32.mrb[10].mxu0  ;;  %v2407_v30 = vpop.f32.mrb[11].mxu1 }
 0x228   :  { %v3542_v33 = vadd.f32 %v4398_v25, %v3541_v14  ;;  %v3613_v34 = vmul.f32 %v4398_v25, %v4398_v25  ;;  %v4399_v35 = vadd.f32 %v2983_v29, %v2405_v27  ;;  %v2985_v36 = vpop.f32.mrb[11].mxu0 }
 0x229   :  { %2617 = vmatmul.mubr.bf16.gmra.mrb[116].mxu1 %v3989_v24 }
 0x22a   :  { %v3676_v37 = vadd.f32 %v3675_v17, %v3613_v34  ;;  %v4216_v38 = vpack.c.bf16 %v4399_v35, %v4398_v25  ;;  %v3543_v39 = vadd.f32 %v4399_v35, %v3542_v33  ;;  %v3614_v40 = vmul.f32 %v4399_v35, %v4399_v35  ;;  %3195 = vmatmul.mubr.bf16.gmra.mrb[116].mxu0 %v3993_v28 }
 0x22b   :  { %2624 = vmatprep.mubr.bf16.mxu1 %v3998_v31  ;;  %3202 = vmatprep.mubr.bf16.mxu0 %v4002_v32 }
 0x22c   :  { %4364 = vst [vmem:[%s5949_s2 + $0x10] sm:$0xff] %v4216_v38   ;;  %v3677_v42 = vadd.f32 %v3676_v37, %v3614_v40  ;;  %v2410_v43 = vpop.f32.mrb[12].mxu1 }
 0x22d   :  { %v2988_v47 = vpop.f32.mrb[12].mxu0  ;;  %v2412_v48 = vpop.f32.mrb[13].mxu1 }
 0x22e   :  { %v4400_v50 = vadd.f32 %v2988_v47, %v2410_v43  ;;  %v2990_v51 = vpop.f32.mrb[13].mxu0  ;;  %v2413_v52 = vpop.f32.mrb[14].mxu1 }
 0x22f   :  { %v2991_v54 = vpop.f32.mrb[14].mxu0  ;;  %v2415_v55 = vpop.f32.mrb[15].mxu1 }
 0x230   :  { %v3544_v0 = vadd.f32 %v4400_v50, %v3543_v39  ;;  %v3615_v58 = vmul.f32 %v4400_v50, %v4400_v50  ;;  %v4401_v59 = vadd.f32 %v2991_v54, %v2413_v52  ;;  %v2993_v60 = vpop.f32.mrb[15].mxu0 }
 0x231   :  { %2625 = vmatmul.mubr.bf16.gmra.mrb[120].mxu1 %v3997_v49 }
 0x232   :  { %v3678_v61 = vadd.f32 %v3677_v42, %v3615_v58  ;;  %v4221_v62 = vpack.c.bf16 %v4401_v59, %v4400_v50  ;;  %v3545_v63 = vadd.f32 %v4401_v59, %v3544_v0  ;;  %v3616_v1 = vmul.f32 %v4401_v59, %v4401_v59  ;;  %3203 = vmatmul.mubr.bf16.gmra.mrb[120].mxu0 %v4001_v53 }
 0x233   :  { %2632 = vmatprep.mubr.bf16.mxu1 %v4006_v56  ;;  %3210 = vmatprep.mubr.bf16.mxu0 %v4010_v57 }
 0x234   :  { %4365 = vst [vmem:[%s5949_s2 + $0x18] sm:$0xff] %v4221_v62   ;;  %v3679_v2 = vadd.f32 %v3678_v61, %v3616_v1  ;;  %v2418_v3 = vpop.f32.mrb[16].mxu1 }
 0x235   :  { %v2996_v4 = vpop.f32.mrb[16].mxu0  ;;  %v2420_v5 = vpop.f32.mrb[17].mxu1 }
 0x236   :  { %v4402_v7 = vadd.f32 %v2996_v4, %v2418_v3  ;;  %v2998_v8 = vpop.f32.mrb[17].mxu0  ;;  %v2421_v9 = vpop.f32.mrb[18].mxu1 }
 0x237   :  { %v2999_v11 = vpop.f32.mrb[18].mxu0  ;;  %v2423_v12 = vpop.f32.mrb[19].mxu1 }
 0x238   :  { %v3546_v13 = vadd.f32 %v4402_v7, %v3545_v63  ;;  %v3617_v14 = vmul.f32 %v4402_v7, %v4402_v7  ;;  %v4403_v15 = vadd.f32 %v2999_v11, %v2421_v9  ;;  %v3001_v16 = vpop.f32.mrb[19].mxu0 }
 0x239   :  { %2633 = vmatmul.mubr.bf16.gmra.mrb[124].mxu1 %v4005_v6 }
 0x23a   :  { %v3680_v17 = vadd.f32 %v3679_v2, %v3617_v14  ;;  %v4226_v18 = vpack.c.bf16 %v4403_v15, %v4402_v7  ;;  %v3547_v19 = vadd.f32 %v4403_v15, %v3546_v13  ;;  %v3618_v20 = vmul.f32 %v4403_v15, %v4403_v15  ;;  %3211 = vmatmul.mubr.bf16.gmra.mrb[124].mxu0 %v4009_v10 }
 0x23c   :  { %4366 = vst [vmem:[%s5949_s2 + $0x20] sm:$0xff] %v4226_v18   ;;  %v3681_v21 = vadd.f32 %v3680_v17, %v3618_v20  ;;  %v2426_v22 = vpop.f32.mrb[20].mxu1 }
 0x23d   :  { %v3004_v23 = vpop.f32.mrb[20].mxu0  ;;  %v2428_v24 = vpop.f32.mrb[21].mxu1 }
 0x23e   :  { %v4404_v25 = vadd.f32 %v3004_v23, %v2426_v22  ;;  %v3006_v26 = vpop.f32.mrb[21].mxu0  ;;  %v2429_v27 = vpop.f32.mrb[22].mxu1 }
 0x23f   :  { %v3007_v28 = vpop.f32.mrb[22].mxu0  ;;  %v2431_v29 = vpop.f32.mrb[23].mxu1 }
 0x240   :  { %v3548_v30 = vadd.f32 %v4404_v25, %v3547_v19  ;;  %v3619_v31 = vmul.f32 %v4404_v25, %v4404_v25  ;;  %v4405_v32 = vadd.f32 %v3007_v28, %v2429_v27  ;;  %v3009_v33 = vpop.f32.mrb[23].mxu0 }
 0x242   :  { %v3682_v34 = vadd.f32 %v3681_v21, %v3619_v31  ;;  %v4231_v35 = vpack.c.bf16 %v4405_v32, %v4404_v25  ;;  %v3549_v36 = vadd.f32 %v4405_v32, %v3548_v30  ;;  %v3620_v37 = vmul.f32 %v4405_v32, %v4405_v32 }
 0x244   :  { %4367 = vst [vmem:[%s5949_s2 + $0x28] sm:$0xff] %v4231_v35   ;;  %v3683_v38 = vadd.f32 %v3682_v34, %v3620_v37  ;;  %v2434_v39 = vpop.f32.mrb[24].mxu1 }
 0x245   :  { %v3012_v40 = vpop.f32.mrb[24].mxu0  ;;  %v2436_v41 = vpop.f32.mrb[25].mxu1 }
 0x246   :  { %v4406_v42 = vadd.f32 %v3012_v40, %v2434_v39  ;;  %v3014_v43 = vpop.f32.mrb[25].mxu0  ;;  %v2437_v44 = vpop.f32.mrb[26].mxu1 }
 0x247   :  { %v3015_v45 = vpop.f32.mrb[26].mxu0  ;;  %v2439_v46 = vpop.f32.mrb[27].mxu1 }
 0x248   :  { %v3550_v47 = vadd.f32 %v4406_v42, %v3549_v36  ;;  %v3621_v48 = vmul.f32 %v4406_v42, %v4406_v42  ;;  %v4407_v49 = vadd.f32 %v3015_v45, %v2437_v44  ;;  %v3017_v50 = vpop.f32.mrb[27].mxu0 }
 0x24a   :  { %v3684_v51 = vadd.f32 %v3683_v38, %v3621_v48  ;;  %v4236_v52 = vpack.c.bf16 %v4407_v49, %v4406_v42  ;;  %v3551_v53 = vadd.f32 %v4407_v49, %v3550_v47  ;;  %v3622_v54 = vmul.f32 %v4407_v49, %v4407_v49 }
 0x24c   :  { %4368 = vst [vmem:[%s5949_s2 + $0x30] sm:$0xff] %v4236_v52   ;;  %v3685_v55 = vadd.f32 %v3684_v51, %v3622_v54  ;;  %v2442_v56 = vpop.f32.mrb[28].mxu1 }
 0x24d   :  { %v3020_v57 = vpop.f32.mrb[28].mxu0  ;;  %v2444_v0 = vpop.f32.mrb[29].mxu1 }
 0x24e   :  { %v4408_v58 = vadd.f32 %v3020_v57, %v2442_v56  ;;  %v3022_v59 = vpop.f32.mrb[29].mxu0  ;;  %v2445_v60 = vpop.f32.mrb[30].mxu1 }
 0x24f   :  { %v3023_v61 = vpop.f32.mrb[30].mxu0  ;;  %v2447_v62 = vpop.f32.mrb[31].mxu1 }
 0x250   :  { %v3552_v63 = vadd.f32 %v4408_v58, %v3551_v53  ;;  %v3623_v1 = vmul.f32 %v4408_v58, %v4408_v58  ;;  %v4409_v2 = vadd.f32 %v3023_v61, %v2445_v60  ;;  %v3025_v3 = vpop.f32.mrb[31].mxu0 }
 0x252   :  { %v3686_v4 = vadd.f32 %v3685_v55, %v3623_v1  ;;  %v4241_v5 = vpack.c.bf16 %v4409_v2, %v4408_v58  ;;  %v3553_v6 = vadd.f32 %v4409_v2, %v3552_v63  ;;  %v3624_v7 = vmul.f32 %v4409_v2, %v4409_v2 }
 0x254   :  { %4369 = vst [vmem:[%s5949_s2 + $0x38] sm:$0xff] %v4241_v5   ;;  %v3687_v8 = vadd.f32 %v3686_v4, %v3624_v7  ;;  %v2450_v9 = vpop.f32.mrb[32].mxu1 }
 0x255   :  { %v3028_v10 = vpop.f32.mrb[32].mxu0  ;;  %v2452_v11 = vpop.f32.mrb[33].mxu1 }
 0x256   :  { %v4410_v12 = vadd.f32 %v3028_v10, %v2450_v9  ;;  %v3030_v13 = vpop.f32.mrb[33].mxu0  ;;  %v2453_v14 = vpop.f32.mrb[34].mxu1 }
 0x257   :  { %v3031_v15 = vpop.f32.mrb[34].mxu0  ;;  %v2455_v16 = vpop.f32.mrb[35].mxu1 }
 0x258   :  { %v3554_v17 = vadd.f32 %v4410_v12, %v3553_v6  ;;  %v3625_v18 = vmul.f32 %v4410_v12, %v4410_v12  ;;  %v4411_v19 = vadd.f32 %v3031_v15, %v2453_v14  ;;  %v3033_v20 = vpop.f32.mrb[35].mxu0 }
 0x25a   :  { %v3688_v21 = vadd.f32 %v3687_v8, %v3625_v18  ;;  %v4246_v22 = vpack.c.bf16 %v4411_v19, %v4410_v12  ;;  %v3555_v23 = vadd.f32 %v4411_v19, %v3554_v17  ;;  %v3626_v24 = vmul.f32 %v4411_v19, %v4411_v19 }
 0x25c   :  { %4370 = vst [vmem:[%s5949_s2 + $0x40] sm:$0xff] %v4246_v22   ;;  %v3689_v25 = vadd.f32 %v3688_v21, %v3626_v24  ;;  %v2458_v26 = vpop.f32.mrb[36].mxu1 }
 0x25d   :  { %v3036_v27 = vpop.f32.mrb[36].mxu0  ;;  %v2460_v28 = vpop.f32.mrb[37].mxu1 }
 0x25e   :  { %v4412_v29 = vadd.f32 %v3036_v27, %v2458_v26  ;;  %v3038_v30 = vpop.f32.mrb[37].mxu0  ;;  %v2461_v31 = vpop.f32.mrb[38].mxu1 }
 0x25f   :  { %v3039_v32 = vpop.f32.mrb[38].mxu0  ;;  %v2463_v33 = vpop.f32.mrb[39].mxu1 }
 0x260   :  { %v3556_v34 = vadd.f32 %v4412_v29, %v3555_v23  ;;  %v3627_v35 = vmul.f32 %v4412_v29, %v4412_v29  ;;  %v4413_v36 = vadd.f32 %v3039_v32, %v2461_v31  ;;  %v3041_v37 = vpop.f32.mrb[39].mxu0 }
 0x262   :  { %v3690_v38 = vadd.f32 %v3689_v25, %v3627_v35  ;;  %v4251_v39 = vpack.c.bf16 %v4413_v36, %v4412_v29  ;;  %v3557_v40 = vadd.f32 %v4413_v36, %v3556_v34  ;;  %v3628_v41 = vmul.f32 %v4413_v36, %v4413_v36 }
 0x264   :  { %4371 = vst [vmem:[%s5949_s2 + $0x48] sm:$0xff] %v4251_v39   ;;  %v3691_v42 = vadd.f32 %v3690_v38, %v3628_v41  ;;  %v2466_v43 = vpop.f32.mrb[40].mxu1 }
 0x265   :  { %v3044_v44 = vpop.f32.mrb[40].mxu0  ;;  %v2468_v45 = vpop.f32.mrb[41].mxu1 }
 0x266   :  { %v4414_v46 = vadd.f32 %v3044_v44, %v2466_v43  ;;  %v3046_v47 = vpop.f32.mrb[41].mxu0  ;;  %v2469_v48 = vpop.f32.mrb[42].mxu1 }
 0x267   :  { %v3047_v49 = vpop.f32.mrb[42].mxu0  ;;  %v2471_v50 = vpop.f32.mrb[43].mxu1 }
 0x268   :  { %v3558_v51 = vadd.f32 %v4414_v46, %v3557_v40  ;;  %v3629_v52 = vmul.f32 %v4414_v46, %v4414_v46  ;;  %v4415_v53 = vadd.f32 %v3047_v49, %v2469_v48  ;;  %v3049_v54 = vpop.f32.mrb[43].mxu0 }
 0x26a   :  { %v3692_v55 = vadd.f32 %v3691_v42, %v3629_v52  ;;  %v4256_v56 = vpack.c.bf16 %v4415_v53, %v4414_v46  ;;  %v3559_v57 = vadd.f32 %v4415_v53, %v3558_v51  ;;  %v3630_v0 = vmul.f32 %v4415_v53, %v4415_v53 }
 0x26c   :  { %4372 = vst [vmem:[%s5949_s2 + $0x50] sm:$0xff] %v4256_v56   ;;  %v3693_v58 = vadd.f32 %v3692_v55, %v3630_v0  ;;  %v2474_v59 = vpop.f32.mrb[44].mxu1 }
 0x26d   :  { %v3052_v60 = vpop.f32.mrb[44].mxu0  ;;  %v2476_v61 = vpop.f32.mrb[45].mxu1 }
 0x26e   :  { %v4416_v62 = vadd.f32 %v3052_v60, %v2474_v59  ;;  %v3054_v63 = vpop.f32.mrb[45].mxu0  ;;  %v2477_v1 = vpop.f32.mrb[46].mxu1 }
 0x26f   :  { %v3055_v2 = vpop.f32.mrb[46].mxu0  ;;  %v2479_v3 = vpop.f32.mrb[47].mxu1 }
 0x270   :  { %v3560_v4 = vadd.f32 %v4416_v62, %v3559_v57  ;;  %v3631_v5 = vmul.f32 %v4416_v62, %v4416_v62  ;;  %v4417_v6 = vadd.f32 %v3055_v2, %v2477_v1  ;;  %v3057_v7 = vpop.f32.mrb[47].mxu0 }
 0x272   :  { %v3694_v8 = vadd.f32 %v3693_v58, %v3631_v5  ;;  %v4261_v9 = vpack.c.bf16 %v4417_v6, %v4416_v62  ;;  %v3561_v10 = vadd.f32 %v4417_v6, %v3560_v4  ;;  %v3632_v11 = vmul.f32 %v4417_v6, %v4417_v6 }
 0x274   :  { %4373 = vst [vmem:[%s5949_s2 + $0x58] sm:$0xff] %v4261_v9   ;;  %v3695_v12 = vadd.f32 %v3694_v8, %v3632_v11  ;;  %v2482_v13 = vpop.f32.mrb[48].mxu1 }
 0x275   :  { %v3060_v14 = vpop.f32.mrb[48].mxu0  ;;  %v2484_v15 = vpop.f32.mrb[49].mxu1 }
 0x276   :  { %v4418_v16 = vadd.f32 %v3060_v14, %v2482_v13  ;;  %v3062_v17 = vpop.f32.mrb[49].mxu0  ;;  %v2485_v18 = vpop.f32.mrb[50].mxu1 }
 0x277   :  { %v3063_v19 = vpop.f32.mrb[50].mxu0  ;;  %v2487_v20 = vpop.f32.mrb[51].mxu1 }
 0x278   :  { %v3562_v21 = vadd.f32 %v4418_v16, %v3561_v10  ;;  %v3633_v22 = vmul.f32 %v4418_v16, %v4418_v16  ;;  %v4419_v23 = vadd.f32 %v3063_v19, %v2485_v18  ;;  %v3065_v24 = vpop.f32.mrb[51].mxu0 }
 0x27a   :  { %v3696_v25 = vadd.f32 %v3695_v12, %v3633_v22  ;;  %v4266_v26 = vpack.c.bf16 %v4419_v23, %v4418_v16  ;;  %v3563_v27 = vadd.f32 %v4419_v23, %v3562_v21  ;;  %v3634_v28 = vmul.f32 %v4419_v23, %v4419_v23 }
 0x27c   :  { %4374 = vst [vmem:[%s5949_s2 + $0x60] sm:$0xff] %v4266_v26   ;;  %v3697_v29 = vadd.f32 %v3696_v25, %v3634_v28  ;;  %v2490_v30 = vpop.f32.mrb[52].mxu1 }
 0x27d   :  { %v3068_v31 = vpop.f32.mrb[52].mxu0  ;;  %v2492_v32 = vpop.f32.mrb[53].mxu1 }
 0x27e   :  { %v4420_v33 = vadd.f32 %v3068_v31, %v2490_v30  ;;  %v3070_v34 = vpop.f32.mrb[53].mxu0  ;;  %v2493_v35 = vpop.f32.mrb[54].mxu1 }
 0x27f   :  { %v3071_v36 = vpop.f32.mrb[54].mxu0  ;;  %v2495_v37 = vpop.f32.mrb[55].mxu1 }
 0x280   :  { %v3564_v38 = vadd.f32 %v4420_v33, %v3563_v27  ;;  %v3635_v39 = vmul.f32 %v4420_v33, %v4420_v33  ;;  %v4421_v40 = vadd.f32 %v3071_v36, %v2493_v35  ;;  %v3073_v41 = vpop.f32.mrb[55].mxu0 }
 0x282   :  { %v3698_v42 = vadd.f32 %v3697_v29, %v3635_v39  ;;  %v4271_v43 = vpack.c.bf16 %v4421_v40, %v4420_v33  ;;  %v3565_v44 = vadd.f32 %v4421_v40, %v3564_v38  ;;  %v3636_v45 = vmul.f32 %v4421_v40, %v4421_v40 }
 0x284   :  { %4375 = vst [vmem:[%s5949_s2 + $0x68] sm:$0xff] %v4271_v43   ;;  %v3699_v46 = vadd.f32 %v3698_v42, %v3636_v45  ;;  %v2498_v47 = vpop.f32.mrb[56].mxu1 }
 0x285   :  { %v3076_v48 = vpop.f32.mrb[56].mxu0  ;;  %v2500_v49 = vpop.f32.mrb[57].mxu1 }
 0x286   :  { %v4422_v50 = vadd.f32 %v3076_v48, %v2498_v47  ;;  %v3078_v51 = vpop.f32.mrb[57].mxu0  ;;  %v2501_v52 = vpop.f32.mrb[58].mxu1 }
 0x287   :  { %v3079_v53 = vpop.f32.mrb[58].mxu0  ;;  %v2503_v54 = vpop.f32.mrb[59].mxu1 }
 0x288   :  { %v3566_v55 = vadd.f32 %v4422_v50, %v3565_v44  ;;  %v3637_v56 = vmul.f32 %v4422_v50, %v4422_v50  ;;  %v4423_v57 = vadd.f32 %v3079_v53, %v2501_v52  ;;  %v3081_v0 = vpop.f32.mrb[59].mxu0 }
 0x28a   :  { %v3700_v58 = vadd.f32 %v3699_v46, %v3637_v56  ;;  %v4276_v59 = vpack.c.bf16 %v4423_v57, %v4422_v50  ;;  %v3567_v60 = vadd.f32 %v4423_v57, %v3566_v55  ;;  %v3638_v61 = vmul.f32 %v4423_v57, %v4423_v57 }
 0x28c   :  { %4376 = vst [vmem:[%s5949_s2 + $0x70] sm:$0xff] %v4276_v59   ;;  %v3701_v62 = vadd.f32 %v3700_v58, %v3638_v61  ;;  %v2506_v63 = vpop.f32.mrb[60].mxu1 }
 0x28d   :  { %v3084_v1 = vpop.f32.mrb[60].mxu0  ;;  %v2508_v2 = vpop.f32.mrb[61].mxu1 }
 0x28e   :  { %v4424_v3 = vadd.f32 %v3084_v1, %v2506_v63  ;;  %v3086_v4 = vpop.f32.mrb[61].mxu0  ;;  %v2509_v5 = vpop.f32.mrb[62].mxu1 }
 0x28f   :  { %v3087_v6 = vpop.f32.mrb[62].mxu0  ;;  %v2511_v7 = vpop.f32.mrb[63].mxu1 }
 0x290   :  { %v3568_v8 = vadd.f32 %v4424_v3, %v3567_v60  ;;  %v3639_v9 = vmul.f32 %v4424_v3, %v4424_v3  ;;  %v4425_v10 = vadd.f32 %v3087_v6, %v2509_v5  ;;  %v3089_v11 = vpop.f32.mrb[63].mxu0 }
 0x292   :  { %v3702_v12 = vadd.f32 %v3701_v62, %v3639_v9  ;;  %v4281_v13 = vpack.c.bf16 %v4425_v10, %v4424_v3  ;;  %v3569_v14 = vadd.f32 %v4425_v10, %v3568_v8  ;;  %v3640_v15 = vmul.f32 %v4425_v10, %v4425_v10 }
 0x294   :  { %4377 = vst [vmem:[%s5949_s2 + $0x78] sm:$0xff] %v4281_v13   ;;  %v3703_v16 = vadd.f32 %v3702_v12, %v3640_v15  ;;  %v2514_v17 = vpop.f32.mrb[64].mxu1 }
 0x295   :  { %v3092_v18 = vpop.f32.mrb[64].mxu0  ;;  %v2516_v19 = vpop.f32.mrb[65].mxu1 }
 0x296   :  { %v4426_v20 = vadd.f32 %v3092_v18, %v2514_v17  ;;  %v3094_v21 = vpop.f32.mrb[65].mxu0  ;;  %v2517_v22 = vpop.f32.mrb[66].mxu1 }
 0x297   :  { %v3095_v23 = vpop.f32.mrb[66].mxu0  ;;  %v2519_v24 = vpop.f32.mrb[67].mxu1 }
 0x298   :  { %v3570_v25 = vadd.f32 %v4426_v20, %v3569_v14  ;;  %v3641_v26 = vmul.f32 %v4426_v20, %v4426_v20  ;;  %v4427_v27 = vadd.f32 %v3095_v23, %v2517_v22  ;;  %v3097_v28 = vpop.f32.mrb[67].mxu0 }
 0x29a   :  { %v3704_v29 = vadd.f32 %v3703_v16, %v3641_v26  ;;  %v4286_v30 = vpack.c.bf16 %v4427_v27, %v4426_v20  ;;  %v3571_v31 = vadd.f32 %v4427_v27, %v3570_v25  ;;  %v3642_v32 = vmul.f32 %v4427_v27, %v4427_v27 }
 0x29c   :  { %4378 = vst [vmem:[%s5949_s2 + $0x80] sm:$0xff] %v4286_v30   ;;  %v3705_v33 = vadd.f32 %v3704_v29, %v3642_v32  ;;  %v2522_v34 = vpop.f32.mrb[68].mxu1 }
 0x29d   :  { %v3100_v35 = vpop.f32.mrb[68].mxu0  ;;  %v2524_v36 = vpop.f32.mrb[69].mxu1 }
 0x29e   :  { %v4428_v37 = vadd.f32 %v3100_v35, %v2522_v34  ;;  %v3102_v38 = vpop.f32.mrb[69].mxu0  ;;  %v2525_v39 = vpop.f32.mrb[70].mxu1 }
 0x29f   :  { %v3103_v40 = vpop.f32.mrb[70].mxu0  ;;  %v2527_v41 = vpop.f32.mrb[71].mxu1 }
 0x2a0   :  { %v3572_v42 = vadd.f32 %v4428_v37, %v3571_v31  ;;  %v3643_v43 = vmul.f32 %v4428_v37, %v4428_v37  ;;  %v4429_v44 = vadd.f32 %v3103_v40, %v2525_v39  ;;  %v3105_v45 = vpop.f32.mrb[71].mxu0 }
 0x2a2   :  { %v3706_v46 = vadd.f32 %v3705_v33, %v3643_v43  ;;  %v4291_v47 = vpack.c.bf16 %v4429_v44, %v4428_v37  ;;  %v3573_v48 = vadd.f32 %v4429_v44, %v3572_v42  ;;  %v3644_v49 = vmul.f32 %v4429_v44, %v4429_v44 }
 0x2a4   :  { %4379 = vst [vmem:[%s5949_s2 + $0x88] sm:$0xff] %v4291_v47   ;;  %v3707_v50 = vadd.f32 %v3706_v46, %v3644_v49  ;;  %v2530_v51 = vpop.f32.mrb[72].mxu1 }
 0x2a5   :  { %v3108_v52 = vpop.f32.mrb[72].mxu0  ;;  %v2532_v53 = vpop.f32.mrb[73].mxu1 }
 0x2a6   :  { %v4430_v54 = vadd.f32 %v3108_v52, %v2530_v51  ;;  %v3110_v55 = vpop.f32.mrb[73].mxu0  ;;  %v2533_v56 = vpop.f32.mrb[74].mxu1 }
 0x2a7   :  { %v3111_v57 = vpop.f32.mrb[74].mxu0  ;;  %v2535_v0 = vpop.f32.mrb[75].mxu1 }
 0x2a8   :  { %v3574_v58 = vadd.f32 %v4430_v54, %v3573_v48  ;;  %v3645_v59 = vmul.f32 %v4430_v54, %v4430_v54  ;;  %v4431_v60 = vadd.f32 %v3111_v57, %v2533_v56  ;;  %v3113_v61 = vpop.f32.mrb[75].mxu0 }
 0x2aa   :  { %v3708_v62 = vadd.f32 %v3707_v50, %v3645_v59  ;;  %v4296_v63 = vpack.c.bf16 %v4431_v60, %v4430_v54  ;;  %v3575_v1 = vadd.f32 %v4431_v60, %v3574_v58  ;;  %v3646_v2 = vmul.f32 %v4431_v60, %v4431_v60 }
 0x2ac   :  { %4380 = vst [vmem:[%s5949_s2 + $0x90] sm:$0xff] %v4296_v63   ;;  %v3709_v3 = vadd.f32 %v3708_v62, %v3646_v2  ;;  %v2538_v4 = vpop.f32.mrb[76].mxu1 }
 0x2ad   :  { %v3116_v5 = vpop.f32.mrb[76].mxu0  ;;  %v2540_v6 = vpop.f32.mrb[77].mxu1 }
 0x2ae   :  { %v4432_v7 = vadd.f32 %v3116_v5, %v2538_v4  ;;  %v3118_v8 = vpop.f32.mrb[77].mxu0  ;;  %v2541_v9 = vpop.f32.mrb[78].mxu1 }
 0x2af   :  { %v3119_v10 = vpop.f32.mrb[78].mxu0  ;;  %v2543_v11 = vpop.f32.mrb[79].mxu1 }
 0x2b0   :  { %v3576_v12 = vadd.f32 %v4432_v7, %v3575_v1  ;;  %v3647_v13 = vmul.f32 %v4432_v7, %v4432_v7  ;;  %v4433_v14 = vadd.f32 %v3119_v10, %v2541_v9  ;;  %v3121_v15 = vpop.f32.mrb[79].mxu0 }
 0x2b2   :  { %v3710_v16 = vadd.f32 %v3709_v3, %v3647_v13  ;;  %v4301_v17 = vpack.c.bf16 %v4433_v14, %v4432_v7  ;;  %v3577_v18 = vadd.f32 %v4433_v14, %v3576_v12  ;;  %v3648_v19 = vmul.f32 %v4433_v14, %v4433_v14 }
 0x2b4   :  { %4381 = vst [vmem:[%s5949_s2 + $0x98] sm:$0xff] %v4301_v17   ;;  %v3711_v20 = vadd.f32 %v3710_v16, %v3648_v19  ;;  %v2546_v21 = vpop.f32.mrb[80].mxu1 }
 0x2b5   :  { %v3124_v22 = vpop.f32.mrb[80].mxu0  ;;  %v2548_v23 = vpop.f32.mrb[81].mxu1 }
 0x2b6   :  { %v4434_v24 = vadd.f32 %v3124_v22, %v2546_v21  ;;  %v3126_v25 = vpop.f32.mrb[81].mxu0  ;;  %v2549_v26 = vpop.f32.mrb[82].mxu1 }
 0x2b7   :  { %v3127_v27 = vpop.f32.mrb[82].mxu0  ;;  %v2551_v28 = vpop.f32.mrb[83].mxu1 }
 0x2b8   :  { %v3578_v29 = vadd.f32 %v4434_v24, %v3577_v18  ;;  %v3649_v30 = vmul.f32 %v4434_v24, %v4434_v24  ;;  %v4435_v31 = vadd.f32 %v3127_v27, %v2549_v26  ;;  %v3129_v32 = vpop.f32.mrb[83].mxu0 }
 0x2ba   :  { %v3712_v33 = vadd.f32 %v3711_v20, %v3649_v30  ;;  %v4306_v34 = vpack.c.bf16 %v4435_v31, %v4434_v24  ;;  %v3579_v35 = vadd.f32 %v4435_v31, %v3578_v29  ;;  %v3650_v36 = vmul.f32 %v4435_v31, %v4435_v31 }
 0x2bc   :  { %4382 = vst [vmem:[%s5949_s2 + $0xa0] sm:$0xff] %v4306_v34   ;;  %v3713_v37 = vadd.f32 %v3712_v33, %v3650_v36  ;;  %v2554_v38 = vpop.f32.mrb[84].mxu1 }
 0x2bd   :  { %v3132_v39 = vpop.f32.mrb[84].mxu0  ;;  %v2556_v40 = vpop.f32.mrb[85].mxu1 }
 0x2be   :  { %v4436_v41 = vadd.f32 %v3132_v39, %v2554_v38  ;;  %v3134_v42 = vpop.f32.mrb[85].mxu0  ;;  %v2557_v43 = vpop.f32.mrb[86].mxu1 }
 0x2bf   :  { %v3135_v44 = vpop.f32.mrb[86].mxu0  ;;  %v2559_v45 = vpop.f32.mrb[87].mxu1 }
 0x2c0   :  { %v3580_v46 = vadd.f32 %v4436_v41, %v3579_v35  ;;  %v3651_v47 = vmul.f32 %v4436_v41, %v4436_v41  ;;  %v4437_v48 = vadd.f32 %v3135_v44, %v2557_v43  ;;  %v3137_v49 = vpop.f32.mrb[87].mxu0 }
 0x2c2   :  { %v3714_v50 = vadd.f32 %v3713_v37, %v3651_v47  ;;  %v4311_v51 = vpack.c.bf16 %v4437_v48, %v4436_v41  ;;  %v3581_v52 = vadd.f32 %v4437_v48, %v3580_v46  ;;  %v3652_v53 = vmul.f32 %v4437_v48, %v4437_v48 }
 0x2c4   :  { %4383 = vst [vmem:[%s5949_s2 + $0xa8] sm:$0xff] %v4311_v51   ;;  %v3715_v54 = vadd.f32 %v3714_v50, %v3652_v53  ;;  %v2562_v55 = vpop.f32.mrb[88].mxu1 }
 0x2c5   :  { %v3140_v56 = vpop.f32.mrb[88].mxu0  ;;  %v2564_v57 = vpop.f32.mrb[89].mxu1 }
 0x2c6   :  { %v4438_v0 = vadd.f32 %v3140_v56, %v2562_v55  ;;  %v3142_v58 = vpop.f32.mrb[89].mxu0  ;;  %v2565_v59 = vpop.f32.mrb[90].mxu1 }
 0x2c7   :  { %v3143_v60 = vpop.f32.mrb[90].mxu0  ;;  %v2567_v61 = vpop.f32.mrb[91].mxu1 }
 0x2c8   :  { %v3582_v62 = vadd.f32 %v4438_v0, %v3581_v52  ;;  %v3653_v63 = vmul.f32 %v4438_v0, %v4438_v0  ;;  %v4439_v1 = vadd.f32 %v3143_v60, %v2565_v59  ;;  %v3145_v2 = vpop.f32.mrb[91].mxu0 }
 0x2ca   :  { %v3716_v3 = vadd.f32 %v3715_v54, %v3653_v63  ;;  %v4316_v4 = vpack.c.bf16 %v4439_v1, %v4438_v0  ;;  %v3583_v5 = vadd.f32 %v4439_v1, %v3582_v62  ;;  %v3654_v6 = vmul.f32 %v4439_v1, %v4439_v1 }
 0x2cc   :  { %4384 = vst [vmem:[%s5949_s2 + $0xb0] sm:$0xff] %v4316_v4   ;;  %v3717_v7 = vadd.f32 %v3716_v3, %v3654_v6  ;;  %v2570_v8 = vpop.f32.mrb[92].mxu1 }
 0x2cd   :  { %v3148_v9 = vpop.f32.mrb[92].mxu0  ;;  %v2572_v10 = vpop.f32.mrb[93].mxu1 }
 0x2ce   :  { %v4440_v11 = vadd.f32 %v3148_v9, %v2570_v8  ;;  %v3150_v12 = vpop.f32.mrb[93].mxu0  ;;  %v2573_v13 = vpop.f32.mrb[94].mxu1 }
 0x2cf   :  { %v3151_v14 = vpop.f32.mrb[94].mxu0  ;;  %v2575_v15 = vpop.f32.mrb[95].mxu1 }
 0x2d0   :  { %v3584_v16 = vadd.f32 %v4440_v11, %v3583_v5  ;;  %v3655_v17 = vmul.f32 %v4440_v11, %v4440_v11  ;;  %v4441_v18 = vadd.f32 %v3151_v14, %v2573_v13  ;;  %v3153_v19 = vpop.f32.mrb[95].mxu0 }
 0x2d2   :  { %v3718_v20 = vadd.f32 %v3717_v7, %v3655_v17  ;;  %v4321_v21 = vpack.c.bf16 %v4441_v18, %v4440_v11  ;;  %v3585_v22 = vadd.f32 %v4441_v18, %v3584_v16  ;;  %v3656_v23 = vmul.f32 %v4441_v18, %v4441_v18 }
 0x2d4   :  { %4385 = vst [vmem:[%s5949_s2 + $0xb8] sm:$0xff] %v4321_v21   ;;  %v3719_v24 = vadd.f32 %v3718_v20, %v3656_v23  ;;  %v2578_v25 = vpop.f32.mrb[96].mxu1 }
 0x2d5   :  { %v3156_v26 = vpop.f32.mrb[96].mxu0  ;;  %v2580_v27 = vpop.f32.mrb[97].mxu1 }
 0x2d6   :  { %v4442_v28 = vadd.f32 %v3156_v26, %v2578_v25  ;;  %v3158_v29 = vpop.f32.mrb[97].mxu0  ;;  %v2581_v30 = vpop.f32.mrb[98].mxu1 }
 0x2d7   :  { %v3159_v31 = vpop.f32.mrb[98].mxu0  ;;  %v2583_v32 = vpop.f32.mrb[99].mxu1 }
 0x2d8   :  { %v3586_v33 = vadd.f32 %v4442_v28, %v3585_v22  ;;  %v3657_v34 = vmul.f32 %v4442_v28, %v4442_v28  ;;  %v4443_v35 = vadd.f32 %v3159_v31, %v2581_v30  ;;  %v3161_v36 = vpop.f32.mrb[99].mxu0 }
 0x2da   :  { %v3720_v37 = vadd.f32 %v3719_v24, %v3657_v34  ;;  %v4326_v38 = vpack.c.bf16 %v4443_v35, %v4442_v28  ;;  %v3587_v39 = vadd.f32 %v4443_v35, %v3586_v33  ;;  %v3658_v40 = vmul.f32 %v4443_v35, %v4443_v35 }
 0x2dc   :  { %4386 = vst [vmem:[%s5949_s2 + $0xc0] sm:$0xff] %v4326_v38   ;;  %v3721_v41 = vadd.f32 %v3720_v37, %v3658_v40  ;;  %v2586_v42 = vpop.f32.mrb[100].mxu1 }
 0x2dd   :  { %v3164_v43 = vpop.f32.mrb[100].mxu0  ;;  %v2588_v44 = vpop.f32.mrb[101].mxu1 }
 0x2de   :  { %v4444_v45 = vadd.f32 %v3164_v43, %v2586_v42  ;;  %v3166_v46 = vpop.f32.mrb[101].mxu0  ;;  %v2589_v47 = vpop.f32.mrb[102].mxu1 }
 0x2df   :  { %v3167_v48 = vpop.f32.mrb[102].mxu0  ;;  %v2591_v49 = vpop.f32.mrb[103].mxu1 }
 0x2e0   :  { %v3588_v50 = vadd.f32 %v4444_v45, %v3587_v39  ;;  %v3659_v51 = vmul.f32 %v4444_v45, %v4444_v45  ;;  %v4445_v52 = vadd.f32 %v3167_v48, %v2589_v47  ;;  %v3169_v53 = vpop.f32.mrb[103].mxu0 }
 0x2e2   :  { %v3722_v54 = vadd.f32 %v3721_v41, %v3659_v51  ;;  %v4331_v55 = vpack.c.bf16 %v4445_v52, %v4444_v45  ;;  %v3589_v56 = vadd.f32 %v4445_v52, %v3588_v50  ;;  %v3660_v57 = vmul.f32 %v4445_v52, %v4445_v52 }
 0x2e4   :  { %4387 = vst [vmem:[%s5949_s2 + $0xc8] sm:$0xff] %v4331_v55   ;;  %v3723_v0 = vadd.f32 %v3722_v54, %v3660_v57  ;;  %v2594_v58 = vpop.f32.mrb[104].mxu1 }
 0x2e5   :  { %v3172_v59 = vpop.f32.mrb[104].mxu0  ;;  %v2596_v60 = vpop.f32.mrb[105].mxu1 }
 0x2e6   :  { %v4446_v61 = vadd.f32 %v3172_v59, %v2594_v58  ;;  %v3174_v62 = vpop.f32.mrb[105].mxu0  ;;  %v2597_v63 = vpop.f32.mrb[106].mxu1 }
 0x2e7   :  { %v3175_v1 = vpop.f32.mrb[106].mxu0  ;;  %v2599_v2 = vpop.f32.mrb[107].mxu1 }
 0x2e8   :  { %v3590_v3 = vadd.f32 %v4446_v61, %v3589_v56  ;;  %v3661_v4 = vmul.f32 %v4446_v61, %v4446_v61  ;;  %v4447_v5 = vadd.f32 %v3175_v1, %v2597_v63  ;;  %v3177_v6 = vpop.f32.mrb[107].mxu0 }
 0x2ea   :  { %v3724_v7 = vadd.f32 %v3723_v0, %v3661_v4  ;;  %v4336_v8 = vpack.c.bf16 %v4447_v5, %v4446_v61  ;;  %v3591_v9 = vadd.f32 %v4447_v5, %v3590_v3  ;;  %v3662_v10 = vmul.f32 %v4447_v5, %v4447_v5 }
 0x2ec   :  { %4388 = vst [vmem:[%s5949_s2 + $0xd0] sm:$0xff] %v4336_v8   ;;  %v3725_v11 = vadd.f32 %v3724_v7, %v3662_v10  ;;  %v2602_v12 = vpop.f32.mrb[108].mxu1 }
 0x2ed   :  { %v3180_v13 = vpop.f32.mrb[108].mxu0  ;;  %v2604_v14 = vpop.f32.mrb[109].mxu1 }
 0x2ee   :  { %v4448_v15 = vadd.f32 %v3180_v13, %v2602_v12  ;;  %v3182_v16 = vpop.f32.mrb[109].mxu0  ;;  %v2605_v17 = vpop.f32.mrb[110].mxu1 }
 0x2ef   :  { %v3183_v18 = vpop.f32.mrb[110].mxu0  ;;  %v2607_v19 = vpop.f32.mrb[111].mxu1 }
 0x2f0   :  { %v3592_v20 = vadd.f32 %v4448_v15, %v3591_v9  ;;  %v3663_v21 = vmul.f32 %v4448_v15, %v4448_v15  ;;  %v4449_v22 = vadd.f32 %v3183_v18, %v2605_v17  ;;  %v3185_v23 = vpop.f32.mrb[111].mxu0 }
 0x2f2   :  { %v3726_v24 = vadd.f32 %v3725_v11, %v3663_v21  ;;  %v4341_v25 = vpack.c.bf16 %v4449_v22, %v4448_v15  ;;  %v3593_v26 = vadd.f32 %v4449_v22, %v3592_v20  ;;  %v3664_v27 = vmul.f32 %v4449_v22, %v4449_v22 }
 0x2f4   :  { %4389 = vst [vmem:[%s5949_s2 + $0xd8] sm:$0xff] %v4341_v25   ;;  %v3727_v28 = vadd.f32 %v3726_v24, %v3664_v27  ;;  %v2610_v29 = vpop.f32.mrb[112].mxu1 }
 0x2f5   :  { %v3188_v30 = vpop.f32.mrb[112].mxu0  ;;  %v2612_v31 = vpop.f32.mrb[113].mxu1 }
 0x2f6   :  { %v4450_v32 = vadd.f32 %v3188_v30, %v2610_v29  ;;  %v3190_v33 = vpop.f32.mrb[113].mxu0  ;;  %v2613_v34 = vpop.f32.mrb[114].mxu1 }
 0x2f7   :  { %v3191_v35 = vpop.f32.mrb[114].mxu0  ;;  %v2615_v36 = vpop.f32.mrb[115].mxu1 }
 0x2f8   :  { %v3594_v37 = vadd.f32 %v4450_v32, %v3593_v26  ;;  %v3665_v38 = vmul.f32 %v4450_v32, %v4450_v32  ;;  %v4451_v39 = vadd.f32 %v3191_v35, %v2613_v34  ;;  %v3193_v40 = vpop.f32.mrb[115].mxu0 }
 0x2fa   :  { %v3728_v41 = vadd.f32 %v3727_v28, %v3665_v38  ;;  %v4346_v42 = vpack.c.bf16 %v4451_v39, %v4450_v32  ;;  %v3595_v43 = vadd.f32 %v4451_v39, %v3594_v37  ;;  %v3666_v44 = vmul.f32 %v4451_v39, %v4451_v39 }
 0x2fc   :  { %4390 = vst [vmem:[%s5949_s2 + $0xe0] sm:$0xff] %v4346_v42   ;;  %v3729_v45 = vadd.f32 %v3728_v41, %v3666_v44  ;;  %v2618_v46 = vpop.f32.mrb[116].mxu1 }
 0x2fd   :  { %v3196_v47 = vpop.f32.mrb[116].mxu0  ;;  %v2620_v48 = vpop.f32.mrb[117].mxu1 }
 0x2fe   :  { %v4452_v49 = vadd.f32 %v3196_v47, %v2618_v46  ;;  %v3198_v50 = vpop.f32.mrb[117].mxu0  ;;  %v2621_v51 = vpop.f32.mrb[118].mxu1 }
 0x2ff   :  { %v3199_v52 = vpop.f32.mrb[118].mxu0  ;;  %v2623_v53 = vpop.f32.mrb[119].mxu1 }
 0x300   :  { %v3596_v54 = vadd.f32 %v4452_v49, %v3595_v43  ;;  %v3667_v55 = vmul.f32 %v4452_v49, %v4452_v49  ;;  %v4453_v56 = vadd.f32 %v3199_v52, %v2621_v51  ;;  %v3201_v57 = vpop.f32.mrb[119].mxu0 }
 0x302   :  { %v3730_v0 = vadd.f32 %v3729_v45, %v3667_v55  ;;  %v4351_v58 = vpack.c.bf16 %v4453_v56, %v4452_v49  ;;  %v3597_v59 = vadd.f32 %v4453_v56, %v3596_v54  ;;  %v3668_v60 = vmul.f32 %v4453_v56, %v4453_v56 }
 0x304   :  { %4391 = vst [vmem:[%s5949_s2 + $0xe8] sm:$0xff] %v4351_v58   ;;  %v3731_v61 = vadd.f32 %v3730_v0, %v3668_v60  ;;  %v2626_v62 = vpop.f32.mrb[120].mxu1 }
 0x305   :  { %v3204_v63 = vpop.f32.mrb[120].mxu0  ;;  %v2628_v1 = vpop.f32.mrb[121].mxu1 }
 0x306   :  { %v4454_v2 = vadd.f32 %v3204_v63, %v2626_v62  ;;  %v3206_v3 = vpop.f32.mrb[121].mxu0  ;;  %v2629_v4 = vpop.f32.mrb[122].mxu1 }
 0x307   :  { %v3207_v5 = vpop.f32.mrb[122].mxu0  ;;  %v2631_v6 = vpop.f32.mrb[123].mxu1 }
 0x308   :  { %v3598_v7 = vadd.f32 %v4454_v2, %v3597_v59  ;;  %v3669_v8 = vmul.f32 %v4454_v2, %v4454_v2  ;;  %v4455_v9 = vadd.f32 %v3207_v5, %v2629_v4  ;;  %v3209_v10 = vpop.f32.mrb[123].mxu0 }
 0x30a   :  { %v3732_v11 = vadd.f32 %v3731_v61, %v3669_v8  ;;  %v4356_v12 = vpack.c.bf16 %v4455_v9, %v4454_v2  ;;  %v3599_v13 = vadd.f32 %v4455_v9, %v3598_v7  ;;  %v3670_v14 = vmul.f32 %v4455_v9, %v4455_v9 }
 0x30c   :  { %4392 = vst [vmem:[%s5949_s2 + $0xf0] sm:$0xff] %v4356_v12   ;;  %v3733_v15 = vadd.f32 %v3732_v11, %v3670_v14  ;;  %v2634_v16 = vpop.f32.mrb[124].mxu1 }
 0x30d   :  { %v3212_v17 = vpop.f32.mrb[124].mxu0  ;;  %v2636_v18 = vpop.f32.mrb[125].mxu1 }
 0x30e   :  { %v4456_v19 = vadd.f32 %v3212_v17, %v2634_v16  ;;  %v3214_v20 = vpop.f32.mrb[125].mxu0  ;;  %v2637_v21 = vpop.f32.mrb[126].mxu1 }
 0x30f   :  { %v3215_v22 = vpop.f32.mrb[126].mxu0  ;;  %v2639_v23 = vpop.f32.mrb[127].mxu1 }
 0x310   :  { %v3600_v24 = vadd.f32 %v4456_v19, %v3599_v13  ;;  %v3671_v25 = vmul.f32 %v4456_v19, %v4456_v19  ;;  %v4457_v26 = vadd.f32 %v3215_v22, %v2637_v21  ;;  %v3217_v27 = vpop.f32.mrb[127].mxu0 }
 0x312   :  { %v3734_v28 = vadd.f32 %v3733_v15, %v3671_v25  ;;  %v4361_v29 = vpack.c.bf16 %v4457_v26, %v4456_v19  ;;  %v3601_v30 = vadd.f32 %v4457_v26, %v3600_v24  ;;  %v3672_v31 = vmul.f32 %v4457_v26, %v4457_v26 }
 0x314   :  { %4393 = vst [vmem:[%s5949_s2 + $0xf8] sm:$0xff] %v4361_v29   ;;  %v3602_v32 = vrot.slane %v3601_v30, 4  ;;  %v3735_v33 = vadd.f32 %v3734_v28, %v3672_v31 }
 0x316   :  { %v3603_v34 = vadd.f32 %v3602_v32, %v3601_v30  ;;  %v3736_v35 = vrot.slane %v3735_v33, 4 }
 0x318   :  { %v3604_v36 = vrot.slane %v3603_v34, 2  ;;  %v3737_v37 = vadd.f32 %v3736_v35, %v3735_v33 }
 0x31a   :  { %v3605_v38 = vadd.f32 %v3604_v36, %v3603_v34  ;;  %v3738_v39 = vrot.slane %v3737_v37, 2 }
 0x31c   :  { %v3606_v40 = vrot.slane %v3605_v38, 1  ;;  %v3739_v41 = vadd.f32 %v3738_v39, %v3737_v37 }
 0x31e   :  { %v3607_v42 = vadd.f32 %v3606_v40, %v3605_v38  ;;  %v3740_v43 = vrot.slane %v3739_v41, 1 }
 0x320   :  { %3608 = vst [vmem:[%s5950_s3] sm:$0x1] %v3607_v42  ;;  %v3741_v44 = vadd.f32 %v3740_v43, %v3739_v41 }
 0x322   :  { %3742 = vst [vmem:[%s5951_s4] sm:$0x1] %v3741_v44 }

// kernel: discriminator_forward.11
= control target key start
LH: loop header
LB: loop body
LE: loop exit
PB: predicated region body
PF: predicated region fallthrough
CT: control target
= control target key end

     0   :  { %v64_v0 = vlaneseq  ;;  %s608_s0 = inlined_call_operand.vmem [shape: bf16[128,256], index: 0, kind: input, shape index: {}]   ;;  %s609_s1 = inlined_call_operand.vmem [shape: f32[1,256], index: 1, kind: input, shape index: {}]   ;;  %s610_s2 = inlined_call_operand.vmem [shape: f32[1,256], index: 2, kind: input, shape index: {}]   ;;  %s611_s3 = inlined_call_operand.vmem [shape: bf16[128,256], index: 3, kind: output, shape index: {}]  }
   0x1   :  { %v14_v1 = vld [vmem:[%s608_s0] sm:$0xff]  ;;  %v15_v6 = vld [vmem:[%s608_s0 + $0x8] sm:$0xff]  ;;  %v16_v7 = vld [vmem:[%s608_s0 + $0x10] sm:$0xff] }
   0x2   :  { %v62_v2 = vld [vmem:[%s609_s1] sm:$0x3]  ;;  %v30_v3 = vunpack.c.l.bf16 %v14_v1  ;;  %v31_v4 = vunpack.c.h.bf16 %v14_v1  ;;  %v65_v5 = vshrl.u32 %v64_v0, 7  ;;  %v17_v8 = vld [vmem:[%s608_s0 + $0x18] sm:$0xff]  ;;  %v32_v10 = vunpack.c.l.bf16 %v15_v6  ;;  %v440_v15 = vld [vmem:[%s608_s0 + $0x28] sm:$0xff] }
   0x3   :  { %v106_v9 = vld [vmem:[%s610_s2] sm:$0x3]  ;;  %v33_v11 = vunpack.c.h.bf16 %v15_v6  ;;  %v34_v12 = vunpack.c.l.bf16 %v16_v7  ;;  %v35_v13 = vunpack.c.h.bf16 %v16_v7  ;;  %v36_v18 = vunpack.c.l.bf16 %v17_v8  ;;  %v445_v20 = vld [vmem:[%s608_s0 + $0x30] sm:$0xff]  ;;  %v450_v21 = vld [vmem:[%s608_s0 + $0x38] sm:$0xff] }
   0x4   :  { %v435_v14 = vld [vmem:[%s608_s0 + $0x20] sm:$0xff]  ;;  %v66_v16 = vsub.s32 0, %v65_v5  ;;  %v70_v17 = vsub.s32 1, %v65_v5  ;;  %v37_v19 = vunpack.c.h.bf16 %v17_v8  ;;  %v40_v24 = vunpack.c.l.bf16 %v440_v15 }
   0x5   :  { %v38_v22 = vunpack.c.l.bf16 %v435_v14  ;;  %v39_v23 = vunpack.c.h.bf16 %v435_v14  ;;  %v41_v25 = vunpack.c.h.bf16 %v440_v15  ;;  %v42_v30 = vunpack.c.l.bf16 %v445_v20 }
   0x6   :  { %v456_v26 = vrot.slane %v62_v2, %v66_v16  ;;  %v458_v27 = vrot.slane %v62_v2, %v70_v17  ;;  %v460_v28 = vrot.slane %v106_v9, %v66_v16  ;;  %v462_v29 = vrot.slane %v106_v9, %v70_v17 }
   0x7   :  { %v43_v31 = vunpack.c.h.bf16 %v445_v20  ;;  %v44_v32 = vunpack.c.l.bf16 %v450_v21  ;;  %v45_v33 = vunpack.c.h.bf16 %v450_v21 }
   0x8   :  { %v74_v34 = vmul.f32 %v456_v26, %v30_v3  ;;  %v75_v35 = vmul.f32 %v458_v27, %v31_v4  ;;  %v76_v36 = vmul.f32 %v456_v26, %v32_v10  ;;  %v77_v37 = vmul.f32 %v458_v27, %v33_v11 }
   0x9   :  { %v78_v38 = vmul.f32 %v456_v26, %v34_v12  ;;  %v79_v39 = vmul.f32 %v458_v27, %v35_v13  ;;  %v80_v40 = vmul.f32 %v456_v26, %v36_v18  ;;  %v81_v41 = vmul.f32 %v458_v27, %v37_v19 }
   0xa   :  { %v118_v42 = vadd.f32 %v460_v28, %v74_v34  ;;  %v119_v43 = vadd.f32 %v462_v29, %v75_v35  ;;  %v120_v44 = vadd.f32 %v460_v28, %v76_v36  ;;  %v121_v45 = vadd.f32 %v462_v29, %v77_v37  ;;  %v23_v37 = vld [vmem:[%s608_s0 + $0x48] sm:$0xff] }
   0xb   :  { %v122_v46 = vadd.f32 %v460_v28, %v78_v38  ;;  %v123_v47 = vadd.f32 %v462_v29, %v79_v39  ;;  %v124_v48 = vadd.f32 %v460_v28, %v80_v40  ;;  %v125_v49 = vadd.f32 %v462_v29, %v81_v41 }
   0xc   :  { %vm150_vm0 = vcmp.ge.f32.partialorder %v118_v42, 0.0  ;;  %vm151_vm1 = vcmp.ge.f32.partialorder %v119_v43, 0.0  ;;  %v182_v50 = vmul.f32 0.2, %v118_v42  ;;  %v183_v51 = vmul.f32 0.2, %v119_v43 }
   0xd   :  { %vm152_vm2 = vcmp.ge.f32.partialorder %v120_v44, 0.0  ;;  %vm153_vm3 = vcmp.ge.f32.partialorder %v121_v45, 0.0  ;;  %v184_v52 = vmul.f32 0.2, %v120_v44  ;;  %v185_v53 = vmul.f32 0.2, %v121_v45 }
   0xe   :  { %v214_v54 = vsel %vm150_vm0, %v118_v42, %v182_v50  ;;  %v215_v55 = vsel %vm151_vm1, %v119_v43, %v183_v51  ;;  %vm154_vm4 = vcmp.ge.f32.partialorder %v122_v46, 0.0  ;;  %vm155_vm5 = vcmp.ge.f32.partialorder %v123_v47, 0.0 }
   0xf   :  { %v378_v56 = vpack.c.bf16 %v215_v55, %v214_v54  ;;  %v216_v57 = vsel %vm152_vm2, %v120_v44, %v184_v52  ;;  %v217_v58 = vsel %vm153_vm3, %v121_v45, %v185_v53  ;;  %v186_v59 = vmul.f32 0.2, %v122_v46 }
  0x10   :  { %v379_v60 = vpack.c.bf16 %v217_v58, %v216_v57  ;;  %v187_v61 = vmul.f32 0.2, %v123_v47  ;;  %vm156_vm6 = vcmp.ge.f32.partialorder %v124_v48, 0.0  ;;  %vm157_vm7 = vcmp.ge.f32.partialorder %v125_v49, 0.0 }
  0x11   :  { %342 = vst [vmem:[%s611_s3] sm:$0xff] %v378_v56  ;;  %v218_v62 = vsel %vm154_vm4, %v122_v46, %v186_v59  ;;  %v188_v63 = vmul.f32 0.2, %v124_v48  ;;  %v189_v0 = vmul.f32 0.2, %v125_v49  ;;  %v82_v1 = vmul.f32 %v456_v26, %v38_v22  ;;  %v24_v46 = vld [vmem:[%s608_s0 + $0x50] sm:$0xff] }
  0x12   :  { %343 = vst [vmem:[%s611_s3 + $0x8] sm:$0xff] %v379_v60  ;;  %v219_v2 = vsel %vm155_vm5, %v123_v47, %v187_v61  ;;  %v83_v3 = vmul.f32 %v458_v27, %v39_v23  ;;  %v84_v4 = vmul.f32 %v456_v26, %v40_v24  ;;  %v85_v5 = vmul.f32 %v458_v27, %v41_v25 }
  0x13   :  { %v380_v6 = vpack.c.bf16 %v219_v2, %v218_v62  ;;  %v220_v7 = vsel %vm156_vm6, %v124_v48, %v188_v63  ;;  %v221_v8 = vsel %vm157_vm7, %v125_v49, %v189_v0  ;;  %v126_v9 = vadd.f32 %v460_v28, %v82_v1  ;;  %v25_v1 = vld [vmem:[%s608_s0 + $0x58] sm:$0xff] }
  0x14   :  { %v381_v10 = vpack.c.bf16 %v221_v8, %v220_v7  ;;  %v127_v11 = vadd.f32 %v462_v29, %v83_v3  ;;  %v128_v12 = vadd.f32 %v460_v28, %v84_v4  ;;  %v129_v13 = vadd.f32 %v462_v29, %v85_v5 }
  0x15   :  { %344 = vst [vmem:[%s611_s3 + $0x10] sm:$0xff] %v380_v6  ;;  %vm158_vm8 = vcmp.ge.f32.partialorder %v126_v9, 0.0  ;;  %v190_v14 = vmul.f32 0.2, %v126_v9  ;;  %v86_v15 = vmul.f32 %v456_v26, %v42_v30  ;;  %v87_v16 = vmul.f32 %v458_v27, %v43_v31  ;;  %v22_v31 = vld [vmem:[%s608_s0 + $0x40] sm:$0xff] }
  0x16   :  { %345 = vst [vmem:[%s611_s3 + $0x18] sm:$0xff] %v381_v10  ;;  %vm159_vm9 = vcmp.ge.f32.partialorder %v127_v11, 0.0  ;;  %v191_v17 = vmul.f32 0.2, %v127_v11  ;;  %vm160_vm10 = vcmp.ge.f32.partialorder %v128_v12, 0.0  ;;  %vm161_vm11 = vcmp.ge.f32.partialorder %v129_v13, 0.0 }
  0x17   :  { %v222_v18 = vsel %vm158_vm8, %v126_v9, %v190_v14  ;;  %v192_v19 = vmul.f32 0.2, %v128_v12  ;;  %v193_v20 = vmul.f32 0.2, %v129_v13  ;;  %v130_v22 = vadd.f32 %v460_v28, %v86_v15  ;;  %v26_v10 = vld [vmem:[%s608_s0 + $0x60] sm:$0xff]  ;;  %v27_v15 = vld [vmem:[%s608_s0 + $0x68] sm:$0xff] }
  0x18   :  { %v223_v23 = vsel %vm159_vm9, %v127_v11, %v191_v17  ;;  %v131_v24 = vadd.f32 %v462_v29, %v87_v16  ;;  %v88_v25 = vmul.f32 %v456_v26, %v44_v32  ;;  %v89_v30 = vmul.f32 %v458_v27, %v45_v33 }
  0x19   :  { %v382_v34 = vpack.c.bf16 %v223_v23, %v222_v18  ;;  %v224_v35 = vsel %vm160_vm10, %v128_v12, %v192_v19  ;;  %v225_v36 = vsel %vm161_vm11, %v129_v13, %v193_v20  ;;  %vm162_vm12 = vcmp.ge.f32.partialorder %v130_v22, 0.0 }
  0x1a   :  { %v383_v38 = vpack.c.bf16 %v225_v36, %v224_v35  ;;  %vm163_vm13 = vcmp.ge.f32.partialorder %v131_v24, 0.0  ;;  %v194_v39 = vmul.f32 0.2, %v130_v22  ;;  %v195_v32 = vmul.f32 0.2, %v131_v24 }
  0x1b   :  { %346 = vst [vmem:[%s611_s3 + $0x20] sm:$0xff] %v382_v34  ;;  %v132_v21 = vadd.f32 %v460_v28, %v88_v25  ;;  %v133_v33 = vadd.f32 %v462_v29, %v89_v30  ;;  %v46_v40 = vunpack.c.l.bf16 %v22_v31  ;;  %v47_v41 = vunpack.c.h.bf16 %v22_v31 }
  0x1c   :  { %347 = vst [vmem:[%s611_s3 + $0x28] sm:$0xff] %v383_v38  ;;  %v226_v42 = vsel %vm162_vm12, %v130_v22, %v194_v39  ;;  %v227_v43 = vsel %vm163_vm13, %v131_v24, %v195_v32  ;;  %v48_v44 = vunpack.c.l.bf16 %v23_v37  ;;  %v49_v45 = vunpack.c.h.bf16 %v23_v37  ;;  %v28_v37 = vld [vmem:[%s608_s0 + $0x70] sm:$0xff] }
  0x1d   :  { %v384_v47 = vpack.c.bf16 %v227_v43, %v226_v42  ;;  %vm164_vm14 = vcmp.ge.f32.partialorder %v132_v21, 0.0  ;;  %vm165_vm15 = vcmp.ge.f32.partialorder %v133_v33, 0.0  ;;  %v196_v48 = vmul.f32 0.2, %v132_v21 }
  0x1e   :  { %v197_v49 = vmul.f32 0.2, %v133_v33  ;;  %v90_v50 = vmul.f32 %v456_v26, %v46_v40  ;;  %v91_v51 = vmul.f32 %v458_v27, %v47_v41  ;;  %v92_v52 = vmul.f32 %v456_v26, %v48_v44 }
  0x1f   :  { %348 = vst [vmem:[%s611_s3 + $0x30] sm:$0xff] %v384_v47  ;;  %v228_v53 = vsel %vm164_vm14, %v132_v21, %v196_v48  ;;  %v93_v54 = vmul.f32 %v458_v27, %v49_v45  ;;  %v50_v55 = vunpack.c.l.bf16 %v24_v46  ;;  %v51_v56 = vunpack.c.h.bf16 %v24_v46 }
  0x20   :  { %v229_v57 = vsel %vm165_vm15, %v133_v33, %v197_v49  ;;  %v134_v58 = vadd.f32 %v460_v28, %v90_v50  ;;  %v135_v59 = vadd.f32 %v462_v29, %v91_v51  ;;  %v136_v60 = vadd.f32 %v460_v28, %v92_v52 }
  0x21   :  { %v385_v61 = vpack.c.bf16 %v229_v57, %v228_v53  ;;  %v137_v62 = vadd.f32 %v462_v29, %v93_v54  ;;  %v94_v63 = vmul.f32 %v456_v26, %v50_v55  ;;  %v95_v0 = vmul.f32 %v458_v27, %v51_v56  ;;  %v29_v53 = vld [vmem:[%s608_s0 + $0x78] sm:$0xff] }
  0x22   :  { %vm166_vm0 = vcmp.ge.f32.partialorder %v134_v58, 0.0  ;;  %vm167_vm1 = vcmp.ge.f32.partialorder %v135_v59, 0.0  ;;  %v198_v2 = vmul.f32 0.2, %v134_v58  ;;  %v199_v3 = vmul.f32 0.2, %v135_v59 }
  0x23   :  { %349 = vst [vmem:[%s611_s3 + $0x38] sm:$0xff] %v385_v61  ;;  %vm168_vm2 = vcmp.ge.f32.partialorder %v136_v60, 0.0  ;;  %vm169_vm3 = vcmp.ge.f32.partialorder %v137_v62, 0.0  ;;  %v200_v4 = vmul.f32 0.2, %v136_v60  ;;  %v138_v8 = vadd.f32 %v460_v28, %v94_v63 }
  0x24   :  { %v201_v5 = vmul.f32 0.2, %v137_v62  ;;  %v230_v6 = vsel %vm166_vm0, %v134_v58, %v198_v2  ;;  %v231_v7 = vsel %vm167_vm1, %v135_v59, %v199_v3  ;;  %v139_v9 = vadd.f32 %v462_v29, %v95_v0 }
  0x25   :  { %v386_v11 = vpack.c.bf16 %v231_v7, %v230_v6  ;;  %v232_v12 = vsel %vm168_vm2, %v136_v60, %v200_v4  ;;  %v52_v14 = vunpack.c.l.bf16 %v25_v1  ;;  %vm170_vm4 = vcmp.ge.f32.partialorder %v138_v8, 0.0 }
  0x26   :  { %v233_v13 = vsel %vm169_vm3, %v137_v62, %v201_v5  ;;  %vm171_vm5 = vcmp.ge.f32.partialorder %v139_v9, 0.0  ;;  %v202_v17 = vmul.f32 0.2, %v138_v8  ;;  %v203_v18 = vmul.f32 0.2, %v139_v9 }
  0x27   :  { %v387_v16 = vpack.c.bf16 %v233_v13, %v232_v12  ;;  %350 = vst [vmem:[%s611_s3 + $0x40] sm:$0xff] %v386_v11  ;;  %v53_v19 = vunpack.c.h.bf16 %v25_v1  ;;  %v96_v20 = vmul.f32 %v456_v26, %v52_v14  ;;  %v54_v22 = vunpack.c.l.bf16 %v26_v10 }
  0x28   :  { %v234_v23 = vsel %vm170_vm4, %v138_v8, %v202_v17  ;;  %v55_v24 = vunpack.c.h.bf16 %v26_v10  ;;  %v56_v25 = vunpack.c.l.bf16 %v27_v15  ;;  %v57_v30 = vunpack.c.h.bf16 %v27_v15 }
  0x29   :  { %351 = vst [vmem:[%s611_s3 + $0x48] sm:$0xff] %v387_v16  ;;  %v235_v31 = vsel %vm171_vm5, %v139_v9, %v203_v18  ;;  %v97_v34 = vmul.f32 %v458_v27, %v53_v19  ;;  %v140_v35 = vadd.f32 %v460_v28, %v96_v20  ;;  %v98_v36 = vmul.f32 %v456_v26, %v54_v22 }
  0x2a   :  { %v388_v38 = vpack.c.bf16 %v235_v31, %v234_v23  ;;  %v99_v39 = vmul.f32 %v458_v27, %v55_v24  ;;  %v100_v32 = vmul.f32 %v456_v26, %v56_v25  ;;  %v101_v21 = vmul.f32 %v458_v27, %v57_v30 }
  0x2b   :  { %v141_v33 = vadd.f32 %v462_v29, %v97_v34  ;;  %vm172_vm6 = vcmp.ge.f32.partialorder %v140_v35, 0.0  ;;  %v204_v40 = vmul.f32 0.2, %v140_v35  ;;  %v142_v41 = vadd.f32 %v460_v28, %v98_v36 }
  0x2c   :  { %352 = vst [vmem:[%s611_s3 + $0x50] sm:$0xff] %v388_v38  ;;  %v143_v42 = vadd.f32 %v462_v29, %v99_v39  ;;  %v144_v43 = vadd.f32 %v460_v28, %v100_v32  ;;  %v145_v44 = vadd.f32 %v462_v29, %v101_v21  ;;  %v58_v45 = vunpack.c.l.bf16 %v28_v37 }
  0x2d   :  { %vm173_vm7 = vcmp.ge.f32.partialorder %v141_v33, 0.0  ;;  %v205_v46 = vmul.f32 0.2, %v141_v33  ;;  %v236_v47 = vsel %vm172_vm6, %v140_v35, %v204_v40  ;;  %vm174_vm8 = vcmp.ge.f32.partialorder %v142_v41, 0.0 }
  0x2e   :  { %vm175_vm9 = vcmp.ge.f32.partialorder %v143_v42, 0.0  ;;  %v206_v48 = vmul.f32 0.2, %v142_v41  ;;  %v207_v49 = vmul.f32 0.2, %v143_v42  ;;  %vm176_vm10 = vcmp.ge.f32.partialorder %v144_v43, 0.0 }
  0x2f   :  { %v237_v50 = vsel %vm173_vm7, %v141_v33, %v205_v46  ;;  %vm177_vm11 = vcmp.ge.f32.partialorder %v145_v44, 0.0  ;;  %v208_v51 = vmul.f32 0.2, %v144_v43  ;;  %v209_v52 = vmul.f32 0.2, %v145_v44 }
  0x30   :  { %v389_v54 = vpack.c.bf16 %v237_v50, %v236_v47  ;;  %v238_v55 = vsel %vm174_vm8, %v142_v41, %v206_v48  ;;  %v239_v56 = vsel %vm175_vm9, %v143_v42, %v207_v49  ;;  %v59_v57 = vunpack.c.h.bf16 %v28_v37 }
  0x31   :  { %v390_v58 = vpack.c.bf16 %v239_v56, %v238_v55  ;;  %v240_v59 = vsel %vm176_vm10, %v144_v43, %v208_v51  ;;  %v241_v60 = vsel %vm177_vm11, %v145_v44, %v209_v52  ;;  %v102_v61 = vmul.f32 %v456_v26, %v58_v45 }
  0x32   :  { %353 = vst [vmem:[%s611_s3 + $0x58] sm:$0xff] %v389_v54  ;;  %v391_v62 = vpack.c.bf16 %v241_v60, %v240_v59  ;;  %v103_v63 = vmul.f32 %v458_v27, %v59_v57  ;;  %v60_v0 = vunpack.c.l.bf16 %v29_v53  ;;  %v61_v1 = vunpack.c.h.bf16 %v29_v53 }
  0x33   :  { %354 = vst [vmem:[%s611_s3 + $0x60] sm:$0xff] %v390_v58  ;;  %v146_v2 = vadd.f32 %v460_v28, %v102_v61 }
  0x34   :  { %355 = vst [vmem:[%s611_s3 + $0x68] sm:$0xff] %v391_v62  ;;  %v147_v3 = vadd.f32 %v462_v29, %v103_v63  ;;  %v104_v4 = vmul.f32 %v456_v26, %v60_v0  ;;  %v105_v5 = vmul.f32 %v458_v27, %v61_v1 }
  0x35   :  { %vm178_vm12 = vcmp.ge.f32.partialorder %v146_v2, 0.0  ;;  %v210_v6 = vmul.f32 0.2, %v146_v2 }
  0x36   :  { %vm179_vm13 = vcmp.ge.f32.partialorder %v147_v3, 0.0  ;;  %v211_v7 = vmul.f32 0.2, %v147_v3  ;;  %v148_v8 = vadd.f32 %v460_v28, %v104_v4  ;;  %v149_v9 = vadd.f32 %v462_v29, %v105_v5 }
  0x37   :  { %v242_v10 = vsel %vm178_vm12, %v146_v2, %v210_v6 }
  0x38   :  { %v243_v11 = vsel %vm179_vm13, %v147_v3, %v211_v7  ;;  %vm180_vm14 = vcmp.ge.f32.partialorder %v148_v8, 0.0  ;;  %vm181_vm15 = vcmp.ge.f32.partialorder %v149_v9, 0.0  ;;  %v212_v12 = vmul.f32 0.2, %v148_v8 }
  0x39   :  { %v392_v13 = vpack.c.bf16 %v243_v11, %v242_v10  ;;  %v213_v14 = vmul.f32 0.2, %v149_v9 }
  0x3a   :  { %v244_v15 = vsel %vm180_vm14, %v148_v8, %v212_v12 }
  0x3b   :  { %356 = vst [vmem:[%s611_s3 + $0x70] sm:$0xff] %v392_v13  ;;  %v245_v26 = vsel %vm181_vm15, %v149_v9, %v213_v14 }
  0x3c   :  { %v393_v27 = vpack.c.bf16 %v245_v26, %v244_v15 }
  0x3e   :  { %357 = vst [vmem:[%s611_s3 + $0x78] sm:$0xff] %v393_v27 }

// kernel: discriminator_forward.10
= control target key start
LH: loop header
LB: loop body
LE: loop exit
PB: predicated region body
PF: predicated region fallthrough
CT: control target
= control target key end

     0   :  { %s5761_s1 = inlined_call_operand.vmem [shape: bf16[2048,256], index: 1, kind: input, shape index: {}]   ;;  %s5762_s0 = inlined_call_operand.vmem [shape: bf16[128,2048], index: 0, kind: input, shape index: {}]   ;;  %s5763_s2 = inlined_call_operand.vmem [shape: bf16[128,256], index: 2, kind: output, shape index: {0}]   ;;  %s5764_s3 = inlined_call_operand.vmem [shape: f32[1,1,256], index: 3, kind: output, shape index: {1}]   ;;  %s5765_s4 = inlined_call_operand.vmem [shape: f32[1,1,256], index: 4, kind: output, shape index: {2}]  }
   0x1   :  { %v4145_v0 = vld [vmem:[%s5761_s1 + $0x4] ss:$8 sps:$4 sm:$0xff]   ;;  %v4149_v2 = vld [vmem:[%s5761_s1] ss:$8 sps:$4 sm:$0xff]   ;;  %v4151_v4 = vld [vmem:[%s5761_s1 + $0x14] ss:$8 sps:$4 sm:$0xff]  }
   0x2   :  { %v4147_v1 = vld [vmem:[%s5761_s1 + $0x404] ss:$8 sps:$4 sm:$0xff]   ;;  %2318 = vmatprep.subr.bf16.mxu1 %v4145_v0  ;;  %v4150_v3 = vld [vmem:[%s5761_s1 + $0x400] ss:$8 sps:$4 sm:$0xff]   ;;  %v4153_v5 = vld [vmem:[%s5761_s1 + $0x414] ss:$8 sps:$4 sm:$0xff]  }
   0x3   :  { %2770 = vmatprep.subr.bf16.mxu0 %v4147_v1  ;;  %2319 = vmatpush1.bf16.msra.mxu1 %v4149_v2  ;;  %v4155_v6 = vld [vmem:[%s5761_s1 + $0x10] ss:$8 sps:$4 sm:$0xff]   ;;  %v4157_v8 = vld [vmem:[%s5761_s1 + $0x24] ss:$8 sps:$4 sm:$0xff]   ;;  %v4161_v10 = vld [vmem:[%s5761_s1 + $0x20] ss:$8 sps:$4 sm:$0xff]  }
   0x4   :  { %2771 = vmatpush1.bf16.msra.mxu0 %v4150_v3  ;;  %2320 = vmatprep.subr.bf16.mxu1 %v4151_v4  ;;  %v4156_v7 = vld [vmem:[%s5761_s1 + $0x410] ss:$8 sps:$4 sm:$0xff]   ;;  %v4159_v9 = vld [vmem:[%s5761_s1 + $0x424] ss:$8 sps:$4 sm:$0xff]   ;;  %v4162_v11 = vld [vmem:[%s5761_s1 + $0x420] ss:$8 sps:$4 sm:$0xff]  }
   0x5   :  { %2772 = vmatprep.subr.bf16.mxu0 %v4153_v5  ;;  %v4163_v12 = vld [vmem:[%s5761_s1 + $0x34] ss:$8 sps:$4 sm:$0xff]   ;;  %v4167_v14 = vld [vmem:[%s5761_s1 + $0x30] ss:$8 sps:$4 sm:$0xff]   ;;  %v4169_v16 = vld [vmem:[%s5761_s1 + $0x44] ss:$8 sps:$4 sm:$0xff]  }
   0x6   :  { %v4165_v13 = vld [vmem:[%s5761_s1 + $0x434] ss:$8 sps:$4 sm:$0xff]   ;;  %v4168_v15 = vld [vmem:[%s5761_s1 + $0x430] ss:$8 sps:$4 sm:$0xff]   ;;  %v4171_v17 = vld [vmem:[%s5761_s1 + $0x444] ss:$8 sps:$4 sm:$0xff]  }
   0x7   :  { %2321 = vmatpush1.bf16.msra.mxu1 %v4155_v6  ;;  %v4173_v18 = vld [vmem:[%s5761_s1 + $0x40] ss:$8 sps:$4 sm:$0xff]   ;;  %v4175_v20 = vld [vmem:[%s5761_s1 + $0x54] ss:$8 sps:$4 sm:$0xff]   ;;  %v4179_v22 = vld [vmem:[%s5761_s1 + $0x50] ss:$8 sps:$4 sm:$0xff]  }
   0x8   :  { %2773 = vmatpush1.bf16.msra.mxu0 %v4156_v7  ;;  %2322 = vmatprep.subr.bf16.mxu1 %v4157_v8  ;;  %v4174_v19 = vld [vmem:[%s5761_s1 + $0x440] ss:$8 sps:$4 sm:$0xff]   ;;  %v4177_v21 = vld [vmem:[%s5761_s1 + $0x454] ss:$8 sps:$4 sm:$0xff]   ;;  %v4180_v23 = vld [vmem:[%s5761_s1 + $0x450] ss:$8 sps:$4 sm:$0xff]  }
   0x9   :  { %2774 = vmatprep.subr.bf16.mxu0 %v4159_v9  ;;  %v4181_v24 = vld [vmem:[%s5761_s1 + $0x64] ss:$8 sps:$4 sm:$0xff]   ;;  %v4185_v26 = vld [vmem:[%s5761_s1 + $0x60] ss:$8 sps:$4 sm:$0xff]   ;;  %v4187_v28 = vld [vmem:[%s5761_s1 + $0x74] ss:$8 sps:$4 sm:$0xff]  }
   0xa   :  { %v4183_v25 = vld [vmem:[%s5761_s1 + $0x464] ss:$8 sps:$4 sm:$0xff]   ;;  %v4186_v27 = vld [vmem:[%s5761_s1 + $0x460] ss:$8 sps:$4 sm:$0xff]   ;;  %v4189_v29 = vld [vmem:[%s5761_s1 + $0x474] ss:$8 sps:$4 sm:$0xff]  }
   0xb   :  { %2323 = vmatpush1.bf16.msra.mxu1 %v4161_v10  ;;  %v4191_v30 = vld [vmem:[%s5761_s1 + $0x70] ss:$8 sps:$4 sm:$0xff]   ;;  %v4193_v32 = vld [vmem:[%s5761_s1 + $0x84] ss:$8 sps:$4 sm:$0xff]   ;;  %v4197_v34 = vld [vmem:[%s5761_s1 + $0x80] ss:$8 sps:$4 sm:$0xff]  }
   0xc   :  { %2775 = vmatpush1.bf16.msra.mxu0 %v4162_v11  ;;  %2324 = vmatprep.subr.bf16.mxu1 %v4163_v12  ;;  %v4192_v31 = vld [vmem:[%s5761_s1 + $0x470] ss:$8 sps:$4 sm:$0xff]   ;;  %v4195_v33 = vld [vmem:[%s5761_s1 + $0x484] ss:$8 sps:$4 sm:$0xff]   ;;  %v4198_v35 = vld [vmem:[%s5761_s1 + $0x480] ss:$8 sps:$4 sm:$0xff]  }
   0xd   :  { %2776 = vmatprep.subr.bf16.mxu0 %v4165_v13  ;;  %v4199_v36 = vld [vmem:[%s5761_s1 + $0x94] ss:$8 sps:$4 sm:$0xff]   ;;  %v4203_v38 = vld [vmem:[%s5761_s1 + $0x90] ss:$8 sps:$4 sm:$0xff]   ;;  %v4205_v40 = vld [vmem:[%s5761_s1 + $0xa4] ss:$8 sps:$4 sm:$0xff]  }
   0xe   :  { %v4201_v37 = vld [vmem:[%s5761_s1 + $0x494] ss:$8 sps:$4 sm:$0xff]   ;;  %v4204_v39 = vld [vmem:[%s5761_s1 + $0x490] ss:$8 sps:$4 sm:$0xff]   ;;  %v4207_v41 = vld [vmem:[%s5761_s1 + $0x4a4] ss:$8 sps:$4 sm:$0xff]  }
   0xf   :  { %2325 = vmatpush1.bf16.msra.mxu1 %v4167_v14  ;;  %v4209_v42 = vld [vmem:[%s5761_s1 + $0xa0] ss:$8 sps:$4 sm:$0xff]   ;;  %v4211_v44 = vld [vmem:[%s5761_s1 + $0xb4] ss:$8 sps:$4 sm:$0xff]   ;;  %v4215_v46 = vld [vmem:[%s5761_s1 + $0xb0] ss:$8 sps:$4 sm:$0xff]  }
  0x10   :  { %2777 = vmatpush1.bf16.msra.mxu0 %v4168_v15  ;;  %2326 = vmatprep.subr.bf16.mxu1 %v4169_v16  ;;  %v4210_v43 = vld [vmem:[%s5761_s1 + $0x4a0] ss:$8 sps:$4 sm:$0xff]   ;;  %v4213_v45 = vld [vmem:[%s5761_s1 + $0x4b4] ss:$8 sps:$4 sm:$0xff]   ;;  %v4216_v47 = vld [vmem:[%s5761_s1 + $0x4b0] ss:$8 sps:$4 sm:$0xff]  }
  0x11   :  { %2778 = vmatprep.subr.bf16.mxu0 %v4171_v17  ;;  %v14_v48 = vld [vmem:[%s5762_s0] sm:$0xff]  ;;  %v4223_v58 = vld [vmem:[%s5761_s1 + $0xd4] ss:$8 sps:$4 sm:$0xff]   ;;  %v4227_v60 = vld [vmem:[%s5761_s1 + $0xd0] ss:$8 sps:$4 sm:$0xff]  }
  0x12   :  { %v22_v49 = vld [vmem:[%s5762_s0 + $0x40] sm:$0xff]  ;;  %v4225_v59 = vld [vmem:[%s5761_s1 + $0x4d4] ss:$8 sps:$4 sm:$0xff]   ;;  %v4228_v61 = vld [vmem:[%s5761_s1 + $0x4d0] ss:$8 sps:$4 sm:$0xff]  }
  0x13   :  { %2327 = vmatpush1.bf16.msra.mxu1 %v4173_v18  ;;  %v18_v50 = vld [vmem:[%s5762_s0 + $0x20] sm:$0xff]  ;;  %v3505_v53 = vcombine.high %v14_v48, %v22_v49  ;;  %v4235_v2 = vld [vmem:[%s5761_s1 + $0xf4] ss:$8 sps:$4 sm:$0xff]   ;;  %v4239_v4 = vld [vmem:[%s5761_s1 + $0xf0] ss:$8 sps:$4 sm:$0xff]   ;;  %v3504_v11 = vcombine.low %v14_v48, %v22_v49 }
  0x14   :  { %2779 = vmatpush1.bf16.msra.mxu0 %v4174_v19  ;;  %2328 = vmatprep.subr.bf16.mxu1 %v4175_v20  ;;  %v26_v51 = vld [vmem:[%s5762_s0 + $0x60] sm:$0xff]  ;;  %v4237_v3 = vld [vmem:[%s5761_s1 + $0x4f4] ss:$8 sps:$4 sm:$0xff]   ;;  %v4240_v5 = vld [vmem:[%s5761_s1 + $0x4f0] ss:$8 sps:$4 sm:$0xff]  }
  0x15   :  { %2780 = vmatprep.subr.bf16.mxu0 %v4177_v21  ;;  %v4217_v52 = vld [vmem:[%s5761_s1 + $0xc4] ss:$8 sps:$4 sm:$0xff]   ;;  %v3513_v55 = vcombine.high %v18_v50, %v26_v51  ;;  %2350 = vmatprep.mubr.bf16.mxu1 %v3505_v53  ;;  %v4221_v56 = vld [vmem:[%s5761_s1 + $0xc0] ss:$8 sps:$4 sm:$0xff]   ;;  %v3512_v12 = vcombine.low %v18_v50, %v26_v51  ;;  %v4249_v16 = vld [vmem:[%s5761_s1 + $0x114] ss:$8 sps:$4 sm:$0xff]  }
  0x16   :  { %v4219_v54 = vld [vmem:[%s5761_s1 + $0x4c4] ss:$8 sps:$4 sm:$0xff]   ;;  %v4222_v57 = vld [vmem:[%s5761_s1 + $0x4c0] ss:$8 sps:$4 sm:$0xff]   ;;  %v4252_v17 = vld [vmem:[%s5761_s1 + $0x514] ss:$8 sps:$4 sm:$0xff]  }
  0x17   :  { %2329 = vmatpush1.bf16.msra.mxu1 %v4179_v22  ;;  %2802 = vmatprep.mubr.bf16.mxu0 %v3513_v55  ;;  %v4229_v62 = vld [vmem:[%s5761_s1 + $0xe4] ss:$8 sps:$4 sm:$0xff]   ;;  %v4233_v0 = vld [vmem:[%s5761_s1 + $0xe0] ss:$8 sps:$4 sm:$0xff]   ;;  %v4247_v20 = vld [vmem:[%s5761_s1 + $0x110] ss:$8 sps:$4 sm:$0xff]  }
  0x18   :  { %2781 = vmatpush1.bf16.msra.mxu0 %v4180_v23  ;;  %2330 = vmatprep.subr.bf16.mxu1 %v4181_v24  ;;  %v4231_v63 = vld [vmem:[%s5761_s1 + $0x4e4] ss:$8 sps:$4 sm:$0xff]   ;;  %v4234_v1 = vld [vmem:[%s5761_s1 + $0x4e0] ss:$8 sps:$4 sm:$0xff]   ;;  %v4250_v21 = vld [vmem:[%s5761_s1 + $0x510] ss:$8 sps:$4 sm:$0xff]  }
  0x19   :  { %2782 = vmatprep.subr.bf16.mxu0 %v4183_v25  ;;  %v4243_v6 = vld [vmem:[%s5761_s1 + $0x104] ss:$8 sps:$4 sm:$0xff]   ;;  %v4241_v8 = vld [vmem:[%s5761_s1 + $0x100] ss:$8 sps:$4 sm:$0xff]   ;;  %v4273_v48 = vld [vmem:[%s5761_s1 + $0x154] ss:$8 sps:$4 sm:$0xff]  }
  0x1a   :  { %v4246_v7 = vld [vmem:[%s5761_s1 + $0x504] ss:$8 sps:$4 sm:$0xff]   ;;  %v4244_v9 = vld [vmem:[%s5761_s1 + $0x500] ss:$8 sps:$4 sm:$0xff]   ;;  %v4276_v49 = vld [vmem:[%s5761_s1 + $0x554] ss:$8 sps:$4 sm:$0xff]  }
  0x1b   :  { %2331 = vmatpush1.bf16.msra.mxu1 %v4185_v26  ;;  %v30_v10 = vld [vmem:[%s5762_s0 + $0x80] sm:$0xff]  ;;  %v4274_v53 = vld [vmem:[%s5761_s1 + $0x550] ss:$8 sps:$4 sm:$0xff]  }
  0x1c   :  { %2783 = vmatpush1.bf16.msra.mxu0 %v4186_v27  ;;  %2332 = vmatprep.subr.bf16.mxu1 %v4187_v28  ;;  %v38_v13 = vld [vmem:[%s5762_s0 + $0xc0] sm:$0xff] }
  0x1d   :  { %2784 = vmatprep.subr.bf16.mxu0 %v4189_v29  ;;  %v34_v14 = vld [vmem:[%s5762_s0 + $0xa0] sm:$0xff]  ;;  %v3521_v18 = vcombine.high %v30_v10, %v38_v13  ;;  %v3520_v28 = vcombine.low %v30_v10, %v38_v13 }
  0x1e   :  { %v42_v15 = vld [vmem:[%s5762_s0 + $0xe0] sm:$0xff] }
  0x1f   :  { %2333 = vmatpush1.bf16.msra.mxu1 %v4191_v30  ;;  %v3529_v19 = vcombine.high %v34_v14, %v42_v15  ;;  %v4255_v22 = vld [vmem:[%s5761_s1 + $0x124] ss:$8 sps:$4 sm:$0xff]   ;;  %v4253_v24 = vld [vmem:[%s5761_s1 + $0x120] ss:$8 sps:$4 sm:$0xff]   ;;  %v3528_v29 = vcombine.low %v34_v14, %v42_v15 }
  0x20   :  { %2785 = vmatpush1.bf16.msra.mxu0 %v4192_v31  ;;  %2334 = vmatprep.subr.bf16.mxu1 %v4193_v32  ;;  %v4258_v23 = vld [vmem:[%s5761_s1 + $0x524] ss:$8 sps:$4 sm:$0xff]   ;;  %v4256_v25 = vld [vmem:[%s5761_s1 + $0x520] ss:$8 sps:$4 sm:$0xff]   ;;  %v4261_v32 = vld [vmem:[%s5761_s1 + $0x134] ss:$8 sps:$4 sm:$0xff]  }
  0x21   :  { %2786 = vmatprep.subr.bf16.mxu0 %v4195_v33  ;;  %v46_v26 = vld [vmem:[%s5762_s0 + $0x100] sm:$0xff]  ;;  %v4264_v33 = vld [vmem:[%s5761_s1 + $0x534] ss:$8 sps:$4 sm:$0xff]  }
  0x22   :  { %v54_v27 = vld [vmem:[%s5762_s0 + $0x140] sm:$0xff] }
  0x23   :  { %2335 = vmatpush1.bf16.msra.mxu1 %v4197_v34  ;;  %v50_v30 = vld [vmem:[%s5762_s0 + $0x120] sm:$0xff]  ;;  %v3537_v34 = vcombine.high %v46_v26, %v54_v27 }
  0x24   :  { %2787 = vmatpush1.bf16.msra.mxu0 %v4198_v35  ;;  %2336 = vmatprep.subr.bf16.mxu1 %v4199_v36  ;;  %v58_v31 = vld [vmem:[%s5762_s0 + $0x160] sm:$0xff]  ;;  %v4259_v36 = vld [vmem:[%s5761_s1 + $0x130] ss:$8 sps:$4 sm:$0xff]  }
  0x25   :  { %2788 = vmatprep.subr.bf16.mxu0 %v4201_v37  ;;  %v3545_v35 = vcombine.high %v50_v30, %v58_v31  ;;  %v4262_v37 = vld [vmem:[%s5761_s1 + $0x530] ss:$8 sps:$4 sm:$0xff]   ;;  %v4282_v55 = vld [vmem:[%s5761_s1 + $0x564] ss:$8 sps:$4 sm:$0xff]   ;;  %v4289_v14 = vld [vmem:[%s5761_s1 + $0x180] ss:$8 sps:$4 sm:$0xff]  }
  0x26   :  { %v106_v13 = vld [vmem:[%s5762_s0 + $0x2e0] sm:$0xff] }
  0x27   :  { %2337 = vmatpush1.bf16.msra.mxu1 %v4203_v38  ;;  %v4267_v38 = vld [vmem:[%s5761_s1 + $0x144] ss:$8 sps:$4 sm:$0xff]   ;;  %v4292_v15 = vld [vmem:[%s5761_s1 + $0x580] ss:$8 sps:$4 sm:$0xff]  }
  0x28   :  { %2789 = vmatpush1.bf16.msra.mxu0 %v4204_v39  ;;  %2338 = vmatprep.subr.bf16.mxu1 %v4205_v40  ;;  %v4270_v39 = vld [vmem:[%s5761_s1 + $0x544] ss:$8 sps:$4 sm:$0xff]   ;;  %v4265_v40 = vld [vmem:[%s5761_s1 + $0x140] ss:$8 sps:$4 sm:$0xff]  }
  0x29   :  { %2790 = vmatprep.subr.bf16.mxu0 %v4207_v41  ;;  %v4268_v41 = vld [vmem:[%s5761_s1 + $0x540] ss:$8 sps:$4 sm:$0xff]  }
  0x2b   :  { %2339 = vmatpush1.bf16.msra.mxu1 %v4209_v42  ;;  %v62_v42 = vld [vmem:[%s5762_s0 + $0x180] sm:$0xff] }
  0x2c   :  { %2791 = vmatpush1.bf16.msra.mxu0 %v4210_v43  ;;  %2340 = vmatprep.subr.bf16.mxu1 %v4211_v44  ;;  %v70_v43 = vld [vmem:[%s5762_s0 + $0x1c0] sm:$0xff]  ;;  %v3536_v44 = vcombine.low %v46_v26, %v54_v27 }
  0x2d   :  { %2792 = vmatprep.subr.bf16.mxu0 %v4213_v45  ;;  %v3544_v45 = vcombine.low %v50_v30, %v58_v31  ;;  %v3553_v50 = vcombine.high %v62_v42, %v70_v43  ;;  %v110_v26 = vld [vmem:[%s5762_s0 + $0x300] sm:$0xff] }
  0x2e   :  { %v114_v30 = vld [vmem:[%s5762_s0 + $0x320] sm:$0xff] }
  0x2f   :  { %2341 = vmatpush1.bf16.msra.mxu1 %v4215_v46  ;;  %v66_v46 = vld [vmem:[%s5762_s0 + $0x1a0] sm:$0xff] }
  0x30   :  { %2793 = vmatpush1.bf16.msra.mxu0 %v4216_v47  ;;  %2342 = vmatprep.subr.bf16.mxu1 %v4217_v52  ;;  %v74_v47 = vld [vmem:[%s5762_s0 + $0x1e0] sm:$0xff]  ;;  %v4271_v52 = vld [vmem:[%s5761_s1 + $0x150] ss:$8 sps:$4 sm:$0xff]  }
  0x31   :  { %2794 = vmatprep.subr.bf16.mxu0 %v4219_v54  ;;  %v3561_v51 = vcombine.high %v66_v46, %v74_v47  ;;  %v4279_v54 = vld [vmem:[%s5761_s1 + $0x164] ss:$8 sps:$4 sm:$0xff]  }
  0x32   :  { %v122_v31 = vld [vmem:[%s5762_s0 + $0x360] sm:$0xff] }
  0x33   :  { %2343 = vmatpush1.bf16.msra.mxu1 %v4221_v56  ;;  %v4277_v56 = vld [vmem:[%s5761_s1 + $0x160] ss:$8 sps:$4 sm:$0xff]  }
  0x34   :  { %2795 = vmatpush1.bf16.msra.mxu0 %v4222_v57  ;;  %2344 = vmatprep.subr.bf16.mxu1 %v4223_v58  ;;  %v78_v57 = vld [vmem:[%s5762_s0 + $0x200] sm:$0xff] }
  0x35   :  { %2796 = vmatprep.subr.bf16.mxu0 %v4225_v59  ;;  %v86_v58 = vld [vmem:[%s5762_s0 + $0x240] sm:$0xff]  ;;  %v3552_v59 = vcombine.low %v62_v42, %v70_v43 }
  0x36   :  { %v3568_v10 = vcombine.low %v78_v57, %v86_v58  ;;  %v126_v42 = vld [vmem:[%s5762_s0 + $0x380] sm:$0xff] }
  0x37   :  { %2345 = vmatpush1.bf16.msra.mxu1 %v4227_v60  ;;  %v3560_v60 = vcombine.low %v66_v46, %v74_v47  ;;  %v134_v43 = vld [vmem:[%s5762_s0 + $0x3c0] sm:$0xff] }
  0x38   :  { %2797 = vmatpush1.bf16.msra.mxu0 %v4228_v61  ;;  %2346 = vmatprep.subr.bf16.mxu1 %v4229_v62  ;;  %v82_v61 = vld [vmem:[%s5762_s0 + $0x220] sm:$0xff] }
  0x39   :  { %2798 = vmatprep.subr.bf16.mxu0 %v4231_v63  ;;  %v90_v62 = vld [vmem:[%s5762_s0 + $0x260] sm:$0xff] }
  0x3a   :  { %v4280_v63 = vld [vmem:[%s5761_s1 + $0x560] ss:$8 sps:$4 sm:$0xff]  }
  0x3b   :  { %2347 = vmatpush1.bf16.msra.mxu1 %v4233_v0  ;;  %v4285_v0 = vld [vmem:[%s5761_s1 + $0x174] ss:$8 sps:$4 sm:$0xff]   ;;  %v130_v46 = vld [vmem:[%s5762_s0 + $0x3a0] sm:$0xff] }
  0x3c   :  { %2799 = vmatpush1.bf16.msra.mxu0 %v4234_v1  ;;  %2348 = vmatprep.subr.bf16.mxu1 %v4235_v2  ;;  %v4288_v1 = vld [vmem:[%s5761_s1 + $0x574] ss:$8 sps:$4 sm:$0xff]   ;;  %v3569_v2 = vcombine.high %v78_v57, %v86_v58  ;;  %v138_v47 = vld [vmem:[%s5762_s0 + $0x3e0] sm:$0xff]  ;;  %v15_v58 = vld [vmem:[%s5762_s0 + $0x8] sm:$0xff] }
  0x3d   :  { %2800 = vmatprep.subr.bf16.mxu0 %v4237_v3  ;;  %v3577_v3 = vcombine.high %v82_v61, %v90_v62  ;;  %v4328_v57 = vld [vmem:[%s5761_s1 + $0x5e0] ss:$8 sps:$4 sm:$0xff]  }
  0x3f   :  { %2349 = vmatpush1.bf16.msra.mxu1 %v4239_v4  ;;  %v4283_v4 = vld [vmem:[%s5761_s1 + $0x170] ss:$8 sps:$4 sm:$0xff]  }
  0x40   :  { %2801 = vmatpush1.bf16.msra.mxu0 %v4240_v5  ;;  %2431 = vmatprep.subr.bf16.mxu1 %v4243_v6  ;;  %v4286_v5 = vld [vmem:[%s5761_s1 + $0x570] ss:$8 sps:$4 sm:$0xff]   ;;  %v4291_v6 = vld [vmem:[%s5761_s1 + $0x184] ss:$8 sps:$4 sm:$0xff]  }
  0x41   :  { %2883 = vmatprep.subr.bf16.mxu0 %v4246_v7  ;;  %v4294_v7 = vld [vmem:[%s5761_s1 + $0x584] ss:$8 sps:$4 sm:$0xff]  }
  0x42   :  { %2351 = vmatmul.mubr.bf16.vlgmr.msra.gmra.mrb[0].mxu1 %v3504_v11  ;;  %v3576_v11 = vcombine.low %v82_v61, %v90_v62  ;;  %v3624_v61 = vcombine.low %v130_v46, %v138_v47  ;;  %v19_v62 = vld [vmem:[%s5762_s0 + $0x28] sm:$0xff] }
  0x43   :  { %2803 = vmatmul.mubr.bf16.vlgmr.msra.gmra.mrb[0].mxu0 %v3512_v12  ;;  %2432 = vmatpush1.bf16.msra.mxu1 %v4241_v8  ;;  %v94_v8 = vld [vmem:[%s5762_s0 + $0x280] sm:$0xff] }
  0x44   :  { %2884 = vmatpush1.bf16.msra.mxu0 %v4244_v9  ;;  %2433 = vmatprep.subr.bf16.mxu1 %v4249_v16  ;;  %v102_v9 = vld [vmem:[%s5762_s0 + $0x2c0] sm:$0xff]  ;;  %v4297_v16 = vld [vmem:[%s5761_s1 + $0x194] ss:$8 sps:$4 sm:$0xff]  }
  0x45   :  { %2885 = vmatprep.subr.bf16.mxu0 %v4252_v17  ;;  %2360 = vmatprep.mubr.bf16.mxu1 %v3521_v18  ;;  %v98_v12 = vld [vmem:[%s5762_s0 + $0x2a0] sm:$0xff]  ;;  %v4300_v17 = vld [vmem:[%s5761_s1 + $0x594] ss:$8 sps:$4 sm:$0xff]   ;;  %v3585_v18 = vcombine.high %v94_v8, %v102_v9  ;;  %v3584_v27 = vcombine.low %v94_v8, %v102_v9  ;;  %v31_v9 = vld [vmem:[%s5762_s0 + $0x88] sm:$0xff] }
  0x46   :  { %2812 = vmatprep.mubr.bf16.mxu0 %v3529_v19  ;;  %v3593_v19 = vcombine.high %v98_v12, %v106_v13  ;;  %v4337_v8 = vld [vmem:[%s5761_s1 + $0x200] ss:$8 sps:$4 sm:$0xff]  }
  0x47   :  { %2434 = vmatpush1.bf16.msra.mxu1 %v4247_v20  ;;  %v4295_v20 = vld [vmem:[%s5761_s1 + $0x190] ss:$8 sps:$4 sm:$0xff]  }
  0x48   :  { %2886 = vmatpush1.bf16.msra.mxu0 %v4250_v21  ;;  %2435 = vmatprep.subr.bf16.mxu1 %v4255_v22  ;;  %v4298_v21 = vld [vmem:[%s5761_s1 + $0x590] ss:$8 sps:$4 sm:$0xff]   ;;  %v4303_v22 = vld [vmem:[%s5761_s1 + $0x1a4] ss:$8 sps:$4 sm:$0xff]  }
  0x49   :  { %2887 = vmatprep.subr.bf16.mxu0 %v4258_v23  ;;  %v4306_v23 = vld [vmem:[%s5761_s1 + $0x5a4] ss:$8 sps:$4 sm:$0xff]  }
  0x4a   :  { %2361 = vmatmul.mubr.bf16.gmra.mrb[4].mxu1 %v3520_v28  ;;  %v3592_v28 = vcombine.low %v98_v12, %v106_v13  ;;  %v35_v13 = vld [vmem:[%s5762_s0 + $0xa8] sm:$0xff] }
  0x4b   :  { %2813 = vmatmul.mubr.bf16.gmra.mrb[4].mxu0 %v3528_v29  ;;  %2436 = vmatpush1.bf16.msra.mxu1 %v4253_v24  ;;  %v4301_v24 = vld [vmem:[%s5761_s1 + $0x1a0] ss:$8 sps:$4 sm:$0xff]  }
  0x4c   :  { %2888 = vmatpush1.bf16.msra.mxu0 %v4256_v25  ;;  %2437 = vmatprep.subr.bf16.mxu1 %v4261_v32  ;;  %v4304_v25 = vld [vmem:[%s5761_s1 + $0x5a0] ss:$8 sps:$4 sm:$0xff]   ;;  %v4309_v32 = vld [vmem:[%s5761_s1 + $0x1b4] ss:$8 sps:$4 sm:$0xff]  }
  0x4d   :  { %2889 = vmatprep.subr.bf16.mxu0 %v4264_v33  ;;  %2370 = vmatprep.mubr.bf16.mxu1 %v3537_v34  ;;  %v118_v29 = vld [vmem:[%s5762_s0 + $0x340] sm:$0xff]  ;;  %v4312_v33 = vld [vmem:[%s5761_s1 + $0x5b4] ss:$8 sps:$4 sm:$0xff]  }
  0x4e   :  { %2822 = vmatprep.mubr.bf16.mxu0 %v3545_v35  ;;  %v3601_v34 = vcombine.high %v110_v26, %v118_v29  ;;  %v3609_v35 = vcombine.high %v114_v30, %v122_v31 }
  0x4f   :  { %2438 = vmatpush1.bf16.msra.mxu1 %v4259_v36  ;;  %v4307_v36 = vld [vmem:[%s5761_s1 + $0x1b0] ss:$8 sps:$4 sm:$0xff]  }
  0x50   :  { %2890 = vmatpush1.bf16.msra.mxu0 %v4262_v37  ;;  %2439 = vmatprep.subr.bf16.mxu1 %v4267_v38  ;;  %v4310_v37 = vld [vmem:[%s5761_s1 + $0x5b0] ss:$8 sps:$4 sm:$0xff]   ;;  %v4315_v38 = vld [vmem:[%s5761_s1 + $0x1c4] ss:$8 sps:$4 sm:$0xff]  }
  0x51   :  { %2891 = vmatprep.subr.bf16.mxu0 %v4270_v39  ;;  %v4318_v39 = vld [vmem:[%s5761_s1 + $0x5c4] ss:$8 sps:$4 sm:$0xff]  }
  0x52   :  { %2371 = vmatmul.mubr.bf16.gmra.mrb[8].mxu1 %v3536_v44  ;;  %v3600_v44 = vcombine.low %v110_v26, %v118_v29  ;;  %v59_v29 = vld [vmem:[%s5762_s0 + $0x168] sm:$0xff] }
  0x53   :  { %2823 = vmatmul.mubr.bf16.gmra.mrb[8].mxu0 %v3544_v45  ;;  %2440 = vmatpush1.bf16.msra.mxu1 %v4265_v40  ;;  %v4313_v40 = vld [vmem:[%s5761_s1 + $0x1c0] ss:$8 sps:$4 sm:$0xff]   ;;  %v3608_v45 = vcombine.low %v114_v30, %v122_v31 }
  0x54   :  { %2892 = vmatpush1.bf16.msra.mxu0 %v4268_v41  ;;  %2441 = vmatprep.subr.bf16.mxu1 %v4273_v48  ;;  %v4316_v41 = vld [vmem:[%s5761_s1 + $0x5c0] ss:$8 sps:$4 sm:$0xff]   ;;  %v4321_v48 = vld [vmem:[%s5761_s1 + $0x1d4] ss:$8 sps:$4 sm:$0xff]  }
  0x55   :  { %2893 = vmatprep.subr.bf16.mxu0 %v4276_v49  ;;  %2380 = vmatprep.mubr.bf16.mxu1 %v3553_v50  ;;  %v4324_v49 = vld [vmem:[%s5761_s1 + $0x5d4] ss:$8 sps:$4 sm:$0xff]   ;;  %v3617_v50 = vcombine.high %v126_v42, %v134_v43  ;;  %v4349_v30 = vld [vmem:[%s5761_s1 + $0x220] ss:$8 sps:$4 sm:$0xff]  }
  0x56   :  { %2832 = vmatprep.mubr.bf16.mxu0 %v3561_v51  ;;  %v3625_v51 = vcombine.high %v130_v46, %v138_v47  ;;  %v4352_v31 = vld [vmem:[%s5761_s1 + $0x620] ss:$8 sps:$4 sm:$0xff]  }
  0x57   :  { %2442 = vmatpush1.bf16.msra.mxu1 %v4271_v52  ;;  %v4319_v52 = vld [vmem:[%s5761_s1 + $0x1d0] ss:$8 sps:$4 sm:$0xff]   ;;  %v67_v46 = vld [vmem:[%s5762_s0 + $0x1a8] sm:$0xff] }
  0x58   :  { %2894 = vmatpush1.bf16.msra.mxu0 %v4274_v53  ;;  %2443 = vmatprep.subr.bf16.mxu1 %v4279_v54  ;;  %v4322_v53 = vld [vmem:[%s5761_s1 + $0x5d0] ss:$8 sps:$4 sm:$0xff]   ;;  %v4327_v54 = vld [vmem:[%s5761_s1 + $0x1e4] ss:$8 sps:$4 sm:$0xff]  }
  0x59   :  { %2895 = vmatprep.subr.bf16.mxu0 %v4282_v55  ;;  %v4330_v55 = vld [vmem:[%s5761_s1 + $0x5e4] ss:$8 sps:$4 sm:$0xff]  }
  0x5a   :  { %2381 = vmatmul.mubr.bf16.gmra.mrb[12].mxu1 %v3552_v59  ;;  %v23_v59 = vld [vmem:[%s5762_s0 + $0x48] sm:$0xff] }
  0x5b   :  { %2833 = vmatmul.mubr.bf16.gmra.mrb[12].mxu0 %v3560_v60  ;;  %2444 = vmatpush1.bf16.msra.mxu1 %v4277_v56  ;;  %v4325_v56 = vld [vmem:[%s5761_s1 + $0x1e0] ss:$8 sps:$4 sm:$0xff]   ;;  %v3616_v60 = vcombine.low %v126_v42, %v134_v43 }
  0x5c   :  { %2896 = vmatpush1.bf16.msra.mxu0 %v4280_v63  ;;  %2445 = vmatprep.subr.bf16.mxu1 %v4285_v0  ;;  %v27_v63 = vld [vmem:[%s5762_s0 + $0x68] sm:$0xff]  ;;  %v4333_v0 = vld [vmem:[%s5761_s1 + $0x1f4] ss:$8 sps:$4 sm:$0xff]  }
  0x5d   :  { %2897 = vmatprep.subr.bf16.mxu0 %v4288_v1  ;;  %2390 = vmatprep.mubr.bf16.mxu1 %v3569_v2  ;;  %v4336_v1 = vld [vmem:[%s5761_s1 + $0x5f4] ss:$8 sps:$4 sm:$0xff]   ;;  %v3507_v2 = vcombine.high %v15_v58, %v23_v59  ;;  %v3514_v12 = vcombine.low %v19_v62, %v27_v63  ;;  %v63_v42 = vld [vmem:[%s5762_s0 + $0x188] sm:$0xff] }
  0x5e   :  { %2842 = vmatprep.mubr.bf16.mxu0 %v3577_v3  ;;  %v3515_v3 = vcombine.high %v19_v62, %v27_v63  ;;  %v75_v47 = vld [vmem:[%s5762_s0 + $0x1e8] sm:$0xff] }
  0x5f   :  { %2446 = vmatpush1.bf16.msra.mxu1 %v4283_v4  ;;  %v4331_v4 = vld [vmem:[%s5761_s1 + $0x1f0] ss:$8 sps:$4 sm:$0xff]   ;;  %v83_v62 = vld [vmem:[%s5762_s0 + $0x228] sm:$0xff] }
  0x60   :  { %2898 = vmatpush1.bf16.msra.mxu0 %v4286_v5  ;;  %2447 = vmatprep.subr.bf16.mxu1 %v4291_v6  ;;  %v4334_v5 = vld [vmem:[%s5761_s1 + $0x5f0] ss:$8 sps:$4 sm:$0xff]   ;;  %v4339_v6 = vld [vmem:[%s5761_s1 + $0x204] ss:$8 sps:$4 sm:$0xff]  }
  0x61   :  { %2899 = vmatprep.subr.bf16.mxu0 %v4294_v7  ;;  %v4342_v7 = vld [vmem:[%s5761_s1 + $0x604] ss:$8 sps:$4 sm:$0xff]  }
  0x62   :  { %2391 = vmatmul.mubr.bf16.gmra.mrb[16].mxu1 %v3568_v10  ;;  %v39_v10 = vld [vmem:[%s5762_s0 + $0xc8] sm:$0xff] }
  0x63   :  { %2843 = vmatmul.mubr.bf16.gmra.mrb[16].mxu0 %v3576_v11  ;;  %2448 = vmatpush1.bf16.msra.mxu1 %v4289_v14  ;;  %v3506_v11 = vcombine.low %v15_v58, %v23_v59  ;;  %v43_v14 = vld [vmem:[%s5762_s0 + $0xe8] sm:$0xff]  ;;  %v3522_v26 = vcombine.low %v31_v9, %v39_v10 }
  0x64   :  { %2900 = vmatpush1.bf16.msra.mxu0 %v4292_v15  ;;  %2449 = vmatprep.subr.bf16.mxu1 %v4297_v16  ;;  %v4340_v15 = vld [vmem:[%s5761_s1 + $0x600] ss:$8 sps:$4 sm:$0xff]   ;;  %v4345_v16 = vld [vmem:[%s5761_s1 + $0x214] ss:$8 sps:$4 sm:$0xff]  }
  0x65   :  { %2901 = vmatprep.subr.bf16.mxu0 %v4300_v17  ;;  %2400 = vmatprep.mubr.bf16.mxu1 %v3585_v18  ;;  %v4348_v17 = vld [vmem:[%s5761_s1 + $0x614] ss:$8 sps:$4 sm:$0xff]   ;;  %v3523_v18 = vcombine.high %v31_v9, %v39_v10  ;;  %v79_v58 = vld [vmem:[%s5762_s0 + $0x208] sm:$0xff] }
  0x66   :  { %2852 = vmatprep.mubr.bf16.mxu0 %v3593_v19  ;;  %v3531_v19 = vcombine.high %v35_v13, %v43_v14  ;;  %v87_v59 = vld [vmem:[%s5762_s0 + $0x248] sm:$0xff] }
  0x67   :  { %2450 = vmatpush1.bf16.msra.mxu1 %v4295_v20  ;;  %v4343_v20 = vld [vmem:[%s5761_s1 + $0x210] ss:$8 sps:$4 sm:$0xff]   ;;  %v91_v63 = vld [vmem:[%s5762_s0 + $0x268] sm:$0xff] }
  0x68   :  { %2902 = vmatpush1.bf16.msra.mxu0 %v4298_v21  ;;  %2451 = vmatprep.subr.bf16.mxu1 %v4303_v22  ;;  %v4346_v21 = vld [vmem:[%s5761_s1 + $0x610] ss:$8 sps:$4 sm:$0xff]   ;;  %v4351_v22 = vld [vmem:[%s5761_s1 + $0x224] ss:$8 sps:$4 sm:$0xff]   ;;  %v4388_v9 = vld [vmem:[%s5761_s1 + $0x680] ss:$8 sps:$4 sm:$0xff]  }
  0x69   :  { %2903 = vmatprep.subr.bf16.mxu0 %v4306_v23  ;;  %v4354_v23 = vld [vmem:[%s5761_s1 + $0x624] ss:$8 sps:$4 sm:$0xff]  }
  0x6a   :  { %2401 = vmatmul.mubr.bf16.gmra.mrb[20].mxu1 %v3584_v27  ;;  %v3530_v27 = vcombine.low %v35_v13, %v43_v14  ;;  %v95_v10 = vld [vmem:[%s5762_s0 + $0x288] sm:$0xff]  ;;  %v3578_v13 = vcombine.low %v83_v62, %v91_v63 }
  0x6b   :  { %2853 = vmatmul.mubr.bf16.gmra.mrb[20].mxu0 %v3592_v28  ;;  %2452 = vmatpush1.bf16.msra.mxu1 %v4301_v24  ;;  %v47_v24 = vld [vmem:[%s5762_s0 + $0x108] sm:$0xff] }
  0x6c   :  { %2904 = vmatpush1.bf16.msra.mxu0 %v4304_v25  ;;  %2453 = vmatprep.subr.bf16.mxu1 %v4309_v32  ;;  %v55_v25 = vld [vmem:[%s5762_s0 + $0x148] sm:$0xff]  ;;  %v4357_v32 = vld [vmem:[%s5761_s1 + $0x234] ss:$8 sps:$4 sm:$0xff]  }
  0x6d   :  { %2905 = vmatprep.subr.bf16.mxu0 %v4312_v33  ;;  %2410 = vmatprep.mubr.bf16.mxu1 %v3601_v34  ;;  %v51_v28 = vld [vmem:[%s5762_s0 + $0x128] sm:$0xff]  ;;  %v4360_v33 = vld [vmem:[%s5761_s1 + $0x634] ss:$8 sps:$4 sm:$0xff]   ;;  %v3539_v34 = vcombine.high %v47_v24, %v55_v25  ;;  %v3538_v43 = vcombine.low %v47_v24, %v55_v25 }
  0x6e   :  { %2862 = vmatprep.mubr.bf16.mxu0 %v3609_v35  ;;  %v3547_v35 = vcombine.high %v51_v28, %v59_v29  ;;  %v99_v14 = vld [vmem:[%s5762_s0 + $0x2a8] sm:$0xff] }
  0x6f   :  { %2454 = vmatpush1.bf16.msra.mxu1 %v4307_v36  ;;  %v4355_v36 = vld [vmem:[%s5761_s1 + $0x230] ss:$8 sps:$4 sm:$0xff]   ;;  %v4397_v24 = vld [vmem:[%s5761_s1 + $0x2a0] ss:$8 sps:$4 sm:$0xff]  }
  0x70   :  { %2906 = vmatpush1.bf16.msra.mxu0 %v4310_v37  ;;  %2455 = vmatprep.subr.bf16.mxu1 %v4315_v38  ;;  %v4358_v37 = vld [vmem:[%s5761_s1 + $0x630] ss:$8 sps:$4 sm:$0xff]   ;;  %v4363_v38 = vld [vmem:[%s5761_s1 + $0x244] ss:$8 sps:$4 sm:$0xff]  }
  0x71   :  { %2907 = vmatprep.subr.bf16.mxu0 %v4318_v39  ;;  %v4366_v39 = vld [vmem:[%s5761_s1 + $0x644] ss:$8 sps:$4 sm:$0xff]  }
  0x72   :  { %2411 = vmatmul.mubr.bf16.gmra.mrb[24].mxu1 %v3600_v44  ;;  %v3546_v44 = vcombine.low %v51_v28, %v59_v29  ;;  %v111_v25 = vld [vmem:[%s5762_s0 + $0x308] sm:$0xff] }
  0x73   :  { %2863 = vmatmul.mubr.bf16.gmra.mrb[24].mxu0 %v3608_v45  ;;  %2456 = vmatpush1.bf16.msra.mxu1 %v4313_v40  ;;  %v4361_v40 = vld [vmem:[%s5761_s1 + $0x240] ss:$8 sps:$4 sm:$0xff]  }
  0x74   :  { %2908 = vmatpush1.bf16.msra.mxu0 %v4316_v41  ;;  %2457 = vmatprep.subr.bf16.mxu1 %v4321_v48  ;;  %v4364_v41 = vld [vmem:[%s5761_s1 + $0x640] ss:$8 sps:$4 sm:$0xff]   ;;  %v4369_v48 = vld [vmem:[%s5761_s1 + $0x254] ss:$8 sps:$4 sm:$0xff]  }
  0x75   :  { %2909 = vmatprep.subr.bf16.mxu0 %v4324_v49  ;;  %2420 = vmatprep.mubr.bf16.mxu1 %v3617_v50  ;;  %v71_v45 = vld [vmem:[%s5762_s0 + $0x1c8] sm:$0xff]  ;;  %v4372_v49 = vld [vmem:[%s5761_s1 + $0x654] ss:$8 sps:$4 sm:$0xff]  }
  0x76   :  { %2872 = vmatprep.mubr.bf16.mxu0 %v3625_v51  ;;  %v3555_v50 = vcombine.high %v63_v42, %v71_v45  ;;  %v3563_v51 = vcombine.high %v67_v46, %v75_v47  ;;  %v115_v29 = vld [vmem:[%s5762_s0 + $0x328] sm:$0xff] }
  0x77   :  { %2458 = vmatpush1.bf16.msra.mxu1 %v4319_v52  ;;  %v4367_v52 = vld [vmem:[%s5761_s1 + $0x250] ss:$8 sps:$4 sm:$0xff]  }
  0x78   :  { %2910 = vmatpush1.bf16.msra.mxu0 %v4322_v53  ;;  %2459 = vmatprep.subr.bf16.mxu1 %v4327_v54  ;;  %v4370_v53 = vld [vmem:[%s5761_s1 + $0x650] ss:$8 sps:$4 sm:$0xff]   ;;  %v4375_v54 = vld [vmem:[%s5761_s1 + $0x264] ss:$8 sps:$4 sm:$0xff]  }
  0x79   :  { %2911 = vmatprep.subr.bf16.mxu0 %v4330_v55  ;;  %v4378_v55 = vld [vmem:[%s5761_s1 + $0x664] ss:$8 sps:$4 sm:$0xff]  }
  0x7a   :  { %2421 = vmatmul.mubr.bf16.gmra.mrb[28].mxu1 %v3616_v60  ;;  %v3554_v60 = vcombine.low %v63_v42, %v71_v45  ;;  %v139_v45 = vld [vmem:[%s5762_s0 + $0x3e8] sm:$0xff] }
  0x7b   :  { %2873 = vmatmul.mubr.bf16.gmra.mrb[28].mxu0 %v3624_v61  ;;  %2460 = vmatpush1.bf16.msra.mxu1 %v4325_v56  ;;  %v4373_v56 = vld [vmem:[%s5761_s1 + $0x260] ss:$8 sps:$4 sm:$0xff]   ;;  %v3562_v61 = vcombine.low %v67_v46, %v75_v47 }
  0x7c   :  { %2912 = vmatpush1.bf16.msra.mxu0 %v4328_v57  ;;  %2461 = vmatprep.subr.bf16.mxu1 %v4333_v0  ;;  %v4376_v57 = vld [vmem:[%s5761_s1 + $0x660] ss:$8 sps:$4 sm:$0xff]   ;;  %v4381_v0 = vld [vmem:[%s5761_s1 + $0x274] ss:$8 sps:$4 sm:$0xff]  }
  0x7d   :  { %2913 = vmatprep.subr.bf16.mxu0 %v4336_v1  ;;  %2463 = vmatprep.mubr.bf16.mxu1 %v3507_v2  ;;  %v4384_v1 = vld [vmem:[%s5761_s1 + $0x674] ss:$8 sps:$4 sm:$0xff]   ;;  %v3571_v2 = vcombine.high %v79_v58, %v87_v59  ;;  %v4409_v46 = vld [vmem:[%s5761_s1 + $0x2c0] ss:$8 sps:$4 sm:$0xff]  }
  0x7e   :  { %2915 = vmatprep.mubr.bf16.mxu0 %v3515_v3  ;;  %v3579_v3 = vcombine.high %v83_v62, %v91_v63  ;;  %v4412_v47 = vld [vmem:[%s5761_s1 + $0x6c0] ss:$8 sps:$4 sm:$0xff]   ;;  %v20_v62 = vld [vmem:[%s5762_s0 + $0x30] sm:$0xff] }
  0x7f   :  { %2462 = vmatpush1.bf16.msra.mxu1 %v4331_v4  ;;  %v4379_v4 = vld [vmem:[%s5761_s1 + $0x270] ss:$8 sps:$4 sm:$0xff]  }
  0x80   :  { %2914 = vmatpush1.bf16.msra.mxu0 %v4334_v5  ;;  %2544 = vmatprep.subr.bf16.mxu1 %v4339_v6  ;;  %v4382_v5 = vld [vmem:[%s5761_s1 + $0x670] ss:$8 sps:$4 sm:$0xff]   ;;  %v4387_v6 = vld [vmem:[%s5761_s1 + $0x284] ss:$8 sps:$4 sm:$0xff]  }
  0x81   :  { %2996 = vmatprep.subr.bf16.mxu0 %v4342_v7  ;;  %v4390_v7 = vld [vmem:[%s5761_s1 + $0x684] ss:$8 sps:$4 sm:$0xff]   ;;  %v28_v63 = vld [vmem:[%s5762_s0 + $0x70] sm:$0xff] }
  0x82   :  { %2464 = vmatmul.mubr.bf16.vlgmr.msra.gmra.mrb[0].mxu1 %v3506_v11  ;;  %v103_v11 = vld [vmem:[%s5762_s0 + $0x2c8] sm:$0xff] }
  0x83   :  { %2916 = vmatmul.mubr.bf16.vlgmr.msra.gmra.mrb[0].mxu0 %v3514_v12  ;;  %2545 = vmatpush1.bf16.msra.mxu1 %v4337_v8  ;;  %v4385_v8 = vld [vmem:[%s5761_s1 + $0x280] ss:$8 sps:$4 sm:$0xff]   ;;  %v3570_v12 = vcombine.low %v79_v58, %v87_v59  ;;  %v16_v58 = vld [vmem:[%s5762_s0 + $0x10] sm:$0xff] }
  0x84   :  { %2997 = vmatpush1.bf16.msra.mxu0 %v4340_v15  ;;  %2546 = vmatprep.subr.bf16.mxu1 %v4345_v16  ;;  %v107_v15 = vld [vmem:[%s5762_s0 + $0x2e8] sm:$0xff]  ;;  %v4393_v16 = vld [vmem:[%s5761_s1 + $0x294] ss:$8 sps:$4 sm:$0xff]  }
  0x85   :  { %2998 = vmatprep.subr.bf16.mxu0 %v4348_v17  ;;  %2473 = vmatprep.mubr.bf16.mxu1 %v3523_v18  ;;  %v4396_v17 = vld [vmem:[%s5761_s1 + $0x694] ss:$8 sps:$4 sm:$0xff]   ;;  %v3587_v18 = vcombine.high %v95_v10, %v103_v11  ;;  %v3594_v28 = vcombine.low %v99_v14, %v107_v15 }
  0x86   :  { %2925 = vmatprep.mubr.bf16.mxu0 %v3531_v19  ;;  %v3595_v19 = vcombine.high %v99_v14, %v107_v15  ;;  %v36_v14 = vld [vmem:[%s5762_s0 + $0xb0] sm:$0xff] }
  0x87   :  { %2547 = vmatpush1.bf16.msra.mxu1 %v4343_v20  ;;  %v4391_v20 = vld [vmem:[%s5761_s1 + $0x290] ss:$8 sps:$4 sm:$0xff]  }
  0x88   :  { %2999 = vmatpush1.bf16.msra.mxu0 %v4346_v21  ;;  %2548 = vmatprep.subr.bf16.mxu1 %v4351_v22  ;;  %v4394_v21 = vld [vmem:[%s5761_s1 + $0x690] ss:$8 sps:$4 sm:$0xff]   ;;  %v4399_v22 = vld [vmem:[%s5761_s1 + $0x2a4] ss:$8 sps:$4 sm:$0xff]  }
  0x89   :  { %3000 = vmatprep.subr.bf16.mxu0 %v4354_v23  ;;  %v4402_v23 = vld [vmem:[%s5761_s1 + $0x6a4] ss:$8 sps:$4 sm:$0xff]   ;;  %v44_v15 = vld [vmem:[%s5762_s0 + $0xf0] sm:$0xff] }
  0x8a   :  { %2474 = vmatmul.mubr.bf16.gmra.mrb[4].mxu1 %v3522_v26  ;;  %v119_v26 = vld [vmem:[%s5762_s0 + $0x348] sm:$0xff] }
  0x8b   :  { %2926 = vmatmul.mubr.bf16.gmra.mrb[4].mxu0 %v3530_v27  ;;  %2549 = vmatpush1.bf16.msra.mxu1 %v4349_v30  ;;  %v3586_v27 = vcombine.low %v95_v10, %v103_v11  ;;  %v123_v30 = vld [vmem:[%s5762_s0 + $0x368] sm:$0xff]  ;;  %v3602_v42 = vcombine.low %v111_v25, %v119_v26  ;;  %v32_v10 = vld [vmem:[%s5762_s0 + $0x90] sm:$0xff] }
  0x8c   :  { %3001 = vmatpush1.bf16.msra.mxu0 %v4352_v31  ;;  %2550 = vmatprep.subr.bf16.mxu1 %v4357_v32  ;;  %v4400_v31 = vld [vmem:[%s5761_s1 + $0x6a0] ss:$8 sps:$4 sm:$0xff]   ;;  %v4405_v32 = vld [vmem:[%s5761_s1 + $0x2b4] ss:$8 sps:$4 sm:$0xff]  }
  0x8d   :  { %3002 = vmatprep.subr.bf16.mxu0 %v4360_v33  ;;  %2483 = vmatprep.mubr.bf16.mxu1 %v3539_v34  ;;  %v4408_v33 = vld [vmem:[%s5761_s1 + $0x6b4] ss:$8 sps:$4 sm:$0xff]   ;;  %v3603_v34 = vcombine.high %v111_v25, %v119_v26  ;;  %v4448_v25 = vld [vmem:[%s5761_s1 + $0x720] ss:$8 sps:$4 sm:$0xff]  }
  0x8e   :  { %2935 = vmatprep.mubr.bf16.mxu0 %v3547_v35  ;;  %v3611_v35 = vcombine.high %v115_v29, %v123_v30  ;;  %v40_v11 = vld [vmem:[%s5762_s0 + $0xd0] sm:$0xff] }
  0x8f   :  { %2551 = vmatpush1.bf16.msra.mxu1 %v4355_v36  ;;  %v4403_v36 = vld [vmem:[%s5761_s1 + $0x2b0] ss:$8 sps:$4 sm:$0xff]  }
  0x90   :  { %3003 = vmatpush1.bf16.msra.mxu0 %v4358_v37  ;;  %2552 = vmatprep.subr.bf16.mxu1 %v4363_v38  ;;  %v4406_v37 = vld [vmem:[%s5761_s1 + $0x6b0] ss:$8 sps:$4 sm:$0xff]   ;;  %v4411_v38 = vld [vmem:[%s5761_s1 + $0x2c4] ss:$8 sps:$4 sm:$0xff]  }
  0x91   :  { %3004 = vmatprep.subr.bf16.mxu0 %v4366_v39  ;;  %v4414_v39 = vld [vmem:[%s5761_s1 + $0x6c4] ss:$8 sps:$4 sm:$0xff]   ;;  %v48_v26 = vld [vmem:[%s5762_s0 + $0x110] sm:$0xff] }
  0x92   :  { %2484 = vmatmul.mubr.bf16.gmra.mrb[8].mxu1 %v3538_v43  ;;  %v3610_v43 = vcombine.low %v115_v29, %v123_v30  ;;  %v3532_v29 = vcombine.low %v36_v14, %v44_v15  ;;  %v52_v30 = vld [vmem:[%s5762_s0 + $0x130] sm:$0xff] }
  0x93   :  { %2936 = vmatmul.mubr.bf16.gmra.mrb[8].mxu0 %v3546_v44  ;;  %2553 = vmatpush1.bf16.msra.mxu1 %v4361_v40  ;;  %v127_v40 = vld [vmem:[%s5762_s0 + $0x388] sm:$0xff] }
  0x94   :  { %3005 = vmatpush1.bf16.msra.mxu0 %v4364_v41  ;;  %2554 = vmatprep.subr.bf16.mxu1 %v4369_v48  ;;  %v135_v41 = vld [vmem:[%s5762_s0 + $0x3c8] sm:$0xff]  ;;  %v4417_v48 = vld [vmem:[%s5761_s1 + $0x2d4] ss:$8 sps:$4 sm:$0xff]  }
  0x95   :  { %3006 = vmatprep.subr.bf16.mxu0 %v4372_v49  ;;  %2493 = vmatprep.mubr.bf16.mxu1 %v3555_v50  ;;  %v131_v44 = vld [vmem:[%s5762_s0 + $0x3a8] sm:$0xff]  ;;  %v4420_v49 = vld [vmem:[%s5761_s1 + $0x6d4] ss:$8 sps:$4 sm:$0xff]   ;;  %v3619_v50 = vcombine.high %v127_v40, %v135_v41  ;;  %v3618_v59 = vcombine.low %v127_v40, %v135_v41 }
  0x96   :  { %2945 = vmatprep.mubr.bf16.mxu0 %v3563_v51  ;;  %v3627_v51 = vcombine.high %v131_v44, %v139_v45  ;;  %v64_v40 = vld [vmem:[%s5762_s0 + $0x190] sm:$0xff] }
  0x97   :  { %2555 = vmatpush1.bf16.msra.mxu1 %v4367_v52  ;;  %v4415_v52 = vld [vmem:[%s5761_s1 + $0x2d0] ss:$8 sps:$4 sm:$0xff]  }
  0x98   :  { %3007 = vmatpush1.bf16.msra.mxu0 %v4370_v53  ;;  %2556 = vmatprep.subr.bf16.mxu1 %v4375_v54  ;;  %v4418_v53 = vld [vmem:[%s5761_s1 + $0x6d0] ss:$8 sps:$4 sm:$0xff]   ;;  %v4423_v54 = vld [vmem:[%s5761_s1 + $0x2e4] ss:$8 sps:$4 sm:$0xff]  }
  0x99   :  { %3008 = vmatprep.subr.bf16.mxu0 %v4378_v55  ;;  %v4426_v55 = vld [vmem:[%s5761_s1 + $0x6e4] ss:$8 sps:$4 sm:$0xff]  }
  0x9a   :  { %2494 = vmatmul.mubr.bf16.gmra.mrb[12].mxu1 %v3554_v60  ;;  %v3626_v60 = vcombine.low %v131_v44, %v139_v45  ;;  %v68_v44 = vld [vmem:[%s5762_s0 + $0x1b0] sm:$0xff] }
  0x9b   :  { %2946 = vmatmul.mubr.bf16.gmra.mrb[12].mxu0 %v3562_v61  ;;  %2557 = vmatpush1.bf16.msra.mxu1 %v4373_v56  ;;  %v4421_v56 = vld [vmem:[%s5761_s1 + $0x2e0] ss:$8 sps:$4 sm:$0xff]   ;;  %v24_v61 = vld [vmem:[%s5762_s0 + $0x50] sm:$0xff] }
  0x9c   :  { %3009 = vmatpush1.bf16.msra.mxu0 %v4376_v57  ;;  %2558 = vmatprep.subr.bf16.mxu1 %v4381_v0  ;;  %v4424_v57 = vld [vmem:[%s5761_s1 + $0x6e0] ss:$8 sps:$4 sm:$0xff]   ;;  %v4429_v0 = vld [vmem:[%s5761_s1 + $0x2f4] ss:$8 sps:$4 sm:$0xff]  }
  0x9d   :  { %3010 = vmatprep.subr.bf16.mxu0 %v4384_v1  ;;  %2503 = vmatprep.mubr.bf16.mxu1 %v3571_v2  ;;  %v4432_v1 = vld [vmem:[%s5761_s1 + $0x6f4] ss:$8 sps:$4 sm:$0xff]   ;;  %v3509_v2 = vcombine.high %v16_v58, %v24_v61 }
  0x9e   :  { %2955 = vmatprep.mubr.bf16.mxu0 %v3579_v3  ;;  %v3517_v3 = vcombine.high %v20_v62, %v28_v63  ;;  %v76_v45 = vld [vmem:[%s5762_s0 + $0x1f0] sm:$0xff] }
  0x9f   :  { %2559 = vmatpush1.bf16.msra.mxu1 %v4379_v4  ;;  %v4427_v4 = vld [vmem:[%s5761_s1 + $0x2f0] ss:$8 sps:$4 sm:$0xff]  }
  0xa0   :  { %3011 = vmatpush1.bf16.msra.mxu0 %v4382_v5  ;;  %2560 = vmatprep.subr.bf16.mxu1 %v4387_v6  ;;  %v4430_v5 = vld [vmem:[%s5761_s1 + $0x6f0] ss:$8 sps:$4 sm:$0xff]   ;;  %v4435_v6 = vld [vmem:[%s5761_s1 + $0x304] ss:$8 sps:$4 sm:$0xff]  }
  0xa1   :  { %3012 = vmatprep.subr.bf16.mxu0 %v4390_v7  ;;  %v4438_v7 = vld [vmem:[%s5761_s1 + $0x704] ss:$8 sps:$4 sm:$0xff]  }
  0xa2   :  { %2504 = vmatmul.mubr.bf16.gmra.mrb[16].mxu1 %v3570_v12  ;;  %v3508_v12 = vcombine.low %v16_v58, %v24_v61  ;;  %v3564_v58 = vcombine.low %v68_v44, %v76_v45  ;;  %v92_v61 = vld [vmem:[%s5762_s0 + $0x270] sm:$0xff] }
  0xa3   :  { %2956 = vmatmul.mubr.bf16.gmra.mrb[16].mxu0 %v3578_v13  ;;  %2561 = vmatpush1.bf16.msra.mxu1 %v4385_v8  ;;  %v4433_v8 = vld [vmem:[%s5761_s1 + $0x300] ss:$8 sps:$4 sm:$0xff]   ;;  %v3516_v13 = vcombine.low %v20_v62, %v28_v63 }
  0xa4   :  { %3013 = vmatpush1.bf16.msra.mxu0 %v4388_v9  ;;  %2562 = vmatprep.subr.bf16.mxu1 %v4393_v16  ;;  %v4436_v9 = vld [vmem:[%s5761_s1 + $0x700] ss:$8 sps:$4 sm:$0xff]   ;;  %v4441_v16 = vld [vmem:[%s5761_s1 + $0x314] ss:$8 sps:$4 sm:$0xff]  }
  0xa5   :  { %3014 = vmatprep.subr.bf16.mxu0 %v4396_v17  ;;  %2513 = vmatprep.mubr.bf16.mxu1 %v3587_v18  ;;  %v4444_v17 = vld [vmem:[%s5761_s1 + $0x714] ss:$8 sps:$4 sm:$0xff]   ;;  %v3525_v18 = vcombine.high %v32_v10, %v40_v11  ;;  %v4469_v62 = vld [vmem:[%s5761_s1 + $0x360] ss:$8 sps:$4 sm:$0xff]  }
  0xa6   :  { %2965 = vmatprep.mubr.bf16.mxu0 %v3595_v19  ;;  %v3533_v19 = vcombine.high %v36_v14, %v44_v15  ;;  %v4472_v63 = vld [vmem:[%s5761_s1 + $0x760] ss:$8 sps:$4 sm:$0xff]  }
  0xa7   :  { %2563 = vmatpush1.bf16.msra.mxu1 %v4391_v20  ;;  %v4439_v20 = vld [vmem:[%s5761_s1 + $0x310] ss:$8 sps:$4 sm:$0xff]   ;;  %v4481_v14 = vld [vmem:[%s5761_s1 + $0x380] ss:$8 sps:$4 sm:$0xff]  }
  0xa8   :  { %3015 = vmatpush1.bf16.msra.mxu0 %v4394_v21  ;;  %2564 = vmatprep.subr.bf16.mxu1 %v4399_v22  ;;  %v4442_v21 = vld [vmem:[%s5761_s1 + $0x710] ss:$8 sps:$4 sm:$0xff]   ;;  %v4447_v22 = vld [vmem:[%s5761_s1 + $0x324] ss:$8 sps:$4 sm:$0xff]   ;;  %v4484_v15 = vld [vmem:[%s5761_s1 + $0x780] ss:$8 sps:$4 sm:$0xff]  }
  0xa9   :  { %3016 = vmatprep.subr.bf16.mxu0 %v4402_v23  ;;  %v4450_v23 = vld [vmem:[%s5761_s1 + $0x724] ss:$8 sps:$4 sm:$0xff]  }
  0xaa   :  { %2514 = vmatmul.mubr.bf16.gmra.mrb[20].mxu1 %v3586_v27  ;;  %v56_v27 = vld [vmem:[%s5762_s0 + $0x150] sm:$0xff] }
  0xab   :  { %2966 = vmatmul.mubr.bf16.gmra.mrb[20].mxu0 %v3594_v28  ;;  %2565 = vmatpush1.bf16.msra.mxu1 %v4397_v24  ;;  %v4445_v24 = vld [vmem:[%s5761_s1 + $0x320] ss:$8 sps:$4 sm:$0xff]   ;;  %v3524_v28 = vcombine.low %v32_v10, %v40_v11  ;;  %v3540_v41 = vcombine.low %v48_v26, %v56_v27  ;;  %v104_v11 = vld [vmem:[%s5762_s0 + $0x2d0] sm:$0xff] }
  0xac   :  { %3017 = vmatpush1.bf16.msra.mxu0 %v4400_v31  ;;  %2566 = vmatprep.subr.bf16.mxu1 %v4405_v32  ;;  %v60_v31 = vld [vmem:[%s5762_s0 + $0x170] sm:$0xff] }
  0xad   :  { %3018 = vmatprep.subr.bf16.mxu0 %v4408_v33  ;;  %2523 = vmatprep.mubr.bf16.mxu1 %v3603_v34  ;;  %v4453_v32 = vld [vmem:[%s5761_s1 + $0x334] ss:$8 sps:$4 sm:$0xff]   ;;  %v3541_v34 = vcombine.high %v48_v26, %v56_v27 }
  0xae   :  { %2975 = vmatprep.mubr.bf16.mxu0 %v3611_v35  ;;  %v4456_v33 = vld [vmem:[%s5761_s1 + $0x734] ss:$8 sps:$4 sm:$0xff]   ;;  %v3549_v35 = vcombine.high %v52_v30, %v60_v31 }
  0xaf   :  { %2567 = vmatpush1.bf16.msra.mxu1 %v4403_v36  ;;  %v4451_v36 = vld [vmem:[%s5761_s1 + $0x330] ss:$8 sps:$4 sm:$0xff]  }
  0xb0   :  { %3019 = vmatpush1.bf16.msra.mxu0 %v4406_v37  ;;  %2568 = vmatprep.subr.bf16.mxu1 %v4411_v38  ;;  %v4454_v37 = vld [vmem:[%s5761_s1 + $0x730] ss:$8 sps:$4 sm:$0xff]   ;;  %v4459_v38 = vld [vmem:[%s5761_s1 + $0x344] ss:$8 sps:$4 sm:$0xff]  }
  0xb1   :  { %3020 = vmatprep.subr.bf16.mxu0 %v4414_v39  ;;  %v4462_v39 = vld [vmem:[%s5761_s1 + $0x744] ss:$8 sps:$4 sm:$0xff]   ;;  %v120_v27 = vld [vmem:[%s5762_s0 + $0x350] sm:$0xff] }
  0xb2   :  { %2524 = vmatmul.mubr.bf16.gmra.mrb[24].mxu1 %v3602_v42  ;;  %v3548_v42 = vcombine.low %v52_v30, %v60_v31  ;;  %v4493_v30 = vld [vmem:[%s5761_s1 + $0x3a0] ss:$8 sps:$4 sm:$0xff]  }
  0xb3   :  { %2976 = vmatmul.mubr.bf16.gmra.mrb[24].mxu0 %v3610_v43  ;;  %2569 = vmatpush1.bf16.msra.mxu1 %v4409_v46  ;;  %v72_v43 = vld [vmem:[%s5762_s0 + $0x1d0] sm:$0xff]  ;;  %v4457_v46 = vld [vmem:[%s5761_s1 + $0x340] ss:$8 sps:$4 sm:$0xff]  }
  0xb4   :  { %3021 = vmatpush1.bf16.msra.mxu0 %v4412_v47  ;;  %2570 = vmatprep.subr.bf16.mxu1 %v4417_v48  ;;  %v4460_v47 = vld [vmem:[%s5761_s1 + $0x740] ss:$8 sps:$4 sm:$0xff]   ;;  %v4465_v48 = vld [vmem:[%s5761_s1 + $0x354] ss:$8 sps:$4 sm:$0xff]  }
  0xb5   :  { %3022 = vmatprep.subr.bf16.mxu0 %v4420_v49  ;;  %2533 = vmatprep.mubr.bf16.mxu1 %v3619_v50  ;;  %v4468_v49 = vld [vmem:[%s5761_s1 + $0x754] ss:$8 sps:$4 sm:$0xff]   ;;  %v3557_v50 = vcombine.high %v64_v40, %v72_v43  ;;  %v4496_v31 = vld [vmem:[%s5761_s1 + $0x7a0] ss:$8 sps:$4 sm:$0xff]  }
  0xb6   :  { %2985 = vmatprep.mubr.bf16.mxu0 %v3627_v51  ;;  %v3565_v51 = vcombine.high %v68_v44, %v76_v45  ;;  %v132_v44 = vld [vmem:[%s5762_s0 + $0x3b0] sm:$0xff] }
  0xb7   :  { %2571 = vmatpush1.bf16.msra.mxu1 %v4415_v52  ;;  %v4463_v52 = vld [vmem:[%s5761_s1 + $0x350] ss:$8 sps:$4 sm:$0xff]  }
  0xb8   :  { %3023 = vmatpush1.bf16.msra.mxu0 %v4418_v53  ;;  %2572 = vmatprep.subr.bf16.mxu1 %v4423_v54  ;;  %v4466_v53 = vld [vmem:[%s5761_s1 + $0x750] ss:$8 sps:$4 sm:$0xff]   ;;  %v4471_v54 = vld [vmem:[%s5761_s1 + $0x364] ss:$8 sps:$4 sm:$0xff]  }
  0xb9   :  { %3024 = vmatprep.subr.bf16.mxu0 %v4426_v55  ;;  %v4474_v55 = vld [vmem:[%s5761_s1 + $0x764] ss:$8 sps:$4 sm:$0xff]   ;;  %v140_v45 = vld [vmem:[%s5762_s0 + $0x3f0] sm:$0xff] }
  0xba   :  { %2534 = vmatmul.mubr.bf16.gmra.mrb[28].mxu1 %v3618_v59  ;;  %v88_v59 = vld [vmem:[%s5762_s0 + $0x250] sm:$0xff] }
  0xbb   :  { %2986 = vmatmul.mubr.bf16.gmra.mrb[28].mxu0 %v3626_v60  ;;  %2573 = vmatpush1.bf16.msra.mxu1 %v4421_v56  ;;  %v80_v56 = vld [vmem:[%s5762_s0 + $0x210] sm:$0xff] }
  0xbc   :  { %3025 = vmatpush1.bf16.msra.mxu0 %v4424_v57  ;;  %2574 = vmatprep.subr.bf16.mxu1 %v4429_v0  ;;  %v3556_v57 = vcombine.low %v64_v40, %v72_v43  ;;  %v84_v60 = vld [vmem:[%s5762_s0 + $0x230] sm:$0xff] }
  0xbd   :  { %3026 = vmatprep.subr.bf16.mxu0 %v4432_v1  ;;  %2576 = vmatprep.mubr.bf16.mxu1 %v3509_v2  ;;  %v4477_v0 = vld [vmem:[%s5761_s1 + $0x374] ss:$8 sps:$4 sm:$0xff]   ;;  %v3573_v2 = vcombine.high %v80_v56, %v88_v59  ;;  %v3580_v10 = vcombine.low %v84_v60, %v92_v61 }
  0xbe   :  { %3028 = vmatprep.mubr.bf16.mxu0 %v3517_v3  ;;  %v4480_v1 = vld [vmem:[%s5761_s1 + $0x774] ss:$8 sps:$4 sm:$0xff]   ;;  %v3581_v3 = vcombine.high %v84_v60, %v92_v61 }
  0xbf   :  { %2575 = vmatpush1.bf16.msra.mxu1 %v4427_v4  ;;  %v4475_v4 = vld [vmem:[%s5761_s1 + $0x370] ss:$8 sps:$4 sm:$0xff]  }
  0xc0   :  { %3027 = vmatpush1.bf16.msra.mxu0 %v4430_v5  ;;  %2657 = vmatprep.subr.bf16.mxu1 %v4435_v6  ;;  %v4478_v5 = vld [vmem:[%s5761_s1 + $0x770] ss:$8 sps:$4 sm:$0xff]   ;;  %v4483_v6 = vld [vmem:[%s5761_s1 + $0x384] ss:$8 sps:$4 sm:$0xff]  }
  0xc1   :  { %3109 = vmatprep.subr.bf16.mxu0 %v4438_v7  ;;  %v4486_v7 = vld [vmem:[%s5761_s1 + $0x784] ss:$8 sps:$4 sm:$0xff]   ;;  %v128_v40 = vld [vmem:[%s5762_s0 + $0x390] sm:$0xff]  ;;  %v21_v60 = vld [vmem:[%s5762_s0 + $0x38] sm:$0xff] }
  0xc2   :  { %2577 = vmatmul.mubr.bf16.vlgmr.msra.gmra.mrb[0].mxu1 %v3508_v12  ;;  %v100_v12 = vld [vmem:[%s5762_s0 + $0x2b0] sm:$0xff]  ;;  %v29_v61 = vld [vmem:[%s5762_s0 + $0x78] sm:$0xff] }
  0xc3   :  { %3029 = vmatmul.mubr.bf16.vlgmr.msra.gmra.mrb[0].mxu0 %v3516_v13  ;;  %2658 = vmatpush1.bf16.msra.mxu1 %v4433_v8  ;;  %v96_v8 = vld [vmem:[%s5762_s0 + $0x290] sm:$0xff] }
  0xc4   :  { %3110 = vmatpush1.bf16.msra.mxu0 %v4436_v9  ;;  %2659 = vmatprep.subr.bf16.mxu1 %v4441_v16  ;;  %v3572_v9 = vcombine.low %v80_v56, %v88_v59  ;;  %v108_v13 = vld [vmem:[%s5762_s0 + $0x2f0] sm:$0xff]  ;;  %v17_v56 = vld [vmem:[%s5762_s0 + $0x18] sm:$0xff] }
  0xc5   :  { %3111 = vmatprep.subr.bf16.mxu0 %v4444_v17  ;;  %2586 = vmatprep.mubr.bf16.mxu1 %v3525_v18  ;;  %v4489_v16 = vld [vmem:[%s5761_s1 + $0x394] ss:$8 sps:$4 sm:$0xff]   ;;  %v3589_v18 = vcombine.high %v96_v8, %v104_v11  ;;  %v3596_v26 = vcombine.low %v100_v12, %v108_v13 }
  0xc6   :  { %3038 = vmatprep.mubr.bf16.mxu0 %v3533_v19  ;;  %v4492_v17 = vld [vmem:[%s5761_s1 + $0x794] ss:$8 sps:$4 sm:$0xff]   ;;  %v3597_v19 = vcombine.high %v100_v12, %v108_v13 }
  0xc7   :  { %2660 = vmatpush1.bf16.msra.mxu1 %v4439_v20  ;;  %v4487_v20 = vld [vmem:[%s5761_s1 + $0x390] ss:$8 sps:$4 sm:$0xff]  }
  0xc8   :  { %3112 = vmatpush1.bf16.msra.mxu0 %v4442_v21  ;;  %2661 = vmatprep.subr.bf16.mxu1 %v4447_v22  ;;  %v4490_v21 = vld [vmem:[%s5761_s1 + $0x790] ss:$8 sps:$4 sm:$0xff]   ;;  %v4495_v22 = vld [vmem:[%s5761_s1 + $0x3a4] ss:$8 sps:$4 sm:$0xff]  }
  0xc9   :  { %3113 = vmatprep.subr.bf16.mxu0 %v4450_v23  ;;  %v4498_v23 = vld [vmem:[%s5761_s1 + $0x7a4] ss:$8 sps:$4 sm:$0xff]   ;;  %v136_v43 = vld [vmem:[%s5762_s0 + $0x3d0] sm:$0xff]  ;;  %v25_v59 = vld [vmem:[%s5762_s0 + $0x58] sm:$0xff] }
  0xca   :  { %2587 = vmatmul.mubr.bf16.gmra.mrb[4].mxu1 %v3524_v28  ;;  %v116_v28 = vld [vmem:[%s5762_s0 + $0x330] sm:$0xff] }
  0xcb   :  { %3039 = vmatmul.mubr.bf16.gmra.mrb[4].mxu0 %v3532_v29  ;;  %2662 = vmatpush1.bf16.msra.mxu1 %v4445_v24  ;;  %v112_v24 = vld [vmem:[%s5762_s0 + $0x310] sm:$0xff] }
  0xcc   :  { %3114 = vmatpush1.bf16.msra.mxu0 %v4448_v25  ;;  %2663 = vmatprep.subr.bf16.mxu1 %v4453_v32  ;;  %v3588_v25 = vcombine.low %v96_v8, %v104_v11  ;;  %v124_v29 = vld [vmem:[%s5762_s0 + $0x370] sm:$0xff]  ;;  %v37_v8 = vld [vmem:[%s5762_s0 + $0xb8] sm:$0xff]  ;;  %v3518_v11 = vcombine.low %v21_v60, %v29_v61 }
  0xcd   :  { %3115 = vmatprep.subr.bf16.mxu0 %v4456_v33  ;;  %2596 = vmatprep.mubr.bf16.mxu1 %v3541_v34  ;;  %v4501_v32 = vld [vmem:[%s5761_s1 + $0x3b4] ss:$8 sps:$4 sm:$0xff]   ;;  %v3605_v34 = vcombine.high %v112_v24, %v120_v27 }
  0xce   :  { %3048 = vmatprep.mubr.bf16.mxu0 %v3549_v35  ;;  %v4504_v33 = vld [vmem:[%s5761_s1 + $0x7b4] ss:$8 sps:$4 sm:$0xff]   ;;  %v3613_v35 = vcombine.high %v116_v28, %v124_v29 }
  0xcf   :  { %2664 = vmatpush1.bf16.msra.mxu1 %v4451_v36  ;;  %v4499_v36 = vld [vmem:[%s5761_s1 + $0x3b0] ss:$8 sps:$4 sm:$0xff]  }
  0xd0   :  { %3116 = vmatpush1.bf16.msra.mxu0 %v4454_v37  ;;  %2665 = vmatprep.subr.bf16.mxu1 %v4459_v38  ;;  %v4502_v37 = vld [vmem:[%s5761_s1 + $0x7b0] ss:$8 sps:$4 sm:$0xff]   ;;  %v4507_v38 = vld [vmem:[%s5761_s1 + $0x3c4] ss:$8 sps:$4 sm:$0xff]  }
  0xd1   :  { %3117 = vmatprep.subr.bf16.mxu0 %v4462_v39  ;;  %v4510_v39 = vld [vmem:[%s5761_s1 + $0x7c4] ss:$8 sps:$4 sm:$0xff]  }
  0xd2   :  { %2597 = vmatmul.mubr.bf16.gmra.mrb[8].mxu1 %v3540_v41  ;;  %v3604_v41 = vcombine.low %v112_v24, %v120_v27  ;;  %v69_v24 = vld [vmem:[%s5762_s0 + $0x1b8] sm:$0xff] }
  0xd3   :  { %3049 = vmatmul.mubr.bf16.gmra.mrb[8].mxu0 %v3548_v42  ;;  %2666 = vmatpush1.bf16.msra.mxu1 %v4457_v46  ;;  %v3612_v42 = vcombine.low %v116_v28, %v124_v29  ;;  %v4505_v46 = vld [vmem:[%s5761_s1 + $0x3c0] ss:$8 sps:$4 sm:$0xff]  }
  0xd4   :  { %3118 = vmatpush1.bf16.msra.mxu0 %v4460_v47  ;;  %2667 = vmatprep.subr.bf16.mxu1 %v4465_v48  ;;  %v4508_v47 = vld [vmem:[%s5761_s1 + $0x7c0] ss:$8 sps:$4 sm:$0xff]   ;;  %v4513_v48 = vld [vmem:[%s5761_s1 + $0x3d4] ss:$8 sps:$4 sm:$0xff]  }
  0xd5   :  { %3119 = vmatprep.subr.bf16.mxu0 %v4468_v49  ;;  %2606 = vmatprep.mubr.bf16.mxu1 %v3557_v50  ;;  %v4516_v49 = vld [vmem:[%s5761_s1 + $0x7d4] ss:$8 sps:$4 sm:$0xff]   ;;  %v3621_v50 = vcombine.high %v128_v40, %v136_v43 }
  0xd6   :  { %3058 = vmatprep.mubr.bf16.mxu0 %v3565_v51  ;;  %v3629_v51 = vcombine.high %v132_v44, %v140_v45 }
  0xd7   :  { %2668 = vmatpush1.bf16.msra.mxu1 %v4463_v52  ;;  %v4511_v52 = vld [vmem:[%s5761_s1 + $0x3d0] ss:$8 sps:$4 sm:$0xff]  }
  0xd8   :  { %3120 = vmatpush1.bf16.msra.mxu0 %v4466_v53  ;;  %2669 = vmatprep.subr.bf16.mxu1 %v4471_v54  ;;  %v4514_v53 = vld [vmem:[%s5761_s1 + $0x7d0] ss:$8 sps:$4 sm:$0xff]   ;;  %v4519_v54 = vld [vmem:[%s5761_s1 + $0x3e4] ss:$8 sps:$4 sm:$0xff]  }
  0xd9   :  { %3121 = vmatprep.subr.bf16.mxu0 %v4474_v55  ;;  %v4522_v55 = vld [vmem:[%s5761_s1 + $0x7e4] ss:$8 sps:$4 sm:$0xff]  }
  0xda   :  { %2607 = vmatmul.mubr.bf16.gmra.mrb[12].mxu1 %v3556_v57  ;;  %v3620_v57 = vcombine.low %v128_v40, %v136_v43  ;;  %v101_v40 = vld [vmem:[%s5762_s0 + $0x2b8] sm:$0xff] }
  0xdb   :  { %3059 = vmatmul.mubr.bf16.gmra.mrb[12].mxu0 %v3564_v58  ;;  %2670 = vmatpush1.bf16.msra.mxu1 %v4469_v62  ;;  %v3628_v58 = vcombine.low %v132_v44, %v140_v45  ;;  %v4517_v62 = vld [vmem:[%s5761_s1 + $0x3e0] ss:$8 sps:$4 sm:$0xff]  }
  0xdc   :  { %3122 = vmatpush1.bf16.msra.mxu0 %v4472_v63  ;;  %2671 = vmatprep.subr.bf16.mxu1 %v4477_v0  ;;  %v4520_v63 = vld [vmem:[%s5761_s1 + $0x7e0] ss:$8 sps:$4 sm:$0xff]   ;;  %v4525_v0 = vld [vmem:[%s5761_s1 + $0x3f4] ss:$8 sps:$4 sm:$0xff]  }
  0xdd   :  { %3123 = vmatprep.subr.bf16.mxu0 %v4480_v1  ;;  %2616 = vmatprep.mubr.bf16.mxu1 %v3573_v2  ;;  %v4528_v1 = vld [vmem:[%s5761_s1 + $0x7f4] ss:$8 sps:$4 sm:$0xff]   ;;  %v3511_v2 = vcombine.high %v17_v56, %v25_v59 }
  0xde   :  { %3068 = vmatprep.mubr.bf16.mxu0 %v3581_v3  ;;  %v3519_v3 = vcombine.high %v21_v60, %v29_v61 }
  0xdf   :  { %2672 = vmatpush1.bf16.msra.mxu1 %v4475_v4  ;;  %v4523_v4 = vld [vmem:[%s5761_s1 + $0x3f0] ss:$8 sps:$4 sm:$0xff]  }
  0xe0   :  { %3124 = vmatpush1.bf16.msra.mxu0 %v4478_v5  ;;  %2673 = vmatprep.subr.bf16.mxu1 %v4483_v6  ;;  %v4526_v5 = vld [vmem:[%s5761_s1 + $0x7f0] ss:$8 sps:$4 sm:$0xff]  }
  0xe1   :  { %3125 = vmatprep.subr.bf16.mxu0 %v4486_v7  ;;  %v33_v6 = vld [vmem:[%s5762_s0 + $0x98] sm:$0xff] }
  0xe2   :  { %2617 = vmatmul.mubr.bf16.gmra.mrb[16].mxu1 %v3572_v9  ;;  %v41_v7 = vld [vmem:[%s5762_s0 + $0xd8] sm:$0xff] }
  0xe3   :  { %3069 = vmatmul.mubr.bf16.gmra.mrb[16].mxu0 %v3580_v10  ;;  %2674 = vmatpush1.bf16.msra.mxu1 %v4481_v14  ;;  %v45_v9 = vld [vmem:[%s5762_s0 + $0xf8] sm:$0xff]  ;;  %v3510_v10 = vcombine.low %v17_v56, %v25_v59  ;;  %v3527_v12 = vcombine.high %v33_v6, %v41_v7 }
  0xe4   :  { %3126 = vmatpush1.bf16.msra.mxu0 %v4484_v15  ;;  %2675 = vmatprep.subr.bf16.mxu1 %v4489_v16  ;;  %v3535_v13 = vcombine.high %v37_v8, %v45_v9  ;;  %v49_v14 = vld [vmem:[%s5762_s0 + $0x118] sm:$0xff] }
  0xe5   :  { %3127 = vmatprep.subr.bf16.mxu0 %v4492_v17  ;;  %2626 = vmatprep.mubr.bf16.mxu1 %v3589_v18  ;;  %v57_v15 = vld [vmem:[%s5762_s0 + $0x158] sm:$0xff]  ;;  %v3526_v18 = vcombine.low %v33_v6, %v41_v7 }
  0xe6   :  { %3078 = vmatprep.mubr.bf16.mxu0 %v3597_v19  ;;  %v53_v16 = vld [vmem:[%s5762_s0 + $0x138] sm:$0xff]  ;;  %v3534_v19 = vcombine.low %v37_v8, %v45_v9 }
  0xe7   :  { %2676 = vmatpush1.bf16.msra.mxu1 %v4487_v20  ;;  %v61_v17 = vld [vmem:[%s5762_s0 + $0x178] sm:$0xff]  ;;  %v3543_v20 = vcombine.high %v49_v14, %v57_v15 }
  0xe8   :  { %3128 = vmatpush1.bf16.msra.mxu0 %v4490_v21  ;;  %2677 = vmatprep.subr.bf16.mxu1 %v4495_v22  ;;  %v3551_v21 = vcombine.high %v53_v16, %v61_v17  ;;  %v65_v22 = vld [vmem:[%s5762_s0 + $0x198] sm:$0xff]  ;;  %v3550_v27 = vcombine.low %v53_v16, %v61_v17 }
  0xe9   :  { %3129 = vmatprep.subr.bf16.mxu0 %v4498_v23  ;;  %v73_v23 = vld [vmem:[%s5762_s0 + $0x1d8] sm:$0xff] }
  0xea   :  { %2627 = vmatmul.mubr.bf16.gmra.mrb[20].mxu1 %v3588_v25  ;;  %v77_v25 = vld [vmem:[%s5762_s0 + $0x1f8] sm:$0xff]  ;;  %v3559_v28 = vcombine.high %v65_v22, %v73_v23 }
  0xeb   :  { %3079 = vmatmul.mubr.bf16.gmra.mrb[20].mxu0 %v3596_v26  ;;  %2678 = vmatpush1.bf16.msra.mxu1 %v4493_v30  ;;  %v3542_v26 = vcombine.low %v49_v14, %v57_v15  ;;  %v3567_v29 = vcombine.high %v69_v24, %v77_v25  ;;  %v81_v30 = vld [vmem:[%s5762_s0 + $0x218] sm:$0xff] }
  0xec   :  { %3130 = vmatpush1.bf16.msra.mxu0 %v4496_v31  ;;  %2679 = vmatprep.subr.bf16.mxu1 %v4501_v32  ;;  %v89_v31 = vld [vmem:[%s5762_s0 + $0x258] sm:$0xff] }
  0xed   :  { %3131 = vmatprep.subr.bf16.mxu0 %v4504_v33  ;;  %2636 = vmatprep.mubr.bf16.mxu1 %v3605_v34  ;;  %v85_v32 = vld [vmem:[%s5762_s0 + $0x238] sm:$0xff]  ;;  %v3558_v34 = vcombine.low %v65_v22, %v73_v23 }
  0xee   :  { %3088 = vmatprep.mubr.bf16.mxu0 %v3613_v35  ;;  %v93_v33 = vld [vmem:[%s5762_s0 + $0x278] sm:$0xff]  ;;  %v3566_v35 = vcombine.low %v69_v24, %v77_v25 }
  0xef   :  { %2680 = vmatpush1.bf16.msra.mxu1 %v4499_v36  ;;  %v3575_v36 = vcombine.high %v81_v30, %v89_v31  ;;  %v3582_v43 = vcombine.low %v85_v32, %v93_v33  ;;  %v133_v56 = vld [vmem:[%s5762_s0 + $0x3b8] sm:$0xff] }
  0xf0   :  { %3132 = vmatpush1.bf16.msra.mxu0 %v4502_v37  ;;  %2681 = vmatprep.subr.bf16.mxu1 %v4507_v38  ;;  %v3583_v37 = vcombine.high %v85_v32, %v93_v33  ;;  %v97_v38 = vld [vmem:[%s5762_s0 + $0x298] sm:$0xff] }
  0xf1   :  { %3133 = vmatprep.subr.bf16.mxu0 %v4510_v39  ;;  %v105_v39 = vld [vmem:[%s5762_s0 + $0x2d8] sm:$0xff] }
  0xf2   :  { %2637 = vmatmul.mubr.bf16.gmra.mrb[24].mxu1 %v3604_v41  ;;  %v109_v41 = vld [vmem:[%s5762_s0 + $0x2f8] sm:$0xff]  ;;  %v3591_v44 = vcombine.high %v97_v38, %v105_v39 }
  0xf3   :  { %3089 = vmatmul.mubr.bf16.gmra.mrb[24].mxu0 %v3612_v42  ;;  %2682 = vmatpush1.bf16.msra.mxu1 %v4505_v46  ;;  %v3574_v42 = vcombine.low %v81_v30, %v89_v31  ;;  %v3599_v45 = vcombine.high %v101_v40, %v109_v41  ;;  %v113_v46 = vld [vmem:[%s5762_s0 + $0x318] sm:$0xff] }
  0xf4   :  { %3134 = vmatpush1.bf16.msra.mxu0 %v4508_v47  ;;  %2683 = vmatprep.subr.bf16.mxu1 %v4513_v48  ;;  %v121_v47 = vld [vmem:[%s5762_s0 + $0x358] sm:$0xff] }
  0xf5   :  { %3135 = vmatprep.subr.bf16.mxu0 %v4516_v49  ;;  %2646 = vmatprep.mubr.bf16.mxu1 %v3621_v50  ;;  %v117_v48 = vld [vmem:[%s5762_s0 + $0x338] sm:$0xff]  ;;  %v3590_v50 = vcombine.low %v97_v38, %v105_v39 }
  0xf6   :  { %3098 = vmatprep.mubr.bf16.mxu0 %v3629_v51  ;;  %v125_v49 = vld [vmem:[%s5762_s0 + $0x378] sm:$0xff]  ;;  %v3598_v51 = vcombine.low %v101_v40, %v109_v41 }
  0xf7   :  { %2684 = vmatpush1.bf16.msra.mxu1 %v4511_v52  ;;  %v3607_v52 = vcombine.high %v113_v46, %v121_v47  ;;  %v3614_v59 = vcombine.low %v117_v48, %v125_v49 }
  0xf8   :  { %3136 = vmatpush1.bf16.msra.mxu0 %v4514_v53  ;;  %2685 = vmatprep.subr.bf16.mxu1 %v4519_v54  ;;  %v3615_v53 = vcombine.high %v117_v48, %v125_v49  ;;  %v129_v54 = vld [vmem:[%s5762_s0 + $0x398] sm:$0xff] }
  0xf9   :  { %3137 = vmatprep.subr.bf16.mxu0 %v4522_v55  ;;  %v137_v55 = vld [vmem:[%s5762_s0 + $0x3d8] sm:$0xff] }
  0xfa   :  { %2647 = vmatmul.mubr.bf16.gmra.mrb[28].mxu1 %v3620_v57  ;;  %v141_v57 = vld [vmem:[%s5762_s0 + $0x3f8] sm:$0xff]  ;;  %v3623_v60 = vcombine.high %v129_v54, %v137_v55 }
  0xfb   :  { %3099 = vmatmul.mubr.bf16.gmra.mrb[28].mxu0 %v3628_v58  ;;  %2686 = vmatpush1.bf16.msra.mxu1 %v4517_v62  ;;  %v3606_v58 = vcombine.low %v113_v46, %v121_v47  ;;  %v3631_v61 = vcombine.high %v133_v56, %v141_v57  ;;  %v3622_v62 = vcombine.low %v129_v54, %v137_v55 }
  0xfc   :  { %3138 = vmatpush1.bf16.msra.mxu0 %v4520_v63  ;;  %2687 = vmatprep.subr.bf16.mxu1 %v4525_v0  ;;  %v3630_v63 = vcombine.low %v133_v56, %v141_v57 }
  0xfd   :  { %3139 = vmatprep.subr.bf16.mxu0 %v4528_v1  ;;  %2689 = vmatprep.mubr.bf16.mxu1 %v3511_v2 }
  0xfe   :  { %3141 = vmatprep.mubr.bf16.mxu0 %v3519_v3 }
  0xff   :  { %2688 = vmatpush1.bf16.msra.mxu1 %v4523_v4 }
 0x100   :  { %3140 = vmatpush1.bf16.msra.mxu0 %v4526_v5 }
 0x102   :  { %2690 = vmatmul.mubr.bf16.vlgmr.msra.gmra.mrb[0].mxu1 %v3510_v10 }
 0x103   :  { %3142 = vmatmul.mubr.bf16.vlgmr.msra.gmra.mrb[0].mxu0 %v3518_v11  ;;  %2699 = vmatprep.mubr.bf16.mxu1 %v3527_v12 }
 0x104   :  { %3151 = vmatprep.mubr.bf16.mxu0 %v3535_v13 }
 0x10a   :  { %2700 = vmatmul.mubr.bf16.gmra.mrb[4].mxu1 %v3526_v18 }
 0x10b   :  { %3152 = vmatmul.mubr.bf16.gmra.mrb[4].mxu0 %v3534_v19  ;;  %2709 = vmatprep.mubr.bf16.mxu1 %v3543_v20 }
 0x10c   :  { %3161 = vmatprep.mubr.bf16.mxu0 %v3551_v21 }
 0x112   :  { %2710 = vmatmul.mubr.bf16.gmra.mrb[8].mxu1 %v3542_v26 }
 0x113   :  { %3162 = vmatmul.mubr.bf16.gmra.mrb[8].mxu0 %v3550_v27  ;;  %2719 = vmatprep.mubr.bf16.mxu1 %v3559_v28 }
 0x114   :  { %3171 = vmatprep.mubr.bf16.mxu0 %v3567_v29 }
 0x11a   :  { %2720 = vmatmul.mubr.bf16.gmra.mrb[12].mxu1 %v3558_v34 }
 0x11b   :  { %3172 = vmatmul.mubr.bf16.gmra.mrb[12].mxu0 %v3566_v35  ;;  %2729 = vmatprep.mubr.bf16.mxu1 %v3575_v36 }
 0x11c   :  { %3181 = vmatprep.mubr.bf16.mxu0 %v3583_v37 }
 0x122   :  { %2730 = vmatmul.mubr.bf16.gmra.mrb[16].mxu1 %v3574_v42 }
 0x123   :  { %3182 = vmatmul.mubr.bf16.gmra.mrb[16].mxu0 %v3582_v43  ;;  %2739 = vmatprep.mubr.bf16.mxu1 %v3591_v44 }
 0x124   :  { %3191 = vmatprep.mubr.bf16.mxu0 %v3599_v45 }
 0x12a   :  { %2740 = vmatmul.mubr.bf16.gmra.mrb[20].mxu1 %v3590_v50 }
 0x12b   :  { %3192 = vmatmul.mubr.bf16.gmra.mrb[20].mxu0 %v3598_v51  ;;  %2749 = vmatprep.mubr.bf16.mxu1 %v3607_v52 }
 0x12c   :  { %3201 = vmatprep.mubr.bf16.mxu0 %v3615_v53 }
 0x132   :  { %2750 = vmatmul.mubr.bf16.gmra.mrb[24].mxu1 %v3606_v58 }
 0x133   :  { %3202 = vmatmul.mubr.bf16.gmra.mrb[24].mxu0 %v3614_v59  ;;  %2759 = vmatprep.mubr.bf16.mxu1 %v3623_v60 }
 0x134   :  { %3211 = vmatprep.mubr.bf16.mxu0 %v3631_v61 }
 0x13a   :  { %2760 = vmatmul.mubr.bf16.gmra.mrb[28].mxu1 %v3622_v62 }
 0x13b   :  { %3212 = vmatmul.mubr.bf16.gmra.mrb[28].mxu0 %v3630_v63 }
 0x1d5   :  { %v2691_v0 = vpop.f32.mrb[0].mxu1 }
 0x1d6   :  { %v3143_v1 = vpop.f32.mrb[0].mxu0  ;;  %v2693_v3 = vpop.f32.mrb[1].mxu1 }
 0x1d7   :  { %v3920_v2 = vadd.f32 %v3143_v1, %v2691_v0  ;;  %v3145_v4 = vpop.f32.mrb[1].mxu0  ;;  %v2695_v6 = vpop.f32.mrb[2].mxu1 }
 0x1d8   :  { %v3921_v5 = vadd.f32 %v3145_v4, %v2693_v3  ;;  %v3147_v7 = vpop.f32.mrb[2].mxu0  ;;  %v2697_v9 = vpop.f32.mrb[3].mxu1 }
 0x1d9   :  { %v3922_v8 = vadd.f32 %v3147_v7, %v2695_v6  ;;  %v3149_v10 = vpop.f32.mrb[3].mxu0  ;;  %v3399_v13 = vmul.f32 %v3920_v2, %v3920_v2 }
 0x1da   :  { %v3904_v11 = vpack.c.bf16 %v3921_v5, %v3920_v2  ;;  %v3923_v12 = vadd.f32 %v3149_v10, %v2697_v9  ;;  %v3400_v16 = vmul.f32 %v3921_v5, %v3921_v5 }
 0x1db   :  { %v3334_v14 = vadd.f32 %v3922_v8, %v3920_v2  ;;  %v3401_v15 = vmul.f32 %v3922_v8, %v3922_v8 }
 0x1dc   :  { %3318 = vst [vmem:[%s5763_s2] sm:$0xff] %v3904_v11  ;;  %v3905_v17 = vpack.c.bf16 %v3923_v12, %v3922_v8  ;;  %v3355_v18 = vadd.f32 %v3923_v12, %v3921_v5  ;;  %v3402_v19 = vmul.f32 %v3923_v12, %v3923_v12 }
 0x1dd   :  { %v3431_v20 = vadd.f32 %v3401_v15, %v3399_v13  ;;  %v2701_v22 = vpop.f32.mrb[4].mxu1 }
 0x1de   :  { %3319 = vst [vmem:[%s5763_s2 + $0x8] sm:$0xff] %v3905_v17  ;;  %v3452_v21 = vadd.f32 %v3402_v19, %v3400_v16  ;;  %v3153_v23 = vpop.f32.mrb[4].mxu0  ;;  %v2703_v25 = vpop.f32.mrb[5].mxu1 }
 0x1df   :  { %v3924_v24 = vadd.f32 %v3153_v23, %v2701_v22  ;;  %v3155_v26 = vpop.f32.mrb[5].mxu0  ;;  %v2705_v28 = vpop.f32.mrb[6].mxu1 }
 0x1e0   :  { %v3925_v27 = vadd.f32 %v3155_v26, %v2703_v25  ;;  %v3157_v29 = vpop.f32.mrb[6].mxu0  ;;  %v2707_v33 = vpop.f32.mrb[7].mxu1 }
 0x1e1   :  { %v3335_v30 = vadd.f32 %v3924_v24, %v3334_v14  ;;  %v3403_v31 = vmul.f32 %v3924_v24, %v3924_v24  ;;  %v3926_v32 = vadd.f32 %v3157_v29, %v2705_v28  ;;  %v3159_v34 = vpop.f32.mrb[7].mxu0 }
 0x1e2   :  { %v3906_v35 = vpack.c.bf16 %v3925_v27, %v3924_v24  ;;  %v3356_v36 = vadd.f32 %v3925_v27, %v3355_v18  ;;  %v3404_v37 = vmul.f32 %v3925_v27, %v3925_v27  ;;  %v3927_v38 = vadd.f32 %v3159_v34, %v2707_v33 }
 0x1e3   :  { %v3432_v39 = vadd.f32 %v3431_v20, %v3403_v31  ;;  %v3336_v40 = vadd.f32 %v3926_v32, %v3335_v30  ;;  %v3405_v41 = vmul.f32 %v3926_v32, %v3926_v32 }
 0x1e4   :  { %3320 = vst [vmem:[%s5763_s2 + $0x10] sm:$0xff] %v3906_v35  ;;  %v3453_v42 = vadd.f32 %v3452_v21, %v3404_v37  ;;  %v3907_v43 = vpack.c.bf16 %v3927_v38, %v3926_v32  ;;  %v3357_v44 = vadd.f32 %v3927_v38, %v3356_v36  ;;  %v3406_v45 = vmul.f32 %v3927_v38, %v3927_v38 }
 0x1e5   :  { %v3433_v46 = vadd.f32 %v3432_v39, %v3405_v41  ;;  %v2711_v48 = vpop.f32.mrb[8].mxu1 }
 0x1e6   :  { %3321 = vst [vmem:[%s5763_s2 + $0x18] sm:$0xff] %v3907_v43  ;;  %v3454_v47 = vadd.f32 %v3453_v42, %v3406_v45  ;;  %v3163_v49 = vpop.f32.mrb[8].mxu0  ;;  %v2713_v51 = vpop.f32.mrb[9].mxu1 }
 0x1e7   :  { %v3928_v50 = vadd.f32 %v3163_v49, %v2711_v48  ;;  %v3165_v52 = vpop.f32.mrb[9].mxu0  ;;  %v2715_v54 = vpop.f32.mrb[10].mxu1 }
 0x1e8   :  { %v3929_v53 = vadd.f32 %v3165_v52, %v2713_v51  ;;  %v3167_v55 = vpop.f32.mrb[10].mxu0  ;;  %v2717_v59 = vpop.f32.mrb[11].mxu1 }
 0x1e9   :  { %v3337_v56 = vadd.f32 %v3928_v50, %v3336_v40  ;;  %v3407_v57 = vmul.f32 %v3928_v50, %v3928_v50  ;;  %v3930_v58 = vadd.f32 %v3167_v55, %v2715_v54  ;;  %v3169_v60 = vpop.f32.mrb[11].mxu0 }
 0x1ea   :  { %v3908_v61 = vpack.c.bf16 %v3929_v53, %v3928_v50  ;;  %v3358_v62 = vadd.f32 %v3929_v53, %v3357_v44  ;;  %v3408_v63 = vmul.f32 %v3929_v53, %v3929_v53  ;;  %v3931_v0 = vadd.f32 %v3169_v60, %v2717_v59 }
 0x1eb   :  { %v3434_v1 = vadd.f32 %v3433_v46, %v3407_v57  ;;  %v3338_v2 = vadd.f32 %v3930_v58, %v3337_v56  ;;  %v3409_v3 = vmul.f32 %v3930_v58, %v3930_v58 }
 0x1ec   :  { %3322 = vst [vmem:[%s5763_s2 + $0x20] sm:$0xff] %v3908_v61  ;;  %v3455_v4 = vadd.f32 %v3454_v47, %v3408_v63  ;;  %v3909_v5 = vpack.c.bf16 %v3931_v0, %v3930_v58  ;;  %v3359_v6 = vadd.f32 %v3931_v0, %v3358_v62  ;;  %v3410_v7 = vmul.f32 %v3931_v0, %v3931_v0 }
 0x1ed   :  { %v3435_v8 = vadd.f32 %v3434_v1, %v3409_v3  ;;  %v2721_v10 = vpop.f32.mrb[12].mxu1 }
 0x1ee   :  { %3323 = vst [vmem:[%s5763_s2 + $0x28] sm:$0xff] %v3909_v5  ;;  %v3456_v9 = vadd.f32 %v3455_v4, %v3410_v7  ;;  %v3173_v11 = vpop.f32.mrb[12].mxu0  ;;  %v2723_v13 = vpop.f32.mrb[13].mxu1 }
 0x1ef   :  { %v3932_v12 = vadd.f32 %v3173_v11, %v2721_v10  ;;  %v3175_v14 = vpop.f32.mrb[13].mxu0  ;;  %v2725_v16 = vpop.f32.mrb[14].mxu1 }
 0x1f0   :  { %v3933_v15 = vadd.f32 %v3175_v14, %v2723_v13  ;;  %v3177_v17 = vpop.f32.mrb[14].mxu0  ;;  %v2727_v21 = vpop.f32.mrb[15].mxu1 }
 0x1f1   :  { %v3339_v18 = vadd.f32 %v3932_v12, %v3338_v2  ;;  %v3411_v19 = vmul.f32 %v3932_v12, %v3932_v12  ;;  %v3934_v20 = vadd.f32 %v3177_v17, %v2725_v16  ;;  %v3179_v22 = vpop.f32.mrb[15].mxu0 }
 0x1f2   :  { %v3910_v23 = vpack.c.bf16 %v3933_v15, %v3932_v12  ;;  %v3360_v24 = vadd.f32 %v3933_v15, %v3359_v6  ;;  %v3412_v25 = vmul.f32 %v3933_v15, %v3933_v15  ;;  %v3935_v26 = vadd.f32 %v3179_v22, %v2727_v21 }
 0x1f3   :  { %v3436_v27 = vadd.f32 %v3435_v8, %v3411_v19  ;;  %v3340_v28 = vadd.f32 %v3934_v20, %v3339_v18  ;;  %v3413_v29 = vmul.f32 %v3934_v20, %v3934_v20 }
 0x1f4   :  { %3324 = vst [vmem:[%s5763_s2 + $0x30] sm:$0xff] %v3910_v23  ;;  %v3457_v30 = vadd.f32 %v3456_v9, %v3412_v25  ;;  %v3911_v31 = vpack.c.bf16 %v3935_v26, %v3934_v20  ;;  %v3361_v32 = vadd.f32 %v3935_v26, %v3360_v24  ;;  %v3414_v33 = vmul.f32 %v3935_v26, %v3935_v26 }
 0x1f5   :  { %v3437_v34 = vadd.f32 %v3436_v27, %v3413_v29  ;;  %v2731_v36 = vpop.f32.mrb[16].mxu1 }
 0x1f6   :  { %3325 = vst [vmem:[%s5763_s2 + $0x38] sm:$0xff] %v3911_v31  ;;  %v3458_v35 = vadd.f32 %v3457_v30, %v3414_v33  ;;  %v3183_v37 = vpop.f32.mrb[16].mxu0  ;;  %v2733_v39 = vpop.f32.mrb[17].mxu1 }
 0x1f7   :  { %v3936_v38 = vadd.f32 %v3183_v37, %v2731_v36  ;;  %v3185_v40 = vpop.f32.mrb[17].mxu0  ;;  %v2735_v42 = vpop.f32.mrb[18].mxu1 }
 0x1f8   :  { %v3937_v41 = vadd.f32 %v3185_v40, %v2733_v39  ;;  %v3187_v43 = vpop.f32.mrb[18].mxu0  ;;  %v2737_v47 = vpop.f32.mrb[19].mxu1 }
 0x1f9   :  { %v3341_v44 = vadd.f32 %v3936_v38, %v3340_v28  ;;  %v3415_v45 = vmul.f32 %v3936_v38, %v3936_v38  ;;  %v3938_v46 = vadd.f32 %v3187_v43, %v2735_v42  ;;  %v3189_v48 = vpop.f32.mrb[19].mxu0 }
 0x1fa   :  { %v3912_v49 = vpack.c.bf16 %v3937_v41, %v3936_v38  ;;  %v3362_v50 = vadd.f32 %v3937_v41, %v3361_v32  ;;  %v3416_v51 = vmul.f32 %v3937_v41, %v3937_v41  ;;  %v3939_v52 = vadd.f32 %v3189_v48, %v2737_v47 }
 0x1fb   :  { %v3438_v53 = vadd.f32 %v3437_v34, %v3415_v45  ;;  %v3342_v54 = vadd.f32 %v3938_v46, %v3341_v44  ;;  %v3417_v55 = vmul.f32 %v3938_v46, %v3938_v46 }
 0x1fc   :  { %3326 = vst [vmem:[%s5763_s2 + $0x40] sm:$0xff] %v3912_v49  ;;  %v3459_v56 = vadd.f32 %v3458_v35, %v3416_v51  ;;  %v3913_v57 = vpack.c.bf16 %v3939_v52, %v3938_v46  ;;  %v3363_v58 = vadd.f32 %v3939_v52, %v3362_v50  ;;  %v3418_v59 = vmul.f32 %v3939_v52, %v3939_v52 }
 0x1fd   :  { %v3439_v60 = vadd.f32 %v3438_v53, %v3417_v55  ;;  %v2741_v62 = vpop.f32.mrb[20].mxu1 }
 0x1fe   :  { %3327 = vst [vmem:[%s5763_s2 + $0x48] sm:$0xff] %v3913_v57  ;;  %v3460_v61 = vadd.f32 %v3459_v56, %v3418_v59  ;;  %v3193_v63 = vpop.f32.mrb[20].mxu0  ;;  %v2743_v1 = vpop.f32.mrb[21].mxu1 }
 0x1ff   :  { %v3940_v0 = vadd.f32 %v3193_v63, %v2741_v62  ;;  %v3195_v2 = vpop.f32.mrb[21].mxu0  ;;  %v2745_v4 = vpop.f32.mrb[22].mxu1 }
 0x200   :  { %v3941_v3 = vadd.f32 %v3195_v2, %v2743_v1  ;;  %v3197_v5 = vpop.f32.mrb[22].mxu0  ;;  %v2747_v9 = vpop.f32.mrb[23].mxu1 }
 0x201   :  { %v3343_v6 = vadd.f32 %v3940_v0, %v3342_v54  ;;  %v3419_v7 = vmul.f32 %v3940_v0, %v3940_v0  ;;  %v3942_v8 = vadd.f32 %v3197_v5, %v2745_v4  ;;  %v3199_v10 = vpop.f32.mrb[23].mxu0 }
 0x202   :  { %v3914_v11 = vpack.c.bf16 %v3941_v3, %v3940_v0  ;;  %v3364_v12 = vadd.f32 %v3941_v3, %v3363_v58  ;;  %v3420_v13 = vmul.f32 %v3941_v3, %v3941_v3  ;;  %v3943_v14 = vadd.f32 %v3199_v10, %v2747_v9 }
 0x203   :  { %v3440_v15 = vadd.f32 %v3439_v60, %v3419_v7  ;;  %v3344_v16 = vadd.f32 %v3942_v8, %v3343_v6  ;;  %v3421_v17 = vmul.f32 %v3942_v8, %v3942_v8 }
 0x204   :  { %3328 = vst [vmem:[%s5763_s2 + $0x50] sm:$0xff] %v3914_v11  ;;  %v3461_v18 = vadd.f32 %v3460_v61, %v3420_v13  ;;  %v3915_v19 = vpack.c.bf16 %v3943_v14, %v3942_v8  ;;  %v3365_v20 = vadd.f32 %v3943_v14, %v3364_v12  ;;  %v3422_v21 = vmul.f32 %v3943_v14, %v3943_v14 }
 0x205   :  { %v3441_v22 = vadd.f32 %v3440_v15, %v3421_v17  ;;  %v2751_v24 = vpop.f32.mrb[24].mxu1  ;;  %v4529_v17 = vmov 1966171168  }
 0x206   :  { %3329 = vst [vmem:[%s5763_s2 + $0x58] sm:$0xff] %v3915_v19  ;;  %v3462_v23 = vadd.f32 %v3461_v18, %v3422_v21  ;;  %v3203_v25 = vpop.f32.mrb[24].mxu0  ;;  %v2753_v27 = vpop.f32.mrb[25].mxu1  ;;  %v3380_v18 = vunpack.c.l.s4 %v4529_v17  ;;  %v3382_v19 = vlaneseq }
 0x207   :  { %v3944_v26 = vadd.f32 %v3203_v25, %v2751_v24  ;;  %v3205_v28 = vpop.f32.mrb[25].mxu0  ;;  %v2755_v30 = vpop.f32.mrb[26].mxu1 }
 0x208   :  { %v3945_v29 = vadd.f32 %v3205_v28, %v2753_v27  ;;  %v3207_v31 = vpop.f32.mrb[26].mxu0  ;;  %v2757_v35 = vpop.f32.mrb[27].mxu1  ;;  %v3381_v28 = vunpack.c.0.s8 %v3380_v18  ;;  %vm3396_vm0 = vcmp.lt.s32.totalorder %v3382_v19, 256 }
 0x209   :  { %v3345_v32 = vadd.f32 %v3944_v26, %v3344_v16  ;;  %v3423_v33 = vmul.f32 %v3944_v26, %v3944_v26  ;;  %v3946_v34 = vadd.f32 %v3207_v31, %v2755_v30  ;;  %v3209_v36 = vpop.f32.mrb[27].mxu0 }
 0x20a   :  { %v3916_v37 = vpack.c.bf16 %v3945_v29, %v3944_v26  ;;  %v3366_v38 = vadd.f32 %v3945_v29, %v3365_v20  ;;  %v3424_v39 = vmul.f32 %v3945_v29, %v3945_v29  ;;  %v3947_v40 = vadd.f32 %v3209_v36, %v2757_v35 }
 0x20b   :  { %v3442_v41 = vadd.f32 %v3441_v22, %v3423_v33  ;;  %v3346_v42 = vadd.f32 %v3946_v34, %v3345_v32  ;;  %v3425_v43 = vmul.f32 %v3946_v34, %v3946_v34  ;;  %v3383_v29 = vshrl.u32 %v3382_v19, 7 }
 0x20c   :  { %3330 = vst [vmem:[%s5763_s2 + $0x60] sm:$0xff] %v3916_v37  ;;  %v3463_v44 = vadd.f32 %v3462_v23, %v3424_v39  ;;  %v3917_v45 = vpack.c.bf16 %v3947_v40, %v3946_v34  ;;  %v3367_v46 = vadd.f32 %v3947_v40, %v3366_v38  ;;  %v3426_v47 = vmul.f32 %v3947_v40, %v3947_v40 }
 0x20d   :  { %v3443_v48 = vadd.f32 %v3442_v41, %v3425_v43  ;;  %v2761_v50 = vpop.f32.mrb[28].mxu1  ;;  %v3384_v38 = vsub.s32 %v3381_v28, %v3383_v29 }
 0x20e   :  { %3331 = vst [vmem:[%s5763_s2 + $0x68] sm:$0xff] %v3917_v45  ;;  %v3464_v49 = vadd.f32 %v3463_v44, %v3426_v47  ;;  %v3213_v51 = vpop.f32.mrb[28].mxu0  ;;  %v2763_v53 = vpop.f32.mrb[29].mxu1 }
 0x20f   :  { %v3948_v52 = vadd.f32 %v3213_v51, %v2761_v50  ;;  %v3215_v54 = vpop.f32.mrb[29].mxu0  ;;  %v2765_v56 = vpop.f32.mrb[30].mxu1 }
 0x210   :  { %v3949_v55 = vadd.f32 %v3215_v54, %v2763_v53  ;;  %v3217_v57 = vpop.f32.mrb[30].mxu0  ;;  %v2767_v61 = vpop.f32.mrb[31].mxu1 }
 0x211   :  { %v3347_v58 = vadd.f32 %v3948_v52, %v3346_v42  ;;  %v3427_v59 = vmul.f32 %v3948_v52, %v3948_v52  ;;  %v3950_v60 = vadd.f32 %v3217_v57, %v2765_v56  ;;  %v3219_v62 = vpop.f32.mrb[31].mxu0 }
 0x212   :  { %v3918_v63 = vpack.c.bf16 %v3949_v55, %v3948_v52  ;;  %v3368_v0 = vadd.f32 %v3949_v55, %v3367_v46  ;;  %v3428_v1 = vmul.f32 %v3949_v55, %v3949_v55  ;;  %v3951_v2 = vadd.f32 %v3219_v62, %v2767_v61 }
 0x213   :  { %v3444_v3 = vadd.f32 %v3443_v48, %v3427_v59  ;;  %v3348_v4 = vadd.f32 %v3950_v60, %v3347_v58  ;;  %v3429_v5 = vmul.f32 %v3950_v60, %v3950_v60 }
 0x214   :  { %3332 = vst [vmem:[%s5763_s2 + $0x70] sm:$0xff] %v3918_v63  ;;  %v3465_v6 = vadd.f32 %v3464_v49, %v3428_v1  ;;  %v3919_v7 = vpack.c.bf16 %v3951_v2, %v3950_v60  ;;  %v3369_v8 = vadd.f32 %v3951_v2, %v3368_v0  ;;  %v3430_v9 = vmul.f32 %v3951_v2, %v3951_v2 }
 0x215   :  { %v3349_v10 = vrot.slane %v3348_v4, 4  ;;  %v3445_v11 = vadd.f32 %v3444_v3, %v3429_v5 }
 0x216   :  { %3333 = vst [vmem:[%s5763_s2 + $0x78] sm:$0xff] %v3919_v7  ;;  %v3370_v12 = vrot.slane %v3369_v8, 4  ;;  %v3466_v13 = vadd.f32 %v3465_v6, %v3430_v9 }
 0x217   :  { %v3350_v14 = vadd.f32 %v3349_v10, %v3348_v4  ;;  %v3446_v15 = vrot.slane %v3445_v11, 4 }
 0x218   :  { %v3371_v16 = vadd.f32 %v3370_v12, %v3369_v8  ;;  %v3467_v20 = vrot.slane %v3466_v13, 4 }
 0x219   :  { %v3351_v21 = vrot.slane %v3350_v14, 2  ;;  %v3447_v22 = vadd.f32 %v3446_v15, %v3445_v11 }
 0x21a   :  { %v3372_v23 = vrot.slane %v3371_v16, 2  ;;  %v3468_v24 = vadd.f32 %v3467_v20, %v3466_v13 }
 0x21b   :  { %v3352_v25 = vadd.f32 %v3351_v21, %v3350_v14  ;;  %v3448_v26 = vrot.slane %v3447_v22, 2 }
 0x21c   :  { %v3373_v27 = vadd.f32 %v3372_v23, %v3371_v16  ;;  %v3469_v30 = vrot.slane %v3468_v24, 2 }
 0x21d   :  { %v3353_v31 = vrot.slane %v3352_v25, 1  ;;  %v3449_v32 = vadd.f32 %v3448_v26, %v3447_v22 }
 0x21e   :  { %v3374_v33 = vrot.slane %v3373_v27, 1  ;;  %v3470_v34 = vadd.f32 %v3469_v30, %v3468_v24 }
 0x21f   :  { %v3354_v35 = vadd.f32 %v3353_v31, %v3352_v25  ;;  %v3450_v36 = vrot.slane %v3449_v32, 1 }
 0x220   :  { %v3375_v37 = vadd.f32 %v3374_v33, %v3373_v27  ;;  %v3471_v39 = vrot.slane %v3470_v34, 1 }
 0x221   :  { %v3451_v40 = vadd.f32 %v3450_v36, %v3449_v32 }
 0x222   :  { %v3378_v41 = vcombine.low %v3354_v35, %v3375_v37  ;;  %v3472_v42 = vadd.f32 %v3471_v39, %v3470_v34 }
 0x224   :  { %v3385_v43 = vrot.slane %v3378_v41, %v3384_v38  ;;  %v3475_v44 = vcombine.low %v3451_v40, %v3472_v42 }
 0x226   :  { %v3392_v45 = vrot.slane %v3385_v43, %v3384_v38  ;;  %v3482_v46 = vrot.slane %v3475_v44, %v3384_v38 }
 0x228   :  { %3398 = vst.msk [vmem:[%s5764_s3] sm:$0x3] %vm3396_vm0, %v3392_v45  ;;  %v3489_v47 = vrot.slane %v3482_v46, %v3384_v38 }
 0x22a   :  { %3491 = vst.msk [vmem:[%s5765_s4] sm:$0x3] %vm3396_vm0, %v3489_v47 }

// kernel: discriminator_forward.13
= control target key start
LH: loop header
LB: loop body
LE: loop exit
PB: predicated region body
PF: predicated region fallthrough
CT: control target
= control target key end

     0   :  { %v43_v0 = vlaneseq  ;;  %s411_s0 = inlined_call_operand.vmem [shape: bf16[32,512], index: 0, kind: input, shape index: {}]   ;;  %s412_s1 = inlined_call_operand.vmem [shape: f32[1,512], index: 1, kind: input, shape index: {}]   ;;  %s413_s2 = inlined_call_operand.vmem [shape: f32[1,512], index: 2, kind: input, shape index: {}]   ;;  %s414_s3 = inlined_call_operand.vmem [shape: f32[16,512], index: 3, kind: input, shape index: {}]   ;;  %s415_s4 = inlined_call_operand.vmem [shape: f32[2,1], index: 4, kind: output, shape index: {}]  }
   0x1   :  { %v21_v1 = vld [vmem:[%s411_s0 + $0x20] sm:$0xff]  ;;  %v22_v2 = vld [vmem:[%s411_s0 + $0x28] sm:$0xff]  ;;  %v303_v13 = vld [vmem:[%s411_s0 + $0x30] sm:$0xff] }
   0x2   :  { %v33_v3 = vunpack.c.l.bf16 %v21_v1  ;;  %v34_v4 = vunpack.c.h.bf16 %v21_v1  ;;  %v35_v5 = vunpack.c.l.bf16 %v22_v2  ;;  %v289_v6 = vshrl.u32 %v43_v0, 7  ;;  %v17_v7 = vld [vmem:[%s411_s0] sm:$0xff]  ;;  %v18_v10 = vld [vmem:[%s411_s0 + $0x8] sm:$0xff]  ;;  %v24_v44 = vld [vmem:[%s411_s0 + $0x38] sm:$0xff] }
   0x3   :  { %v36_v8 = vunpack.c.h.bf16 %v22_v2  ;;  %v41_v9 = vld [vmem:[%s412_s1] sm:$0xf]  ;;  %v25_v11 = vunpack.c.l.bf16 %v17_v7  ;;  %v26_v12 = vunpack.c.h.bf16 %v17_v7  ;;  %v305_v14 = vand.u32 127, %v43_v0  ;;  %v166_v50 = vld [vmem:[%s414_s3 + $0x8] sm:$0xff]  ;;  %v167_v51 = vld [vmem:[%s414_s3 + $0x10] sm:$0xff] }
   0x4   :  { %v45_v15 = vsub.s32 0, %v289_v6  ;;  %v49_v16 = vsub.s32 1, %v289_v6  ;;  %v53_v17 = vsub.s32 2, %v289_v6  ;;  %v57_v18 = vsub.s32 3, %v289_v6  ;;  %v79_v19 = vld [vmem:[%s413_s2] sm:$0xf] }
   0x5   :  { %v27_v20 = vunpack.c.l.bf16 %v18_v10  ;;  %v28_v21 = vunpack.c.h.bf16 %v18_v10  ;;  %v37_v22 = vunpack.c.l.bf16 %v303_v13  ;;  %v38_v23 = vunpack.c.h.bf16 %v303_v13  ;;  %v165_v45 = vld [vmem:[%s414_s3] sm:$0xff]  ;;  %v168_v57 = vld [vmem:[%s414_s3 + $0x18] sm:$0xff] }
   0x6   :  { %v316_v24 = vrot.slane %v41_v9, %v45_v15  ;;  %v318_v25 = vrot.slane %v41_v9, %v49_v16  ;;  %v320_v26 = vrot.slane %v41_v9, %v53_v17  ;;  %v322_v27 = vrot.slane %v41_v9, %v57_v18 }
   0x7   :  { %v324_v28 = vrot.slane %v79_v19, %v45_v15  ;;  %v326_v29 = vrot.slane %v79_v19, %v49_v16  ;;  %v328_v30 = vrot.slane %v79_v19, %v53_v17  ;;  %v330_v31 = vrot.slane %v79_v19, %v57_v18 }
   0x8   :  { %v71_v32 = vmul.f32 %v316_v24, %v33_v3  ;;  %v72_v33 = vmul.f32 %v318_v25, %v34_v4  ;;  %v73_v34 = vmul.f32 %v320_v26, %v35_v5  ;;  %v74_v35 = vmul.f32 %v322_v27, %v36_v8 }
   0x9   :  { %v63_v36 = vmul.f32 %v316_v24, %v25_v11  ;;  %v64_v37 = vmul.f32 %v318_v25, %v26_v12  ;;  %v65_v38 = vmul.f32 %v320_v26, %v27_v20  ;;  %v66_v39 = vmul.f32 %v322_v27, %v28_v21  ;;  %v19_v20 = vld [vmem:[%s411_s0 + $0x10] sm:$0xff] }
   0xa   :  { %v109_v40 = vadd.f32 %v324_v28, %v71_v32  ;;  %v110_v41 = vadd.f32 %v326_v29, %v72_v33  ;;  %v111_v42 = vadd.f32 %v328_v30, %v73_v34  ;;  %v112_v43 = vadd.f32 %v330_v31, %v74_v35 }
   0xb   :  { %v101_v46 = vadd.f32 %v324_v28, %v63_v36  ;;  %v102_v47 = vadd.f32 %v326_v29, %v64_v37  ;;  %v103_v48 = vadd.f32 %v328_v30, %v65_v38  ;;  %v104_v49 = vadd.f32 %v330_v31, %v66_v39  ;;  %v169_v38 = vld [vmem:[%s414_s3 + $0x20] sm:$0xff]  ;;  %v20_v39 = vld [vmem:[%s411_s0 + $0x18] sm:$0xff] }
   0xc   :  { %vm125_vm0 = vcmp.ge.f32.partialorder %v109_v40, 0.0  ;;  %vm126_vm1 = vcmp.ge.f32.partialorder %v110_v41, 0.0  ;;  %vm127_vm2 = vcmp.ge.f32.partialorder %v111_v42, 0.0  ;;  %vm128_vm3 = vcmp.ge.f32.partialorder %v112_v43, 0.0 }
   0xd   :  { %v141_v52 = vmul.f32 0.2, %v109_v40  ;;  %v142_v53 = vmul.f32 0.2, %v110_v41  ;;  %v143_v54 = vmul.f32 0.2, %v111_v42  ;;  %v39_v55 = vunpack.c.l.bf16 %v24_v44 }
   0xe   :  { %v144_v56 = vmul.f32 0.2, %v112_v43  ;;  %vm117_vm4 = vcmp.ge.f32.partialorder %v101_v46, 0.0  ;;  %vm118_vm5 = vcmp.ge.f32.partialorder %v102_v47, 0.0  ;;  %vm119_vm6 = vcmp.ge.f32.partialorder %v103_v48, 0.0 }
   0xf   :  { %v157_v58 = vsel %vm125_vm0, %v109_v40, %v141_v52  ;;  %v158_v59 = vsel %vm126_vm1, %v110_v41, %v142_v53  ;;  %v159_v60 = vsel %vm127_vm2, %v111_v42, %v143_v54  ;;  %vm120_vm7 = vcmp.ge.f32.partialorder %v104_v49, 0.0  ;;  %v172_v54 = vld [vmem:[%s414_s3 + $0x38] sm:$0xff] }
  0x10   :  { %v160_v61 = vsel %vm128_vm3, %v112_v43, %v144_v56  ;;  %v181_v62 = vmul.f32 %v165_v45, %v157_v58  ;;  %v182_v63 = vmul.f32 %v166_v50, %v158_v59  ;;  %v183_v0 = vmul.f32 %v167_v51, %v159_v60 }
  0x11   :  { %v184_v1 = vmul.f32 %v168_v57, %v160_v61  ;;  %v133_v2 = vmul.f32 0.2, %v101_v46  ;;  %v134_v3 = vmul.f32 0.2, %v102_v47  ;;  %v135_v4 = vmul.f32 0.2, %v103_v48 }
  0x12   :  { %v199_v5 = vadd.f32 %v182_v63, %v181_v62  ;;  %v136_v7 = vmul.f32 0.2, %v104_v49  ;;  %v40_v8 = vunpack.c.h.bf16 %v24_v44  ;;  %v75_v9 = vmul.f32 %v316_v24, %v37_v22  ;;  %v170_v44 = vld [vmem:[%s414_s3 + $0x28] sm:$0xff] }
  0x13   :  { %v149_v10 = vsel %vm117_vm4, %v101_v46, %v133_v2  ;;  %v150_v11 = vsel %vm118_vm5, %v102_v47, %v134_v3  ;;  %v151_v12 = vsel %vm119_vm6, %v103_v48, %v135_v4  ;;  %v76_v15 = vmul.f32 %v318_v25, %v38_v23 }
  0x14   :  { %v200_v16 = vadd.f32 %v199_v5, %v183_v0  ;;  %v152_v17 = vsel %vm120_vm7, %v104_v49, %v136_v7  ;;  %v173_v18 = vmul.f32 %v165_v45, %v149_v10  ;;  %v174_v19 = vmul.f32 %v166_v50, %v150_v11  ;;  %v171_v45 = vld [vmem:[%s414_s3 + $0x30] sm:$0xff] }
  0x15   :  { %v175_v21 = vmul.f32 %v167_v51, %v151_v12  ;;  %v176_v22 = vmul.f32 %v168_v57, %v152_v17  ;;  %v77_v32 = vmul.f32 %v320_v26, %v39_v55  ;;  %v78_v33 = vmul.f32 %v322_v27, %v40_v8 }
  0x16   :  { %v201_v34 = vadd.f32 %v200_v16, %v184_v1  ;;  %v189_v35 = vadd.f32 %v174_v19, %v173_v18  ;;  %v113_v13 = vadd.f32 %v324_v28, %v75_v9  ;;  %v114_v23 = vadd.f32 %v326_v29, %v76_v15 }
  0x17   :  { %v115_v36 = vadd.f32 %v328_v30, %v77_v32  ;;  %v116_v37 = vadd.f32 %v330_v31, %v78_v33  ;;  %v29_v40 = vunpack.c.l.bf16 %v19_v20  ;;  %v30_v41 = vunpack.c.h.bf16 %v19_v20 }
  0x18   :  { %202 = vadd.xlane.f32.xlu1 %v201_v34  ;;  %v190_v42 = vadd.f32 %v189_v35, %v175_v21  ;;  %vm129_vm8 = vcmp.ge.f32.partialorder %v113_v13, 0.0  ;;  %vm130_vm9 = vcmp.ge.f32.partialorder %v114_v23, 0.0  ;;  %v145_v43 = vmul.f32 0.2, %v113_v13 }
  0x19   :  { %vm131_vm10 = vcmp.ge.f32.partialorder %v115_v36, 0.0  ;;  %vm132_vm11 = vcmp.ge.f32.partialorder %v116_v37, 0.0  ;;  %v146_v46 = vmul.f32 0.2, %v114_v23  ;;  %v147_v47 = vmul.f32 0.2, %v115_v36 }
  0x1a   :  { %v191_v48 = vadd.f32 %v190_v42, %v176_v22  ;;  %v148_v49 = vmul.f32 0.2, %v116_v37  ;;  %v161_v50 = vsel %vm129_vm8, %v113_v13, %v145_v43  ;;  %v31_v51 = vunpack.c.l.bf16 %v20_v39 }
  0x1b   :  { %v162_v52 = vsel %vm130_vm9, %v114_v23, %v146_v46  ;;  %v163_v53 = vsel %vm131_vm10, %v115_v36, %v147_v47  ;;  %v185_v55 = vmul.f32 %v169_v38, %v161_v50  ;;  %v32_v56 = vunpack.c.h.bf16 %v20_v39 }
  0x1c   :  { %192 = vadd.xlane.f32.xlu0 %v191_v48  ;;  %v164_v57 = vsel %vm132_vm11, %v116_v37, %v148_v49  ;;  %v186_v58 = vmul.f32 %v170_v44, %v162_v52  ;;  %v187_v59 = vmul.f32 %v171_v45, %v163_v53  ;;  %v67_v60 = vmul.f32 %v316_v24, %v29_v40 }
  0x1d   :  { %v68_v61 = vmul.f32 %v318_v25, %v30_v41  ;;  %v69_v62 = vmul.f32 %v320_v26, %v31_v51  ;;  %v70_v63 = vmul.f32 %v322_v27, %v32_v56  ;;  %v188_v0 = vmul.f32 %v172_v54, %v164_v57 }
  0x1e   :  { %v204_v1 = vadd.f32 %v186_v58, %v185_v55  ;;  %v105_v2 = vadd.f32 %v324_v28, %v67_v60  ;;  %v217_v3 = vsub.s32 %v305_v14, %v289_v6  ;;  %v219_v19 = vadd.s32 4294967288, %v305_v14 }
  0x1f   :  { %v106_v4 = vadd.f32 %v326_v29, %v68_v61  ;;  %v107_v5 = vadd.f32 %v328_v30, %v69_v62  ;;  %v108_v7 = vadd.f32 %v330_v31, %v70_v63  ;;  %vm224_vm0 = vcmask 130112  }
  0x20   :  { %v205_v24 = vadd.f32 %v204_v1, %v187_v59  ;;  %vm121_vm12 = vcmp.ge.f32.partialorder %v105_v2, 0.0  ;;  %v137_v25 = vmul.f32 0.2, %v105_v2  ;;  %v222_v20 = vsub.s32 %v219_v19, %v289_v6 }
  0x21   :  { %vm122_vm13 = vcmp.ge.f32.partialorder %v106_v4, 0.0  ;;  %vm123_vm14 = vcmp.ge.f32.partialorder %v107_v5, 0.0  ;;  %vm124_vm15 = vcmp.ge.f32.partialorder %v108_v7, 0.0  ;;  %v138_v26 = vmul.f32 0.2, %v106_v4 }
  0x22   :  { %v206_v27 = vadd.f32 %v205_v24, %v188_v0  ;;  %v139_v8 = vmul.f32 0.2, %v107_v5  ;;  %v140_v9 = vmul.f32 0.2, %v108_v7  ;;  %v153_v28 = vsel %vm121_vm12, %v105_v2, %v137_v25 }
  0x23   :  { %v154_v10 = vsel %vm122_vm13, %v106_v4, %v138_v26  ;;  %v177_v11 = vmul.f32 %v169_v38, %v153_v28  ;;  %vm235_vm1 = vcmask 1041409   ;;  %vm238_vm2 = vcmask 123904  }
  0x24   :  { %207 = vadd.xlane.f32.xlu1 %v206_v27  ;;  %v155_v12 = vsel %vm123_vm14, %v107_v5, %v139_v8  ;;  %v156_v29 = vsel %vm124_vm15, %v108_v7, %v140_v9  ;;  %v178_v15 = vmul.f32 %v170_v44, %v154_v10  ;;  %vm248_vm3 = vcmask 1024  }
  0x25   :  { %v179_v30 = vmul.f32 %v171_v45, %v155_v12  ;;  %v180_v16 = vmul.f32 %v172_v54, %v156_v29 }
  0x26   :  { %v194_v31 = vadd.f32 %v178_v15, %v177_v11 }
  0x28   :  { %v195_v17 = vadd.f32 %v194_v31, %v179_v30 }
  0x2a   :  { %v196_v18 = vadd.f32 %v195_v17, %v180_v16 }
  0x2c   :  { %197 = vadd.xlane.f32.xlu0 %v196_v18 }
  0xa5   :  { %v203_v21 = vpop.xlane.xlu1 %202 }
  0xa6   :  { %v229_v32 = vrot.slane %v203_v21, %v217_v3 }
  0xa9   :  { %v193_v34 = vpop.xlane.xlu0 %192 }
  0xaa   :  { %v218_v23 = vrot.slane %v193_v34, %v217_v3 }
  0xb1   :  { %v208_v22 = vpop.xlane.xlu1 %207 }
  0xb2   :  { %v233_v33 = vrot.slane %v208_v22, %v222_v20 }
  0xb4   :  { %v234_v35 = vsel %vm224_vm0, %v233_v33, %v229_v32 }
  0xb9   :  { %v198_v13 = vpop.xlane.xlu0 %197 }
  0xba   :  { %v223_v36 = vrot.slane %v198_v13, %v222_v20 }
  0xbc   :  { %v225_v37 = vsel %vm224_vm0, %v223_v36, %v218_v23 }
  0xbd   :  { %v236_v38 = vsel %vm235_vm1, %v234_v35, %v225_v37 }
  0xbe   :  { %v239_v39 = vsel %vm238_vm2, %v236_v38, 0.0 }
  0xbf   :  { %240 = vadd.xlane.f32.xlu0 %v239_v39 }
 0x14c   :  { %v241_v14 = vpop.xlane.xlu0 %240 }
 0x14d   :  { %v242_v40 = vsub.f32 0.0, %v241_v14 }
 0x14f   :  { %v243_v41 = vmul.f32 1.442695, %v242_v40 }
 0x151   :  { %254 = vpow2.f32 %v243_v41 }
 0x15b   :  { %v255_v6 = vpop.eup %254 }
 0x15c   :  { %v245_v42 = vadd.f32 1.0, %v255_v6 }
 0x15e   :  { %256 = vrcp.f32 %v245_v42 }
 0x168   :  { %v257_v43 = vpop.eup %256 }
 0x169   :  { %249 = vst.msk [vmem:[%s415_s4] sm:$0x3] %vm248_vm3, %v257_v43 }

// kernel: discriminator_forward.12
= control target key start
LH: loop header
LB: loop body
LE: loop exit
PB: predicated region body
PF: predicated region fallthrough
CT: control target
= control target key end

     0   :  { %s14789_s1 = inlined_call_operand.vmem [shape: bf16[4096,512], index: 1, kind: input, shape index: {}]   ;;  %s14790_s0 = inlined_call_operand.vmem [shape: bf16[32,4096], index: 0, kind: input, shape index: {}]   ;;  %s14791_s2 = inlined_call_operand.vmem [shape: bf16[32,512], index: 2, kind: output, shape index: {0}]   ;;  %s14792_s3 = inlined_call_operand.vmem [shape: f32[1,1,512], index: 3, kind: output, shape index: {1}]   ;;  %s14793_s4 = inlined_call_operand.vmem [shape: f32[1,1,512], index: 4, kind: output, shape index: {2}]  }
   0x1   :  { %v9803_v0 = vld [vmem:[%s14789_s1 + $0x4] ss:$16 sps:$4 sm:$0xff]   ;;  %v9805_v1 = vld [vmem:[%s14789_s1 + $0xc] ss:$16 sps:$4 sm:$0xff]   ;;  %v9807_v2 = vld [vmem:[%s14789_s1] ss:$16 sps:$4 sm:$0xff]  }
   0x2   :  { %6542 = vmatprep.subr.bf16.mxu0 %v9803_v0  ;;  %v9808_v3 = vld [vmem:[%s14789_s1 + $0x8] ss:$16 sps:$4 sm:$0xff]   ;;  %7390 = vmatprep.subr.bf16.mxu1 %v9805_v1  ;;  %v9809_v4 = vld [vmem:[%s14789_s1 + $0x24] ss:$16 sps:$4 sm:$0xff]   ;;  %v9811_v5 = vld [vmem:[%s14789_s1 + $0x2c] ss:$16 sps:$4 sm:$0xff]  }
   0x3   :  { %6543 = vmatpush1.bf16.msra.mxu0 %v9807_v2  ;;  %7391 = vmatpush1.bf16.msra.mxu1 %v9808_v3  ;;  %v9813_v6 = vld [vmem:[%s14789_s1 + $0x20] ss:$16 sps:$4 sm:$0xff]   ;;  %v9814_v7 = vld [vmem:[%s14789_s1 + $0x28] ss:$16 sps:$4 sm:$0xff]   ;;  %v9815_v8 = vld [vmem:[%s14789_s1 + $0x44] ss:$16 sps:$4 sm:$0xff]  }
   0x4   :  { %6544 = vmatprep.subr.bf16.mxu0 %v9809_v4  ;;  %7392 = vmatprep.subr.bf16.mxu1 %v9811_v5  ;;  %v9817_v9 = vld [vmem:[%s14789_s1 + $0x4c] ss:$16 sps:$4 sm:$0xff]   ;;  %v9819_v10 = vld [vmem:[%s14789_s1 + $0x40] ss:$16 sps:$4 sm:$0xff]   ;;  %v9820_v11 = vld [vmem:[%s14789_s1 + $0x48] ss:$16 sps:$4 sm:$0xff]  }
   0x5   :  { %v9821_v12 = vld [vmem:[%s14789_s1 + $0x64] ss:$16 sps:$4 sm:$0xff]   ;;  %v9823_v13 = vld [vmem:[%s14789_s1 + $0x6c] ss:$16 sps:$4 sm:$0xff]   ;;  %v9825_v14 = vld [vmem:[%s14789_s1 + $0x60] ss:$16 sps:$4 sm:$0xff]  }
   0x6   :  { %v9826_v15 = vld [vmem:[%s14789_s1 + $0x68] ss:$16 sps:$4 sm:$0xff]   ;;  %v9827_v16 = vld [vmem:[%s14789_s1 + $0x84] ss:$16 sps:$4 sm:$0xff]   ;;  %v9829_v17 = vld [vmem:[%s14789_s1 + $0x8c] ss:$16 sps:$4 sm:$0xff]  }
   0x7   :  { %6545 = vmatpush1.bf16.msra.mxu0 %v9813_v6  ;;  %7393 = vmatpush1.bf16.msra.mxu1 %v9814_v7  ;;  %v9831_v18 = vld [vmem:[%s14789_s1 + $0x80] ss:$16 sps:$4 sm:$0xff]   ;;  %v9832_v19 = vld [vmem:[%s14789_s1 + $0x88] ss:$16 sps:$4 sm:$0xff]   ;;  %v9833_v20 = vld [vmem:[%s14789_s1 + $0xa4] ss:$16 sps:$4 sm:$0xff]  }
   0x8   :  { %6546 = vmatprep.subr.bf16.mxu0 %v9815_v8  ;;  %7394 = vmatprep.subr.bf16.mxu1 %v9817_v9  ;;  %v9835_v21 = vld [vmem:[%s14789_s1 + $0xac] ss:$16 sps:$4 sm:$0xff]   ;;  %v9837_v22 = vld [vmem:[%s14789_s1 + $0xa0] ss:$16 sps:$4 sm:$0xff]   ;;  %v9838_v23 = vld [vmem:[%s14789_s1 + $0xa8] ss:$16 sps:$4 sm:$0xff]  }
   0x9   :  { %v9839_v24 = vld [vmem:[%s14789_s1 + $0xc4] ss:$16 sps:$4 sm:$0xff]   ;;  %v9841_v25 = vld [vmem:[%s14789_s1 + $0xcc] ss:$16 sps:$4 sm:$0xff]   ;;  %v9843_v26 = vld [vmem:[%s14789_s1 + $0xc0] ss:$16 sps:$4 sm:$0xff]  }
   0xa   :  { %v9844_v27 = vld [vmem:[%s14789_s1 + $0xc8] ss:$16 sps:$4 sm:$0xff]   ;;  %v9845_v28 = vld [vmem:[%s14789_s1 + $0xe4] ss:$16 sps:$4 sm:$0xff]   ;;  %v9847_v29 = vld [vmem:[%s14789_s1 + $0xec] ss:$16 sps:$4 sm:$0xff]  }
   0xb   :  { %6547 = vmatpush1.bf16.msra.mxu0 %v9819_v10  ;;  %7395 = vmatpush1.bf16.msra.mxu1 %v9820_v11  ;;  %v9849_v30 = vld [vmem:[%s14789_s1 + $0xe0] ss:$16 sps:$4 sm:$0xff]   ;;  %v9850_v31 = vld [vmem:[%s14789_s1 + $0xe8] ss:$16 sps:$4 sm:$0xff]   ;;  %v9851_v32 = vld [vmem:[%s14789_s1 + $0x104] ss:$16 sps:$4 sm:$0xff]  }
   0xc   :  { %6548 = vmatprep.subr.bf16.mxu0 %v9821_v12  ;;  %7396 = vmatprep.subr.bf16.mxu1 %v9823_v13  ;;  %v9853_v33 = vld [vmem:[%s14789_s1 + $0x10c] ss:$16 sps:$4 sm:$0xff]   ;;  %v9855_v34 = vld [vmem:[%s14789_s1 + $0x100] ss:$16 sps:$4 sm:$0xff]   ;;  %v9856_v35 = vld [vmem:[%s14789_s1 + $0x108] ss:$16 sps:$4 sm:$0xff]  }
   0xd   :  { %v9857_v36 = vld [vmem:[%s14789_s1 + $0x124] ss:$16 sps:$4 sm:$0xff]   ;;  %v9859_v37 = vld [vmem:[%s14789_s1 + $0x12c] ss:$16 sps:$4 sm:$0xff]   ;;  %v9861_v38 = vld [vmem:[%s14789_s1 + $0x120] ss:$16 sps:$4 sm:$0xff]  }
   0xe   :  { %v9862_v39 = vld [vmem:[%s14789_s1 + $0x128] ss:$16 sps:$4 sm:$0xff]   ;;  %v9863_v40 = vld [vmem:[%s14789_s1 + $0x144] ss:$16 sps:$4 sm:$0xff]   ;;  %v9865_v41 = vld [vmem:[%s14789_s1 + $0x14c] ss:$16 sps:$4 sm:$0xff]  }
   0xf   :  { %6549 = vmatpush1.bf16.msra.mxu0 %v9825_v14  ;;  %7397 = vmatpush1.bf16.msra.mxu1 %v9826_v15  ;;  %v9867_v42 = vld [vmem:[%s14789_s1 + $0x140] ss:$16 sps:$4 sm:$0xff]   ;;  %v9868_v43 = vld [vmem:[%s14789_s1 + $0x148] ss:$16 sps:$4 sm:$0xff]   ;;  %v9869_v44 = vld [vmem:[%s14789_s1 + $0x164] ss:$16 sps:$4 sm:$0xff]  }
  0x10   :  { %6550 = vmatprep.subr.bf16.mxu0 %v9827_v16  ;;  %7398 = vmatprep.subr.bf16.mxu1 %v9829_v17  ;;  %v9871_v45 = vld [vmem:[%s14789_s1 + $0x16c] ss:$16 sps:$4 sm:$0xff]   ;;  %v14_v46 = vld [vmem:[%s14790_s0] sm:$0xff]  ;;  %v9874_v49 = vld [vmem:[%s14789_s1 + $0x168] ss:$16 sps:$4 sm:$0xff]  }
  0x11   :  { %v30_v47 = vld [vmem:[%s14790_s0 + $0x80] sm:$0xff]  ;;  %v9877_v52 = vld [vmem:[%s14789_s1 + $0x18c] ss:$16 sps:$4 sm:$0xff]   ;;  %v9880_v54 = vld [vmem:[%s14789_s1 + $0x188] ss:$16 sps:$4 sm:$0xff]  }
  0x12   :  { %v9873_v48 = vld [vmem:[%s14789_s1 + $0x160] ss:$16 sps:$4 sm:$0xff]   ;;  %v8459_v50 = vcombine.high %v14_v46, %v30_v47  ;;  %v9875_v51 = vld [vmem:[%s14789_s1 + $0x184] ss:$16 sps:$4 sm:$0xff]   ;;  %v9883_v56 = vld [vmem:[%s14789_s1 + $0x1ac] ss:$16 sps:$4 sm:$0xff]   ;;  %v8458_v5 = vcombine.low %v14_v46, %v30_v47 }
  0x13   :  { %6551 = vmatpush1.bf16.msra.mxu0 %v9831_v18  ;;  %7399 = vmatpush1.bf16.msra.mxu1 %v9832_v19  ;;  %v9879_v53 = vld [vmem:[%s14789_s1 + $0x180] ss:$16 sps:$4 sm:$0xff]   ;;  %v9881_v55 = vld [vmem:[%s14789_s1 + $0x1a4] ss:$16 sps:$4 sm:$0xff]   ;;  %v9886_v58 = vld [vmem:[%s14789_s1 + $0x1a8] ss:$16 sps:$4 sm:$0xff]  }
  0x14   :  { %6552 = vmatprep.subr.bf16.mxu0 %v9833_v20  ;;  %7400 = vmatprep.subr.bf16.mxu1 %v9835_v21  ;;  %v9885_v57 = vld [vmem:[%s14789_s1 + $0x1a0] ss:$16 sps:$4 sm:$0xff]   ;;  %v9887_v59 = vld [vmem:[%s14789_s1 + $0x1c4] ss:$16 sps:$4 sm:$0xff]   ;;  %v9889_v60 = vld [vmem:[%s14789_s1 + $0x1cc] ss:$16 sps:$4 sm:$0xff]  }
  0x15   :  { %6574 = vmatprep.mubr.bf16.mxu0 %v8459_v50  ;;  %7422 = vmatprep.mubr.bf16.mxu1 %v8459_v50  ;;  %v9891_v61 = vld [vmem:[%s14789_s1 + $0x1c0] ss:$16 sps:$4 sm:$0xff]   ;;  %v9892_v62 = vld [vmem:[%s14789_s1 + $0x1c8] ss:$16 sps:$4 sm:$0xff]   ;;  %v9893_v63 = vld [vmem:[%s14789_s1 + $0x1e4] ss:$16 sps:$4 sm:$0xff]  }
  0x16   :  { %v9895_v0 = vld [vmem:[%s14789_s1 + $0x1ec] ss:$16 sps:$4 sm:$0xff]   ;;  %v9897_v1 = vld [vmem:[%s14789_s1 + $0x1e0] ss:$16 sps:$4 sm:$0xff]   ;;  %v9898_v2 = vld [vmem:[%s14789_s1 + $0x1e8] ss:$16 sps:$4 sm:$0xff]  }
  0x17   :  { %6553 = vmatpush1.bf16.msra.mxu0 %v9837_v22  ;;  %7401 = vmatpush1.bf16.msra.mxu1 %v9838_v23  ;;  %v9901_v3 = vld [vmem:[%s14789_s1 + $0x204] ss:$16 sps:$4 sm:$0xff]   ;;  %v9904_v4 = vld [vmem:[%s14789_s1 + $0x20c] ss:$16 sps:$4 sm:$0xff]   ;;  %v9899_v6 = vld [vmem:[%s14789_s1 + $0x200] ss:$16 sps:$4 sm:$0xff]  }
  0x18   :  { %6554 = vmatprep.subr.bf16.mxu0 %v9839_v24  ;;  %7402 = vmatprep.subr.bf16.mxu1 %v9841_v25  ;;  %v9902_v7 = vld [vmem:[%s14789_s1 + $0x208] ss:$16 sps:$4 sm:$0xff]   ;;  %v9907_v8 = vld [vmem:[%s14789_s1 + $0x224] ss:$16 sps:$4 sm:$0xff]   ;;  %v9910_v9 = vld [vmem:[%s14789_s1 + $0x22c] ss:$16 sps:$4 sm:$0xff]  }
  0x19   :  { %v9905_v10 = vld [vmem:[%s14789_s1 + $0x220] ss:$16 sps:$4 sm:$0xff]   ;;  %v9908_v11 = vld [vmem:[%s14789_s1 + $0x228] ss:$16 sps:$4 sm:$0xff]   ;;  %v9913_v12 = vld [vmem:[%s14789_s1 + $0x244] ss:$16 sps:$4 sm:$0xff]  }
  0x1a   :  { %v9916_v13 = vld [vmem:[%s14789_s1 + $0x24c] ss:$16 sps:$4 sm:$0xff]   ;;  %v9911_v14 = vld [vmem:[%s14789_s1 + $0x240] ss:$16 sps:$4 sm:$0xff]   ;;  %v9914_v15 = vld [vmem:[%s14789_s1 + $0x248] ss:$16 sps:$4 sm:$0xff]  }
  0x1b   :  { %6555 = vmatpush1.bf16.msra.mxu0 %v9843_v26  ;;  %7403 = vmatpush1.bf16.msra.mxu1 %v9844_v27  ;;  %v9919_v16 = vld [vmem:[%s14789_s1 + $0x264] ss:$16 sps:$4 sm:$0xff]   ;;  %v9922_v17 = vld [vmem:[%s14789_s1 + $0x26c] ss:$16 sps:$4 sm:$0xff]   ;;  %v9917_v18 = vld [vmem:[%s14789_s1 + $0x260] ss:$16 sps:$4 sm:$0xff]  }
  0x1c   :  { %6556 = vmatprep.subr.bf16.mxu0 %v9845_v28  ;;  %7404 = vmatprep.subr.bf16.mxu1 %v9847_v29  ;;  %v9920_v19 = vld [vmem:[%s14789_s1 + $0x268] ss:$16 sps:$4 sm:$0xff]   ;;  %v9925_v20 = vld [vmem:[%s14789_s1 + $0x284] ss:$16 sps:$4 sm:$0xff]   ;;  %v9928_v21 = vld [vmem:[%s14789_s1 + $0x28c] ss:$16 sps:$4 sm:$0xff]  }
  0x1d   :  { %v9923_v22 = vld [vmem:[%s14789_s1 + $0x280] ss:$16 sps:$4 sm:$0xff]   ;;  %v9926_v23 = vld [vmem:[%s14789_s1 + $0x288] ss:$16 sps:$4 sm:$0xff]   ;;  %v9931_v24 = vld [vmem:[%s14789_s1 + $0x2a4] ss:$16 sps:$4 sm:$0xff]  }
  0x1e   :  { %v9934_v25 = vld [vmem:[%s14789_s1 + $0x2ac] ss:$16 sps:$4 sm:$0xff]   ;;  %v46_v26 = vld [vmem:[%s14790_s0 + $0x100] sm:$0xff]  ;;  %v9950_v46 = vld [vmem:[%s14789_s1 + $0x308] ss:$16 sps:$4 sm:$0xff]  }
  0x1f   :  { %6557 = vmatpush1.bf16.msra.mxu0 %v9849_v30  ;;  %7405 = vmatpush1.bf16.msra.mxu1 %v9850_v31  ;;  %v62_v27 = vld [vmem:[%s14790_s0 + $0x180] sm:$0xff]  ;;  %v9932_v30 = vld [vmem:[%s14789_s1 + $0x2a8] ss:$16 sps:$4 sm:$0xff]  }
  0x20   :  { %6558 = vmatprep.subr.bf16.mxu0 %v9851_v32  ;;  %7406 = vmatprep.subr.bf16.mxu1 %v9853_v33  ;;  %v8491_v28 = vcombine.high %v46_v26, %v62_v27  ;;  %v9929_v29 = vld [vmem:[%s14789_s1 + $0x2a0] ss:$16 sps:$4 sm:$0xff]   ;;  %v8490_v31 = vcombine.low %v46_v26, %v62_v27  ;;  %v9937_v32 = vld [vmem:[%s14789_s1 + $0x2c4] ss:$16 sps:$4 sm:$0xff]   ;;  %v9940_v33 = vld [vmem:[%s14789_s1 + $0x2cc] ss:$16 sps:$4 sm:$0xff]  }
  0x21   :  { %v9955_v47 = vld [vmem:[%s14789_s1 + $0x324] ss:$16 sps:$4 sm:$0xff]   ;;  %v9956_v50 = vld [vmem:[%s14789_s1 + $0x328] ss:$16 sps:$4 sm:$0xff]  }
  0x22   :  { %v11819_v27 = vld [vmem:[%s14790_s0 + $0x90] sm:$0xff] }
  0x23   :  { %6559 = vmatpush1.bf16.msra.mxu0 %v9855_v34  ;;  %7407 = vmatpush1.bf16.msra.mxu1 %v9856_v35  ;;  %v11650_v34 = vld [vmem:[%s14790_s0 + $0x8] sm:$0xff] }
  0x24   :  { %6560 = vmatprep.subr.bf16.mxu0 %v9857_v36  ;;  %7408 = vmatprep.subr.bf16.mxu1 %v9859_v37  ;;  %v11655_v35 = vld [vmem:[%s14790_s0 + $0x88] sm:$0xff]  ;;  %v9935_v36 = vld [vmem:[%s14789_s1 + $0x2c0] ss:$16 sps:$4 sm:$0xff]  }
  0x25   :  { %v9938_v37 = vld [vmem:[%s14789_s1 + $0x2c8] ss:$16 sps:$4 sm:$0xff]  }
  0x27   :  { %6561 = vmatpush1.bf16.msra.mxu0 %v9861_v38  ;;  %7409 = vmatpush1.bf16.msra.mxu1 %v9862_v39  ;;  %v8461_v38 = vcombine.high %v11650_v34, %v11655_v35  ;;  %v9943_v39 = vld [vmem:[%s14789_s1 + $0x2e4] ss:$16 sps:$4 sm:$0xff]  }
  0x28   :  { %6562 = vmatprep.subr.bf16.mxu0 %v9863_v40  ;;  %7410 = vmatprep.subr.bf16.mxu1 %v9865_v41  ;;  %v9946_v40 = vld [vmem:[%s14789_s1 + $0x2ec] ss:$16 sps:$4 sm:$0xff]   ;;  %v9941_v41 = vld [vmem:[%s14789_s1 + $0x2e0] ss:$16 sps:$4 sm:$0xff]  }
  0x2b   :  { %6563 = vmatpush1.bf16.msra.mxu0 %v9867_v42  ;;  %7411 = vmatpush1.bf16.msra.mxu1 %v9868_v43  ;;  %v9944_v42 = vld [vmem:[%s14789_s1 + $0x2e8] ss:$16 sps:$4 sm:$0xff]   ;;  %v9949_v43 = vld [vmem:[%s14789_s1 + $0x304] ss:$16 sps:$4 sm:$0xff]  }
  0x2c   :  { %6564 = vmatprep.subr.bf16.mxu0 %v9869_v44  ;;  %7412 = vmatprep.subr.bf16.mxu1 %v9871_v45  ;;  %v9952_v44 = vld [vmem:[%s14789_s1 + $0x30c] ss:$16 sps:$4 sm:$0xff]   ;;  %v9947_v45 = vld [vmem:[%s14789_s1 + $0x300] ss:$16 sps:$4 sm:$0xff]  }
  0x2f   :  { %6565 = vmatpush1.bf16.msra.mxu0 %v9873_v48  ;;  %7413 = vmatpush1.bf16.msra.mxu1 %v9874_v49  ;;  %v9958_v48 = vld [vmem:[%s14789_s1 + $0x32c] ss:$16 sps:$4 sm:$0xff]   ;;  %v9953_v49 = vld [vmem:[%s14789_s1 + $0x320] ss:$16 sps:$4 sm:$0xff]  }
  0x30   :  { %6566 = vmatprep.subr.bf16.mxu0 %v9875_v51  ;;  %7414 = vmatprep.subr.bf16.mxu1 %v9877_v52  ;;  %v9961_v51 = vld [vmem:[%s14789_s1 + $0x344] ss:$16 sps:$4 sm:$0xff]   ;;  %v9964_v52 = vld [vmem:[%s14789_s1 + $0x34c] ss:$16 sps:$4 sm:$0xff]  }
  0x33   :  { %6567 = vmatpush1.bf16.msra.mxu0 %v9879_v53  ;;  %7415 = vmatpush1.bf16.msra.mxu1 %v9880_v54  ;;  %v9959_v53 = vld [vmem:[%s14789_s1 + $0x340] ss:$16 sps:$4 sm:$0xff]   ;;  %v9962_v54 = vld [vmem:[%s14789_s1 + $0x348] ss:$16 sps:$4 sm:$0xff]  }
  0x34   :  { %6568 = vmatprep.subr.bf16.mxu0 %v9881_v55  ;;  %7416 = vmatprep.subr.bf16.mxu1 %v9883_v56  ;;  %v9967_v55 = vld [vmem:[%s14789_s1 + $0x364] ss:$16 sps:$4 sm:$0xff]   ;;  %v9970_v56 = vld [vmem:[%s14789_s1 + $0x36c] ss:$16 sps:$4 sm:$0xff]  }
  0x37   :  { %6569 = vmatpush1.bf16.msra.mxu0 %v9885_v57  ;;  %7417 = vmatpush1.bf16.msra.mxu1 %v9886_v58  ;;  %v9965_v57 = vld [vmem:[%s14789_s1 + $0x360] ss:$16 sps:$4 sm:$0xff]   ;;  %v9968_v58 = vld [vmem:[%s14789_s1 + $0x368] ss:$16 sps:$4 sm:$0xff]  }
  0x38   :  { %6570 = vmatprep.subr.bf16.mxu0 %v9887_v59  ;;  %7418 = vmatprep.subr.bf16.mxu1 %v9889_v60  ;;  %v9973_v59 = vld [vmem:[%s14789_s1 + $0x384] ss:$16 sps:$4 sm:$0xff]   ;;  %v9976_v60 = vld [vmem:[%s14789_s1 + $0x38c] ss:$16 sps:$4 sm:$0xff]  }
  0x3b   :  { %6571 = vmatpush1.bf16.msra.mxu0 %v9891_v61  ;;  %7419 = vmatpush1.bf16.msra.mxu1 %v9892_v62  ;;  %v9971_v61 = vld [vmem:[%s14789_s1 + $0x380] ss:$16 sps:$4 sm:$0xff]   ;;  %v9974_v62 = vld [vmem:[%s14789_s1 + $0x388] ss:$16 sps:$4 sm:$0xff]  }
  0x3c   :  { %6572 = vmatprep.subr.bf16.mxu0 %v9893_v63  ;;  %7420 = vmatprep.subr.bf16.mxu1 %v9895_v0  ;;  %v9979_v63 = vld [vmem:[%s14789_s1 + $0x3a4] ss:$16 sps:$4 sm:$0xff]   ;;  %v9982_v0 = vld [vmem:[%s14789_s1 + $0x3ac] ss:$16 sps:$4 sm:$0xff]  }
  0x3f   :  { %6573 = vmatpush1.bf16.msra.mxu0 %v9897_v1  ;;  %7421 = vmatpush1.bf16.msra.mxu1 %v9898_v2  ;;  %v9977_v1 = vld [vmem:[%s14789_s1 + $0x3a0] ss:$16 sps:$4 sm:$0xff]   ;;  %v9980_v2 = vld [vmem:[%s14789_s1 + $0x3a8] ss:$16 sps:$4 sm:$0xff]  }
  0x40   :  { %6595 = vmatprep.subr.bf16.mxu0 %v9901_v3  ;;  %7443 = vmatprep.subr.bf16.mxu1 %v9904_v4  ;;  %v9985_v3 = vld [vmem:[%s14789_s1 + $0x3c4] ss:$16 sps:$4 sm:$0xff]   ;;  %v9988_v4 = vld [vmem:[%s14789_s1 + $0x3cc] ss:$16 sps:$4 sm:$0xff]  }
  0x42   :  { %6575 = vmatmul.mubr.bf16.vlgmr.msra.gmra.mrb[0].mxu0 %v8458_v5  ;;  %7423 = vmatmul.mubr.bf16.vlgmr.msra.gmra.mrb[0].mxu1 %v8458_v5  ;;  %v9983_v5 = vld [vmem:[%s14789_s1 + $0x3c0] ss:$16 sps:$4 sm:$0xff]  }
  0x43   :  { %6596 = vmatpush1.bf16.msra.mxu0 %v9899_v6  ;;  %7444 = vmatpush1.bf16.msra.mxu1 %v9902_v7  ;;  %v9986_v6 = vld [vmem:[%s14789_s1 + $0x3c8] ss:$16 sps:$4 sm:$0xff]   ;;  %v9991_v7 = vld [vmem:[%s14789_s1 + $0x3e4] ss:$16 sps:$4 sm:$0xff]  }
  0x44   :  { %6597 = vmatprep.subr.bf16.mxu0 %v9907_v8  ;;  %7445 = vmatprep.subr.bf16.mxu1 %v9910_v9  ;;  %v9994_v8 = vld [vmem:[%s14789_s1 + $0x3ec] ss:$16 sps:$4 sm:$0xff]   ;;  %v9989_v9 = vld [vmem:[%s14789_s1 + $0x3e0] ss:$16 sps:$4 sm:$0xff]  }
  0x45   :  { %6584 = vmatprep.mubr.bf16.mxu0 %v8491_v28  ;;  %7432 = vmatprep.mubr.bf16.mxu1 %v8491_v28  ;;  %v10007_v28 = vld [vmem:[%s14789_s1 + $0x440] ss:$16 sps:$4 sm:$0xff]  }
  0x47   :  { %6598 = vmatpush1.bf16.msra.mxu0 %v9905_v10  ;;  %7446 = vmatpush1.bf16.msra.mxu1 %v9908_v11  ;;  %v9992_v10 = vld [vmem:[%s14789_s1 + $0x3e8] ss:$16 sps:$4 sm:$0xff]   ;;  %v9997_v11 = vld [vmem:[%s14789_s1 + $0x404] ss:$16 sps:$4 sm:$0xff]  }
  0x48   :  { %6599 = vmatprep.subr.bf16.mxu0 %v9913_v12  ;;  %7447 = vmatprep.subr.bf16.mxu1 %v9916_v13  ;;  %v10000_v12 = vld [vmem:[%s14789_s1 + $0x40c] ss:$16 sps:$4 sm:$0xff]   ;;  %v9995_v13 = vld [vmem:[%s14789_s1 + $0x400] ss:$16 sps:$4 sm:$0xff]  }
  0x4a   :  { %6585 = vmatmul.mubr.bf16.gmra.mrb[4].mxu0 %v8490_v31  ;;  %7433 = vmatmul.mubr.bf16.gmra.mrb[4].mxu1 %v8490_v31  ;;  %v10018_v31 = vld [vmem:[%s14789_s1 + $0x46c] ss:$16 sps:$4 sm:$0xff]  }
  0x4b   :  { %6600 = vmatpush1.bf16.msra.mxu0 %v9911_v14  ;;  %7448 = vmatpush1.bf16.msra.mxu1 %v9914_v15  ;;  %v9998_v14 = vld [vmem:[%s14789_s1 + $0x408] ss:$16 sps:$4 sm:$0xff]   ;;  %v8460_v15 = vcombine.low %v11650_v34, %v11655_v35  ;;  %v10021_v35 = vld [vmem:[%s14789_s1 + $0x484] ss:$16 sps:$4 sm:$0xff]  }
  0x4c   :  { %6601 = vmatprep.subr.bf16.mxu0 %v9919_v16  ;;  %7449 = vmatprep.subr.bf16.mxu1 %v9922_v17  ;;  %v47_v16 = vld [vmem:[%s14790_s0 + $0x108] sm:$0xff] }
  0x4d   :  { %6627 = vmatprep.mubr.bf16.mxu0 %v8461_v38  ;;  %7475 = vmatprep.mubr.bf16.mxu1 %v8461_v38  ;;  %v63_v17 = vld [vmem:[%s14790_s0 + $0x188] sm:$0xff] }
  0x4e   :  { %v8492_v26 = vcombine.low %v47_v16, %v63_v17  ;;  %v10016_v34 = vld [vmem:[%s14789_s1 + $0x468] ss:$16 sps:$4 sm:$0xff]  }
  0x4f   :  { %6602 = vmatpush1.bf16.msra.mxu0 %v9917_v18  ;;  %7450 = vmatpush1.bf16.msra.mxu1 %v9920_v19  ;;  %v10003_v18 = vld [vmem:[%s14789_s1 + $0x424] ss:$16 sps:$4 sm:$0xff]   ;;  %v10006_v19 = vld [vmem:[%s14789_s1 + $0x42c] ss:$16 sps:$4 sm:$0xff]   ;;  %v10022_v38 = vld [vmem:[%s14789_s1 + $0x488] ss:$16 sps:$4 sm:$0xff]  }
  0x50   :  { %6603 = vmatprep.subr.bf16.mxu0 %v9925_v20  ;;  %7451 = vmatprep.subr.bf16.mxu1 %v9928_v21  ;;  %v8493_v20 = vcombine.high %v47_v16, %v63_v17  ;;  %v10001_v21 = vld [vmem:[%s14789_s1 + $0x420] ss:$16 sps:$4 sm:$0xff]   ;;  %v10090_v16 = vld [vmem:[%s14789_s1 + $0x5ec] ss:$16 sps:$4 sm:$0xff]  }
  0x51   :  { %v10085_v17 = vld [vmem:[%s14789_s1 + $0x5e0] ss:$16 sps:$4 sm:$0xff]  }
  0x53   :  { %6604 = vmatpush1.bf16.msra.mxu0 %v9923_v22  ;;  %7452 = vmatpush1.bf16.msra.mxu1 %v9926_v23  ;;  %v10004_v22 = vld [vmem:[%s14789_s1 + $0x428] ss:$16 sps:$4 sm:$0xff]   ;;  %v10009_v23 = vld [vmem:[%s14789_s1 + $0x444] ss:$16 sps:$4 sm:$0xff]  }
  0x54   :  { %6605 = vmatprep.subr.bf16.mxu0 %v9931_v24  ;;  %7453 = vmatprep.subr.bf16.mxu1 %v9934_v25  ;;  %v10012_v24 = vld [vmem:[%s14789_s1 + $0x44c] ss:$16 sps:$4 sm:$0xff]   ;;  %v11814_v25 = vld [vmem:[%s14790_s0 + $0x10] sm:$0xff] }
  0x57   :  { %6606 = vmatpush1.bf16.msra.mxu0 %v9929_v29  ;;  %7454 = vmatpush1.bf16.msra.mxu1 %v9932_v30  ;;  %v10010_v29 = vld [vmem:[%s14789_s1 + $0x448] ss:$16 sps:$4 sm:$0xff]   ;;  %v10015_v30 = vld [vmem:[%s14789_s1 + $0x464] ss:$16 sps:$4 sm:$0xff]  }
  0x58   :  { %6607 = vmatprep.subr.bf16.mxu0 %v9937_v32  ;;  %7455 = vmatprep.subr.bf16.mxu1 %v9940_v33  ;;  %v8463_v32 = vcombine.high %v11814_v25, %v11819_v27  ;;  %v10013_v33 = vld [vmem:[%s14789_s1 + $0x460] ss:$16 sps:$4 sm:$0xff]  }
  0x5b   :  { %6608 = vmatpush1.bf16.msra.mxu0 %v9935_v36  ;;  %7456 = vmatpush1.bf16.msra.mxu1 %v9938_v37  ;;  %v10024_v36 = vld [vmem:[%s14789_s1 + $0x48c] ss:$16 sps:$4 sm:$0xff]   ;;  %v10019_v37 = vld [vmem:[%s14789_s1 + $0x480] ss:$16 sps:$4 sm:$0xff]  }
  0x5c   :  { %6609 = vmatprep.subr.bf16.mxu0 %v9943_v39  ;;  %7457 = vmatprep.subr.bf16.mxu1 %v9946_v40  ;;  %v10027_v39 = vld [vmem:[%s14789_s1 + $0x4a4] ss:$16 sps:$4 sm:$0xff]   ;;  %v10030_v40 = vld [vmem:[%s14789_s1 + $0x4ac] ss:$16 sps:$4 sm:$0xff]  }
  0x5f   :  { %6610 = vmatpush1.bf16.msra.mxu0 %v9941_v41  ;;  %7458 = vmatpush1.bf16.msra.mxu1 %v9944_v42  ;;  %v10025_v41 = vld [vmem:[%s14789_s1 + $0x4a0] ss:$16 sps:$4 sm:$0xff]   ;;  %v10028_v42 = vld [vmem:[%s14789_s1 + $0x4a8] ss:$16 sps:$4 sm:$0xff]  }
  0x60   :  { %6611 = vmatprep.subr.bf16.mxu0 %v9949_v43  ;;  %7459 = vmatprep.subr.bf16.mxu1 %v9952_v44  ;;  %v10033_v43 = vld [vmem:[%s14789_s1 + $0x4c4] ss:$16 sps:$4 sm:$0xff]   ;;  %v10036_v44 = vld [vmem:[%s14789_s1 + $0x4cc] ss:$16 sps:$4 sm:$0xff]  }
  0x63   :  { %6612 = vmatpush1.bf16.msra.mxu0 %v9947_v45  ;;  %7460 = vmatpush1.bf16.msra.mxu1 %v9950_v46  ;;  %v10031_v45 = vld [vmem:[%s14789_s1 + $0x4c0] ss:$16 sps:$4 sm:$0xff]   ;;  %v10034_v46 = vld [vmem:[%s14789_s1 + $0x4c8] ss:$16 sps:$4 sm:$0xff]  }
  0x64   :  { %6613 = vmatprep.subr.bf16.mxu0 %v9955_v47  ;;  %7461 = vmatprep.subr.bf16.mxu1 %v9958_v48  ;;  %v10039_v47 = vld [vmem:[%s14789_s1 + $0x4e4] ss:$16 sps:$4 sm:$0xff]   ;;  %v10042_v48 = vld [vmem:[%s14789_s1 + $0x4ec] ss:$16 sps:$4 sm:$0xff]  }
  0x67   :  { %6614 = vmatpush1.bf16.msra.mxu0 %v9953_v49  ;;  %7462 = vmatpush1.bf16.msra.mxu1 %v9956_v50  ;;  %v10037_v49 = vld [vmem:[%s14789_s1 + $0x4e0] ss:$16 sps:$4 sm:$0xff]   ;;  %v10040_v50 = vld [vmem:[%s14789_s1 + $0x4e8] ss:$16 sps:$4 sm:$0xff]  }
  0x68   :  { %6615 = vmatprep.subr.bf16.mxu0 %v9961_v51  ;;  %7463 = vmatprep.subr.bf16.mxu1 %v9964_v52  ;;  %v10045_v51 = vld [vmem:[%s14789_s1 + $0x504] ss:$16 sps:$4 sm:$0xff]   ;;  %v10048_v52 = vld [vmem:[%s14789_s1 + $0x50c] ss:$16 sps:$4 sm:$0xff]  }
  0x6b   :  { %6616 = vmatpush1.bf16.msra.mxu0 %v9959_v53  ;;  %7464 = vmatpush1.bf16.msra.mxu1 %v9962_v54  ;;  %v10043_v53 = vld [vmem:[%s14789_s1 + $0x500] ss:$16 sps:$4 sm:$0xff]   ;;  %v10046_v54 = vld [vmem:[%s14789_s1 + $0x508] ss:$16 sps:$4 sm:$0xff]  }
  0x6c   :  { %6617 = vmatprep.subr.bf16.mxu0 %v9967_v55  ;;  %7465 = vmatprep.subr.bf16.mxu1 %v9970_v56  ;;  %v10051_v55 = vld [vmem:[%s14789_s1 + $0x524] ss:$16 sps:$4 sm:$0xff]   ;;  %v10054_v56 = vld [vmem:[%s14789_s1 + $0x52c] ss:$16 sps:$4 sm:$0xff]  }
  0x6f   :  { %6618 = vmatpush1.bf16.msra.mxu0 %v9965_v57  ;;  %7466 = vmatpush1.bf16.msra.mxu1 %v9968_v58  ;;  %v10049_v57 = vld [vmem:[%s14789_s1 + $0x520] ss:$16 sps:$4 sm:$0xff]   ;;  %v10052_v58 = vld [vmem:[%s14789_s1 + $0x528] ss:$16 sps:$4 sm:$0xff]  }
  0x70   :  { %6619 = vmatprep.subr.bf16.mxu0 %v9973_v59  ;;  %7467 = vmatprep.subr.bf16.mxu1 %v9976_v60  ;;  %v10057_v59 = vld [vmem:[%s14789_s1 + $0x544] ss:$16 sps:$4 sm:$0xff]   ;;  %v10060_v60 = vld [vmem:[%s14789_s1 + $0x54c] ss:$16 sps:$4 sm:$0xff]  }
  0x73   :  { %6620 = vmatpush1.bf16.msra.mxu0 %v9971_v61  ;;  %7468 = vmatpush1.bf16.msra.mxu1 %v9974_v62  ;;  %v10055_v61 = vld [vmem:[%s14789_s1 + $0x540] ss:$16 sps:$4 sm:$0xff]   ;;  %v10058_v62 = vld [vmem:[%s14789_s1 + $0x548] ss:$16 sps:$4 sm:$0xff]  }
  0x74   :  { %6621 = vmatprep.subr.bf16.mxu0 %v9979_v63  ;;  %7469 = vmatprep.subr.bf16.mxu1 %v9982_v0  ;;  %v10063_v63 = vld [vmem:[%s14789_s1 + $0x564] ss:$16 sps:$4 sm:$0xff]   ;;  %v10066_v0 = vld [vmem:[%s14789_s1 + $0x56c] ss:$16 sps:$4 sm:$0xff]  }
  0x77   :  { %6622 = vmatpush1.bf16.msra.mxu0 %v9977_v1  ;;  %7470 = vmatpush1.bf16.msra.mxu1 %v9980_v2  ;;  %v10061_v1 = vld [vmem:[%s14789_s1 + $0x560] ss:$16 sps:$4 sm:$0xff]   ;;  %v10064_v2 = vld [vmem:[%s14789_s1 + $0x568] ss:$16 sps:$4 sm:$0xff]  }
  0x78   :  { %6623 = vmatprep.subr.bf16.mxu0 %v9985_v3  ;;  %7471 = vmatprep.subr.bf16.mxu1 %v9988_v4  ;;  %v10069_v3 = vld [vmem:[%s14789_s1 + $0x584] ss:$16 sps:$4 sm:$0xff]   ;;  %v10072_v4 = vld [vmem:[%s14789_s1 + $0x58c] ss:$16 sps:$4 sm:$0xff]  }
  0x7b   :  { %6624 = vmatpush1.bf16.msra.mxu0 %v9983_v5  ;;  %7472 = vmatpush1.bf16.msra.mxu1 %v9986_v6  ;;  %v10067_v5 = vld [vmem:[%s14789_s1 + $0x580] ss:$16 sps:$4 sm:$0xff]   ;;  %v10070_v6 = vld [vmem:[%s14789_s1 + $0x588] ss:$16 sps:$4 sm:$0xff]  }
  0x7c   :  { %6625 = vmatprep.subr.bf16.mxu0 %v9991_v7  ;;  %7473 = vmatprep.subr.bf16.mxu1 %v9994_v8  ;;  %v10075_v7 = vld [vmem:[%s14789_s1 + $0x5a4] ss:$16 sps:$4 sm:$0xff]   ;;  %v10078_v8 = vld [vmem:[%s14789_s1 + $0x5ac] ss:$16 sps:$4 sm:$0xff]  }
  0x7f   :  { %6626 = vmatpush1.bf16.msra.mxu0 %v9989_v9  ;;  %7474 = vmatpush1.bf16.msra.mxu1 %v9992_v10  ;;  %v10073_v9 = vld [vmem:[%s14789_s1 + $0x5a0] ss:$16 sps:$4 sm:$0xff]   ;;  %v10076_v10 = vld [vmem:[%s14789_s1 + $0x5a8] ss:$16 sps:$4 sm:$0xff]  }
  0x80   :  { %6648 = vmatprep.subr.bf16.mxu0 %v9997_v11  ;;  %7496 = vmatprep.subr.bf16.mxu1 %v10000_v12  ;;  %v10081_v11 = vld [vmem:[%s14789_s1 + $0x5c4] ss:$16 sps:$4 sm:$0xff]   ;;  %v10084_v12 = vld [vmem:[%s14789_s1 + $0x5cc] ss:$16 sps:$4 sm:$0xff]  }
  0x82   :  { %6628 = vmatmul.mubr.bf16.vlgmr.msra.gmra.mrb[0].mxu0 %v8460_v15  ;;  %7476 = vmatmul.mubr.bf16.vlgmr.msra.gmra.mrb[0].mxu1 %v8460_v15  ;;  %v10087_v15 = vld [vmem:[%s14789_s1 + $0x5e4] ss:$16 sps:$4 sm:$0xff]  }
  0x83   :  { %6649 = vmatpush1.bf16.msra.mxu0 %v9995_v13  ;;  %7497 = vmatpush1.bf16.msra.mxu1 %v9998_v14  ;;  %v10079_v13 = vld [vmem:[%s14789_s1 + $0x5c0] ss:$16 sps:$4 sm:$0xff]   ;;  %v10082_v14 = vld [vmem:[%s14789_s1 + $0x5c8] ss:$16 sps:$4 sm:$0xff]  }
  0x84   :  { %6650 = vmatprep.subr.bf16.mxu0 %v10003_v18  ;;  %7498 = vmatprep.subr.bf16.mxu1 %v10006_v19  ;;  %v10088_v18 = vld [vmem:[%s14789_s1 + $0x5e8] ss:$16 sps:$4 sm:$0xff]   ;;  %v10093_v19 = vld [vmem:[%s14789_s1 + $0x604] ss:$16 sps:$4 sm:$0xff]  }
  0x85   :  { %6637 = vmatprep.mubr.bf16.mxu0 %v8493_v20  ;;  %7485 = vmatprep.mubr.bf16.mxu1 %v8493_v20  ;;  %v10096_v20 = vld [vmem:[%s14789_s1 + $0x60c] ss:$16 sps:$4 sm:$0xff]  }
  0x87   :  { %6651 = vmatpush1.bf16.msra.mxu0 %v10001_v21  ;;  %7499 = vmatpush1.bf16.msra.mxu1 %v10004_v22  ;;  %v48_v21 = vld [vmem:[%s14790_s0 + $0x110] sm:$0xff]  ;;  %v8462_v22 = vcombine.low %v11814_v25, %v11819_v27  ;;  %v10102_v27 = vld [vmem:[%s14789_s1 + $0x62c] ss:$16 sps:$4 sm:$0xff]  }
  0x88   :  { %6652 = vmatprep.subr.bf16.mxu0 %v10009_v23  ;;  %7500 = vmatprep.subr.bf16.mxu1 %v10012_v24  ;;  %v64_v23 = vld [vmem:[%s14790_s0 + $0x190] sm:$0xff] }
  0x89   :  { %v10091_v24 = vld [vmem:[%s14789_s1 + $0x600] ss:$16 sps:$4 sm:$0xff]   ;;  %v10099_v25 = vld [vmem:[%s14789_s1 + $0x624] ss:$16 sps:$4 sm:$0xff]  }
  0x8a   :  { %6638 = vmatmul.mubr.bf16.gmra.mrb[4].mxu0 %v8492_v26  ;;  %7486 = vmatmul.mubr.bf16.gmra.mrb[4].mxu1 %v8492_v26  ;;  %v10094_v26 = vld [vmem:[%s14789_s1 + $0x608] ss:$16 sps:$4 sm:$0xff]  }
  0x8b   :  { %6653 = vmatpush1.bf16.msra.mxu0 %v10007_v28  ;;  %7501 = vmatpush1.bf16.msra.mxu1 %v10010_v29  ;;  %v8495_v28 = vcombine.high %v48_v21, %v64_v23  ;;  %v10097_v29 = vld [vmem:[%s14789_s1 + $0x620] ss:$16 sps:$4 sm:$0xff]  }
  0x8c   :  { %6654 = vmatprep.subr.bf16.mxu0 %v10015_v30  ;;  %7502 = vmatprep.subr.bf16.mxu1 %v10018_v31  ;;  %v10100_v30 = vld [vmem:[%s14789_s1 + $0x628] ss:$16 sps:$4 sm:$0xff]   ;;  %v10105_v31 = vld [vmem:[%s14789_s1 + $0x644] ss:$16 sps:$4 sm:$0xff]  }
  0x8d   :  { %6680 = vmatprep.mubr.bf16.mxu0 %v8463_v32  ;;  %7528 = vmatprep.mubr.bf16.mxu1 %v8463_v32  ;;  %v10108_v32 = vld [vmem:[%s14789_s1 + $0x64c] ss:$16 sps:$4 sm:$0xff]  }
  0x8f   :  { %6655 = vmatpush1.bf16.msra.mxu0 %v10013_v33  ;;  %7503 = vmatpush1.bf16.msra.mxu1 %v10016_v34  ;;  %v12026_v33 = vld [vmem:[%s14790_s0 + $0x18] sm:$0xff]  ;;  %v8494_v34 = vcombine.low %v48_v21, %v64_v23  ;;  %v10175_v21 = vld [vmem:[%s14789_s1 + $0x7c0] ss:$16 sps:$4 sm:$0xff]   ;;  %v10183_v23 = vld [vmem:[%s14789_s1 + $0x7e4] ss:$16 sps:$4 sm:$0xff]  }
  0x90   :  { %6656 = vmatprep.subr.bf16.mxu0 %v10021_v35  ;;  %7504 = vmatprep.subr.bf16.mxu1 %v10024_v36  ;;  %v12031_v35 = vld [vmem:[%s14790_s0 + $0x98] sm:$0xff]  ;;  %v10103_v36 = vld [vmem:[%s14789_s1 + $0x640] ss:$16 sps:$4 sm:$0xff]  }
  0x93   :  { %6657 = vmatpush1.bf16.msra.mxu0 %v10019_v37  ;;  %7505 = vmatpush1.bf16.msra.mxu1 %v10022_v38  ;;  %v10106_v37 = vld [vmem:[%s14789_s1 + $0x648] ss:$16 sps:$4 sm:$0xff]   ;;  %v10111_v38 = vld [vmem:[%s14789_s1 + $0x664] ss:$16 sps:$4 sm:$0xff]  }
  0x94   :  { %6658 = vmatprep.subr.bf16.mxu0 %v10027_v39  ;;  %7506 = vmatprep.subr.bf16.mxu1 %v10030_v40  ;;  %v10114_v39 = vld [vmem:[%s14789_s1 + $0x66c] ss:$16 sps:$4 sm:$0xff]   ;;  %v8465_v40 = vcombine.high %v12026_v33, %v12031_v35 }
  0x97   :  { %6659 = vmatpush1.bf16.msra.mxu0 %v10025_v41  ;;  %7507 = vmatpush1.bf16.msra.mxu1 %v10028_v42  ;;  %v10109_v41 = vld [vmem:[%s14789_s1 + $0x660] ss:$16 sps:$4 sm:$0xff]   ;;  %v10112_v42 = vld [vmem:[%s14789_s1 + $0x668] ss:$16 sps:$4 sm:$0xff]  }
  0x98   :  { %6660 = vmatprep.subr.bf16.mxu0 %v10033_v43  ;;  %7508 = vmatprep.subr.bf16.mxu1 %v10036_v44  ;;  %v10117_v43 = vld [vmem:[%s14789_s1 + $0x684] ss:$16 sps:$4 sm:$0xff]   ;;  %v10120_v44 = vld [vmem:[%s14789_s1 + $0x68c] ss:$16 sps:$4 sm:$0xff]  }
  0x9b   :  { %6661 = vmatpush1.bf16.msra.mxu0 %v10031_v45  ;;  %7509 = vmatpush1.bf16.msra.mxu1 %v10034_v46  ;;  %v10115_v45 = vld [vmem:[%s14789_s1 + $0x680] ss:$16 sps:$4 sm:$0xff]   ;;  %v10118_v46 = vld [vmem:[%s14789_s1 + $0x688] ss:$16 sps:$4 sm:$0xff]  }
  0x9c   :  { %6662 = vmatprep.subr.bf16.mxu0 %v10039_v47  ;;  %7510 = vmatprep.subr.bf16.mxu1 %v10042_v48  ;;  %v10123_v47 = vld [vmem:[%s14789_s1 + $0x6a4] ss:$16 sps:$4 sm:$0xff]   ;;  %v10126_v48 = vld [vmem:[%s14789_s1 + $0x6ac] ss:$16 sps:$4 sm:$0xff]  }
  0x9f   :  { %6663 = vmatpush1.bf16.msra.mxu0 %v10037_v49  ;;  %7511 = vmatpush1.bf16.msra.mxu1 %v10040_v50  ;;  %v10121_v49 = vld [vmem:[%s14789_s1 + $0x6a0] ss:$16 sps:$4 sm:$0xff]   ;;  %v10124_v50 = vld [vmem:[%s14789_s1 + $0x6a8] ss:$16 sps:$4 sm:$0xff]  }
  0xa0   :  { %6664 = vmatprep.subr.bf16.mxu0 %v10045_v51  ;;  %7512 = vmatprep.subr.bf16.mxu1 %v10048_v52  ;;  %v10129_v51 = vld [vmem:[%s14789_s1 + $0x6c4] ss:$16 sps:$4 sm:$0xff]   ;;  %v10132_v52 = vld [vmem:[%s14789_s1 + $0x6cc] ss:$16 sps:$4 sm:$0xff]  }
  0xa3   :  { %6665 = vmatpush1.bf16.msra.mxu0 %v10043_v53  ;;  %7513 = vmatpush1.bf16.msra.mxu1 %v10046_v54  ;;  %v10127_v53 = vld [vmem:[%s14789_s1 + $0x6c0] ss:$16 sps:$4 sm:$0xff]   ;;  %v10130_v54 = vld [vmem:[%s14789_s1 + $0x6c8] ss:$16 sps:$4 sm:$0xff]  }
  0xa4   :  { %6666 = vmatprep.subr.bf16.mxu0 %v10051_v55  ;;  %7514 = vmatprep.subr.bf16.mxu1 %v10054_v56  ;;  %v10135_v55 = vld [vmem:[%s14789_s1 + $0x6e4] ss:$16 sps:$4 sm:$0xff]   ;;  %v10138_v56 = vld [vmem:[%s14789_s1 + $0x6ec] ss:$16 sps:$4 sm:$0xff]  }
  0xa7   :  { %6667 = vmatpush1.bf16.msra.mxu0 %v10049_v57  ;;  %7515 = vmatpush1.bf16.msra.mxu1 %v10052_v58  ;;  %v10133_v57 = vld [vmem:[%s14789_s1 + $0x6e0] ss:$16 sps:$4 sm:$0xff]   ;;  %v10136_v58 = vld [vmem:[%s14789_s1 + $0x6e8] ss:$16 sps:$4 sm:$0xff]  }
  0xa8   :  { %6668 = vmatprep.subr.bf16.mxu0 %v10057_v59  ;;  %7516 = vmatprep.subr.bf16.mxu1 %v10060_v60  ;;  %v10141_v59 = vld [vmem:[%s14789_s1 + $0x704] ss:$16 sps:$4 sm:$0xff]   ;;  %v10144_v60 = vld [vmem:[%s14789_s1 + $0x70c] ss:$16 sps:$4 sm:$0xff]  }
  0xab   :  { %6669 = vmatpush1.bf16.msra.mxu0 %v10055_v61  ;;  %7517 = vmatpush1.bf16.msra.mxu1 %v10058_v62  ;;  %v10139_v61 = vld [vmem:[%s14789_s1 + $0x700] ss:$16 sps:$4 sm:$0xff]   ;;  %v10142_v62 = vld [vmem:[%s14789_s1 + $0x708] ss:$16 sps:$4 sm:$0xff]  }
  0xac   :  { %6670 = vmatprep.subr.bf16.mxu0 %v10063_v63  ;;  %7518 = vmatprep.subr.bf16.mxu1 %v10066_v0  ;;  %v10147_v63 = vld [vmem:[%s14789_s1 + $0x724] ss:$16 sps:$4 sm:$0xff]   ;;  %v10150_v0 = vld [vmem:[%s14789_s1 + $0x72c] ss:$16 sps:$4 sm:$0xff]  }
  0xaf   :  { %6671 = vmatpush1.bf16.msra.mxu0 %v10061_v1  ;;  %7519 = vmatpush1.bf16.msra.mxu1 %v10064_v2  ;;  %v10145_v1 = vld [vmem:[%s14789_s1 + $0x720] ss:$16 sps:$4 sm:$0xff]   ;;  %v10148_v2 = vld [vmem:[%s14789_s1 + $0x728] ss:$16 sps:$4 sm:$0xff]  }
  0xb0   :  { %6672 = vmatprep.subr.bf16.mxu0 %v10069_v3  ;;  %7520 = vmatprep.subr.bf16.mxu1 %v10072_v4  ;;  %v10153_v3 = vld [vmem:[%s14789_s1 + $0x744] ss:$16 sps:$4 sm:$0xff]   ;;  %v10156_v4 = vld [vmem:[%s14789_s1 + $0x74c] ss:$16 sps:$4 sm:$0xff]  }
  0xb3   :  { %6673 = vmatpush1.bf16.msra.mxu0 %v10067_v5  ;;  %7521 = vmatpush1.bf16.msra.mxu1 %v10070_v6  ;;  %v10151_v5 = vld [vmem:[%s14789_s1 + $0x740] ss:$16 sps:$4 sm:$0xff]   ;;  %v10154_v6 = vld [vmem:[%s14789_s1 + $0x748] ss:$16 sps:$4 sm:$0xff]  }
  0xb4   :  { %6674 = vmatprep.subr.bf16.mxu0 %v10075_v7  ;;  %7522 = vmatprep.subr.bf16.mxu1 %v10078_v8  ;;  %v10159_v7 = vld [vmem:[%s14789_s1 + $0x764] ss:$16 sps:$4 sm:$0xff]   ;;  %v10162_v8 = vld [vmem:[%s14789_s1 + $0x76c] ss:$16 sps:$4 sm:$0xff]  }
  0xb7   :  { %6675 = vmatpush1.bf16.msra.mxu0 %v10073_v9  ;;  %7523 = vmatpush1.bf16.msra.mxu1 %v10076_v10  ;;  %v10157_v9 = vld [vmem:[%s14789_s1 + $0x760] ss:$16 sps:$4 sm:$0xff]   ;;  %v10160_v10 = vld [vmem:[%s14789_s1 + $0x768] ss:$16 sps:$4 sm:$0xff]  }
  0xb8   :  { %6676 = vmatprep.subr.bf16.mxu0 %v10081_v11  ;;  %7524 = vmatprep.subr.bf16.mxu1 %v10084_v12  ;;  %v10165_v11 = vld [vmem:[%s14789_s1 + $0x784] ss:$16 sps:$4 sm:$0xff]   ;;  %v10168_v12 = vld [vmem:[%s14789_s1 + $0x78c] ss:$16 sps:$4 sm:$0xff]  }
  0xbb   :  { %6677 = vmatpush1.bf16.msra.mxu0 %v10079_v13  ;;  %7525 = vmatpush1.bf16.msra.mxu1 %v10082_v14  ;;  %v10163_v13 = vld [vmem:[%s14789_s1 + $0x780] ss:$16 sps:$4 sm:$0xff]   ;;  %v10166_v14 = vld [vmem:[%s14789_s1 + $0x788] ss:$16 sps:$4 sm:$0xff]  }
  0xbc   :  { %6678 = vmatprep.subr.bf16.mxu0 %v10087_v15  ;;  %7526 = vmatprep.subr.bf16.mxu1 %v10090_v16  ;;  %v10171_v15 = vld [vmem:[%s14789_s1 + $0x7a4] ss:$16 sps:$4 sm:$0xff]   ;;  %v10174_v16 = vld [vmem:[%s14789_s1 + $0x7ac] ss:$16 sps:$4 sm:$0xff]  }
  0xbf   :  { %6679 = vmatpush1.bf16.msra.mxu0 %v10085_v17  ;;  %7527 = vmatpush1.bf16.msra.mxu1 %v10088_v18  ;;  %v10169_v17 = vld [vmem:[%s14789_s1 + $0x7a0] ss:$16 sps:$4 sm:$0xff]   ;;  %v10172_v18 = vld [vmem:[%s14789_s1 + $0x7a8] ss:$16 sps:$4 sm:$0xff]  }
  0xc0   :  { %6701 = vmatprep.subr.bf16.mxu0 %v10093_v19  ;;  %7549 = vmatprep.subr.bf16.mxu1 %v10096_v20  ;;  %v10177_v19 = vld [vmem:[%s14789_s1 + $0x7c4] ss:$16 sps:$4 sm:$0xff]   ;;  %v10180_v20 = vld [vmem:[%s14789_s1 + $0x7cc] ss:$16 sps:$4 sm:$0xff]  }
  0xc2   :  { %6681 = vmatmul.mubr.bf16.vlgmr.msra.gmra.mrb[0].mxu0 %v8462_v22  ;;  %7529 = vmatmul.mubr.bf16.vlgmr.msra.gmra.mrb[0].mxu1 %v8462_v22  ;;  %v10178_v22 = vld [vmem:[%s14789_s1 + $0x7c8] ss:$16 sps:$4 sm:$0xff]  }
  0xc3   :  { %6702 = vmatpush1.bf16.msra.mxu0 %v10091_v24  ;;  %7550 = vmatpush1.bf16.msra.mxu1 %v10094_v26  ;;  %v10186_v24 = vld [vmem:[%s14789_s1 + $0x7ec] ss:$16 sps:$4 sm:$0xff]   ;;  %v10181_v26 = vld [vmem:[%s14789_s1 + $0x7e0] ss:$16 sps:$4 sm:$0xff]  }
  0xc4   :  { %6703 = vmatprep.subr.bf16.mxu0 %v10099_v25  ;;  %7551 = vmatprep.subr.bf16.mxu1 %v10102_v27  ;;  %v10184_v25 = vld [vmem:[%s14789_s1 + $0x7e8] ss:$16 sps:$4 sm:$0xff]   ;;  %v10189_v27 = vld [vmem:[%s14789_s1 + $0x804] ss:$16 sps:$4 sm:$0xff]  }
  0xc5   :  { %6690 = vmatprep.mubr.bf16.mxu0 %v8495_v28  ;;  %7538 = vmatprep.mubr.bf16.mxu1 %v8495_v28  ;;  %v10192_v28 = vld [vmem:[%s14789_s1 + $0x80c] ss:$16 sps:$4 sm:$0xff]  }
  0xc7   :  { %6704 = vmatpush1.bf16.msra.mxu0 %v10097_v29  ;;  %7552 = vmatpush1.bf16.msra.mxu1 %v10100_v30  ;;  %v49_v29 = vld [vmem:[%s14790_s0 + $0x118] sm:$0xff]  ;;  %v8464_v30 = vcombine.low %v12026_v33, %v12031_v35 }
  0xc8   :  { %6705 = vmatprep.subr.bf16.mxu0 %v10105_v31  ;;  %7553 = vmatprep.subr.bf16.mxu1 %v10108_v32  ;;  %v65_v31 = vld [vmem:[%s14790_s0 + $0x198] sm:$0xff]  ;;  %v10187_v32 = vld [vmem:[%s14789_s1 + $0x800] ss:$16 sps:$4 sm:$0xff]  }
  0xc9   :  { %v10198_v33 = vld [vmem:[%s14789_s1 + $0x82c] ss:$16 sps:$4 sm:$0xff]   ;;  %v8497_v35 = vcombine.high %v49_v29, %v65_v31 }
  0xca   :  { %6691 = vmatmul.mubr.bf16.gmra.mrb[4].mxu0 %v8494_v34  ;;  %7539 = vmatmul.mubr.bf16.gmra.mrb[4].mxu1 %v8494_v34  ;;  %v10190_v34 = vld [vmem:[%s14789_s1 + $0x808] ss:$16 sps:$4 sm:$0xff]  }
  0xcb   :  { %6706 = vmatpush1.bf16.msra.mxu0 %v10103_v36  ;;  %7554 = vmatpush1.bf16.msra.mxu1 %v10106_v37  ;;  %v10195_v36 = vld [vmem:[%s14789_s1 + $0x824] ss:$16 sps:$4 sm:$0xff]   ;;  %v10193_v37 = vld [vmem:[%s14789_s1 + $0x820] ss:$16 sps:$4 sm:$0xff]  }
  0xcc   :  { %6707 = vmatprep.subr.bf16.mxu0 %v10111_v38  ;;  %7555 = vmatprep.subr.bf16.mxu1 %v10114_v39  ;;  %v10196_v38 = vld [vmem:[%s14789_s1 + $0x828] ss:$16 sps:$4 sm:$0xff]   ;;  %v10201_v39 = vld [vmem:[%s14789_s1 + $0x844] ss:$16 sps:$4 sm:$0xff]  }
  0xcd   :  { %6733 = vmatprep.mubr.bf16.mxu0 %v8465_v40  ;;  %7581 = vmatprep.mubr.bf16.mxu1 %v8465_v40  ;;  %v10204_v40 = vld [vmem:[%s14789_s1 + $0x84c] ss:$16 sps:$4 sm:$0xff]  }
  0xcf   :  { %6708 = vmatpush1.bf16.msra.mxu0 %v10109_v41  ;;  %7556 = vmatpush1.bf16.msra.mxu1 %v10112_v42  ;;  %v12238_v41 = vld [vmem:[%s14790_s0 + $0x20] sm:$0xff]  ;;  %v8496_v42 = vcombine.low %v49_v29, %v65_v31 }
  0xd0   :  { %6709 = vmatprep.subr.bf16.mxu0 %v10117_v43  ;;  %7557 = vmatprep.subr.bf16.mxu1 %v10120_v44  ;;  %v12243_v43 = vld [vmem:[%s14790_s0 + $0xa0] sm:$0xff] }
  0xd1   :  { %v10199_v44 = vld [vmem:[%s14789_s1 + $0x840] ss:$16 sps:$4 sm:$0xff]   ;;  %v10279_v31 = vld [vmem:[%s14789_s1 + $0x9e4] ss:$16 sps:$4 sm:$0xff]  }
  0xd2   :  { %v10271_v29 = vld [vmem:[%s14789_s1 + $0x9c0] ss:$16 sps:$4 sm:$0xff]  }
  0xd3   :  { %6710 = vmatpush1.bf16.msra.mxu0 %v10115_v45  ;;  %7558 = vmatpush1.bf16.msra.mxu1 %v10118_v46  ;;  %v10202_v45 = vld [vmem:[%s14789_s1 + $0x848] ss:$16 sps:$4 sm:$0xff]   ;;  %v10207_v46 = vld [vmem:[%s14789_s1 + $0x864] ss:$16 sps:$4 sm:$0xff]  }
  0xd4   :  { %6711 = vmatprep.subr.bf16.mxu0 %v10123_v47  ;;  %7559 = vmatprep.subr.bf16.mxu1 %v10126_v48  ;;  %v10210_v47 = vld [vmem:[%s14789_s1 + $0x86c] ss:$16 sps:$4 sm:$0xff]   ;;  %v8467_v48 = vcombine.high %v12238_v41, %v12243_v43 }
  0xd7   :  { %6712 = vmatpush1.bf16.msra.mxu0 %v10121_v49  ;;  %7560 = vmatpush1.bf16.msra.mxu1 %v10124_v50  ;;  %v10205_v49 = vld [vmem:[%s14789_s1 + $0x860] ss:$16 sps:$4 sm:$0xff]   ;;  %v10208_v50 = vld [vmem:[%s14789_s1 + $0x868] ss:$16 sps:$4 sm:$0xff]  }
  0xd8   :  { %6713 = vmatprep.subr.bf16.mxu0 %v10129_v51  ;;  %7561 = vmatprep.subr.bf16.mxu1 %v10132_v52  ;;  %v10213_v51 = vld [vmem:[%s14789_s1 + $0x884] ss:$16 sps:$4 sm:$0xff]   ;;  %v10216_v52 = vld [vmem:[%s14789_s1 + $0x88c] ss:$16 sps:$4 sm:$0xff]  }
  0xdb   :  { %6714 = vmatpush1.bf16.msra.mxu0 %v10127_v53  ;;  %7562 = vmatpush1.bf16.msra.mxu1 %v10130_v54  ;;  %v10211_v53 = vld [vmem:[%s14789_s1 + $0x880] ss:$16 sps:$4 sm:$0xff]   ;;  %v10214_v54 = vld [vmem:[%s14789_s1 + $0x888] ss:$16 sps:$4 sm:$0xff]  }
  0xdc   :  { %6715 = vmatprep.subr.bf16.mxu0 %v10135_v55  ;;  %7563 = vmatprep.subr.bf16.mxu1 %v10138_v56  ;;  %v10219_v55 = vld [vmem:[%s14789_s1 + $0x8a4] ss:$16 sps:$4 sm:$0xff]   ;;  %v10222_v56 = vld [vmem:[%s14789_s1 + $0x8ac] ss:$16 sps:$4 sm:$0xff]  }
  0xdf   :  { %6716 = vmatpush1.bf16.msra.mxu0 %v10133_v57  ;;  %7564 = vmatpush1.bf16.msra.mxu1 %v10136_v58  ;;  %v10217_v57 = vld [vmem:[%s14789_s1 + $0x8a0] ss:$16 sps:$4 sm:$0xff]   ;;  %v10220_v58 = vld [vmem:[%s14789_s1 + $0x8a8] ss:$16 sps:$4 sm:$0xff]  }
  0xe0   :  { %6717 = vmatprep.subr.bf16.mxu0 %v10141_v59  ;;  %7565 = vmatprep.subr.bf16.mxu1 %v10144_v60  ;;  %v10225_v59 = vld [vmem:[%s14789_s1 + $0x8c4] ss:$16 sps:$4 sm:$0xff]   ;;  %v10228_v60 = vld [vmem:[%s14789_s1 + $0x8cc] ss:$16 sps:$4 sm:$0xff]  }
  0xe3   :  { %6718 = vmatpush1.bf16.msra.mxu0 %v10139_v61  ;;  %7566 = vmatpush1.bf16.msra.mxu1 %v10142_v62  ;;  %v10223_v61 = vld [vmem:[%s14789_s1 + $0x8c0] ss:$16 sps:$4 sm:$0xff]   ;;  %v10226_v62 = vld [vmem:[%s14789_s1 + $0x8c8] ss:$16 sps:$4 sm:$0xff]  }
  0xe4   :  { %6719 = vmatprep.subr.bf16.mxu0 %v10147_v63  ;;  %7567 = vmatprep.subr.bf16.mxu1 %v10150_v0  ;;  %v10231_v63 = vld [vmem:[%s14789_s1 + $0x8e4] ss:$16 sps:$4 sm:$0xff]   ;;  %v10234_v0 = vld [vmem:[%s14789_s1 + $0x8ec] ss:$16 sps:$4 sm:$0xff]  }
  0xe7   :  { %6720 = vmatpush1.bf16.msra.mxu0 %v10145_v1  ;;  %7568 = vmatpush1.bf16.msra.mxu1 %v10148_v2  ;;  %v10229_v1 = vld [vmem:[%s14789_s1 + $0x8e0] ss:$16 sps:$4 sm:$0xff]   ;;  %v10232_v2 = vld [vmem:[%s14789_s1 + $0x8e8] ss:$16 sps:$4 sm:$0xff]  }
  0xe8   :  { %6721 = vmatprep.subr.bf16.mxu0 %v10153_v3  ;;  %7569 = vmatprep.subr.bf16.mxu1 %v10156_v4  ;;  %v10237_v3 = vld [vmem:[%s14789_s1 + $0x904] ss:$16 sps:$4 sm:$0xff]   ;;  %v10240_v4 = vld [vmem:[%s14789_s1 + $0x90c] ss:$16 sps:$4 sm:$0xff]  }
  0xeb   :  { %6722 = vmatpush1.bf16.msra.mxu0 %v10151_v5  ;;  %7570 = vmatpush1.bf16.msra.mxu1 %v10154_v6  ;;  %v10235_v5 = vld [vmem:[%s14789_s1 + $0x900] ss:$16 sps:$4 sm:$0xff]   ;;  %v10238_v6 = vld [vmem:[%s14789_s1 + $0x908] ss:$16 sps:$4 sm:$0xff]  }
  0xec   :  { %6723 = vmatprep.subr.bf16.mxu0 %v10159_v7  ;;  %7571 = vmatprep.subr.bf16.mxu1 %v10162_v8  ;;  %v10243_v7 = vld [vmem:[%s14789_s1 + $0x924] ss:$16 sps:$4 sm:$0xff]   ;;  %v10246_v8 = vld [vmem:[%s14789_s1 + $0x92c] ss:$16 sps:$4 sm:$0xff]  }
  0xef   :  { %6724 = vmatpush1.bf16.msra.mxu0 %v10157_v9  ;;  %7572 = vmatpush1.bf16.msra.mxu1 %v10160_v10  ;;  %v10241_v9 = vld [vmem:[%s14789_s1 + $0x920] ss:$16 sps:$4 sm:$0xff]   ;;  %v10244_v10 = vld [vmem:[%s14789_s1 + $0x928] ss:$16 sps:$4 sm:$0xff]  }
  0xf0   :  { %6725 = vmatprep.subr.bf16.mxu0 %v10165_v11  ;;  %7573 = vmatprep.subr.bf16.mxu1 %v10168_v12  ;;  %v10249_v11 = vld [vmem:[%s14789_s1 + $0x944] ss:$16 sps:$4 sm:$0xff]   ;;  %v10252_v12 = vld [vmem:[%s14789_s1 + $0x94c] ss:$16 sps:$4 sm:$0xff]  }
  0xf3   :  { %6726 = vmatpush1.bf16.msra.mxu0 %v10163_v13  ;;  %7574 = vmatpush1.bf16.msra.mxu1 %v10166_v14  ;;  %v10247_v13 = vld [vmem:[%s14789_s1 + $0x940] ss:$16 sps:$4 sm:$0xff]   ;;  %v10250_v14 = vld [vmem:[%s14789_s1 + $0x948] ss:$16 sps:$4 sm:$0xff]  }
  0xf4   :  { %6727 = vmatprep.subr.bf16.mxu0 %v10171_v15  ;;  %7575 = vmatprep.subr.bf16.mxu1 %v10174_v16  ;;  %v10255_v15 = vld [vmem:[%s14789_s1 + $0x964] ss:$16 sps:$4 sm:$0xff]   ;;  %v10258_v16 = vld [vmem:[%s14789_s1 + $0x96c] ss:$16 sps:$4 sm:$0xff]  }
  0xf7   :  { %6728 = vmatpush1.bf16.msra.mxu0 %v10169_v17  ;;  %7576 = vmatpush1.bf16.msra.mxu1 %v10172_v18  ;;  %v10253_v17 = vld [vmem:[%s14789_s1 + $0x960] ss:$16 sps:$4 sm:$0xff]   ;;  %v10256_v18 = vld [vmem:[%s14789_s1 + $0x968] ss:$16 sps:$4 sm:$0xff]  }
  0xf8   :  { %6729 = vmatprep.subr.bf16.mxu0 %v10177_v19  ;;  %7577 = vmatprep.subr.bf16.mxu1 %v10180_v20  ;;  %v10261_v19 = vld [vmem:[%s14789_s1 + $0x984] ss:$16 sps:$4 sm:$0xff]   ;;  %v10264_v20 = vld [vmem:[%s14789_s1 + $0x98c] ss:$16 sps:$4 sm:$0xff]  }
  0xfb   :  { %6730 = vmatpush1.bf16.msra.mxu0 %v10175_v21  ;;  %7578 = vmatpush1.bf16.msra.mxu1 %v10178_v22  ;;  %v10259_v21 = vld [vmem:[%s14789_s1 + $0x980] ss:$16 sps:$4 sm:$0xff]   ;;  %v10262_v22 = vld [vmem:[%s14789_s1 + $0x988] ss:$16 sps:$4 sm:$0xff]  }
  0xfc   :  { %6731 = vmatprep.subr.bf16.mxu0 %v10183_v23  ;;  %7579 = vmatprep.subr.bf16.mxu1 %v10186_v24  ;;  %v10267_v23 = vld [vmem:[%s14789_s1 + $0x9a4] ss:$16 sps:$4 sm:$0xff]   ;;  %v10270_v24 = vld [vmem:[%s14789_s1 + $0x9ac] ss:$16 sps:$4 sm:$0xff]  }
  0xff   :  { %6732 = vmatpush1.bf16.msra.mxu0 %v10181_v26  ;;  %7580 = vmatpush1.bf16.msra.mxu1 %v10184_v25  ;;  %v10265_v26 = vld [vmem:[%s14789_s1 + $0x9a0] ss:$16 sps:$4 sm:$0xff]   ;;  %v10268_v25 = vld [vmem:[%s14789_s1 + $0x9a8] ss:$16 sps:$4 sm:$0xff]  }
 0x100   :  { %6754 = vmatprep.subr.bf16.mxu0 %v10189_v27  ;;  %7602 = vmatprep.subr.bf16.mxu1 %v10192_v28  ;;  %v10273_v27 = vld [vmem:[%s14789_s1 + $0x9c4] ss:$16 sps:$4 sm:$0xff]   ;;  %v10276_v28 = vld [vmem:[%s14789_s1 + $0x9cc] ss:$16 sps:$4 sm:$0xff]  }
 0x102   :  { %6734 = vmatmul.mubr.bf16.vlgmr.msra.gmra.mrb[0].mxu0 %v8464_v30  ;;  %7582 = vmatmul.mubr.bf16.vlgmr.msra.gmra.mrb[0].mxu1 %v8464_v30  ;;  %v10274_v30 = vld [vmem:[%s14789_s1 + $0x9c8] ss:$16 sps:$4 sm:$0xff]  }
 0x103   :  { %6755 = vmatpush1.bf16.msra.mxu0 %v10187_v32  ;;  %7603 = vmatpush1.bf16.msra.mxu1 %v10190_v34  ;;  %v10282_v32 = vld [vmem:[%s14789_s1 + $0x9ec] ss:$16 sps:$4 sm:$0xff]   ;;  %v10277_v34 = vld [vmem:[%s14789_s1 + $0x9e0] ss:$16 sps:$4 sm:$0xff]  }
 0x104   :  { %6756 = vmatprep.subr.bf16.mxu0 %v10195_v36  ;;  %7604 = vmatprep.subr.bf16.mxu1 %v10198_v33  ;;  %v10280_v36 = vld [vmem:[%s14789_s1 + $0x9e8] ss:$16 sps:$4 sm:$0xff]   ;;  %v10285_v33 = vld [vmem:[%s14789_s1 + $0xa04] ss:$16 sps:$4 sm:$0xff]  }
 0x105   :  { %6743 = vmatprep.mubr.bf16.mxu0 %v8497_v35  ;;  %7591 = vmatprep.mubr.bf16.mxu1 %v8497_v35  ;;  %v10288_v35 = vld [vmem:[%s14789_s1 + $0xa0c] ss:$16 sps:$4 sm:$0xff]  }
 0x107   :  { %6757 = vmatpush1.bf16.msra.mxu0 %v10193_v37  ;;  %7605 = vmatpush1.bf16.msra.mxu1 %v10196_v38  ;;  %v50_v37 = vld [vmem:[%s14790_s0 + $0x120] sm:$0xff] }
 0x108   :  { %6758 = vmatprep.subr.bf16.mxu0 %v10201_v39  ;;  %7606 = vmatprep.subr.bf16.mxu1 %v10204_v40  ;;  %v66_v38 = vld [vmem:[%s14790_s0 + $0x1a0] sm:$0xff]  ;;  %v8466_v39 = vcombine.low %v12238_v41, %v12243_v43  ;;  %v10294_v41 = vld [vmem:[%s14789_s1 + $0xa2c] ss:$16 sps:$4 sm:$0xff]  }
 0x109   :  { %v10283_v40 = vld [vmem:[%s14789_s1 + $0xa00] ss:$16 sps:$4 sm:$0xff]  }
 0x10a   :  { %6744 = vmatmul.mubr.bf16.gmra.mrb[4].mxu0 %v8496_v42  ;;  %7592 = vmatmul.mubr.bf16.gmra.mrb[4].mxu1 %v8496_v42  ;;  %v10286_v42 = vld [vmem:[%s14789_s1 + $0xa08] ss:$16 sps:$4 sm:$0xff]   ;;  %v10289_v43 = vld [vmem:[%s14789_s1 + $0xa20] ss:$16 sps:$4 sm:$0xff]  }
 0x10b   :  { %6759 = vmatpush1.bf16.msra.mxu0 %v10199_v44  ;;  %7607 = vmatpush1.bf16.msra.mxu1 %v10202_v45  ;;  %v10291_v44 = vld [vmem:[%s14789_s1 + $0xa24] ss:$16 sps:$4 sm:$0xff]   ;;  %v10292_v45 = vld [vmem:[%s14789_s1 + $0xa28] ss:$16 sps:$4 sm:$0xff]  }
 0x10c   :  { %6760 = vmatprep.subr.bf16.mxu0 %v10207_v46  ;;  %7608 = vmatprep.subr.bf16.mxu1 %v10210_v47  ;;  %v8499_v46 = vcombine.high %v50_v37, %v66_v38  ;;  %v10297_v47 = vld [vmem:[%s14789_s1 + $0xa44] ss:$16 sps:$4 sm:$0xff]  }
 0x10d   :  { %6786 = vmatprep.mubr.bf16.mxu0 %v8467_v48  ;;  %7634 = vmatprep.mubr.bf16.mxu1 %v8467_v48  ;;  %v10300_v48 = vld [vmem:[%s14789_s1 + $0xa4c] ss:$16 sps:$4 sm:$0xff]  }
 0x10f   :  { %6761 = vmatpush1.bf16.msra.mxu0 %v10205_v49  ;;  %7609 = vmatpush1.bf16.msra.mxu1 %v10208_v50  ;;  %v12450_v49 = vld [vmem:[%s14790_s0 + $0x28] sm:$0xff] }
 0x110   :  { %6762 = vmatprep.subr.bf16.mxu0 %v10213_v51  ;;  %7610 = vmatprep.subr.bf16.mxu1 %v10216_v52  ;;  %v12455_v50 = vld [vmem:[%s14790_s0 + $0xa8] sm:$0xff]  ;;  %v8498_v51 = vcombine.low %v50_v37, %v66_v38  ;;  %v10295_v52 = vld [vmem:[%s14789_s1 + $0xa40] ss:$16 sps:$4 sm:$0xff]  }
 0x111   :  { %v10367_v37 = vld [vmem:[%s14789_s1 + $0xbc0] ss:$16 sps:$4 sm:$0xff]   ;;  %v10370_v38 = vld [vmem:[%s14789_s1 + $0xbc8] ss:$16 sps:$4 sm:$0xff]  }
 0x113   :  { %6763 = vmatpush1.bf16.msra.mxu0 %v10211_v53  ;;  %7611 = vmatpush1.bf16.msra.mxu1 %v10214_v54  ;;  %v10298_v53 = vld [vmem:[%s14789_s1 + $0xa48] ss:$16 sps:$4 sm:$0xff]   ;;  %v10303_v54 = vld [vmem:[%s14789_s1 + $0xa64] ss:$16 sps:$4 sm:$0xff]  }
 0x114   :  { %6764 = vmatprep.subr.bf16.mxu0 %v10219_v55  ;;  %7612 = vmatprep.subr.bf16.mxu1 %v10222_v56  ;;  %v10306_v55 = vld [vmem:[%s14789_s1 + $0xa6c] ss:$16 sps:$4 sm:$0xff]   ;;  %v8469_v56 = vcombine.high %v12450_v49, %v12455_v50 }
 0x117   :  { %6765 = vmatpush1.bf16.msra.mxu0 %v10217_v57  ;;  %7613 = vmatpush1.bf16.msra.mxu1 %v10220_v58  ;;  %v10301_v57 = vld [vmem:[%s14789_s1 + $0xa60] ss:$16 sps:$4 sm:$0xff]   ;;  %v10304_v58 = vld [vmem:[%s14789_s1 + $0xa68] ss:$16 sps:$4 sm:$0xff]  }
 0x118   :  { %6766 = vmatprep.subr.bf16.mxu0 %v10225_v59  ;;  %7614 = vmatprep.subr.bf16.mxu1 %v10228_v60  ;;  %v10309_v59 = vld [vmem:[%s14789_s1 + $0xa84] ss:$16 sps:$4 sm:$0xff]   ;;  %v10312_v60 = vld [vmem:[%s14789_s1 + $0xa8c] ss:$16 sps:$4 sm:$0xff]  }
 0x11b   :  { %6767 = vmatpush1.bf16.msra.mxu0 %v10223_v61  ;;  %7615 = vmatpush1.bf16.msra.mxu1 %v10226_v62  ;;  %v10307_v61 = vld [vmem:[%s14789_s1 + $0xa80] ss:$16 sps:$4 sm:$0xff]   ;;  %v10310_v62 = vld [vmem:[%s14789_s1 + $0xa88] ss:$16 sps:$4 sm:$0xff]  }
 0x11c   :  { %6768 = vmatprep.subr.bf16.mxu0 %v10231_v63  ;;  %7616 = vmatprep.subr.bf16.mxu1 %v10234_v0  ;;  %v10315_v63 = vld [vmem:[%s14789_s1 + $0xaa4] ss:$16 sps:$4 sm:$0xff]   ;;  %v10318_v0 = vld [vmem:[%s14789_s1 + $0xaac] ss:$16 sps:$4 sm:$0xff]  }
 0x11f   :  { %6769 = vmatpush1.bf16.msra.mxu0 %v10229_v1  ;;  %7617 = vmatpush1.bf16.msra.mxu1 %v10232_v2  ;;  %v10313_v1 = vld [vmem:[%s14789_s1 + $0xaa0] ss:$16 sps:$4 sm:$0xff]   ;;  %v10316_v2 = vld [vmem:[%s14789_s1 + $0xaa8] ss:$16 sps:$4 sm:$0xff]  }
 0x120   :  { %6770 = vmatprep.subr.bf16.mxu0 %v10237_v3  ;;  %7618 = vmatprep.subr.bf16.mxu1 %v10240_v4  ;;  %v10321_v3 = vld [vmem:[%s14789_s1 + $0xac4] ss:$16 sps:$4 sm:$0xff]   ;;  %v10324_v4 = vld [vmem:[%s14789_s1 + $0xacc] ss:$16 sps:$4 sm:$0xff]  }
 0x123   :  { %6771 = vmatpush1.bf16.msra.mxu0 %v10235_v5  ;;  %7619 = vmatpush1.bf16.msra.mxu1 %v10238_v6  ;;  %v10319_v5 = vld [vmem:[%s14789_s1 + $0xac0] ss:$16 sps:$4 sm:$0xff]   ;;  %v10322_v6 = vld [vmem:[%s14789_s1 + $0xac8] ss:$16 sps:$4 sm:$0xff]  }
 0x124   :  { %6772 = vmatprep.subr.bf16.mxu0 %v10243_v7  ;;  %7620 = vmatprep.subr.bf16.mxu1 %v10246_v8  ;;  %v10327_v7 = vld [vmem:[%s14789_s1 + $0xae4] ss:$16 sps:$4 sm:$0xff]   ;;  %v10330_v8 = vld [vmem:[%s14789_s1 + $0xaec] ss:$16 sps:$4 sm:$0xff]  }
 0x127   :  { %6773 = vmatpush1.bf16.msra.mxu0 %v10241_v9  ;;  %7621 = vmatpush1.bf16.msra.mxu1 %v10244_v10  ;;  %v10325_v9 = vld [vmem:[%s14789_s1 + $0xae0] ss:$16 sps:$4 sm:$0xff]   ;;  %v10328_v10 = vld [vmem:[%s14789_s1 + $0xae8] ss:$16 sps:$4 sm:$0xff]  }
 0x128   :  { %6774 = vmatprep.subr.bf16.mxu0 %v10249_v11  ;;  %7622 = vmatprep.subr.bf16.mxu1 %v10252_v12  ;;  %v10333_v11 = vld [vmem:[%s14789_s1 + $0xb04] ss:$16 sps:$4 sm:$0xff]   ;;  %v10336_v12 = vld [vmem:[%s14789_s1 + $0xb0c] ss:$16 sps:$4 sm:$0xff]  }
 0x12b   :  { %6775 = vmatpush1.bf16.msra.mxu0 %v10247_v13  ;;  %7623 = vmatpush1.bf16.msra.mxu1 %v10250_v14  ;;  %v10331_v13 = vld [vmem:[%s14789_s1 + $0xb00] ss:$16 sps:$4 sm:$0xff]   ;;  %v10334_v14 = vld [vmem:[%s14789_s1 + $0xb08] ss:$16 sps:$4 sm:$0xff]  }
 0x12c   :  { %6776 = vmatprep.subr.bf16.mxu0 %v10255_v15  ;;  %7624 = vmatprep.subr.bf16.mxu1 %v10258_v16  ;;  %v10339_v15 = vld [vmem:[%s14789_s1 + $0xb24] ss:$16 sps:$4 sm:$0xff]   ;;  %v10342_v16 = vld [vmem:[%s14789_s1 + $0xb2c] ss:$16 sps:$4 sm:$0xff]  }
 0x12f   :  { %6777 = vmatpush1.bf16.msra.mxu0 %v10253_v17  ;;  %7625 = vmatpush1.bf16.msra.mxu1 %v10256_v18  ;;  %v10337_v17 = vld [vmem:[%s14789_s1 + $0xb20] ss:$16 sps:$4 sm:$0xff]   ;;  %v10340_v18 = vld [vmem:[%s14789_s1 + $0xb28] ss:$16 sps:$4 sm:$0xff]  }
 0x130   :  { %6778 = vmatprep.subr.bf16.mxu0 %v10261_v19  ;;  %7626 = vmatprep.subr.bf16.mxu1 %v10264_v20  ;;  %v10345_v19 = vld [vmem:[%s14789_s1 + $0xb44] ss:$16 sps:$4 sm:$0xff]   ;;  %v10348_v20 = vld [vmem:[%s14789_s1 + $0xb4c] ss:$16 sps:$4 sm:$0xff]  }
 0x133   :  { %6779 = vmatpush1.bf16.msra.mxu0 %v10259_v21  ;;  %7627 = vmatpush1.bf16.msra.mxu1 %v10262_v22  ;;  %v10343_v21 = vld [vmem:[%s14789_s1 + $0xb40] ss:$16 sps:$4 sm:$0xff]   ;;  %v10346_v22 = vld [vmem:[%s14789_s1 + $0xb48] ss:$16 sps:$4 sm:$0xff]  }
 0x134   :  { %6780 = vmatprep.subr.bf16.mxu0 %v10267_v23  ;;  %7628 = vmatprep.subr.bf16.mxu1 %v10270_v24  ;;  %v10351_v23 = vld [vmem:[%s14789_s1 + $0xb64] ss:$16 sps:$4 sm:$0xff]   ;;  %v10354_v24 = vld [vmem:[%s14789_s1 + $0xb6c] ss:$16 sps:$4 sm:$0xff]  }
 0x137   :  { %6781 = vmatpush1.bf16.msra.mxu0 %v10265_v26  ;;  %7629 = vmatpush1.bf16.msra.mxu1 %v10268_v25  ;;  %v10349_v26 = vld [vmem:[%s14789_s1 + $0xb60] ss:$16 sps:$4 sm:$0xff]   ;;  %v10352_v25 = vld [vmem:[%s14789_s1 + $0xb68] ss:$16 sps:$4 sm:$0xff]  }
 0x138   :  { %6782 = vmatprep.subr.bf16.mxu0 %v10273_v27  ;;  %7630 = vmatprep.subr.bf16.mxu1 %v10276_v28  ;;  %v10357_v27 = vld [vmem:[%s14789_s1 + $0xb84] ss:$16 sps:$4 sm:$0xff]   ;;  %v10360_v28 = vld [vmem:[%s14789_s1 + $0xb8c] ss:$16 sps:$4 sm:$0xff]  }
 0x13b   :  { %6783 = vmatpush1.bf16.msra.mxu0 %v10271_v29  ;;  %7631 = vmatpush1.bf16.msra.mxu1 %v10274_v30  ;;  %v10355_v29 = vld [vmem:[%s14789_s1 + $0xb80] ss:$16 sps:$4 sm:$0xff]   ;;  %v10358_v30 = vld [vmem:[%s14789_s1 + $0xb88] ss:$16 sps:$4 sm:$0xff]  }
 0x13c   :  { %6784 = vmatprep.subr.bf16.mxu0 %v10279_v31  ;;  %7632 = vmatprep.subr.bf16.mxu1 %v10282_v32  ;;  %v10363_v31 = vld [vmem:[%s14789_s1 + $0xba4] ss:$16 sps:$4 sm:$0xff]   ;;  %v10366_v32 = vld [vmem:[%s14789_s1 + $0xbac] ss:$16 sps:$4 sm:$0xff]  }
 0x13f   :  { %6785 = vmatpush1.bf16.msra.mxu0 %v10277_v34  ;;  %7633 = vmatpush1.bf16.msra.mxu1 %v10280_v36  ;;  %v10361_v34 = vld [vmem:[%s14789_s1 + $0xba0] ss:$16 sps:$4 sm:$0xff]   ;;  %v10364_v36 = vld [vmem:[%s14789_s1 + $0xba8] ss:$16 sps:$4 sm:$0xff]  }
 0x140   :  { %6807 = vmatprep.subr.bf16.mxu0 %v10285_v33  ;;  %7655 = vmatprep.subr.bf16.mxu1 %v10288_v35  ;;  %v10369_v33 = vld [vmem:[%s14789_s1 + $0xbc4] ss:$16 sps:$4 sm:$0xff]   ;;  %v10372_v35 = vld [vmem:[%s14789_s1 + $0xbcc] ss:$16 sps:$4 sm:$0xff]  }
 0x142   :  { %6787 = vmatmul.mubr.bf16.vlgmr.msra.gmra.mrb[0].mxu0 %v8466_v39  ;;  %7635 = vmatmul.mubr.bf16.vlgmr.msra.gmra.mrb[0].mxu1 %v8466_v39  ;;  %v10375_v39 = vld [vmem:[%s14789_s1 + $0xbe4] ss:$16 sps:$4 sm:$0xff]  }
 0x143   :  { %6808 = vmatpush1.bf16.msra.mxu0 %v10283_v40  ;;  %7656 = vmatpush1.bf16.msra.mxu1 %v10286_v42  ;;  %v10378_v40 = vld [vmem:[%s14789_s1 + $0xbec] ss:$16 sps:$4 sm:$0xff]   ;;  %v10373_v42 = vld [vmem:[%s14789_s1 + $0xbe0] ss:$16 sps:$4 sm:$0xff]  }
 0x144   :  { %6809 = vmatprep.subr.bf16.mxu0 %v10291_v44  ;;  %7657 = vmatprep.subr.bf16.mxu1 %v10294_v41  ;;  %v10376_v44 = vld [vmem:[%s14789_s1 + $0xbe8] ss:$16 sps:$4 sm:$0xff]   ;;  %v10381_v41 = vld [vmem:[%s14789_s1 + $0xc04] ss:$16 sps:$4 sm:$0xff]  }
 0x145   :  { %6796 = vmatprep.mubr.bf16.mxu0 %v8499_v46  ;;  %7644 = vmatprep.mubr.bf16.mxu1 %v8499_v46  ;;  %v67_v46 = vld [vmem:[%s14790_s0 + $0x1a8] sm:$0xff] }
 0x147   :  { %6810 = vmatpush1.bf16.msra.mxu0 %v10289_v43  ;;  %7658 = vmatpush1.bf16.msra.mxu1 %v10292_v45  ;;  %v10384_v43 = vld [vmem:[%s14789_s1 + $0xc0c] ss:$16 sps:$4 sm:$0xff]  }
 0x148   :  { %6811 = vmatprep.subr.bf16.mxu0 %v10297_v47  ;;  %7659 = vmatprep.subr.bf16.mxu1 %v10300_v48  ;;  %v51_v45 = vld [vmem:[%s14790_s0 + $0x128] sm:$0xff]  ;;  %v8468_v47 = vcombine.low %v12450_v49, %v12455_v50  ;;  %v10379_v48 = vld [vmem:[%s14789_s1 + $0xc00] ss:$16 sps:$4 sm:$0xff]  }
 0x149   :  { %v10390_v49 = vld [vmem:[%s14789_s1 + $0xc2c] ss:$16 sps:$4 sm:$0xff]   ;;  %v10385_v50 = vld [vmem:[%s14789_s1 + $0xc20] ss:$16 sps:$4 sm:$0xff]  }
 0x14a   :  { %6797 = vmatmul.mubr.bf16.gmra.mrb[4].mxu0 %v8498_v51  ;;  %7645 = vmatmul.mubr.bf16.gmra.mrb[4].mxu1 %v8498_v51  ;;  %v10382_v51 = vld [vmem:[%s14789_s1 + $0xc08] ss:$16 sps:$4 sm:$0xff]  }
 0x14b   :  { %6812 = vmatpush1.bf16.msra.mxu0 %v10295_v52  ;;  %7660 = vmatpush1.bf16.msra.mxu1 %v10298_v53  ;;  %v10387_v52 = vld [vmem:[%s14789_s1 + $0xc24] ss:$16 sps:$4 sm:$0xff]   ;;  %v10388_v53 = vld [vmem:[%s14789_s1 + $0xc28] ss:$16 sps:$4 sm:$0xff]  }
 0x14c   :  { %6813 = vmatprep.subr.bf16.mxu0 %v10303_v54  ;;  %7661 = vmatprep.subr.bf16.mxu1 %v10306_v55  ;;  %v8501_v54 = vcombine.high %v51_v45, %v67_v46  ;;  %v10393_v55 = vld [vmem:[%s14789_s1 + $0xc44] ss:$16 sps:$4 sm:$0xff]  }
 0x14d   :  { %6839 = vmatprep.mubr.bf16.mxu0 %v8469_v56  ;;  %7687 = vmatprep.mubr.bf16.mxu1 %v8469_v56  ;;  %v10396_v56 = vld [vmem:[%s14789_s1 + $0xc4c] ss:$16 sps:$4 sm:$0xff]  }
 0x14f   :  { %6814 = vmatpush1.bf16.msra.mxu0 %v10301_v57  ;;  %7662 = vmatpush1.bf16.msra.mxu1 %v10304_v58  ;;  %v12662_v57 = vld [vmem:[%s14790_s0 + $0x30] sm:$0xff] }
 0x150   :  { %6815 = vmatprep.subr.bf16.mxu0 %v10309_v59  ;;  %7663 = vmatprep.subr.bf16.mxu1 %v10312_v60  ;;  %v12667_v58 = vld [vmem:[%s14790_s0 + $0xb0] sm:$0xff]  ;;  %v8500_v59 = vcombine.low %v51_v45, %v67_v46  ;;  %v10466_v46 = vld [vmem:[%s14789_s1 + $0xdc8] ss:$16 sps:$4 sm:$0xff]  }
 0x151   :  { %v10391_v60 = vld [vmem:[%s14789_s1 + $0xc40] ss:$16 sps:$4 sm:$0xff]  }
 0x152   :  { %v10463_v45 = vld [vmem:[%s14789_s1 + $0xdc0] ss:$16 sps:$4 sm:$0xff]  }
 0x153   :  { %6816 = vmatpush1.bf16.msra.mxu0 %v10307_v61  ;;  %7664 = vmatpush1.bf16.msra.mxu1 %v10310_v62  ;;  %v10394_v61 = vld [vmem:[%s14789_s1 + $0xc48] ss:$16 sps:$4 sm:$0xff]   ;;  %v10399_v62 = vld [vmem:[%s14789_s1 + $0xc64] ss:$16 sps:$4 sm:$0xff]  }
 0x154   :  { %6817 = vmatprep.subr.bf16.mxu0 %v10315_v63  ;;  %7665 = vmatprep.subr.bf16.mxu1 %v10318_v0  ;;  %v10402_v63 = vld [vmem:[%s14789_s1 + $0xc6c] ss:$16 sps:$4 sm:$0xff]   ;;  %v8471_v0 = vcombine.high %v12662_v57, %v12667_v58 }
 0x157   :  { %6818 = vmatpush1.bf16.msra.mxu0 %v10313_v1  ;;  %7666 = vmatpush1.bf16.msra.mxu1 %v10316_v2  ;;  %v10397_v1 = vld [vmem:[%s14789_s1 + $0xc60] ss:$16 sps:$4 sm:$0xff]   ;;  %v10400_v2 = vld [vmem:[%s14789_s1 + $0xc68] ss:$16 sps:$4 sm:$0xff]  }
 0x158   :  { %6819 = vmatprep.subr.bf16.mxu0 %v10321_v3  ;;  %7667 = vmatprep.subr.bf16.mxu1 %v10324_v4  ;;  %v10405_v3 = vld [vmem:[%s14789_s1 + $0xc84] ss:$16 sps:$4 sm:$0xff]   ;;  %v10408_v4 = vld [vmem:[%s14789_s1 + $0xc8c] ss:$16 sps:$4 sm:$0xff]  }
 0x15b   :  { %6820 = vmatpush1.bf16.msra.mxu0 %v10319_v5  ;;  %7668 = vmatpush1.bf16.msra.mxu1 %v10322_v6  ;;  %v10403_v5 = vld [vmem:[%s14789_s1 + $0xc80] ss:$16 sps:$4 sm:$0xff]   ;;  %v10406_v6 = vld [vmem:[%s14789_s1 + $0xc88] ss:$16 sps:$4 sm:$0xff]  }
 0x15c   :  { %6821 = vmatprep.subr.bf16.mxu0 %v10327_v7  ;;  %7669 = vmatprep.subr.bf16.mxu1 %v10330_v8  ;;  %v10411_v7 = vld [vmem:[%s14789_s1 + $0xca4] ss:$16 sps:$4 sm:$0xff]   ;;  %v10414_v8 = vld [vmem:[%s14789_s1 + $0xcac] ss:$16 sps:$4 sm:$0xff]  }
 0x15f   :  { %6822 = vmatpush1.bf16.msra.mxu0 %v10325_v9  ;;  %7670 = vmatpush1.bf16.msra.mxu1 %v10328_v10  ;;  %v10409_v9 = vld [vmem:[%s14789_s1 + $0xca0] ss:$16 sps:$4 sm:$0xff]   ;;  %v10412_v10 = vld [vmem:[%s14789_s1 + $0xca8] ss:$16 sps:$4 sm:$0xff]  }
 0x160   :  { %6823 = vmatprep.subr.bf16.mxu0 %v10333_v11  ;;  %7671 = vmatprep.subr.bf16.mxu1 %v10336_v12  ;;  %v10417_v11 = vld [vmem:[%s14789_s1 + $0xcc4] ss:$16 sps:$4 sm:$0xff]   ;;  %v10420_v12 = vld [vmem:[%s14789_s1 + $0xccc] ss:$16 sps:$4 sm:$0xff]  }
 0x163   :  { %6824 = vmatpush1.bf16.msra.mxu0 %v10331_v13  ;;  %7672 = vmatpush1.bf16.msra.mxu1 %v10334_v14  ;;  %v10415_v13 = vld [vmem:[%s14789_s1 + $0xcc0] ss:$16 sps:$4 sm:$0xff]   ;;  %v10418_v14 = vld [vmem:[%s14789_s1 + $0xcc8] ss:$16 sps:$4 sm:$0xff]  }
 0x164   :  { %6825 = vmatprep.subr.bf16.mxu0 %v10339_v15  ;;  %7673 = vmatprep.subr.bf16.mxu1 %v10342_v16  ;;  %v10423_v15 = vld [vmem:[%s14789_s1 + $0xce4] ss:$16 sps:$4 sm:$0xff]   ;;  %v10426_v16 = vld [vmem:[%s14789_s1 + $0xcec] ss:$16 sps:$4 sm:$0xff]  }
 0x167   :  { %6826 = vmatpush1.bf16.msra.mxu0 %v10337_v17  ;;  %7674 = vmatpush1.bf16.msra.mxu1 %v10340_v18  ;;  %v10421_v17 = vld [vmem:[%s14789_s1 + $0xce0] ss:$16 sps:$4 sm:$0xff]   ;;  %v10424_v18 = vld [vmem:[%s14789_s1 + $0xce8] ss:$16 sps:$4 sm:$0xff]  }
 0x168   :  { %6827 = vmatprep.subr.bf16.mxu0 %v10345_v19  ;;  %7675 = vmatprep.subr.bf16.mxu1 %v10348_v20  ;;  %v10429_v19 = vld [vmem:[%s14789_s1 + $0xd04] ss:$16 sps:$4 sm:$0xff]   ;;  %v10432_v20 = vld [vmem:[%s14789_s1 + $0xd0c] ss:$16 sps:$4 sm:$0xff]  }
 0x16b   :  { %6828 = vmatpush1.bf16.msra.mxu0 %v10343_v21  ;;  %7676 = vmatpush1.bf16.msra.mxu1 %v10346_v22  ;;  %v10427_v21 = vld [vmem:[%s14789_s1 + $0xd00] ss:$16 sps:$4 sm:$0xff]   ;;  %v10430_v22 = vld [vmem:[%s14789_s1 + $0xd08] ss:$16 sps:$4 sm:$0xff]  }
 0x16c   :  { %6829 = vmatprep.subr.bf16.mxu0 %v10351_v23  ;;  %7677 = vmatprep.subr.bf16.mxu1 %v10354_v24  ;;  %v10435_v23 = vld [vmem:[%s14789_s1 + $0xd24] ss:$16 sps:$4 sm:$0xff]   ;;  %v10438_v24 = vld [vmem:[%s14789_s1 + $0xd2c] ss:$16 sps:$4 sm:$0xff]  }
 0x16f   :  { %6830 = vmatpush1.bf16.msra.mxu0 %v10349_v26  ;;  %7678 = vmatpush1.bf16.msra.mxu1 %v10352_v25  ;;  %v10433_v26 = vld [vmem:[%s14789_s1 + $0xd20] ss:$16 sps:$4 sm:$0xff]   ;;  %v10436_v25 = vld [vmem:[%s14789_s1 + $0xd28] ss:$16 sps:$4 sm:$0xff]  }
 0x170   :  { %6831 = vmatprep.subr.bf16.mxu0 %v10357_v27  ;;  %7679 = vmatprep.subr.bf16.mxu1 %v10360_v28  ;;  %v10441_v27 = vld [vmem:[%s14789_s1 + $0xd44] ss:$16 sps:$4 sm:$0xff]   ;;  %v10444_v28 = vld [vmem:[%s14789_s1 + $0xd4c] ss:$16 sps:$4 sm:$0xff]  }
 0x173   :  { %6832 = vmatpush1.bf16.msra.mxu0 %v10355_v29  ;;  %7680 = vmatpush1.bf16.msra.mxu1 %v10358_v30  ;;  %v10439_v29 = vld [vmem:[%s14789_s1 + $0xd40] ss:$16 sps:$4 sm:$0xff]   ;;  %v10442_v30 = vld [vmem:[%s14789_s1 + $0xd48] ss:$16 sps:$4 sm:$0xff]  }
 0x174   :  { %6833 = vmatprep.subr.bf16.mxu0 %v10363_v31  ;;  %7681 = vmatprep.subr.bf16.mxu1 %v10366_v32  ;;  %v10447_v31 = vld [vmem:[%s14789_s1 + $0xd64] ss:$16 sps:$4 sm:$0xff]   ;;  %v10450_v32 = vld [vmem:[%s14789_s1 + $0xd6c] ss:$16 sps:$4 sm:$0xff]  }
 0x177   :  { %6834 = vmatpush1.bf16.msra.mxu0 %v10361_v34  ;;  %7682 = vmatpush1.bf16.msra.mxu1 %v10364_v36  ;;  %v10445_v34 = vld [vmem:[%s14789_s1 + $0xd60] ss:$16 sps:$4 sm:$0xff]   ;;  %v10448_v36 = vld [vmem:[%s14789_s1 + $0xd68] ss:$16 sps:$4 sm:$0xff]  }
 0x178   :  { %6835 = vmatprep.subr.bf16.mxu0 %v10369_v33  ;;  %7683 = vmatprep.subr.bf16.mxu1 %v10372_v35  ;;  %v10453_v33 = vld [vmem:[%s14789_s1 + $0xd84] ss:$16 sps:$4 sm:$0xff]   ;;  %v10456_v35 = vld [vmem:[%s14789_s1 + $0xd8c] ss:$16 sps:$4 sm:$0xff]  }
 0x17b   :  { %6836 = vmatpush1.bf16.msra.mxu0 %v10367_v37  ;;  %7684 = vmatpush1.bf16.msra.mxu1 %v10370_v38  ;;  %v10451_v37 = vld [vmem:[%s14789_s1 + $0xd80] ss:$16 sps:$4 sm:$0xff]   ;;  %v10454_v38 = vld [vmem:[%s14789_s1 + $0xd88] ss:$16 sps:$4 sm:$0xff]  }
 0x17c   :  { %6837 = vmatprep.subr.bf16.mxu0 %v10375_v39  ;;  %7685 = vmatprep.subr.bf16.mxu1 %v10378_v40  ;;  %v10459_v39 = vld [vmem:[%s14789_s1 + $0xda4] ss:$16 sps:$4 sm:$0xff]   ;;  %v10462_v40 = vld [vmem:[%s14789_s1 + $0xdac] ss:$16 sps:$4 sm:$0xff]  }
 0x17f   :  { %6838 = vmatpush1.bf16.msra.mxu0 %v10373_v42  ;;  %7686 = vmatpush1.bf16.msra.mxu1 %v10376_v44  ;;  %v10457_v42 = vld [vmem:[%s14789_s1 + $0xda0] ss:$16 sps:$4 sm:$0xff]   ;;  %v10460_v44 = vld [vmem:[%s14789_s1 + $0xda8] ss:$16 sps:$4 sm:$0xff]  }
 0x180   :  { %6860 = vmatprep.subr.bf16.mxu0 %v10381_v41  ;;  %7708 = vmatprep.subr.bf16.mxu1 %v10384_v43  ;;  %v10465_v41 = vld [vmem:[%s14789_s1 + $0xdc4] ss:$16 sps:$4 sm:$0xff]   ;;  %v10468_v43 = vld [vmem:[%s14789_s1 + $0xdcc] ss:$16 sps:$4 sm:$0xff]  }
 0x182   :  { %6840 = vmatmul.mubr.bf16.vlgmr.msra.gmra.mrb[0].mxu0 %v8468_v47  ;;  %7688 = vmatmul.mubr.bf16.vlgmr.msra.gmra.mrb[0].mxu1 %v8468_v47  ;;  %v10471_v47 = vld [vmem:[%s14789_s1 + $0xde4] ss:$16 sps:$4 sm:$0xff]  }
 0x183   :  { %6861 = vmatpush1.bf16.msra.mxu0 %v10379_v48  ;;  %7709 = vmatpush1.bf16.msra.mxu1 %v10382_v51  ;;  %v10474_v48 = vld [vmem:[%s14789_s1 + $0xdec] ss:$16 sps:$4 sm:$0xff]   ;;  %v10469_v51 = vld [vmem:[%s14789_s1 + $0xde0] ss:$16 sps:$4 sm:$0xff]  }
 0x184   :  { %6862 = vmatprep.subr.bf16.mxu0 %v10387_v52  ;;  %7710 = vmatprep.subr.bf16.mxu1 %v10390_v49  ;;  %v10472_v52 = vld [vmem:[%s14789_s1 + $0xde8] ss:$16 sps:$4 sm:$0xff]   ;;  %v10477_v49 = vld [vmem:[%s14789_s1 + $0xe04] ss:$16 sps:$4 sm:$0xff]  }
 0x185   :  { %6849 = vmatprep.mubr.bf16.mxu0 %v8501_v54  ;;  %7697 = vmatprep.mubr.bf16.mxu1 %v8501_v54  ;;  %v68_v54 = vld [vmem:[%s14790_s0 + $0x1b0] sm:$0xff] }
 0x187   :  { %6863 = vmatpush1.bf16.msra.mxu0 %v10385_v50  ;;  %7711 = vmatpush1.bf16.msra.mxu1 %v10388_v53  ;;  %v10480_v50 = vld [vmem:[%s14789_s1 + $0xe0c] ss:$16 sps:$4 sm:$0xff]   ;;  %v52_v53 = vld [vmem:[%s14790_s0 + $0x130] sm:$0xff] }
 0x188   :  { %6864 = vmatprep.subr.bf16.mxu0 %v10393_v55  ;;  %7712 = vmatprep.subr.bf16.mxu1 %v10396_v56  ;;  %v8470_v55 = vcombine.low %v12662_v57, %v12667_v58  ;;  %v10475_v56 = vld [vmem:[%s14789_s1 + $0xe00] ss:$16 sps:$4 sm:$0xff]   ;;  %v10486_v57 = vld [vmem:[%s14789_s1 + $0xe2c] ss:$16 sps:$4 sm:$0xff]  }
 0x189   :  { %v10481_v58 = vld [vmem:[%s14789_s1 + $0xe20] ss:$16 sps:$4 sm:$0xff]  }
 0x18a   :  { %6850 = vmatmul.mubr.bf16.gmra.mrb[4].mxu0 %v8500_v59  ;;  %7698 = vmatmul.mubr.bf16.gmra.mrb[4].mxu1 %v8500_v59  ;;  %v10478_v59 = vld [vmem:[%s14789_s1 + $0xe08] ss:$16 sps:$4 sm:$0xff]  }
 0x18b   :  { %6865 = vmatpush1.bf16.msra.mxu0 %v10391_v60  ;;  %7713 = vmatpush1.bf16.msra.mxu1 %v10394_v61  ;;  %v10483_v60 = vld [vmem:[%s14789_s1 + $0xe24] ss:$16 sps:$4 sm:$0xff]   ;;  %v10484_v61 = vld [vmem:[%s14789_s1 + $0xe28] ss:$16 sps:$4 sm:$0xff]  }
 0x18c   :  { %6866 = vmatprep.subr.bf16.mxu0 %v10399_v62  ;;  %7714 = vmatprep.subr.bf16.mxu1 %v10402_v63  ;;  %v8503_v62 = vcombine.high %v52_v53, %v68_v54  ;;  %v10489_v63 = vld [vmem:[%s14789_s1 + $0xe44] ss:$16 sps:$4 sm:$0xff]  }
 0x18d   :  { %6892 = vmatprep.mubr.bf16.mxu0 %v8471_v0  ;;  %7740 = vmatprep.mubr.bf16.mxu1 %v8471_v0  ;;  %v10492_v0 = vld [vmem:[%s14789_s1 + $0xe4c] ss:$16 sps:$4 sm:$0xff]  }
 0x18f   :  { %6867 = vmatpush1.bf16.msra.mxu0 %v10397_v1  ;;  %7715 = vmatpush1.bf16.msra.mxu1 %v10400_v2  ;;  %v12874_v1 = vld [vmem:[%s14790_s0 + $0x38] sm:$0xff] }
 0x190   :  { %6868 = vmatprep.subr.bf16.mxu0 %v10405_v3  ;;  %7716 = vmatprep.subr.bf16.mxu1 %v10408_v4  ;;  %v12879_v2 = vld [vmem:[%s14790_s0 + $0xb8] sm:$0xff]  ;;  %v8502_v3 = vcombine.low %v52_v53, %v68_v54  ;;  %v10487_v4 = vld [vmem:[%s14789_s1 + $0xe40] ss:$16 sps:$4 sm:$0xff]  }
 0x191   :  { %v10559_v53 = vld [vmem:[%s14789_s1 + $0xfc0] ss:$16 sps:$4 sm:$0xff]   ;;  %v10562_v54 = vld [vmem:[%s14789_s1 + $0xfc8] ss:$16 sps:$4 sm:$0xff]  }
 0x193   :  { %6869 = vmatpush1.bf16.msra.mxu0 %v10403_v5  ;;  %7717 = vmatpush1.bf16.msra.mxu1 %v10406_v6  ;;  %v10490_v5 = vld [vmem:[%s14789_s1 + $0xe48] ss:$16 sps:$4 sm:$0xff]   ;;  %v10495_v6 = vld [vmem:[%s14789_s1 + $0xe64] ss:$16 sps:$4 sm:$0xff]  }
 0x194   :  { %6870 = vmatprep.subr.bf16.mxu0 %v10411_v7  ;;  %7718 = vmatprep.subr.bf16.mxu1 %v10414_v8  ;;  %v10498_v7 = vld [vmem:[%s14789_s1 + $0xe6c] ss:$16 sps:$4 sm:$0xff]   ;;  %v8473_v8 = vcombine.high %v12874_v1, %v12879_v2 }
 0x197   :  { %6871 = vmatpush1.bf16.msra.mxu0 %v10409_v9  ;;  %7719 = vmatpush1.bf16.msra.mxu1 %v10412_v10  ;;  %v10493_v9 = vld [vmem:[%s14789_s1 + $0xe60] ss:$16 sps:$4 sm:$0xff]   ;;  %v10496_v10 = vld [vmem:[%s14789_s1 + $0xe68] ss:$16 sps:$4 sm:$0xff]  }
 0x198   :  { %6872 = vmatprep.subr.bf16.mxu0 %v10417_v11  ;;  %7720 = vmatprep.subr.bf16.mxu1 %v10420_v12  ;;  %v10501_v11 = vld [vmem:[%s14789_s1 + $0xe84] ss:$16 sps:$4 sm:$0xff]   ;;  %v10504_v12 = vld [vmem:[%s14789_s1 + $0xe8c] ss:$16 sps:$4 sm:$0xff]  }
 0x19b   :  { %6873 = vmatpush1.bf16.msra.mxu0 %v10415_v13  ;;  %7721 = vmatpush1.bf16.msra.mxu1 %v10418_v14  ;;  %v10499_v13 = vld [vmem:[%s14789_s1 + $0xe80] ss:$16 sps:$4 sm:$0xff]   ;;  %v10502_v14 = vld [vmem:[%s14789_s1 + $0xe88] ss:$16 sps:$4 sm:$0xff]  }
 0x19c   :  { %6874 = vmatprep.subr.bf16.mxu0 %v10423_v15  ;;  %7722 = vmatprep.subr.bf16.mxu1 %v10426_v16  ;;  %v10507_v15 = vld [vmem:[%s14789_s1 + $0xea4] ss:$16 sps:$4 sm:$0xff]   ;;  %v10510_v16 = vld [vmem:[%s14789_s1 + $0xeac] ss:$16 sps:$4 sm:$0xff]  }
 0x19f   :  { %6875 = vmatpush1.bf16.msra.mxu0 %v10421_v17  ;;  %7723 = vmatpush1.bf16.msra.mxu1 %v10424_v18  ;;  %v10505_v17 = vld [vmem:[%s14789_s1 + $0xea0] ss:$16 sps:$4 sm:$0xff]   ;;  %v10508_v18 = vld [vmem:[%s14789_s1 + $0xea8] ss:$16 sps:$4 sm:$0xff]  }
 0x1a0   :  { %6876 = vmatprep.subr.bf16.mxu0 %v10429_v19  ;;  %7724 = vmatprep.subr.bf16.mxu1 %v10432_v20  ;;  %v10513_v19 = vld [vmem:[%s14789_s1 + $0xec4] ss:$16 sps:$4 sm:$0xff]   ;;  %v10516_v20 = vld [vmem:[%s14789_s1 + $0xecc] ss:$16 sps:$4 sm:$0xff]  }
 0x1a3   :  { %6877 = vmatpush1.bf16.msra.mxu0 %v10427_v21  ;;  %7725 = vmatpush1.bf16.msra.mxu1 %v10430_v22  ;;  %v10511_v21 = vld [vmem:[%s14789_s1 + $0xec0] ss:$16 sps:$4 sm:$0xff]   ;;  %v10514_v22 = vld [vmem:[%s14789_s1 + $0xec8] ss:$16 sps:$4 sm:$0xff]  }
 0x1a4   :  { %6878 = vmatprep.subr.bf16.mxu0 %v10435_v23  ;;  %7726 = vmatprep.subr.bf16.mxu1 %v10438_v24  ;;  %v10519_v23 = vld [vmem:[%s14789_s1 + $0xee4] ss:$16 sps:$4 sm:$0xff]   ;;  %v10522_v24 = vld [vmem:[%s14789_s1 + $0xeec] ss:$16 sps:$4 sm:$0xff]  }
 0x1a7   :  { %6879 = vmatpush1.bf16.msra.mxu0 %v10433_v26  ;;  %7727 = vmatpush1.bf16.msra.mxu1 %v10436_v25  ;;  %v10517_v26 = vld [vmem:[%s14789_s1 + $0xee0] ss:$16 sps:$4 sm:$0xff]   ;;  %v10520_v25 = vld [vmem:[%s14789_s1 + $0xee8] ss:$16 sps:$4 sm:$0xff]  }
 0x1a8   :  { %6880 = vmatprep.subr.bf16.mxu0 %v10441_v27  ;;  %7728 = vmatprep.subr.bf16.mxu1 %v10444_v28  ;;  %v10525_v27 = vld [vmem:[%s14789_s1 + $0xf04] ss:$16 sps:$4 sm:$0xff]   ;;  %v10528_v28 = vld [vmem:[%s14789_s1 + $0xf0c] ss:$16 sps:$4 sm:$0xff]  }
 0x1ab   :  { %6881 = vmatpush1.bf16.msra.mxu0 %v10439_v29  ;;  %7729 = vmatpush1.bf16.msra.mxu1 %v10442_v30  ;;  %v10523_v29 = vld [vmem:[%s14789_s1 + $0xf00] ss:$16 sps:$4 sm:$0xff]   ;;  %v10526_v30 = vld [vmem:[%s14789_s1 + $0xf08] ss:$16 sps:$4 sm:$0xff]  }
 0x1ac   :  { %6882 = vmatprep.subr.bf16.mxu0 %v10447_v31  ;;  %7730 = vmatprep.subr.bf16.mxu1 %v10450_v32  ;;  %v10531_v31 = vld [vmem:[%s14789_s1 + $0xf24] ss:$16 sps:$4 sm:$0xff]   ;;  %v10534_v32 = vld [vmem:[%s14789_s1 + $0xf2c] ss:$16 sps:$4 sm:$0xff]  }
 0x1af   :  { %6883 = vmatpush1.bf16.msra.mxu0 %v10445_v34  ;;  %7731 = vmatpush1.bf16.msra.mxu1 %v10448_v36  ;;  %v10529_v34 = vld [vmem:[%s14789_s1 + $0xf20] ss:$16 sps:$4 sm:$0xff]   ;;  %v10532_v36 = vld [vmem:[%s14789_s1 + $0xf28] ss:$16 sps:$4 sm:$0xff]  }
 0x1b0   :  { %6884 = vmatprep.subr.bf16.mxu0 %v10453_v33  ;;  %7732 = vmatprep.subr.bf16.mxu1 %v10456_v35  ;;  %v10537_v33 = vld [vmem:[%s14789_s1 + $0xf44] ss:$16 sps:$4 sm:$0xff]   ;;  %v10540_v35 = vld [vmem:[%s14789_s1 + $0xf4c] ss:$16 sps:$4 sm:$0xff]  }
 0x1b3   :  { %6885 = vmatpush1.bf16.msra.mxu0 %v10451_v37  ;;  %7733 = vmatpush1.bf16.msra.mxu1 %v10454_v38  ;;  %v10535_v37 = vld [vmem:[%s14789_s1 + $0xf40] ss:$16 sps:$4 sm:$0xff]   ;;  %v10538_v38 = vld [vmem:[%s14789_s1 + $0xf48] ss:$16 sps:$4 sm:$0xff]  }
 0x1b4   :  { %6886 = vmatprep.subr.bf16.mxu0 %v10459_v39  ;;  %7734 = vmatprep.subr.bf16.mxu1 %v10462_v40  ;;  %v10543_v39 = vld [vmem:[%s14789_s1 + $0xf64] ss:$16 sps:$4 sm:$0xff]   ;;  %v10546_v40 = vld [vmem:[%s14789_s1 + $0xf6c] ss:$16 sps:$4 sm:$0xff]  }
 0x1b7   :  { %6887 = vmatpush1.bf16.msra.mxu0 %v10457_v42  ;;  %7735 = vmatpush1.bf16.msra.mxu1 %v10460_v44  ;;  %v10541_v42 = vld [vmem:[%s14789_s1 + $0xf60] ss:$16 sps:$4 sm:$0xff]   ;;  %v10544_v44 = vld [vmem:[%s14789_s1 + $0xf68] ss:$16 sps:$4 sm:$0xff]  }
 0x1b8   :  { %6888 = vmatprep.subr.bf16.mxu0 %v10465_v41  ;;  %7736 = vmatprep.subr.bf16.mxu1 %v10468_v43  ;;  %v10549_v41 = vld [vmem:[%s14789_s1 + $0xf84] ss:$16 sps:$4 sm:$0xff]   ;;  %v10552_v43 = vld [vmem:[%s14789_s1 + $0xf8c] ss:$16 sps:$4 sm:$0xff]  }
 0x1bb   :  { %6889 = vmatpush1.bf16.msra.mxu0 %v10463_v45  ;;  %7737 = vmatpush1.bf16.msra.mxu1 %v10466_v46  ;;  %v10547_v45 = vld [vmem:[%s14789_s1 + $0xf80] ss:$16 sps:$4 sm:$0xff]   ;;  %v10550_v46 = vld [vmem:[%s14789_s1 + $0xf88] ss:$16 sps:$4 sm:$0xff]  }
 0x1bc   :  { %6890 = vmatprep.subr.bf16.mxu0 %v10471_v47  ;;  %7738 = vmatprep.subr.bf16.mxu1 %v10474_v48  ;;  %v10555_v47 = vld [vmem:[%s14789_s1 + $0xfa4] ss:$16 sps:$4 sm:$0xff]   ;;  %v10558_v48 = vld [vmem:[%s14789_s1 + $0xfac] ss:$16 sps:$4 sm:$0xff]  }
 0x1bf   :  { %6891 = vmatpush1.bf16.msra.mxu0 %v10469_v51  ;;  %7739 = vmatpush1.bf16.msra.mxu1 %v10472_v52  ;;  %v10553_v51 = vld [vmem:[%s14789_s1 + $0xfa0] ss:$16 sps:$4 sm:$0xff]   ;;  %v10556_v52 = vld [vmem:[%s14789_s1 + $0xfa8] ss:$16 sps:$4 sm:$0xff]  }
 0x1c0   :  { %6913 = vmatprep.subr.bf16.mxu0 %v10477_v49  ;;  %7761 = vmatprep.subr.bf16.mxu1 %v10480_v50  ;;  %v10561_v49 = vld [vmem:[%s14789_s1 + $0xfc4] ss:$16 sps:$4 sm:$0xff]   ;;  %v10564_v50 = vld [vmem:[%s14789_s1 + $0xfcc] ss:$16 sps:$4 sm:$0xff]  }
 0x1c2   :  { %6893 = vmatmul.mubr.bf16.vlgmr.msra.gmra.mrb[0].mxu0 %v8470_v55  ;;  %7741 = vmatmul.mubr.bf16.vlgmr.msra.gmra.mrb[0].mxu1 %v8470_v55  ;;  %v10567_v55 = vld [vmem:[%s14789_s1 + $0xfe4] ss:$16 sps:$4 sm:$0xff]  }
 0x1c3   :  { %6914 = vmatpush1.bf16.msra.mxu0 %v10475_v56  ;;  %7762 = vmatpush1.bf16.msra.mxu1 %v10478_v59  ;;  %v10570_v56 = vld [vmem:[%s14789_s1 + $0xfec] ss:$16 sps:$4 sm:$0xff]   ;;  %v10565_v59 = vld [vmem:[%s14789_s1 + $0xfe0] ss:$16 sps:$4 sm:$0xff]  }
 0x1c4   :  { %6915 = vmatprep.subr.bf16.mxu0 %v10483_v60  ;;  %7763 = vmatprep.subr.bf16.mxu1 %v10486_v57  ;;  %v10568_v60 = vld [vmem:[%s14789_s1 + $0xfe8] ss:$16 sps:$4 sm:$0xff]   ;;  %v10573_v57 = vld [vmem:[%s14789_s1 + $0x1004] ss:$16 sps:$4 sm:$0xff]  }
 0x1c5   :  { %6902 = vmatprep.mubr.bf16.mxu0 %v8503_v62  ;;  %7750 = vmatprep.mubr.bf16.mxu1 %v8503_v62  ;;  %v69_v62 = vld [vmem:[%s14790_s0 + $0x1b8] sm:$0xff] }
 0x1c7   :  { %6916 = vmatpush1.bf16.msra.mxu0 %v10481_v58  ;;  %7764 = vmatpush1.bf16.msra.mxu1 %v10484_v61  ;;  %v10576_v58 = vld [vmem:[%s14789_s1 + $0x100c] ss:$16 sps:$4 sm:$0xff]  }
 0x1c8   :  { %6917 = vmatprep.subr.bf16.mxu0 %v10489_v63  ;;  %7765 = vmatprep.subr.bf16.mxu1 %v10492_v0  ;;  %v53_v61 = vld [vmem:[%s14790_s0 + $0x138] sm:$0xff]  ;;  %v8472_v63 = vcombine.low %v12874_v1, %v12879_v2  ;;  %v10571_v0 = vld [vmem:[%s14789_s1 + $0x1000] ss:$16 sps:$4 sm:$0xff]  }
 0x1c9   :  { %v10582_v1 = vld [vmem:[%s14789_s1 + $0x102c] ss:$16 sps:$4 sm:$0xff]   ;;  %v10577_v2 = vld [vmem:[%s14789_s1 + $0x1020] ss:$16 sps:$4 sm:$0xff]  }
 0x1ca   :  { %6903 = vmatmul.mubr.bf16.gmra.mrb[4].mxu0 %v8502_v3  ;;  %7751 = vmatmul.mubr.bf16.gmra.mrb[4].mxu1 %v8502_v3  ;;  %v10574_v3 = vld [vmem:[%s14789_s1 + $0x1008] ss:$16 sps:$4 sm:$0xff]  }
 0x1cb   :  { %6918 = vmatpush1.bf16.msra.mxu0 %v10487_v4  ;;  %7766 = vmatpush1.bf16.msra.mxu1 %v10490_v5  ;;  %v10579_v4 = vld [vmem:[%s14789_s1 + $0x1024] ss:$16 sps:$4 sm:$0xff]   ;;  %v10580_v5 = vld [vmem:[%s14789_s1 + $0x1028] ss:$16 sps:$4 sm:$0xff]  }
 0x1cc   :  { %6919 = vmatprep.subr.bf16.mxu0 %v10495_v6  ;;  %7767 = vmatprep.subr.bf16.mxu1 %v10498_v7  ;;  %v8505_v6 = vcombine.high %v53_v61, %v69_v62  ;;  %v10585_v7 = vld [vmem:[%s14789_s1 + $0x1044] ss:$16 sps:$4 sm:$0xff]  }
 0x1cd   :  { %6945 = vmatprep.mubr.bf16.mxu0 %v8473_v8  ;;  %7793 = vmatprep.mubr.bf16.mxu1 %v8473_v8  ;;  %v10588_v8 = vld [vmem:[%s14789_s1 + $0x104c] ss:$16 sps:$4 sm:$0xff]  }
 0x1cf   :  { %6920 = vmatpush1.bf16.msra.mxu0 %v10493_v9  ;;  %7768 = vmatpush1.bf16.msra.mxu1 %v10496_v10  ;;  %v13086_v9 = vld [vmem:[%s14790_s0 + $0x40] sm:$0xff] }
 0x1d0   :  { %6921 = vmatprep.subr.bf16.mxu0 %v10501_v11  ;;  %7769 = vmatprep.subr.bf16.mxu1 %v10504_v12  ;;  %v13091_v10 = vld [vmem:[%s14790_s0 + $0xc0] sm:$0xff]  ;;  %v8504_v11 = vcombine.low %v53_v61, %v69_v62  ;;  %v10658_v62 = vld [vmem:[%s14789_s1 + $0x11c8] ss:$16 sps:$4 sm:$0xff]  }
 0x1d1   :  { %v10583_v12 = vld [vmem:[%s14789_s1 + $0x1040] ss:$16 sps:$4 sm:$0xff]  }
 0x1d2   :  { %v10655_v61 = vld [vmem:[%s14789_s1 + $0x11c0] ss:$16 sps:$4 sm:$0xff]  }
 0x1d3   :  { %6922 = vmatpush1.bf16.msra.mxu0 %v10499_v13  ;;  %7770 = vmatpush1.bf16.msra.mxu1 %v10502_v14  ;;  %v10586_v13 = vld [vmem:[%s14789_s1 + $0x1048] ss:$16 sps:$4 sm:$0xff]   ;;  %v10591_v14 = vld [vmem:[%s14789_s1 + $0x1064] ss:$16 sps:$4 sm:$0xff]  }
 0x1d4   :  { %6923 = vmatprep.subr.bf16.mxu0 %v10507_v15  ;;  %7771 = vmatprep.subr.bf16.mxu1 %v10510_v16  ;;  %v10594_v15 = vld [vmem:[%s14789_s1 + $0x106c] ss:$16 sps:$4 sm:$0xff]   ;;  %v8475_v16 = vcombine.high %v13086_v9, %v13091_v10 }
 0x1d7   :  { %6924 = vmatpush1.bf16.msra.mxu0 %v10505_v17  ;;  %7772 = vmatpush1.bf16.msra.mxu1 %v10508_v18  ;;  %v10589_v17 = vld [vmem:[%s14789_s1 + $0x1060] ss:$16 sps:$4 sm:$0xff]   ;;  %v10592_v18 = vld [vmem:[%s14789_s1 + $0x1068] ss:$16 sps:$4 sm:$0xff]  }
 0x1d8   :  { %6925 = vmatprep.subr.bf16.mxu0 %v10513_v19  ;;  %7773 = vmatprep.subr.bf16.mxu1 %v10516_v20  ;;  %v10597_v19 = vld [vmem:[%s14789_s1 + $0x1084] ss:$16 sps:$4 sm:$0xff]   ;;  %v10600_v20 = vld [vmem:[%s14789_s1 + $0x108c] ss:$16 sps:$4 sm:$0xff]  }
 0x1db   :  { %6926 = vmatpush1.bf16.msra.mxu0 %v10511_v21  ;;  %7774 = vmatpush1.bf16.msra.mxu1 %v10514_v22  ;;  %v10595_v21 = vld [vmem:[%s14789_s1 + $0x1080] ss:$16 sps:$4 sm:$0xff]   ;;  %v10598_v22 = vld [vmem:[%s14789_s1 + $0x1088] ss:$16 sps:$4 sm:$0xff]  }
 0x1dc   :  { %6927 = vmatprep.subr.bf16.mxu0 %v10519_v23  ;;  %7775 = vmatprep.subr.bf16.mxu1 %v10522_v24  ;;  %v10603_v23 = vld [vmem:[%s14789_s1 + $0x10a4] ss:$16 sps:$4 sm:$0xff]   ;;  %v10606_v24 = vld [vmem:[%s14789_s1 + $0x10ac] ss:$16 sps:$4 sm:$0xff]  }
 0x1df   :  { %6928 = vmatpush1.bf16.msra.mxu0 %v10517_v26  ;;  %7776 = vmatpush1.bf16.msra.mxu1 %v10520_v25  ;;  %v10601_v26 = vld [vmem:[%s14789_s1 + $0x10a0] ss:$16 sps:$4 sm:$0xff]   ;;  %v10604_v25 = vld [vmem:[%s14789_s1 + $0x10a8] ss:$16 sps:$4 sm:$0xff]  }
 0x1e0   :  { %6929 = vmatprep.subr.bf16.mxu0 %v10525_v27  ;;  %7777 = vmatprep.subr.bf16.mxu1 %v10528_v28  ;;  %v10609_v27 = vld [vmem:[%s14789_s1 + $0x10c4] ss:$16 sps:$4 sm:$0xff]   ;;  %v10612_v28 = vld [vmem:[%s14789_s1 + $0x10cc] ss:$16 sps:$4 sm:$0xff]  }
 0x1e3   :  { %6930 = vmatpush1.bf16.msra.mxu0 %v10523_v29  ;;  %7778 = vmatpush1.bf16.msra.mxu1 %v10526_v30  ;;  %v10607_v29 = vld [vmem:[%s14789_s1 + $0x10c0] ss:$16 sps:$4 sm:$0xff]   ;;  %v10610_v30 = vld [vmem:[%s14789_s1 + $0x10c8] ss:$16 sps:$4 sm:$0xff]  }
 0x1e4   :  { %6931 = vmatprep.subr.bf16.mxu0 %v10531_v31  ;;  %7779 = vmatprep.subr.bf16.mxu1 %v10534_v32  ;;  %v10615_v31 = vld [vmem:[%s14789_s1 + $0x10e4] ss:$16 sps:$4 sm:$0xff]   ;;  %v10618_v32 = vld [vmem:[%s14789_s1 + $0x10ec] ss:$16 sps:$4 sm:$0xff]  }
 0x1e7   :  { %6932 = vmatpush1.bf16.msra.mxu0 %v10529_v34  ;;  %7780 = vmatpush1.bf16.msra.mxu1 %v10532_v36  ;;  %v10613_v34 = vld [vmem:[%s14789_s1 + $0x10e0] ss:$16 sps:$4 sm:$0xff]   ;;  %v10616_v36 = vld [vmem:[%s14789_s1 + $0x10e8] ss:$16 sps:$4 sm:$0xff]  }
 0x1e8   :  { %6933 = vmatprep.subr.bf16.mxu0 %v10537_v33  ;;  %7781 = vmatprep.subr.bf16.mxu1 %v10540_v35  ;;  %v10621_v33 = vld [vmem:[%s14789_s1 + $0x1104] ss:$16 sps:$4 sm:$0xff]   ;;  %v10624_v35 = vld [vmem:[%s14789_s1 + $0x110c] ss:$16 sps:$4 sm:$0xff]  }
 0x1eb   :  { %6934 = vmatpush1.bf16.msra.mxu0 %v10535_v37  ;;  %7782 = vmatpush1.bf16.msra.mxu1 %v10538_v38  ;;  %v10619_v37 = vld [vmem:[%s14789_s1 + $0x1100] ss:$16 sps:$4 sm:$0xff]   ;;  %v10622_v38 = vld [vmem:[%s14789_s1 + $0x1108] ss:$16 sps:$4 sm:$0xff]  }
 0x1ec   :  { %6935 = vmatprep.subr.bf16.mxu0 %v10543_v39  ;;  %7783 = vmatprep.subr.bf16.mxu1 %v10546_v40  ;;  %v10627_v39 = vld [vmem:[%s14789_s1 + $0x1124] ss:$16 sps:$4 sm:$0xff]   ;;  %v10630_v40 = vld [vmem:[%s14789_s1 + $0x112c] ss:$16 sps:$4 sm:$0xff]  }
 0x1ef   :  { %6936 = vmatpush1.bf16.msra.mxu0 %v10541_v42  ;;  %7784 = vmatpush1.bf16.msra.mxu1 %v10544_v44  ;;  %v10625_v42 = vld [vmem:[%s14789_s1 + $0x1120] ss:$16 sps:$4 sm:$0xff]   ;;  %v10628_v44 = vld [vmem:[%s14789_s1 + $0x1128] ss:$16 sps:$4 sm:$0xff]  }
 0x1f0   :  { %6937 = vmatprep.subr.bf16.mxu0 %v10549_v41  ;;  %7785 = vmatprep.subr.bf16.mxu1 %v10552_v43  ;;  %v10633_v41 = vld [vmem:[%s14789_s1 + $0x1144] ss:$16 sps:$4 sm:$0xff]   ;;  %v10636_v43 = vld [vmem:[%s14789_s1 + $0x114c] ss:$16 sps:$4 sm:$0xff]  }
 0x1f3   :  { %6938 = vmatpush1.bf16.msra.mxu0 %v10547_v45  ;;  %7786 = vmatpush1.bf16.msra.mxu1 %v10550_v46  ;;  %v10631_v45 = vld [vmem:[%s14789_s1 + $0x1140] ss:$16 sps:$4 sm:$0xff]   ;;  %v10634_v46 = vld [vmem:[%s14789_s1 + $0x1148] ss:$16 sps:$4 sm:$0xff]  }
 0x1f4   :  { %6939 = vmatprep.subr.bf16.mxu0 %v10555_v47  ;;  %7787 = vmatprep.subr.bf16.mxu1 %v10558_v48  ;;  %v10639_v47 = vld [vmem:[%s14789_s1 + $0x1164] ss:$16 sps:$4 sm:$0xff]   ;;  %v10642_v48 = vld [vmem:[%s14789_s1 + $0x116c] ss:$16 sps:$4 sm:$0xff]  }
 0x1f7   :  { %6940 = vmatpush1.bf16.msra.mxu0 %v10553_v51  ;;  %7788 = vmatpush1.bf16.msra.mxu1 %v10556_v52  ;;  %v10637_v51 = vld [vmem:[%s14789_s1 + $0x1160] ss:$16 sps:$4 sm:$0xff]   ;;  %v10640_v52 = vld [vmem:[%s14789_s1 + $0x1168] ss:$16 sps:$4 sm:$0xff]  }
 0x1f8   :  { %6941 = vmatprep.subr.bf16.mxu0 %v10561_v49  ;;  %7789 = vmatprep.subr.bf16.mxu1 %v10564_v50  ;;  %v10645_v49 = vld [vmem:[%s14789_s1 + $0x1184] ss:$16 sps:$4 sm:$0xff]   ;;  %v10648_v50 = vld [vmem:[%s14789_s1 + $0x118c] ss:$16 sps:$4 sm:$0xff]  }
 0x1fb   :  { %6942 = vmatpush1.bf16.msra.mxu0 %v10559_v53  ;;  %7790 = vmatpush1.bf16.msra.mxu1 %v10562_v54  ;;  %v10643_v53 = vld [vmem:[%s14789_s1 + $0x1180] ss:$16 sps:$4 sm:$0xff]   ;;  %v10646_v54 = vld [vmem:[%s14789_s1 + $0x1188] ss:$16 sps:$4 sm:$0xff]  }
 0x1fc   :  { %6943 = vmatprep.subr.bf16.mxu0 %v10567_v55  ;;  %7791 = vmatprep.subr.bf16.mxu1 %v10570_v56  ;;  %v10651_v55 = vld [vmem:[%s14789_s1 + $0x11a4] ss:$16 sps:$4 sm:$0xff]   ;;  %v10654_v56 = vld [vmem:[%s14789_s1 + $0x11ac] ss:$16 sps:$4 sm:$0xff]  }
 0x1ff   :  { %6944 = vmatpush1.bf16.msra.mxu0 %v10565_v59  ;;  %7792 = vmatpush1.bf16.msra.mxu1 %v10568_v60  ;;  %v10649_v59 = vld [vmem:[%s14789_s1 + $0x11a0] ss:$16 sps:$4 sm:$0xff]   ;;  %v10652_v60 = vld [vmem:[%s14789_s1 + $0x11a8] ss:$16 sps:$4 sm:$0xff]  }
 0x200   :  { %6966 = vmatprep.subr.bf16.mxu0 %v10573_v57  ;;  %7814 = vmatprep.subr.bf16.mxu1 %v10576_v58  ;;  %v10657_v57 = vld [vmem:[%s14789_s1 + $0x11c4] ss:$16 sps:$4 sm:$0xff]   ;;  %v10660_v58 = vld [vmem:[%s14789_s1 + $0x11cc] ss:$16 sps:$4 sm:$0xff]  }
 0x202   :  { %6946 = vmatmul.mubr.bf16.vlgmr.msra.gmra.mrb[0].mxu0 %v8472_v63  ;;  %7794 = vmatmul.mubr.bf16.vlgmr.msra.gmra.mrb[0].mxu1 %v8472_v63  ;;  %v10663_v63 = vld [vmem:[%s14789_s1 + $0x11e4] ss:$16 sps:$4 sm:$0xff]  }
 0x203   :  { %6967 = vmatpush1.bf16.msra.mxu0 %v10571_v0  ;;  %7815 = vmatpush1.bf16.msra.mxu1 %v10574_v3  ;;  %v10666_v0 = vld [vmem:[%s14789_s1 + $0x11ec] ss:$16 sps:$4 sm:$0xff]   ;;  %v10661_v3 = vld [vmem:[%s14789_s1 + $0x11e0] ss:$16 sps:$4 sm:$0xff]  }
 0x204   :  { %6968 = vmatprep.subr.bf16.mxu0 %v10579_v4  ;;  %7816 = vmatprep.subr.bf16.mxu1 %v10582_v1  ;;  %v10664_v4 = vld [vmem:[%s14789_s1 + $0x11e8] ss:$16 sps:$4 sm:$0xff]   ;;  %v10669_v1 = vld [vmem:[%s14789_s1 + $0x1204] ss:$16 sps:$4 sm:$0xff]  }
 0x205   :  { %6955 = vmatprep.mubr.bf16.mxu0 %v8505_v6  ;;  %7803 = vmatprep.mubr.bf16.mxu1 %v8505_v6  ;;  %v70_v6 = vld [vmem:[%s14790_s0 + $0x1c0] sm:$0xff] }
 0x207   :  { %6969 = vmatpush1.bf16.msra.mxu0 %v10577_v2  ;;  %7817 = vmatpush1.bf16.msra.mxu1 %v10580_v5  ;;  %v10672_v2 = vld [vmem:[%s14789_s1 + $0x120c] ss:$16 sps:$4 sm:$0xff]   ;;  %v54_v5 = vld [vmem:[%s14790_s0 + $0x140] sm:$0xff] }
 0x208   :  { %6970 = vmatprep.subr.bf16.mxu0 %v10585_v7  ;;  %7818 = vmatprep.subr.bf16.mxu1 %v10588_v8  ;;  %v8474_v7 = vcombine.low %v13086_v9, %v13091_v10  ;;  %v10667_v8 = vld [vmem:[%s14789_s1 + $0x1200] ss:$16 sps:$4 sm:$0xff]   ;;  %v10678_v9 = vld [vmem:[%s14789_s1 + $0x122c] ss:$16 sps:$4 sm:$0xff]  }
 0x209   :  { %v10673_v10 = vld [vmem:[%s14789_s1 + $0x1220] ss:$16 sps:$4 sm:$0xff]  }
 0x20a   :  { %6956 = vmatmul.mubr.bf16.gmra.mrb[4].mxu0 %v8504_v11  ;;  %7804 = vmatmul.mubr.bf16.gmra.mrb[4].mxu1 %v8504_v11  ;;  %v10670_v11 = vld [vmem:[%s14789_s1 + $0x1208] ss:$16 sps:$4 sm:$0xff]  }
 0x20b   :  { %6971 = vmatpush1.bf16.msra.mxu0 %v10583_v12  ;;  %7819 = vmatpush1.bf16.msra.mxu1 %v10586_v13  ;;  %v10675_v12 = vld [vmem:[%s14789_s1 + $0x1224] ss:$16 sps:$4 sm:$0xff]   ;;  %v10676_v13 = vld [vmem:[%s14789_s1 + $0x1228] ss:$16 sps:$4 sm:$0xff]  }
 0x20c   :  { %6972 = vmatprep.subr.bf16.mxu0 %v10591_v14  ;;  %7820 = vmatprep.subr.bf16.mxu1 %v10594_v15  ;;  %v8507_v14 = vcombine.high %v54_v5, %v70_v6  ;;  %v10681_v15 = vld [vmem:[%s14789_s1 + $0x1244] ss:$16 sps:$4 sm:$0xff]  }
 0x20d   :  { %6998 = vmatprep.mubr.bf16.mxu0 %v8475_v16  ;;  %7846 = vmatprep.mubr.bf16.mxu1 %v8475_v16  ;;  %v10684_v16 = vld [vmem:[%s14789_s1 + $0x124c] ss:$16 sps:$4 sm:$0xff]  }
 0x20f   :  { %6973 = vmatpush1.bf16.msra.mxu0 %v10589_v17  ;;  %7821 = vmatpush1.bf16.msra.mxu1 %v10592_v18  ;;  %v13298_v17 = vld [vmem:[%s14790_s0 + $0x48] sm:$0xff] }
 0x210   :  { %6974 = vmatprep.subr.bf16.mxu0 %v10597_v19  ;;  %7822 = vmatprep.subr.bf16.mxu1 %v10600_v20  ;;  %v13303_v18 = vld [vmem:[%s14790_s0 + $0xc8] sm:$0xff]  ;;  %v8506_v19 = vcombine.low %v54_v5, %v70_v6  ;;  %v10679_v20 = vld [vmem:[%s14789_s1 + $0x1240] ss:$16 sps:$4 sm:$0xff]  }
 0x211   :  { %v10751_v5 = vld [vmem:[%s14789_s1 + $0x13c0] ss:$16 sps:$4 sm:$0xff]   ;;  %v10754_v6 = vld [vmem:[%s14789_s1 + $0x13c8] ss:$16 sps:$4 sm:$0xff]  }
 0x213   :  { %6975 = vmatpush1.bf16.msra.mxu0 %v10595_v21  ;;  %7823 = vmatpush1.bf16.msra.mxu1 %v10598_v22  ;;  %v10682_v21 = vld [vmem:[%s14789_s1 + $0x1248] ss:$16 sps:$4 sm:$0xff]   ;;  %v10687_v22 = vld [vmem:[%s14789_s1 + $0x1264] ss:$16 sps:$4 sm:$0xff]  }
 0x214   :  { %6976 = vmatprep.subr.bf16.mxu0 %v10603_v23  ;;  %7824 = vmatprep.subr.bf16.mxu1 %v10606_v24  ;;  %v10690_v23 = vld [vmem:[%s14789_s1 + $0x126c] ss:$16 sps:$4 sm:$0xff]   ;;  %v8477_v24 = vcombine.high %v13298_v17, %v13303_v18 }
 0x217   :  { %6977 = vmatpush1.bf16.msra.mxu0 %v10601_v26  ;;  %7825 = vmatpush1.bf16.msra.mxu1 %v10604_v25  ;;  %v10685_v26 = vld [vmem:[%s14789_s1 + $0x1260] ss:$16 sps:$4 sm:$0xff]   ;;  %v10688_v25 = vld [vmem:[%s14789_s1 + $0x1268] ss:$16 sps:$4 sm:$0xff]  }
 0x218   :  { %6978 = vmatprep.subr.bf16.mxu0 %v10609_v27  ;;  %7826 = vmatprep.subr.bf16.mxu1 %v10612_v28  ;;  %v10693_v27 = vld [vmem:[%s14789_s1 + $0x1284] ss:$16 sps:$4 sm:$0xff]   ;;  %v10696_v28 = vld [vmem:[%s14789_s1 + $0x128c] ss:$16 sps:$4 sm:$0xff]  }
 0x21b   :  { %6979 = vmatpush1.bf16.msra.mxu0 %v10607_v29  ;;  %7827 = vmatpush1.bf16.msra.mxu1 %v10610_v30  ;;  %v10691_v29 = vld [vmem:[%s14789_s1 + $0x1280] ss:$16 sps:$4 sm:$0xff]   ;;  %v10694_v30 = vld [vmem:[%s14789_s1 + $0x1288] ss:$16 sps:$4 sm:$0xff]  }
 0x21c   :  { %6980 = vmatprep.subr.bf16.mxu0 %v10615_v31  ;;  %7828 = vmatprep.subr.bf16.mxu1 %v10618_v32  ;;  %v10699_v31 = vld [vmem:[%s14789_s1 + $0x12a4] ss:$16 sps:$4 sm:$0xff]   ;;  %v10702_v32 = vld [vmem:[%s14789_s1 + $0x12ac] ss:$16 sps:$4 sm:$0xff]  }
 0x21f   :  { %6981 = vmatpush1.bf16.msra.mxu0 %v10613_v34  ;;  %7829 = vmatpush1.bf16.msra.mxu1 %v10616_v36  ;;  %v10697_v34 = vld [vmem:[%s14789_s1 + $0x12a0] ss:$16 sps:$4 sm:$0xff]   ;;  %v10700_v36 = vld [vmem:[%s14789_s1 + $0x12a8] ss:$16 sps:$4 sm:$0xff]  }
 0x220   :  { %6982 = vmatprep.subr.bf16.mxu0 %v10621_v33  ;;  %7830 = vmatprep.subr.bf16.mxu1 %v10624_v35  ;;  %v10705_v33 = vld [vmem:[%s14789_s1 + $0x12c4] ss:$16 sps:$4 sm:$0xff]   ;;  %v10708_v35 = vld [vmem:[%s14789_s1 + $0x12cc] ss:$16 sps:$4 sm:$0xff]  }
 0x223   :  { %6983 = vmatpush1.bf16.msra.mxu0 %v10619_v37  ;;  %7831 = vmatpush1.bf16.msra.mxu1 %v10622_v38  ;;  %v10703_v37 = vld [vmem:[%s14789_s1 + $0x12c0] ss:$16 sps:$4 sm:$0xff]   ;;  %v10706_v38 = vld [vmem:[%s14789_s1 + $0x12c8] ss:$16 sps:$4 sm:$0xff]  }
 0x224   :  { %6984 = vmatprep.subr.bf16.mxu0 %v10627_v39  ;;  %7832 = vmatprep.subr.bf16.mxu1 %v10630_v40  ;;  %v10711_v39 = vld [vmem:[%s14789_s1 + $0x12e4] ss:$16 sps:$4 sm:$0xff]   ;;  %v10714_v40 = vld [vmem:[%s14789_s1 + $0x12ec] ss:$16 sps:$4 sm:$0xff]  }
 0x227   :  { %6985 = vmatpush1.bf16.msra.mxu0 %v10625_v42  ;;  %7833 = vmatpush1.bf16.msra.mxu1 %v10628_v44  ;;  %v10709_v42 = vld [vmem:[%s14789_s1 + $0x12e0] ss:$16 sps:$4 sm:$0xff]   ;;  %v10712_v44 = vld [vmem:[%s14789_s1 + $0x12e8] ss:$16 sps:$4 sm:$0xff]  }
 0x228   :  { %6986 = vmatprep.subr.bf16.mxu0 %v10633_v41  ;;  %7834 = vmatprep.subr.bf16.mxu1 %v10636_v43  ;;  %v10717_v41 = vld [vmem:[%s14789_s1 + $0x1304] ss:$16 sps:$4 sm:$0xff]   ;;  %v10720_v43 = vld [vmem:[%s14789_s1 + $0x130c] ss:$16 sps:$4 sm:$0xff]  }
 0x22b   :  { %6987 = vmatpush1.bf16.msra.mxu0 %v10631_v45  ;;  %7835 = vmatpush1.bf16.msra.mxu1 %v10634_v46  ;;  %v10715_v45 = vld [vmem:[%s14789_s1 + $0x1300] ss:$16 sps:$4 sm:$0xff]   ;;  %v10718_v46 = vld [vmem:[%s14789_s1 + $0x1308] ss:$16 sps:$4 sm:$0xff]  }
 0x22c   :  { %6988 = vmatprep.subr.bf16.mxu0 %v10639_v47  ;;  %7836 = vmatprep.subr.bf16.mxu1 %v10642_v48  ;;  %v10723_v47 = vld [vmem:[%s14789_s1 + $0x1324] ss:$16 sps:$4 sm:$0xff]   ;;  %v10726_v48 = vld [vmem:[%s14789_s1 + $0x132c] ss:$16 sps:$4 sm:$0xff]  }
 0x22f   :  { %6989 = vmatpush1.bf16.msra.mxu0 %v10637_v51  ;;  %7837 = vmatpush1.bf16.msra.mxu1 %v10640_v52  ;;  %v10721_v51 = vld [vmem:[%s14789_s1 + $0x1320] ss:$16 sps:$4 sm:$0xff]   ;;  %v10724_v52 = vld [vmem:[%s14789_s1 + $0x1328] ss:$16 sps:$4 sm:$0xff]  }
 0x230   :  { %6990 = vmatprep.subr.bf16.mxu0 %v10645_v49  ;;  %7838 = vmatprep.subr.bf16.mxu1 %v10648_v50  ;;  %v10729_v49 = vld [vmem:[%s14789_s1 + $0x1344] ss:$16 sps:$4 sm:$0xff]   ;;  %v10732_v50 = vld [vmem:[%s14789_s1 + $0x134c] ss:$16 sps:$4 sm:$0xff]  }
 0x233   :  { %6991 = vmatpush1.bf16.msra.mxu0 %v10643_v53  ;;  %7839 = vmatpush1.bf16.msra.mxu1 %v10646_v54  ;;  %v10727_v53 = vld [vmem:[%s14789_s1 + $0x1340] ss:$16 sps:$4 sm:$0xff]   ;;  %v10730_v54 = vld [vmem:[%s14789_s1 + $0x1348] ss:$16 sps:$4 sm:$0xff]  }
 0x234   :  { %6992 = vmatprep.subr.bf16.mxu0 %v10651_v55  ;;  %7840 = vmatprep.subr.bf16.mxu1 %v10654_v56  ;;  %v10735_v55 = vld [vmem:[%s14789_s1 + $0x1364] ss:$16 sps:$4 sm:$0xff]   ;;  %v10738_v56 = vld [vmem:[%s14789_s1 + $0x136c] ss:$16 sps:$4 sm:$0xff]  }
 0x237   :  { %6993 = vmatpush1.bf16.msra.mxu0 %v10649_v59  ;;  %7841 = vmatpush1.bf16.msra.mxu1 %v10652_v60  ;;  %v10733_v59 = vld [vmem:[%s14789_s1 + $0x1360] ss:$16 sps:$4 sm:$0xff]   ;;  %v10736_v60 = vld [vmem:[%s14789_s1 + $0x1368] ss:$16 sps:$4 sm:$0xff]  }
 0x238   :  { %6994 = vmatprep.subr.bf16.mxu0 %v10657_v57  ;;  %7842 = vmatprep.subr.bf16.mxu1 %v10660_v58  ;;  %v10741_v57 = vld [vmem:[%s14789_s1 + $0x1384] ss:$16 sps:$4 sm:$0xff]   ;;  %v10744_v58 = vld [vmem:[%s14789_s1 + $0x138c] ss:$16 sps:$4 sm:$0xff]  }
 0x23b   :  { %6995 = vmatpush1.bf16.msra.mxu0 %v10655_v61  ;;  %7843 = vmatpush1.bf16.msra.mxu1 %v10658_v62  ;;  %v10739_v61 = vld [vmem:[%s14789_s1 + $0x1380] ss:$16 sps:$4 sm:$0xff]   ;;  %v10742_v62 = vld [vmem:[%s14789_s1 + $0x1388] ss:$16 sps:$4 sm:$0xff]  }
 0x23c   :  { %6996 = vmatprep.subr.bf16.mxu0 %v10663_v63  ;;  %7844 = vmatprep.subr.bf16.mxu1 %v10666_v0  ;;  %v10747_v63 = vld [vmem:[%s14789_s1 + $0x13a4] ss:$16 sps:$4 sm:$0xff]   ;;  %v10750_v0 = vld [vmem:[%s14789_s1 + $0x13ac] ss:$16 sps:$4 sm:$0xff]  }
 0x23f   :  { %6997 = vmatpush1.bf16.msra.mxu0 %v10661_v3  ;;  %7845 = vmatpush1.bf16.msra.mxu1 %v10664_v4  ;;  %v10745_v3 = vld [vmem:[%s14789_s1 + $0x13a0] ss:$16 sps:$4 sm:$0xff]   ;;  %v10748_v4 = vld [vmem:[%s14789_s1 + $0x13a8] ss:$16 sps:$4 sm:$0xff]  }
 0x240   :  { %7019 = vmatprep.subr.bf16.mxu0 %v10669_v1  ;;  %7867 = vmatprep.subr.bf16.mxu1 %v10672_v2  ;;  %v10753_v1 = vld [vmem:[%s14789_s1 + $0x13c4] ss:$16 sps:$4 sm:$0xff]   ;;  %v10756_v2 = vld [vmem:[%s14789_s1 + $0x13cc] ss:$16 sps:$4 sm:$0xff]  }
 0x242   :  { %6999 = vmatmul.mubr.bf16.vlgmr.msra.gmra.mrb[0].mxu0 %v8474_v7  ;;  %7847 = vmatmul.mubr.bf16.vlgmr.msra.gmra.mrb[0].mxu1 %v8474_v7  ;;  %v10759_v7 = vld [vmem:[%s14789_s1 + $0x13e4] ss:$16 sps:$4 sm:$0xff]  }
 0x243   :  { %7020 = vmatpush1.bf16.msra.mxu0 %v10667_v8  ;;  %7868 = vmatpush1.bf16.msra.mxu1 %v10670_v11  ;;  %v10762_v8 = vld [vmem:[%s14789_s1 + $0x13ec] ss:$16 sps:$4 sm:$0xff]   ;;  %v10757_v11 = vld [vmem:[%s14789_s1 + $0x13e0] ss:$16 sps:$4 sm:$0xff]  }
 0x244   :  { %7021 = vmatprep.subr.bf16.mxu0 %v10675_v12  ;;  %7869 = vmatprep.subr.bf16.mxu1 %v10678_v9  ;;  %v10760_v12 = vld [vmem:[%s14789_s1 + $0x13e8] ss:$16 sps:$4 sm:$0xff]   ;;  %v10765_v9 = vld [vmem:[%s14789_s1 + $0x1404] ss:$16 sps:$4 sm:$0xff]  }
 0x245   :  { %7008 = vmatprep.mubr.bf16.mxu0 %v8507_v14  ;;  %7856 = vmatprep.mubr.bf16.mxu1 %v8507_v14  ;;  %v55_v14 = vld [vmem:[%s14790_s0 + $0x148] sm:$0xff] }
 0x247   :  { %7022 = vmatpush1.bf16.msra.mxu0 %v10673_v10  ;;  %7870 = vmatpush1.bf16.msra.mxu1 %v10676_v13  ;;  %v10768_v10 = vld [vmem:[%s14789_s1 + $0x140c] ss:$16 sps:$4 sm:$0xff]   ;;  %v8476_v13 = vcombine.low %v13298_v17, %v13303_v18  ;;  %v10771_v17 = vld [vmem:[%s14789_s1 + $0x1424] ss:$16 sps:$4 sm:$0xff]  }
 0x248   :  { %7023 = vmatprep.subr.bf16.mxu0 %v10681_v15  ;;  %7871 = vmatprep.subr.bf16.mxu1 %v10684_v16  ;;  %v71_v15 = vld [vmem:[%s14790_s0 + $0x1c8] sm:$0xff]  ;;  %v10763_v16 = vld [vmem:[%s14789_s1 + $0x1400] ss:$16 sps:$4 sm:$0xff]  }
 0x249   :  { %v10774_v18 = vld [vmem:[%s14789_s1 + $0x142c] ss:$16 sps:$4 sm:$0xff]  }
 0x24a   :  { %7009 = vmatmul.mubr.bf16.gmra.mrb[4].mxu0 %v8506_v19  ;;  %7857 = vmatmul.mubr.bf16.gmra.mrb[4].mxu1 %v8506_v19  ;;  %v10766_v19 = vld [vmem:[%s14789_s1 + $0x1408] ss:$16 sps:$4 sm:$0xff]  }
 0x24b   :  { %7024 = vmatpush1.bf16.msra.mxu0 %v10679_v20  ;;  %7872 = vmatpush1.bf16.msra.mxu1 %v10682_v21  ;;  %v8509_v20 = vcombine.high %v55_v14, %v71_v15  ;;  %v10769_v21 = vld [vmem:[%s14789_s1 + $0x1420] ss:$16 sps:$4 sm:$0xff]  }
 0x24c   :  { %7025 = vmatprep.subr.bf16.mxu0 %v10687_v22  ;;  %7873 = vmatprep.subr.bf16.mxu1 %v10690_v23  ;;  %v10772_v22 = vld [vmem:[%s14789_s1 + $0x1428] ss:$16 sps:$4 sm:$0xff]   ;;  %v10777_v23 = vld [vmem:[%s14789_s1 + $0x1444] ss:$16 sps:$4 sm:$0xff]  }
 0x24d   :  { %7051 = vmatprep.mubr.bf16.mxu0 %v8477_v24  ;;  %7899 = vmatprep.mubr.bf16.mxu1 %v8477_v24  ;;  %v10780_v24 = vld [vmem:[%s14789_s1 + $0x144c] ss:$16 sps:$4 sm:$0xff]  }
 0x24f   :  { %7026 = vmatpush1.bf16.msra.mxu0 %v10685_v26  ;;  %7874 = vmatpush1.bf16.msra.mxu1 %v10688_v25  ;;  %v8508_v26 = vcombine.low %v55_v14, %v71_v15  ;;  %v13510_v25 = vld [vmem:[%s14790_s0 + $0x50] sm:$0xff]  ;;  %v10850_v14 = vld [vmem:[%s14789_s1 + $0x15c8] ss:$16 sps:$4 sm:$0xff]  }
 0x250   :  { %7027 = vmatprep.subr.bf16.mxu0 %v10693_v27  ;;  %7875 = vmatprep.subr.bf16.mxu1 %v10696_v28  ;;  %v13515_v27 = vld [vmem:[%s14790_s0 + $0xd0] sm:$0xff] }
 0x251   :  { %v10775_v28 = vld [vmem:[%s14789_s1 + $0x1440] ss:$16 sps:$4 sm:$0xff]   ;;  %v10855_v15 = vld [vmem:[%s14789_s1 + $0x15e4] ss:$16 sps:$4 sm:$0xff]  }
 0x253   :  { %7028 = vmatpush1.bf16.msra.mxu0 %v10691_v29  ;;  %7876 = vmatpush1.bf16.msra.mxu1 %v10694_v30  ;;  %v10778_v29 = vld [vmem:[%s14789_s1 + $0x1448] ss:$16 sps:$4 sm:$0xff]   ;;  %v10783_v30 = vld [vmem:[%s14789_s1 + $0x1464] ss:$16 sps:$4 sm:$0xff]  }
 0x254   :  { %7029 = vmatprep.subr.bf16.mxu0 %v10699_v31  ;;  %7877 = vmatprep.subr.bf16.mxu1 %v10702_v32  ;;  %v10786_v31 = vld [vmem:[%s14789_s1 + $0x146c] ss:$16 sps:$4 sm:$0xff]   ;;  %v8479_v32 = vcombine.high %v13510_v25, %v13515_v27 }
 0x257   :  { %7030 = vmatpush1.bf16.msra.mxu0 %v10697_v34  ;;  %7878 = vmatpush1.bf16.msra.mxu1 %v10700_v36  ;;  %v10781_v34 = vld [vmem:[%s14789_s1 + $0x1460] ss:$16 sps:$4 sm:$0xff]   ;;  %v10784_v36 = vld [vmem:[%s14789_s1 + $0x1468] ss:$16 sps:$4 sm:$0xff]  }
 0x258   :  { %7031 = vmatprep.subr.bf16.mxu0 %v10705_v33  ;;  %7879 = vmatprep.subr.bf16.mxu1 %v10708_v35  ;;  %v10789_v33 = vld [vmem:[%s14789_s1 + $0x1484] ss:$16 sps:$4 sm:$0xff]   ;;  %v10792_v35 = vld [vmem:[%s14789_s1 + $0x148c] ss:$16 sps:$4 sm:$0xff]  }
 0x25b   :  { %7032 = vmatpush1.bf16.msra.mxu0 %v10703_v37  ;;  %7880 = vmatpush1.bf16.msra.mxu1 %v10706_v38  ;;  %v10787_v37 = vld [vmem:[%s14789_s1 + $0x1480] ss:$16 sps:$4 sm:$0xff]   ;;  %v10790_v38 = vld [vmem:[%s14789_s1 + $0x1488] ss:$16 sps:$4 sm:$0xff]  }
 0x25c   :  { %7033 = vmatprep.subr.bf16.mxu0 %v10711_v39  ;;  %7881 = vmatprep.subr.bf16.mxu1 %v10714_v40  ;;  %v10795_v39 = vld [vmem:[%s14789_s1 + $0x14a4] ss:$16 sps:$4 sm:$0xff]   ;;  %v10798_v40 = vld [vmem:[%s14789_s1 + $0x14ac] ss:$16 sps:$4 sm:$0xff]  }
 0x25f   :  { %7034 = vmatpush1.bf16.msra.mxu0 %v10709_v42  ;;  %7882 = vmatpush1.bf16.msra.mxu1 %v10712_v44  ;;  %v10793_v42 = vld [vmem:[%s14789_s1 + $0x14a0] ss:$16 sps:$4 sm:$0xff]   ;;  %v10796_v44 = vld [vmem:[%s14789_s1 + $0x14a8] ss:$16 sps:$4 sm:$0xff]  }
 0x260   :  { %7035 = vmatprep.subr.bf16.mxu0 %v10717_v41  ;;  %7883 = vmatprep.subr.bf16.mxu1 %v10720_v43  ;;  %v10801_v41 = vld [vmem:[%s14789_s1 + $0x14c4] ss:$16 sps:$4 sm:$0xff]   ;;  %v10804_v43 = vld [vmem:[%s14789_s1 + $0x14cc] ss:$16 sps:$4 sm:$0xff]  }
 0x263   :  { %7036 = vmatpush1.bf16.msra.mxu0 %v10715_v45  ;;  %7884 = vmatpush1.bf16.msra.mxu1 %v10718_v46  ;;  %v10799_v45 = vld [vmem:[%s14789_s1 + $0x14c0] ss:$16 sps:$4 sm:$0xff]   ;;  %v10802_v46 = vld [vmem:[%s14789_s1 + $0x14c8] ss:$16 sps:$4 sm:$0xff]  }
 0x264   :  { %7037 = vmatprep.subr.bf16.mxu0 %v10723_v47  ;;  %7885 = vmatprep.subr.bf16.mxu1 %v10726_v48  ;;  %v10807_v47 = vld [vmem:[%s14789_s1 + $0x14e4] ss:$16 sps:$4 sm:$0xff]   ;;  %v10810_v48 = vld [vmem:[%s14789_s1 + $0x14ec] ss:$16 sps:$4 sm:$0xff]  }
 0x267   :  { %7038 = vmatpush1.bf16.msra.mxu0 %v10721_v51  ;;  %7886 = vmatpush1.bf16.msra.mxu1 %v10724_v52  ;;  %v10805_v51 = vld [vmem:[%s14789_s1 + $0x14e0] ss:$16 sps:$4 sm:$0xff]   ;;  %v10808_v52 = vld [vmem:[%s14789_s1 + $0x14e8] ss:$16 sps:$4 sm:$0xff]  }
 0x268   :  { %7039 = vmatprep.subr.bf16.mxu0 %v10729_v49  ;;  %7887 = vmatprep.subr.bf16.mxu1 %v10732_v50  ;;  %v10813_v49 = vld [vmem:[%s14789_s1 + $0x1504] ss:$16 sps:$4 sm:$0xff]   ;;  %v10816_v50 = vld [vmem:[%s14789_s1 + $0x150c] ss:$16 sps:$4 sm:$0xff]  }
 0x26b   :  { %7040 = vmatpush1.bf16.msra.mxu0 %v10727_v53  ;;  %7888 = vmatpush1.bf16.msra.mxu1 %v10730_v54  ;;  %v10811_v53 = vld [vmem:[%s14789_s1 + $0x1500] ss:$16 sps:$4 sm:$0xff]   ;;  %v10814_v54 = vld [vmem:[%s14789_s1 + $0x1508] ss:$16 sps:$4 sm:$0xff]  }
 0x26c   :  { %7041 = vmatprep.subr.bf16.mxu0 %v10735_v55  ;;  %7889 = vmatprep.subr.bf16.mxu1 %v10738_v56  ;;  %v10819_v55 = vld [vmem:[%s14789_s1 + $0x1524] ss:$16 sps:$4 sm:$0xff]   ;;  %v10822_v56 = vld [vmem:[%s14789_s1 + $0x152c] ss:$16 sps:$4 sm:$0xff]  }
 0x26f   :  { %7042 = vmatpush1.bf16.msra.mxu0 %v10733_v59  ;;  %7890 = vmatpush1.bf16.msra.mxu1 %v10736_v60  ;;  %v10817_v59 = vld [vmem:[%s14789_s1 + $0x1520] ss:$16 sps:$4 sm:$0xff]   ;;  %v10820_v60 = vld [vmem:[%s14789_s1 + $0x1528] ss:$16 sps:$4 sm:$0xff]  }
 0x270   :  { %7043 = vmatprep.subr.bf16.mxu0 %v10741_v57  ;;  %7891 = vmatprep.subr.bf16.mxu1 %v10744_v58  ;;  %v10825_v57 = vld [vmem:[%s14789_s1 + $0x1544] ss:$16 sps:$4 sm:$0xff]   ;;  %v10828_v58 = vld [vmem:[%s14789_s1 + $0x154c] ss:$16 sps:$4 sm:$0xff]  }
 0x273   :  { %7044 = vmatpush1.bf16.msra.mxu0 %v10739_v61  ;;  %7892 = vmatpush1.bf16.msra.mxu1 %v10742_v62  ;;  %v10823_v61 = vld [vmem:[%s14789_s1 + $0x1540] ss:$16 sps:$4 sm:$0xff]   ;;  %v10826_v62 = vld [vmem:[%s14789_s1 + $0x1548] ss:$16 sps:$4 sm:$0xff]  }
 0x274   :  { %7045 = vmatprep.subr.bf16.mxu0 %v10747_v63  ;;  %7893 = vmatprep.subr.bf16.mxu1 %v10750_v0  ;;  %v10831_v63 = vld [vmem:[%s14789_s1 + $0x1564] ss:$16 sps:$4 sm:$0xff]   ;;  %v10834_v0 = vld [vmem:[%s14789_s1 + $0x156c] ss:$16 sps:$4 sm:$0xff]  }
 0x277   :  { %7046 = vmatpush1.bf16.msra.mxu0 %v10745_v3  ;;  %7894 = vmatpush1.bf16.msra.mxu1 %v10748_v4  ;;  %v10829_v3 = vld [vmem:[%s14789_s1 + $0x1560] ss:$16 sps:$4 sm:$0xff]   ;;  %v10832_v4 = vld [vmem:[%s14789_s1 + $0x1568] ss:$16 sps:$4 sm:$0xff]  }
 0x278   :  { %7047 = vmatprep.subr.bf16.mxu0 %v10753_v1  ;;  %7895 = vmatprep.subr.bf16.mxu1 %v10756_v2  ;;  %v10837_v1 = vld [vmem:[%s14789_s1 + $0x1584] ss:$16 sps:$4 sm:$0xff]   ;;  %v10840_v2 = vld [vmem:[%s14789_s1 + $0x158c] ss:$16 sps:$4 sm:$0xff]  }
 0x27b   :  { %7048 = vmatpush1.bf16.msra.mxu0 %v10751_v5  ;;  %7896 = vmatpush1.bf16.msra.mxu1 %v10754_v6  ;;  %v10835_v5 = vld [vmem:[%s14789_s1 + $0x1580] ss:$16 sps:$4 sm:$0xff]   ;;  %v10838_v6 = vld [vmem:[%s14789_s1 + $0x1588] ss:$16 sps:$4 sm:$0xff]  }
 0x27c   :  { %7049 = vmatprep.subr.bf16.mxu0 %v10759_v7  ;;  %7897 = vmatprep.subr.bf16.mxu1 %v10762_v8  ;;  %v10843_v7 = vld [vmem:[%s14789_s1 + $0x15a4] ss:$16 sps:$4 sm:$0xff]   ;;  %v10846_v8 = vld [vmem:[%s14789_s1 + $0x15ac] ss:$16 sps:$4 sm:$0xff]  }
 0x27f   :  { %7050 = vmatpush1.bf16.msra.mxu0 %v10757_v11  ;;  %7898 = vmatpush1.bf16.msra.mxu1 %v10760_v12  ;;  %v10841_v11 = vld [vmem:[%s14789_s1 + $0x15a0] ss:$16 sps:$4 sm:$0xff]   ;;  %v10844_v12 = vld [vmem:[%s14789_s1 + $0x15a8] ss:$16 sps:$4 sm:$0xff]  }
 0x280   :  { %7072 = vmatprep.subr.bf16.mxu0 %v10765_v9  ;;  %7920 = vmatprep.subr.bf16.mxu1 %v10768_v10  ;;  %v10849_v9 = vld [vmem:[%s14789_s1 + $0x15c4] ss:$16 sps:$4 sm:$0xff]   ;;  %v10852_v10 = vld [vmem:[%s14789_s1 + $0x15cc] ss:$16 sps:$4 sm:$0xff]  }
 0x282   :  { %7052 = vmatmul.mubr.bf16.vlgmr.msra.gmra.mrb[0].mxu0 %v8476_v13  ;;  %7900 = vmatmul.mubr.bf16.vlgmr.msra.gmra.mrb[0].mxu1 %v8476_v13  ;;  %v10847_v13 = vld [vmem:[%s14789_s1 + $0x15c0] ss:$16 sps:$4 sm:$0xff]  }
 0x283   :  { %7073 = vmatpush1.bf16.msra.mxu0 %v10763_v16  ;;  %7921 = vmatpush1.bf16.msra.mxu1 %v10766_v19  ;;  %v10858_v16 = vld [vmem:[%s14789_s1 + $0x15ec] ss:$16 sps:$4 sm:$0xff]   ;;  %v10853_v19 = vld [vmem:[%s14789_s1 + $0x15e0] ss:$16 sps:$4 sm:$0xff]  }
 0x284   :  { %7074 = vmatprep.subr.bf16.mxu0 %v10771_v17  ;;  %7922 = vmatprep.subr.bf16.mxu1 %v10774_v18  ;;  %v10856_v17 = vld [vmem:[%s14789_s1 + $0x15e8] ss:$16 sps:$4 sm:$0xff]   ;;  %v10861_v18 = vld [vmem:[%s14789_s1 + $0x1604] ss:$16 sps:$4 sm:$0xff]  }
 0x285   :  { %7061 = vmatprep.mubr.bf16.mxu0 %v8509_v20  ;;  %7909 = vmatprep.mubr.bf16.mxu1 %v8509_v20  ;;  %v10864_v20 = vld [vmem:[%s14789_s1 + $0x160c] ss:$16 sps:$4 sm:$0xff]  }
 0x287   :  { %7075 = vmatpush1.bf16.msra.mxu0 %v10769_v21  ;;  %7923 = vmatpush1.bf16.msra.mxu1 %v10772_v22  ;;  %v8478_v21 = vcombine.low %v13510_v25, %v13515_v27  ;;  %v56_v22 = vld [vmem:[%s14790_s0 + $0x150] sm:$0xff]  ;;  %v10870_v27 = vld [vmem:[%s14789_s1 + $0x162c] ss:$16 sps:$4 sm:$0xff]  }
 0x288   :  { %7076 = vmatprep.subr.bf16.mxu0 %v10777_v23  ;;  %7924 = vmatprep.subr.bf16.mxu1 %v10780_v24  ;;  %v72_v23 = vld [vmem:[%s14790_s0 + $0x1d0] sm:$0xff] }
 0x289   :  { %v10859_v24 = vld [vmem:[%s14789_s1 + $0x1600] ss:$16 sps:$4 sm:$0xff]   ;;  %v10867_v25 = vld [vmem:[%s14789_s1 + $0x1624] ss:$16 sps:$4 sm:$0xff]  }
 0x28a   :  { %7062 = vmatmul.mubr.bf16.gmra.mrb[4].mxu0 %v8508_v26  ;;  %7910 = vmatmul.mubr.bf16.gmra.mrb[4].mxu1 %v8508_v26  ;;  %v10862_v26 = vld [vmem:[%s14789_s1 + $0x1608] ss:$16 sps:$4 sm:$0xff]  }
 0x28b   :  { %7077 = vmatpush1.bf16.msra.mxu0 %v10775_v28  ;;  %7925 = vmatpush1.bf16.msra.mxu1 %v10778_v29  ;;  %v8511_v28 = vcombine.high %v56_v22, %v72_v23  ;;  %v10865_v29 = vld [vmem:[%s14789_s1 + $0x1620] ss:$16 sps:$4 sm:$0xff]  }
 0x28c   :  { %7078 = vmatprep.subr.bf16.mxu0 %v10783_v30  ;;  %7926 = vmatprep.subr.bf16.mxu1 %v10786_v31  ;;  %v10868_v30 = vld [vmem:[%s14789_s1 + $0x1628] ss:$16 sps:$4 sm:$0xff]   ;;  %v10873_v31 = vld [vmem:[%s14789_s1 + $0x1644] ss:$16 sps:$4 sm:$0xff]  }
 0x28d   :  { %7104 = vmatprep.mubr.bf16.mxu0 %v8479_v32  ;;  %7952 = vmatprep.mubr.bf16.mxu1 %v8479_v32  ;;  %v10876_v32 = vld [vmem:[%s14789_s1 + $0x164c] ss:$16 sps:$4 sm:$0xff]  }
 0x28f   :  { %7079 = vmatpush1.bf16.msra.mxu0 %v10781_v34  ;;  %7927 = vmatpush1.bf16.msra.mxu1 %v10784_v36  ;;  %v8510_v34 = vcombine.low %v56_v22, %v72_v23  ;;  %v13722_v36 = vld [vmem:[%s14790_s0 + $0x58] sm:$0xff]  ;;  %v10951_v23 = vld [vmem:[%s14789_s1 + $0x17e4] ss:$16 sps:$4 sm:$0xff]  }
 0x290   :  { %7080 = vmatprep.subr.bf16.mxu0 %v10789_v33  ;;  %7928 = vmatprep.subr.bf16.mxu1 %v10792_v35  ;;  %v13727_v33 = vld [vmem:[%s14790_s0 + $0xd8] sm:$0xff]  ;;  %v10871_v35 = vld [vmem:[%s14789_s1 + $0x1640] ss:$16 sps:$4 sm:$0xff]  }
 0x291   :  { %v10946_v22 = vld [vmem:[%s14789_s1 + $0x17c8] ss:$16 sps:$4 sm:$0xff]  }
 0x293   :  { %7081 = vmatpush1.bf16.msra.mxu0 %v10787_v37  ;;  %7929 = vmatpush1.bf16.msra.mxu1 %v10790_v38  ;;  %v10874_v37 = vld [vmem:[%s14789_s1 + $0x1648] ss:$16 sps:$4 sm:$0xff]   ;;  %v10879_v38 = vld [vmem:[%s14789_s1 + $0x1664] ss:$16 sps:$4 sm:$0xff]  }
 0x294   :  { %7082 = vmatprep.subr.bf16.mxu0 %v10795_v39  ;;  %7930 = vmatprep.subr.bf16.mxu1 %v10798_v40  ;;  %v10882_v39 = vld [vmem:[%s14789_s1 + $0x166c] ss:$16 sps:$4 sm:$0xff]   ;;  %v8481_v40 = vcombine.high %v13722_v36, %v13727_v33 }
 0x297   :  { %7083 = vmatpush1.bf16.msra.mxu0 %v10793_v42  ;;  %7931 = vmatpush1.bf16.msra.mxu1 %v10796_v44  ;;  %v10877_v42 = vld [vmem:[%s14789_s1 + $0x1660] ss:$16 sps:$4 sm:$0xff]   ;;  %v10880_v44 = vld [vmem:[%s14789_s1 + $0x1668] ss:$16 sps:$4 sm:$0xff]  }
 0x298   :  { %7084 = vmatprep.subr.bf16.mxu0 %v10801_v41  ;;  %7932 = vmatprep.subr.bf16.mxu1 %v10804_v43  ;;  %v10885_v41 = vld [vmem:[%s14789_s1 + $0x1684] ss:$16 sps:$4 sm:$0xff]   ;;  %v10888_v43 = vld [vmem:[%s14789_s1 + $0x168c] ss:$16 sps:$4 sm:$0xff]  }
 0x29b   :  { %7085 = vmatpush1.bf16.msra.mxu0 %v10799_v45  ;;  %7933 = vmatpush1.bf16.msra.mxu1 %v10802_v46  ;;  %v10883_v45 = vld [vmem:[%s14789_s1 + $0x1680] ss:$16 sps:$4 sm:$0xff]   ;;  %v10886_v46 = vld [vmem:[%s14789_s1 + $0x1688] ss:$16 sps:$4 sm:$0xff]  }
 0x29c   :  { %7086 = vmatprep.subr.bf16.mxu0 %v10807_v47  ;;  %7934 = vmatprep.subr.bf16.mxu1 %v10810_v48  ;;  %v10891_v47 = vld [vmem:[%s14789_s1 + $0x16a4] ss:$16 sps:$4 sm:$0xff]   ;;  %v10894_v48 = vld [vmem:[%s14789_s1 + $0x16ac] ss:$16 sps:$4 sm:$0xff]  }
 0x29f   :  { %7087 = vmatpush1.bf16.msra.mxu0 %v10805_v51  ;;  %7935 = vmatpush1.bf16.msra.mxu1 %v10808_v52  ;;  %v10889_v51 = vld [vmem:[%s14789_s1 + $0x16a0] ss:$16 sps:$4 sm:$0xff]   ;;  %v10892_v52 = vld [vmem:[%s14789_s1 + $0x16a8] ss:$16 sps:$4 sm:$0xff]  }
 0x2a0   :  { %7088 = vmatprep.subr.bf16.mxu0 %v10813_v49  ;;  %7936 = vmatprep.subr.bf16.mxu1 %v10816_v50  ;;  %v10897_v49 = vld [vmem:[%s14789_s1 + $0x16c4] ss:$16 sps:$4 sm:$0xff]   ;;  %v10900_v50 = vld [vmem:[%s14789_s1 + $0x16cc] ss:$16 sps:$4 sm:$0xff]  }
 0x2a3   :  { %7089 = vmatpush1.bf16.msra.mxu0 %v10811_v53  ;;  %7937 = vmatpush1.bf16.msra.mxu1 %v10814_v54  ;;  %v10895_v53 = vld [vmem:[%s14789_s1 + $0x16c0] ss:$16 sps:$4 sm:$0xff]   ;;  %v10898_v54 = vld [vmem:[%s14789_s1 + $0x16c8] ss:$16 sps:$4 sm:$0xff]  }
 0x2a4   :  { %7090 = vmatprep.subr.bf16.mxu0 %v10819_v55  ;;  %7938 = vmatprep.subr.bf16.mxu1 %v10822_v56  ;;  %v10903_v55 = vld [vmem:[%s14789_s1 + $0x16e4] ss:$16 sps:$4 sm:$0xff]   ;;  %v10906_v56 = vld [vmem:[%s14789_s1 + $0x16ec] ss:$16 sps:$4 sm:$0xff]  }
 0x2a7   :  { %7091 = vmatpush1.bf16.msra.mxu0 %v10817_v59  ;;  %7939 = vmatpush1.bf16.msra.mxu1 %v10820_v60  ;;  %v10901_v59 = vld [vmem:[%s14789_s1 + $0x16e0] ss:$16 sps:$4 sm:$0xff]   ;;  %v10904_v60 = vld [vmem:[%s14789_s1 + $0x16e8] ss:$16 sps:$4 sm:$0xff]  }
 0x2a8   :  { %7092 = vmatprep.subr.bf16.mxu0 %v10825_v57  ;;  %7940 = vmatprep.subr.bf16.mxu1 %v10828_v58  ;;  %v10909_v57 = vld [vmem:[%s14789_s1 + $0x1704] ss:$16 sps:$4 sm:$0xff]   ;;  %v10912_v58 = vld [vmem:[%s14789_s1 + $0x170c] ss:$16 sps:$4 sm:$0xff]  }
 0x2ab   :  { %7093 = vmatpush1.bf16.msra.mxu0 %v10823_v61  ;;  %7941 = vmatpush1.bf16.msra.mxu1 %v10826_v62  ;;  %v10907_v61 = vld [vmem:[%s14789_s1 + $0x1700] ss:$16 sps:$4 sm:$0xff]   ;;  %v10910_v62 = vld [vmem:[%s14789_s1 + $0x1708] ss:$16 sps:$4 sm:$0xff]  }
 0x2ac   :  { %7094 = vmatprep.subr.bf16.mxu0 %v10831_v63  ;;  %7942 = vmatprep.subr.bf16.mxu1 %v10834_v0  ;;  %v10915_v63 = vld [vmem:[%s14789_s1 + $0x1724] ss:$16 sps:$4 sm:$0xff]   ;;  %v10918_v0 = vld [vmem:[%s14789_s1 + $0x172c] ss:$16 sps:$4 sm:$0xff]  }
 0x2af   :  { %7095 = vmatpush1.bf16.msra.mxu0 %v10829_v3  ;;  %7943 = vmatpush1.bf16.msra.mxu1 %v10832_v4  ;;  %v10913_v3 = vld [vmem:[%s14789_s1 + $0x1720] ss:$16 sps:$4 sm:$0xff]   ;;  %v10916_v4 = vld [vmem:[%s14789_s1 + $0x1728] ss:$16 sps:$4 sm:$0xff]  }
 0x2b0   :  { %7096 = vmatprep.subr.bf16.mxu0 %v10837_v1  ;;  %7944 = vmatprep.subr.bf16.mxu1 %v10840_v2  ;;  %v10921_v1 = vld [vmem:[%s14789_s1 + $0x1744] ss:$16 sps:$4 sm:$0xff]   ;;  %v10924_v2 = vld [vmem:[%s14789_s1 + $0x174c] ss:$16 sps:$4 sm:$0xff]  }
 0x2b3   :  { %7097 = vmatpush1.bf16.msra.mxu0 %v10835_v5  ;;  %7945 = vmatpush1.bf16.msra.mxu1 %v10838_v6  ;;  %v10919_v5 = vld [vmem:[%s14789_s1 + $0x1740] ss:$16 sps:$4 sm:$0xff]   ;;  %v10922_v6 = vld [vmem:[%s14789_s1 + $0x1748] ss:$16 sps:$4 sm:$0xff]  }
 0x2b4   :  { %7098 = vmatprep.subr.bf16.mxu0 %v10843_v7  ;;  %7946 = vmatprep.subr.bf16.mxu1 %v10846_v8  ;;  %v10927_v7 = vld [vmem:[%s14789_s1 + $0x1764] ss:$16 sps:$4 sm:$0xff]   ;;  %v10930_v8 = vld [vmem:[%s14789_s1 + $0x176c] ss:$16 sps:$4 sm:$0xff]  }
 0x2b7   :  { %7099 = vmatpush1.bf16.msra.mxu0 %v10841_v11  ;;  %7947 = vmatpush1.bf16.msra.mxu1 %v10844_v12  ;;  %v10925_v11 = vld [vmem:[%s14789_s1 + $0x1760] ss:$16 sps:$4 sm:$0xff]   ;;  %v10928_v12 = vld [vmem:[%s14789_s1 + $0x1768] ss:$16 sps:$4 sm:$0xff]  }
 0x2b8   :  { %7100 = vmatprep.subr.bf16.mxu0 %v10849_v9  ;;  %7948 = vmatprep.subr.bf16.mxu1 %v10852_v10  ;;  %v10933_v9 = vld [vmem:[%s14789_s1 + $0x1784] ss:$16 sps:$4 sm:$0xff]   ;;  %v10936_v10 = vld [vmem:[%s14789_s1 + $0x178c] ss:$16 sps:$4 sm:$0xff]  }
 0x2bb   :  { %7101 = vmatpush1.bf16.msra.mxu0 %v10847_v13  ;;  %7949 = vmatpush1.bf16.msra.mxu1 %v10850_v14  ;;  %v10931_v13 = vld [vmem:[%s14789_s1 + $0x1780] ss:$16 sps:$4 sm:$0xff]   ;;  %v10934_v14 = vld [vmem:[%s14789_s1 + $0x1788] ss:$16 sps:$4 sm:$0xff]  }
 0x2bc   :  { %7102 = vmatprep.subr.bf16.mxu0 %v10855_v15  ;;  %7950 = vmatprep.subr.bf16.mxu1 %v10858_v16  ;;  %v10939_v15 = vld [vmem:[%s14789_s1 + $0x17a4] ss:$16 sps:$4 sm:$0xff]   ;;  %v10942_v16 = vld [vmem:[%s14789_s1 + $0x17ac] ss:$16 sps:$4 sm:$0xff]  }
 0x2bf   :  { %7103 = vmatpush1.bf16.msra.mxu0 %v10853_v19  ;;  %7951 = vmatpush1.bf16.msra.mxu1 %v10856_v17  ;;  %v10937_v19 = vld [vmem:[%s14789_s1 + $0x17a0] ss:$16 sps:$4 sm:$0xff]   ;;  %v10940_v17 = vld [vmem:[%s14789_s1 + $0x17a8] ss:$16 sps:$4 sm:$0xff]  }
 0x2c0   :  { %7125 = vmatprep.subr.bf16.mxu0 %v10861_v18  ;;  %7973 = vmatprep.subr.bf16.mxu1 %v10864_v20  ;;  %v10945_v18 = vld [vmem:[%s14789_s1 + $0x17c4] ss:$16 sps:$4 sm:$0xff]   ;;  %v10948_v20 = vld [vmem:[%s14789_s1 + $0x17cc] ss:$16 sps:$4 sm:$0xff]  }
 0x2c2   :  { %7105 = vmatmul.mubr.bf16.vlgmr.msra.gmra.mrb[0].mxu0 %v8478_v21  ;;  %7953 = vmatmul.mubr.bf16.vlgmr.msra.gmra.mrb[0].mxu1 %v8478_v21  ;;  %v10943_v21 = vld [vmem:[%s14789_s1 + $0x17c0] ss:$16 sps:$4 sm:$0xff]  }
 0x2c3   :  { %7126 = vmatpush1.bf16.msra.mxu0 %v10859_v24  ;;  %7974 = vmatpush1.bf16.msra.mxu1 %v10862_v26  ;;  %v10954_v24 = vld [vmem:[%s14789_s1 + $0x17ec] ss:$16 sps:$4 sm:$0xff]   ;;  %v10949_v26 = vld [vmem:[%s14789_s1 + $0x17e0] ss:$16 sps:$4 sm:$0xff]  }
 0x2c4   :  { %7127 = vmatprep.subr.bf16.mxu0 %v10867_v25  ;;  %7975 = vmatprep.subr.bf16.mxu1 %v10870_v27  ;;  %v10952_v25 = vld [vmem:[%s14789_s1 + $0x17e8] ss:$16 sps:$4 sm:$0xff]   ;;  %v10957_v27 = vld [vmem:[%s14789_s1 + $0x1804] ss:$16 sps:$4 sm:$0xff]  }
 0x2c5   :  { %7114 = vmatprep.mubr.bf16.mxu0 %v8511_v28  ;;  %7962 = vmatprep.mubr.bf16.mxu1 %v8511_v28  ;;  %v10960_v28 = vld [vmem:[%s14789_s1 + $0x180c] ss:$16 sps:$4 sm:$0xff]  }
 0x2c7   :  { %7128 = vmatpush1.bf16.msra.mxu0 %v10865_v29  ;;  %7976 = vmatpush1.bf16.msra.mxu1 %v10868_v30  ;;  %v8480_v29 = vcombine.low %v13722_v36, %v13727_v33  ;;  %v57_v30 = vld [vmem:[%s14790_s0 + $0x158] sm:$0xff]  ;;  %v10963_v36 = vld [vmem:[%s14789_s1 + $0x1824] ss:$16 sps:$4 sm:$0xff]  }
 0x2c8   :  { %7129 = vmatprep.subr.bf16.mxu0 %v10873_v31  ;;  %7977 = vmatprep.subr.bf16.mxu1 %v10876_v32  ;;  %v73_v31 = vld [vmem:[%s14790_s0 + $0x1d8] sm:$0xff]  ;;  %v10955_v32 = vld [vmem:[%s14789_s1 + $0x1800] ss:$16 sps:$4 sm:$0xff]  }
 0x2c9   :  { %v10966_v33 = vld [vmem:[%s14789_s1 + $0x182c] ss:$16 sps:$4 sm:$0xff]  }
 0x2ca   :  { %7115 = vmatmul.mubr.bf16.gmra.mrb[4].mxu0 %v8510_v34  ;;  %7963 = vmatmul.mubr.bf16.gmra.mrb[4].mxu1 %v8510_v34  ;;  %v10958_v34 = vld [vmem:[%s14789_s1 + $0x1808] ss:$16 sps:$4 sm:$0xff]  }
 0x2cb   :  { %7130 = vmatpush1.bf16.msra.mxu0 %v10871_v35  ;;  %7978 = vmatpush1.bf16.msra.mxu1 %v10874_v37  ;;  %v8513_v35 = vcombine.high %v57_v30, %v73_v31  ;;  %v10961_v37 = vld [vmem:[%s14789_s1 + $0x1820] ss:$16 sps:$4 sm:$0xff]  }
 0x2cc   :  { %7131 = vmatprep.subr.bf16.mxu0 %v10879_v38  ;;  %7979 = vmatprep.subr.bf16.mxu1 %v10882_v39  ;;  %v10964_v38 = vld [vmem:[%s14789_s1 + $0x1828] ss:$16 sps:$4 sm:$0xff]   ;;  %v10969_v39 = vld [vmem:[%s14789_s1 + $0x1844] ss:$16 sps:$4 sm:$0xff]  }
 0x2cd   :  { %7157 = vmatprep.mubr.bf16.mxu0 %v8481_v40  ;;  %8005 = vmatprep.mubr.bf16.mxu1 %v8481_v40  ;;  %v10972_v40 = vld [vmem:[%s14789_s1 + $0x184c] ss:$16 sps:$4 sm:$0xff]  }
 0x2cf   :  { %7132 = vmatpush1.bf16.msra.mxu0 %v10877_v42  ;;  %7980 = vmatpush1.bf16.msra.mxu1 %v10880_v44  ;;  %v8512_v42 = vcombine.low %v57_v30, %v73_v31  ;;  %v13934_v44 = vld [vmem:[%s14790_s0 + $0x60] sm:$0xff]  ;;  %v11042_v30 = vld [vmem:[%s14789_s1 + $0x19c8] ss:$16 sps:$4 sm:$0xff]  }
 0x2d0   :  { %7133 = vmatprep.subr.bf16.mxu0 %v10885_v41  ;;  %7981 = vmatprep.subr.bf16.mxu1 %v10888_v43  ;;  %v13939_v41 = vld [vmem:[%s14790_s0 + $0xe0] sm:$0xff] }
 0x2d1   :  { %v10967_v43 = vld [vmem:[%s14789_s1 + $0x1840] ss:$16 sps:$4 sm:$0xff]   ;;  %v11047_v31 = vld [vmem:[%s14789_s1 + $0x19e4] ss:$16 sps:$4 sm:$0xff]  }
 0x2d3   :  { %7134 = vmatpush1.bf16.msra.mxu0 %v10883_v45  ;;  %7982 = vmatpush1.bf16.msra.mxu1 %v10886_v46  ;;  %v10970_v45 = vld [vmem:[%s14789_s1 + $0x1848] ss:$16 sps:$4 sm:$0xff]   ;;  %v10975_v46 = vld [vmem:[%s14789_s1 + $0x1864] ss:$16 sps:$4 sm:$0xff]  }
 0x2d4   :  { %7135 = vmatprep.subr.bf16.mxu0 %v10891_v47  ;;  %7983 = vmatprep.subr.bf16.mxu1 %v10894_v48  ;;  %v10978_v47 = vld [vmem:[%s14789_s1 + $0x186c] ss:$16 sps:$4 sm:$0xff]   ;;  %v8483_v48 = vcombine.high %v13934_v44, %v13939_v41 }
 0x2d7   :  { %7136 = vmatpush1.bf16.msra.mxu0 %v10889_v51  ;;  %7984 = vmatpush1.bf16.msra.mxu1 %v10892_v52  ;;  %v10973_v51 = vld [vmem:[%s14789_s1 + $0x1860] ss:$16 sps:$4 sm:$0xff]   ;;  %v10976_v52 = vld [vmem:[%s14789_s1 + $0x1868] ss:$16 sps:$4 sm:$0xff]  }
 0x2d8   :  { %7137 = vmatprep.subr.bf16.mxu0 %v10897_v49  ;;  %7985 = vmatprep.subr.bf16.mxu1 %v10900_v50  ;;  %v10981_v49 = vld [vmem:[%s14789_s1 + $0x1884] ss:$16 sps:$4 sm:$0xff]   ;;  %v10984_v50 = vld [vmem:[%s14789_s1 + $0x188c] ss:$16 sps:$4 sm:$0xff]  }
 0x2db   :  { %7138 = vmatpush1.bf16.msra.mxu0 %v10895_v53  ;;  %7986 = vmatpush1.bf16.msra.mxu1 %v10898_v54  ;;  %v10979_v53 = vld [vmem:[%s14789_s1 + $0x1880] ss:$16 sps:$4 sm:$0xff]   ;;  %v10982_v54 = vld [vmem:[%s14789_s1 + $0x1888] ss:$16 sps:$4 sm:$0xff]  }
 0x2dc   :  { %7139 = vmatprep.subr.bf16.mxu0 %v10903_v55  ;;  %7987 = vmatprep.subr.bf16.mxu1 %v10906_v56  ;;  %v10987_v55 = vld [vmem:[%s14789_s1 + $0x18a4] ss:$16 sps:$4 sm:$0xff]   ;;  %v10990_v56 = vld [vmem:[%s14789_s1 + $0x18ac] ss:$16 sps:$4 sm:$0xff]  }
 0x2df   :  { %7140 = vmatpush1.bf16.msra.mxu0 %v10901_v59  ;;  %7988 = vmatpush1.bf16.msra.mxu1 %v10904_v60  ;;  %v10985_v59 = vld [vmem:[%s14789_s1 + $0x18a0] ss:$16 sps:$4 sm:$0xff]   ;;  %v10988_v60 = vld [vmem:[%s14789_s1 + $0x18a8] ss:$16 sps:$4 sm:$0xff]  }
 0x2e0   :  { %7141 = vmatprep.subr.bf16.mxu0 %v10909_v57  ;;  %7989 = vmatprep.subr.bf16.mxu1 %v10912_v58  ;;  %v10993_v57 = vld [vmem:[%s14789_s1 + $0x18c4] ss:$16 sps:$4 sm:$0xff]   ;;  %v10996_v58 = vld [vmem:[%s14789_s1 + $0x18cc] ss:$16 sps:$4 sm:$0xff]  }
 0x2e3   :  { %7142 = vmatpush1.bf16.msra.mxu0 %v10907_v61  ;;  %7990 = vmatpush1.bf16.msra.mxu1 %v10910_v62  ;;  %v10991_v61 = vld [vmem:[%s14789_s1 + $0x18c0] ss:$16 sps:$4 sm:$0xff]   ;;  %v10994_v62 = vld [vmem:[%s14789_s1 + $0x18c8] ss:$16 sps:$4 sm:$0xff]  }
 0x2e4   :  { %7143 = vmatprep.subr.bf16.mxu0 %v10915_v63  ;;  %7991 = vmatprep.subr.bf16.mxu1 %v10918_v0  ;;  %v10999_v63 = vld [vmem:[%s14789_s1 + $0x18e4] ss:$16 sps:$4 sm:$0xff]   ;;  %v11002_v0 = vld [vmem:[%s14789_s1 + $0x18ec] ss:$16 sps:$4 sm:$0xff]  }
 0x2e7   :  { %7144 = vmatpush1.bf16.msra.mxu0 %v10913_v3  ;;  %7992 = vmatpush1.bf16.msra.mxu1 %v10916_v4  ;;  %v10997_v3 = vld [vmem:[%s14789_s1 + $0x18e0] ss:$16 sps:$4 sm:$0xff]   ;;  %v11000_v4 = vld [vmem:[%s14789_s1 + $0x18e8] ss:$16 sps:$4 sm:$0xff]  }
 0x2e8   :  { %7145 = vmatprep.subr.bf16.mxu0 %v10921_v1  ;;  %7993 = vmatprep.subr.bf16.mxu1 %v10924_v2  ;;  %v11005_v1 = vld [vmem:[%s14789_s1 + $0x1904] ss:$16 sps:$4 sm:$0xff]   ;;  %v11008_v2 = vld [vmem:[%s14789_s1 + $0x190c] ss:$16 sps:$4 sm:$0xff]  }
 0x2eb   :  { %7146 = vmatpush1.bf16.msra.mxu0 %v10919_v5  ;;  %7994 = vmatpush1.bf16.msra.mxu1 %v10922_v6  ;;  %v11003_v5 = vld [vmem:[%s14789_s1 + $0x1900] ss:$16 sps:$4 sm:$0xff]   ;;  %v11006_v6 = vld [vmem:[%s14789_s1 + $0x1908] ss:$16 sps:$4 sm:$0xff]  }
 0x2ec   :  { %7147 = vmatprep.subr.bf16.mxu0 %v10927_v7  ;;  %7995 = vmatprep.subr.bf16.mxu1 %v10930_v8  ;;  %v11011_v7 = vld [vmem:[%s14789_s1 + $0x1924] ss:$16 sps:$4 sm:$0xff]   ;;  %v11014_v8 = vld [vmem:[%s14789_s1 + $0x192c] ss:$16 sps:$4 sm:$0xff]  }
 0x2ef   :  { %7148 = vmatpush1.bf16.msra.mxu0 %v10925_v11  ;;  %7996 = vmatpush1.bf16.msra.mxu1 %v10928_v12  ;;  %v11009_v11 = vld [vmem:[%s14789_s1 + $0x1920] ss:$16 sps:$4 sm:$0xff]   ;;  %v11012_v12 = vld [vmem:[%s14789_s1 + $0x1928] ss:$16 sps:$4 sm:$0xff]  }
 0x2f0   :  { %7149 = vmatprep.subr.bf16.mxu0 %v10933_v9  ;;  %7997 = vmatprep.subr.bf16.mxu1 %v10936_v10  ;;  %v11017_v9 = vld [vmem:[%s14789_s1 + $0x1944] ss:$16 sps:$4 sm:$0xff]   ;;  %v11020_v10 = vld [vmem:[%s14789_s1 + $0x194c] ss:$16 sps:$4 sm:$0xff]  }
 0x2f3   :  { %7150 = vmatpush1.bf16.msra.mxu0 %v10931_v13  ;;  %7998 = vmatpush1.bf16.msra.mxu1 %v10934_v14  ;;  %v11015_v13 = vld [vmem:[%s14789_s1 + $0x1940] ss:$16 sps:$4 sm:$0xff]   ;;  %v11018_v14 = vld [vmem:[%s14789_s1 + $0x1948] ss:$16 sps:$4 sm:$0xff]  }
 0x2f4   :  { %7151 = vmatprep.subr.bf16.mxu0 %v10939_v15  ;;  %7999 = vmatprep.subr.bf16.mxu1 %v10942_v16  ;;  %v11023_v15 = vld [vmem:[%s14789_s1 + $0x1964] ss:$16 sps:$4 sm:$0xff]   ;;  %v11026_v16 = vld [vmem:[%s14789_s1 + $0x196c] ss:$16 sps:$4 sm:$0xff]  }
 0x2f7   :  { %7152 = vmatpush1.bf16.msra.mxu0 %v10937_v19  ;;  %8000 = vmatpush1.bf16.msra.mxu1 %v10940_v17  ;;  %v11021_v19 = vld [vmem:[%s14789_s1 + $0x1960] ss:$16 sps:$4 sm:$0xff]   ;;  %v11024_v17 = vld [vmem:[%s14789_s1 + $0x1968] ss:$16 sps:$4 sm:$0xff]  }
 0x2f8   :  { %7153 = vmatprep.subr.bf16.mxu0 %v10945_v18  ;;  %8001 = vmatprep.subr.bf16.mxu1 %v10948_v20  ;;  %v11029_v18 = vld [vmem:[%s14789_s1 + $0x1984] ss:$16 sps:$4 sm:$0xff]   ;;  %v11032_v20 = vld [vmem:[%s14789_s1 + $0x198c] ss:$16 sps:$4 sm:$0xff]  }
 0x2fb   :  { %7154 = vmatpush1.bf16.msra.mxu0 %v10943_v21  ;;  %8002 = vmatpush1.bf16.msra.mxu1 %v10946_v22  ;;  %v11027_v21 = vld [vmem:[%s14789_s1 + $0x1980] ss:$16 sps:$4 sm:$0xff]   ;;  %v11030_v22 = vld [vmem:[%s14789_s1 + $0x1988] ss:$16 sps:$4 sm:$0xff]  }
 0x2fc   :  { %7155 = vmatprep.subr.bf16.mxu0 %v10951_v23  ;;  %8003 = vmatprep.subr.bf16.mxu1 %v10954_v24  ;;  %v11035_v23 = vld [vmem:[%s14789_s1 + $0x19a4] ss:$16 sps:$4 sm:$0xff]   ;;  %v11038_v24 = vld [vmem:[%s14789_s1 + $0x19ac] ss:$16 sps:$4 sm:$0xff]  }
 0x2ff   :  { %7156 = vmatpush1.bf16.msra.mxu0 %v10949_v26  ;;  %8004 = vmatpush1.bf16.msra.mxu1 %v10952_v25  ;;  %v11033_v26 = vld [vmem:[%s14789_s1 + $0x19a0] ss:$16 sps:$4 sm:$0xff]   ;;  %v11036_v25 = vld [vmem:[%s14789_s1 + $0x19a8] ss:$16 sps:$4 sm:$0xff]  }
 0x300   :  { %7178 = vmatprep.subr.bf16.mxu0 %v10957_v27  ;;  %8026 = vmatprep.subr.bf16.mxu1 %v10960_v28  ;;  %v11041_v27 = vld [vmem:[%s14789_s1 + $0x19c4] ss:$16 sps:$4 sm:$0xff]   ;;  %v11044_v28 = vld [vmem:[%s14789_s1 + $0x19cc] ss:$16 sps:$4 sm:$0xff]  }
 0x302   :  { %7158 = vmatmul.mubr.bf16.vlgmr.msra.gmra.mrb[0].mxu0 %v8480_v29  ;;  %8006 = vmatmul.mubr.bf16.vlgmr.msra.gmra.mrb[0].mxu1 %v8480_v29  ;;  %v11039_v29 = vld [vmem:[%s14789_s1 + $0x19c0] ss:$16 sps:$4 sm:$0xff]  }
 0x303   :  { %7179 = vmatpush1.bf16.msra.mxu0 %v10955_v32  ;;  %8027 = vmatpush1.bf16.msra.mxu1 %v10958_v34  ;;  %v11050_v32 = vld [vmem:[%s14789_s1 + $0x19ec] ss:$16 sps:$4 sm:$0xff]   ;;  %v11045_v34 = vld [vmem:[%s14789_s1 + $0x19e0] ss:$16 sps:$4 sm:$0xff]  }
 0x304   :  { %7180 = vmatprep.subr.bf16.mxu0 %v10963_v36  ;;  %8028 = vmatprep.subr.bf16.mxu1 %v10966_v33  ;;  %v11048_v36 = vld [vmem:[%s14789_s1 + $0x19e8] ss:$16 sps:$4 sm:$0xff]   ;;  %v11053_v33 = vld [vmem:[%s14789_s1 + $0x1a04] ss:$16 sps:$4 sm:$0xff]  }
 0x305   :  { %7167 = vmatprep.mubr.bf16.mxu0 %v8513_v35  ;;  %8015 = vmatprep.mubr.bf16.mxu1 %v8513_v35  ;;  %v11056_v35 = vld [vmem:[%s14789_s1 + $0x1a0c] ss:$16 sps:$4 sm:$0xff]  }
 0x307   :  { %7181 = vmatpush1.bf16.msra.mxu0 %v10961_v37  ;;  %8029 = vmatpush1.bf16.msra.mxu1 %v10964_v38  ;;  %v8482_v37 = vcombine.low %v13934_v44, %v13939_v41  ;;  %v58_v38 = vld [vmem:[%s14790_s0 + $0x160] sm:$0xff]  ;;  %v11062_v41 = vld [vmem:[%s14789_s1 + $0x1a2c] ss:$16 sps:$4 sm:$0xff]  }
 0x308   :  { %7182 = vmatprep.subr.bf16.mxu0 %v10969_v39  ;;  %8030 = vmatprep.subr.bf16.mxu1 %v10972_v40  ;;  %v74_v39 = vld [vmem:[%s14790_s0 + $0x1e0] sm:$0xff] }
 0x309   :  { %v11051_v40 = vld [vmem:[%s14789_s1 + $0x1a00] ss:$16 sps:$4 sm:$0xff]   ;;  %v11059_v44 = vld [vmem:[%s14789_s1 + $0x1a24] ss:$16 sps:$4 sm:$0xff]  }
 0x30a   :  { %7168 = vmatmul.mubr.bf16.gmra.mrb[4].mxu0 %v8512_v42  ;;  %8016 = vmatmul.mubr.bf16.gmra.mrb[4].mxu1 %v8512_v42  ;;  %v11054_v42 = vld [vmem:[%s14789_s1 + $0x1a08] ss:$16 sps:$4 sm:$0xff]  }
 0x30b   :  { %7183 = vmatpush1.bf16.msra.mxu0 %v10967_v43  ;;  %8031 = vmatpush1.bf16.msra.mxu1 %v10970_v45  ;;  %v8515_v43 = vcombine.high %v58_v38, %v74_v39  ;;  %v11057_v45 = vld [vmem:[%s14789_s1 + $0x1a20] ss:$16 sps:$4 sm:$0xff]  }
 0x30c   :  { %7184 = vmatprep.subr.bf16.mxu0 %v10975_v46  ;;  %8032 = vmatprep.subr.bf16.mxu1 %v10978_v47  ;;  %v11060_v46 = vld [vmem:[%s14789_s1 + $0x1a28] ss:$16 sps:$4 sm:$0xff]   ;;  %v11065_v47 = vld [vmem:[%s14789_s1 + $0x1a44] ss:$16 sps:$4 sm:$0xff]  }
 0x30d   :  { %7210 = vmatprep.mubr.bf16.mxu0 %v8483_v48  ;;  %8058 = vmatprep.mubr.bf16.mxu1 %v8483_v48  ;;  %v11068_v48 = vld [vmem:[%s14789_s1 + $0x1a4c] ss:$16 sps:$4 sm:$0xff]  }
 0x30f   :  { %7185 = vmatpush1.bf16.msra.mxu0 %v10973_v51  ;;  %8033 = vmatpush1.bf16.msra.mxu1 %v10976_v52  ;;  %v8514_v51 = vcombine.low %v58_v38, %v74_v39  ;;  %v14146_v52 = vld [vmem:[%s14790_s0 + $0x68] sm:$0xff]  ;;  %v11143_v39 = vld [vmem:[%s14789_s1 + $0x1be4] ss:$16 sps:$4 sm:$0xff]  }
 0x310   :  { %7186 = vmatprep.subr.bf16.mxu0 %v10981_v49  ;;  %8034 = vmatprep.subr.bf16.mxu1 %v10984_v50  ;;  %v14151_v49 = vld [vmem:[%s14790_s0 + $0xe8] sm:$0xff]  ;;  %v11063_v50 = vld [vmem:[%s14789_s1 + $0x1a40] ss:$16 sps:$4 sm:$0xff]  }
 0x311   :  { %v11138_v38 = vld [vmem:[%s14789_s1 + $0x1bc8] ss:$16 sps:$4 sm:$0xff]  }
 0x313   :  { %7187 = vmatpush1.bf16.msra.mxu0 %v10979_v53  ;;  %8035 = vmatpush1.bf16.msra.mxu1 %v10982_v54  ;;  %v11066_v53 = vld [vmem:[%s14789_s1 + $0x1a48] ss:$16 sps:$4 sm:$0xff]   ;;  %v11071_v54 = vld [vmem:[%s14789_s1 + $0x1a64] ss:$16 sps:$4 sm:$0xff]  }
 0x314   :  { %7188 = vmatprep.subr.bf16.mxu0 %v10987_v55  ;;  %8036 = vmatprep.subr.bf16.mxu1 %v10990_v56  ;;  %v11074_v55 = vld [vmem:[%s14789_s1 + $0x1a6c] ss:$16 sps:$4 sm:$0xff]   ;;  %v8485_v56 = vcombine.high %v14146_v52, %v14151_v49 }
 0x317   :  { %7189 = vmatpush1.bf16.msra.mxu0 %v10985_v59  ;;  %8037 = vmatpush1.bf16.msra.mxu1 %v10988_v60  ;;  %v11069_v59 = vld [vmem:[%s14789_s1 + $0x1a60] ss:$16 sps:$4 sm:$0xff]   ;;  %v11072_v60 = vld [vmem:[%s14789_s1 + $0x1a68] ss:$16 sps:$4 sm:$0xff]  }
 0x318   :  { %7190 = vmatprep.subr.bf16.mxu0 %v10993_v57  ;;  %8038 = vmatprep.subr.bf16.mxu1 %v10996_v58  ;;  %v11077_v57 = vld [vmem:[%s14789_s1 + $0x1a84] ss:$16 sps:$4 sm:$0xff]   ;;  %v11080_v58 = vld [vmem:[%s14789_s1 + $0x1a8c] ss:$16 sps:$4 sm:$0xff]  }
 0x31b   :  { %7191 = vmatpush1.bf16.msra.mxu0 %v10991_v61  ;;  %8039 = vmatpush1.bf16.msra.mxu1 %v10994_v62  ;;  %v11075_v61 = vld [vmem:[%s14789_s1 + $0x1a80] ss:$16 sps:$4 sm:$0xff]   ;;  %v11078_v62 = vld [vmem:[%s14789_s1 + $0x1a88] ss:$16 sps:$4 sm:$0xff]  }
 0x31c   :  { %7192 = vmatprep.subr.bf16.mxu0 %v10999_v63  ;;  %8040 = vmatprep.subr.bf16.mxu1 %v11002_v0  ;;  %v11083_v63 = vld [vmem:[%s14789_s1 + $0x1aa4] ss:$16 sps:$4 sm:$0xff]   ;;  %v11086_v0 = vld [vmem:[%s14789_s1 + $0x1aac] ss:$16 sps:$4 sm:$0xff]  }
 0x31f   :  { %7193 = vmatpush1.bf16.msra.mxu0 %v10997_v3  ;;  %8041 = vmatpush1.bf16.msra.mxu1 %v11000_v4  ;;  %v11081_v3 = vld [vmem:[%s14789_s1 + $0x1aa0] ss:$16 sps:$4 sm:$0xff]   ;;  %v11084_v4 = vld [vmem:[%s14789_s1 + $0x1aa8] ss:$16 sps:$4 sm:$0xff]  }
 0x320   :  { %7194 = vmatprep.subr.bf16.mxu0 %v11005_v1  ;;  %8042 = vmatprep.subr.bf16.mxu1 %v11008_v2  ;;  %v11089_v1 = vld [vmem:[%s14789_s1 + $0x1ac4] ss:$16 sps:$4 sm:$0xff]   ;;  %v11092_v2 = vld [vmem:[%s14789_s1 + $0x1acc] ss:$16 sps:$4 sm:$0xff]  }
 0x323   :  { %7195 = vmatpush1.bf16.msra.mxu0 %v11003_v5  ;;  %8043 = vmatpush1.bf16.msra.mxu1 %v11006_v6  ;;  %v11087_v5 = vld [vmem:[%s14789_s1 + $0x1ac0] ss:$16 sps:$4 sm:$0xff]   ;;  %v11090_v6 = vld [vmem:[%s14789_s1 + $0x1ac8] ss:$16 sps:$4 sm:$0xff]  }
 0x324   :  { %7196 = vmatprep.subr.bf16.mxu0 %v11011_v7  ;;  %8044 = vmatprep.subr.bf16.mxu1 %v11014_v8  ;;  %v11095_v7 = vld [vmem:[%s14789_s1 + $0x1ae4] ss:$16 sps:$4 sm:$0xff]   ;;  %v11098_v8 = vld [vmem:[%s14789_s1 + $0x1aec] ss:$16 sps:$4 sm:$0xff]  }
 0x327   :  { %7197 = vmatpush1.bf16.msra.mxu0 %v11009_v11  ;;  %8045 = vmatpush1.bf16.msra.mxu1 %v11012_v12  ;;  %v11093_v11 = vld [vmem:[%s14789_s1 + $0x1ae0] ss:$16 sps:$4 sm:$0xff]   ;;  %v11096_v12 = vld [vmem:[%s14789_s1 + $0x1ae8] ss:$16 sps:$4 sm:$0xff]  }
 0x328   :  { %7198 = vmatprep.subr.bf16.mxu0 %v11017_v9  ;;  %8046 = vmatprep.subr.bf16.mxu1 %v11020_v10  ;;  %v11101_v9 = vld [vmem:[%s14789_s1 + $0x1b04] ss:$16 sps:$4 sm:$0xff]   ;;  %v11104_v10 = vld [vmem:[%s14789_s1 + $0x1b0c] ss:$16 sps:$4 sm:$0xff]  }
 0x32b   :  { %7199 = vmatpush1.bf16.msra.mxu0 %v11015_v13  ;;  %8047 = vmatpush1.bf16.msra.mxu1 %v11018_v14  ;;  %v11099_v13 = vld [vmem:[%s14789_s1 + $0x1b00] ss:$16 sps:$4 sm:$0xff]   ;;  %v11102_v14 = vld [vmem:[%s14789_s1 + $0x1b08] ss:$16 sps:$4 sm:$0xff]  }
 0x32c   :  { %7200 = vmatprep.subr.bf16.mxu0 %v11023_v15  ;;  %8048 = vmatprep.subr.bf16.mxu1 %v11026_v16  ;;  %v11107_v15 = vld [vmem:[%s14789_s1 + $0x1b24] ss:$16 sps:$4 sm:$0xff]   ;;  %v11110_v16 = vld [vmem:[%s14789_s1 + $0x1b2c] ss:$16 sps:$4 sm:$0xff]  }
 0x32f   :  { %7201 = vmatpush1.bf16.msra.mxu0 %v11021_v19  ;;  %8049 = vmatpush1.bf16.msra.mxu1 %v11024_v17  ;;  %v11105_v19 = vld [vmem:[%s14789_s1 + $0x1b20] ss:$16 sps:$4 sm:$0xff]   ;;  %v11108_v17 = vld [vmem:[%s14789_s1 + $0x1b28] ss:$16 sps:$4 sm:$0xff]  }
 0x330   :  { %7202 = vmatprep.subr.bf16.mxu0 %v11029_v18  ;;  %8050 = vmatprep.subr.bf16.mxu1 %v11032_v20  ;;  %v11113_v18 = vld [vmem:[%s14789_s1 + $0x1b44] ss:$16 sps:$4 sm:$0xff]   ;;  %v11116_v20 = vld [vmem:[%s14789_s1 + $0x1b4c] ss:$16 sps:$4 sm:$0xff]  }
 0x333   :  { %7203 = vmatpush1.bf16.msra.mxu0 %v11027_v21  ;;  %8051 = vmatpush1.bf16.msra.mxu1 %v11030_v22  ;;  %v11111_v21 = vld [vmem:[%s14789_s1 + $0x1b40] ss:$16 sps:$4 sm:$0xff]   ;;  %v11114_v22 = vld [vmem:[%s14789_s1 + $0x1b48] ss:$16 sps:$4 sm:$0xff]  }
 0x334   :  { %7204 = vmatprep.subr.bf16.mxu0 %v11035_v23  ;;  %8052 = vmatprep.subr.bf16.mxu1 %v11038_v24  ;;  %v11119_v23 = vld [vmem:[%s14789_s1 + $0x1b64] ss:$16 sps:$4 sm:$0xff]   ;;  %v11122_v24 = vld [vmem:[%s14789_s1 + $0x1b6c] ss:$16 sps:$4 sm:$0xff]  }
 0x337   :  { %7205 = vmatpush1.bf16.msra.mxu0 %v11033_v26  ;;  %8053 = vmatpush1.bf16.msra.mxu1 %v11036_v25  ;;  %v11117_v26 = vld [vmem:[%s14789_s1 + $0x1b60] ss:$16 sps:$4 sm:$0xff]   ;;  %v11120_v25 = vld [vmem:[%s14789_s1 + $0x1b68] ss:$16 sps:$4 sm:$0xff]  }
 0x338   :  { %7206 = vmatprep.subr.bf16.mxu0 %v11041_v27  ;;  %8054 = vmatprep.subr.bf16.mxu1 %v11044_v28  ;;  %v11125_v27 = vld [vmem:[%s14789_s1 + $0x1b84] ss:$16 sps:$4 sm:$0xff]   ;;  %v11128_v28 = vld [vmem:[%s14789_s1 + $0x1b8c] ss:$16 sps:$4 sm:$0xff]  }
 0x33b   :  { %7207 = vmatpush1.bf16.msra.mxu0 %v11039_v29  ;;  %8055 = vmatpush1.bf16.msra.mxu1 %v11042_v30  ;;  %v11123_v29 = vld [vmem:[%s14789_s1 + $0x1b80] ss:$16 sps:$4 sm:$0xff]   ;;  %v11126_v30 = vld [vmem:[%s14789_s1 + $0x1b88] ss:$16 sps:$4 sm:$0xff]  }
 0x33c   :  { %7208 = vmatprep.subr.bf16.mxu0 %v11047_v31  ;;  %8056 = vmatprep.subr.bf16.mxu1 %v11050_v32  ;;  %v11131_v31 = vld [vmem:[%s14789_s1 + $0x1ba4] ss:$16 sps:$4 sm:$0xff]   ;;  %v11134_v32 = vld [vmem:[%s14789_s1 + $0x1bac] ss:$16 sps:$4 sm:$0xff]  }
 0x33f   :  { %7209 = vmatpush1.bf16.msra.mxu0 %v11045_v34  ;;  %8057 = vmatpush1.bf16.msra.mxu1 %v11048_v36  ;;  %v11129_v34 = vld [vmem:[%s14789_s1 + $0x1ba0] ss:$16 sps:$4 sm:$0xff]   ;;  %v11132_v36 = vld [vmem:[%s14789_s1 + $0x1ba8] ss:$16 sps:$4 sm:$0xff]  }
 0x340   :  { %7231 = vmatprep.subr.bf16.mxu0 %v11053_v33  ;;  %8079 = vmatprep.subr.bf16.mxu1 %v11056_v35  ;;  %v11137_v33 = vld [vmem:[%s14789_s1 + $0x1bc4] ss:$16 sps:$4 sm:$0xff]   ;;  %v11140_v35 = vld [vmem:[%s14789_s1 + $0x1bcc] ss:$16 sps:$4 sm:$0xff]  }
 0x342   :  { %7211 = vmatmul.mubr.bf16.vlgmr.msra.gmra.mrb[0].mxu0 %v8482_v37  ;;  %8059 = vmatmul.mubr.bf16.vlgmr.msra.gmra.mrb[0].mxu1 %v8482_v37  ;;  %v11135_v37 = vld [vmem:[%s14789_s1 + $0x1bc0] ss:$16 sps:$4 sm:$0xff]  }
 0x343   :  { %7232 = vmatpush1.bf16.msra.mxu0 %v11051_v40  ;;  %8080 = vmatpush1.bf16.msra.mxu1 %v11054_v42  ;;  %v11146_v40 = vld [vmem:[%s14789_s1 + $0x1bec] ss:$16 sps:$4 sm:$0xff]   ;;  %v11141_v42 = vld [vmem:[%s14789_s1 + $0x1be0] ss:$16 sps:$4 sm:$0xff]  }
 0x344   :  { %7233 = vmatprep.subr.bf16.mxu0 %v11059_v44  ;;  %8081 = vmatprep.subr.bf16.mxu1 %v11062_v41  ;;  %v11144_v44 = vld [vmem:[%s14789_s1 + $0x1be8] ss:$16 sps:$4 sm:$0xff]   ;;  %v11149_v41 = vld [vmem:[%s14789_s1 + $0x1c04] ss:$16 sps:$4 sm:$0xff]  }
 0x345   :  { %7220 = vmatprep.mubr.bf16.mxu0 %v8515_v43  ;;  %8068 = vmatprep.mubr.bf16.mxu1 %v8515_v43  ;;  %v11152_v43 = vld [vmem:[%s14789_s1 + $0x1c0c] ss:$16 sps:$4 sm:$0xff]  }
 0x347   :  { %7234 = vmatpush1.bf16.msra.mxu0 %v11057_v45  ;;  %8082 = vmatpush1.bf16.msra.mxu1 %v11060_v46  ;;  %v8484_v45 = vcombine.low %v14146_v52, %v14151_v49  ;;  %v59_v46 = vld [vmem:[%s14790_s0 + $0x168] sm:$0xff]  ;;  %v11155_v52 = vld [vmem:[%s14789_s1 + $0x1c24] ss:$16 sps:$4 sm:$0xff]  }
 0x348   :  { %7235 = vmatprep.subr.bf16.mxu0 %v11065_v47  ;;  %8083 = vmatprep.subr.bf16.mxu1 %v11068_v48  ;;  %v75_v47 = vld [vmem:[%s14790_s0 + $0x1e8] sm:$0xff]  ;;  %v11147_v48 = vld [vmem:[%s14789_s1 + $0x1c00] ss:$16 sps:$4 sm:$0xff]  }
 0x349   :  { %v11158_v49 = vld [vmem:[%s14789_s1 + $0x1c2c] ss:$16 sps:$4 sm:$0xff]  }
 0x34a   :  { %7221 = vmatmul.mubr.bf16.gmra.mrb[4].mxu0 %v8514_v51  ;;  %8069 = vmatmul.mubr.bf16.gmra.mrb[4].mxu1 %v8514_v51  ;;  %v11150_v51 = vld [vmem:[%s14789_s1 + $0x1c08] ss:$16 sps:$4 sm:$0xff]  }
 0x34b   :  { %7236 = vmatpush1.bf16.msra.mxu0 %v11063_v50  ;;  %8084 = vmatpush1.bf16.msra.mxu1 %v11066_v53  ;;  %v8517_v50 = vcombine.high %v59_v46, %v75_v47  ;;  %v11153_v53 = vld [vmem:[%s14789_s1 + $0x1c20] ss:$16 sps:$4 sm:$0xff]  }
 0x34c   :  { %7237 = vmatprep.subr.bf16.mxu0 %v11071_v54  ;;  %8085 = vmatprep.subr.bf16.mxu1 %v11074_v55  ;;  %v11156_v54 = vld [vmem:[%s14789_s1 + $0x1c28] ss:$16 sps:$4 sm:$0xff]   ;;  %v11161_v55 = vld [vmem:[%s14789_s1 + $0x1c44] ss:$16 sps:$4 sm:$0xff]  }
 0x34d   :  { %7263 = vmatprep.mubr.bf16.mxu0 %v8485_v56  ;;  %8111 = vmatprep.mubr.bf16.mxu1 %v8485_v56  ;;  %v11164_v56 = vld [vmem:[%s14789_s1 + $0x1c4c] ss:$16 sps:$4 sm:$0xff]  }
 0x34f   :  { %7238 = vmatpush1.bf16.msra.mxu0 %v11069_v59  ;;  %8086 = vmatpush1.bf16.msra.mxu1 %v11072_v60  ;;  %v8516_v59 = vcombine.low %v59_v46, %v75_v47  ;;  %v14358_v60 = vld [vmem:[%s14790_s0 + $0x70] sm:$0xff]  ;;  %v11234_v46 = vld [vmem:[%s14789_s1 + $0x1dc8] ss:$16 sps:$4 sm:$0xff]  }
 0x350   :  { %7239 = vmatprep.subr.bf16.mxu0 %v11077_v57  ;;  %8087 = vmatprep.subr.bf16.mxu1 %v11080_v58  ;;  %v14363_v57 = vld [vmem:[%s14790_s0 + $0xf0] sm:$0xff] }
 0x351   :  { %v11159_v58 = vld [vmem:[%s14789_s1 + $0x1c40] ss:$16 sps:$4 sm:$0xff]   ;;  %v11239_v47 = vld [vmem:[%s14789_s1 + $0x1de4] ss:$16 sps:$4 sm:$0xff]  }
 0x353   :  { %7240 = vmatpush1.bf16.msra.mxu0 %v11075_v61  ;;  %8088 = vmatpush1.bf16.msra.mxu1 %v11078_v62  ;;  %v11162_v61 = vld [vmem:[%s14789_s1 + $0x1c48] ss:$16 sps:$4 sm:$0xff]   ;;  %v11167_v62 = vld [vmem:[%s14789_s1 + $0x1c64] ss:$16 sps:$4 sm:$0xff]  }
 0x354   :  { %7241 = vmatprep.subr.bf16.mxu0 %v11083_v63  ;;  %8089 = vmatprep.subr.bf16.mxu1 %v11086_v0  ;;  %v11170_v63 = vld [vmem:[%s14789_s1 + $0x1c6c] ss:$16 sps:$4 sm:$0xff]   ;;  %v8487_v0 = vcombine.high %v14358_v60, %v14363_v57 }
 0x357   :  { %7242 = vmatpush1.bf16.msra.mxu0 %v11081_v3  ;;  %8090 = vmatpush1.bf16.msra.mxu1 %v11084_v4  ;;  %v11165_v3 = vld [vmem:[%s14789_s1 + $0x1c60] ss:$16 sps:$4 sm:$0xff]   ;;  %v11168_v4 = vld [vmem:[%s14789_s1 + $0x1c68] ss:$16 sps:$4 sm:$0xff]  }
 0x358   :  { %7243 = vmatprep.subr.bf16.mxu0 %v11089_v1  ;;  %8091 = vmatprep.subr.bf16.mxu1 %v11092_v2  ;;  %v11173_v1 = vld [vmem:[%s14789_s1 + $0x1c84] ss:$16 sps:$4 sm:$0xff]   ;;  %v11176_v2 = vld [vmem:[%s14789_s1 + $0x1c8c] ss:$16 sps:$4 sm:$0xff]  }
 0x35b   :  { %7244 = vmatpush1.bf16.msra.mxu0 %v11087_v5  ;;  %8092 = vmatpush1.bf16.msra.mxu1 %v11090_v6  ;;  %v11171_v5 = vld [vmem:[%s14789_s1 + $0x1c80] ss:$16 sps:$4 sm:$0xff]   ;;  %v11174_v6 = vld [vmem:[%s14789_s1 + $0x1c88] ss:$16 sps:$4 sm:$0xff]  }
 0x35c   :  { %7245 = vmatprep.subr.bf16.mxu0 %v11095_v7  ;;  %8093 = vmatprep.subr.bf16.mxu1 %v11098_v8  ;;  %v11179_v7 = vld [vmem:[%s14789_s1 + $0x1ca4] ss:$16 sps:$4 sm:$0xff]   ;;  %v11182_v8 = vld [vmem:[%s14789_s1 + $0x1cac] ss:$16 sps:$4 sm:$0xff]  }
 0x35f   :  { %7246 = vmatpush1.bf16.msra.mxu0 %v11093_v11  ;;  %8094 = vmatpush1.bf16.msra.mxu1 %v11096_v12  ;;  %v11177_v11 = vld [vmem:[%s14789_s1 + $0x1ca0] ss:$16 sps:$4 sm:$0xff]   ;;  %v11180_v12 = vld [vmem:[%s14789_s1 + $0x1ca8] ss:$16 sps:$4 sm:$0xff]  }
 0x360   :  { %7247 = vmatprep.subr.bf16.mxu0 %v11101_v9  ;;  %8095 = vmatprep.subr.bf16.mxu1 %v11104_v10  ;;  %v11185_v9 = vld [vmem:[%s14789_s1 + $0x1cc4] ss:$16 sps:$4 sm:$0xff]   ;;  %v11188_v10 = vld [vmem:[%s14789_s1 + $0x1ccc] ss:$16 sps:$4 sm:$0xff]  }
 0x363   :  { %7248 = vmatpush1.bf16.msra.mxu0 %v11099_v13  ;;  %8096 = vmatpush1.bf16.msra.mxu1 %v11102_v14  ;;  %v11183_v13 = vld [vmem:[%s14789_s1 + $0x1cc0] ss:$16 sps:$4 sm:$0xff]   ;;  %v11186_v14 = vld [vmem:[%s14789_s1 + $0x1cc8] ss:$16 sps:$4 sm:$0xff]  }
 0x364   :  { %7249 = vmatprep.subr.bf16.mxu0 %v11107_v15  ;;  %8097 = vmatprep.subr.bf16.mxu1 %v11110_v16  ;;  %v11191_v15 = vld [vmem:[%s14789_s1 + $0x1ce4] ss:$16 sps:$4 sm:$0xff]   ;;  %v11194_v16 = vld [vmem:[%s14789_s1 + $0x1cec] ss:$16 sps:$4 sm:$0xff]  }
 0x367   :  { %7250 = vmatpush1.bf16.msra.mxu0 %v11105_v19  ;;  %8098 = vmatpush1.bf16.msra.mxu1 %v11108_v17  ;;  %v11189_v19 = vld [vmem:[%s14789_s1 + $0x1ce0] ss:$16 sps:$4 sm:$0xff]   ;;  %v11192_v17 = vld [vmem:[%s14789_s1 + $0x1ce8] ss:$16 sps:$4 sm:$0xff]  }
 0x368   :  { %7251 = vmatprep.subr.bf16.mxu0 %v11113_v18  ;;  %8099 = vmatprep.subr.bf16.mxu1 %v11116_v20  ;;  %v11197_v18 = vld [vmem:[%s14789_s1 + $0x1d04] ss:$16 sps:$4 sm:$0xff]   ;;  %v11200_v20 = vld [vmem:[%s14789_s1 + $0x1d0c] ss:$16 sps:$4 sm:$0xff]  }
 0x36b   :  { %7252 = vmatpush1.bf16.msra.mxu0 %v11111_v21  ;;  %8100 = vmatpush1.bf16.msra.mxu1 %v11114_v22  ;;  %v11195_v21 = vld [vmem:[%s14789_s1 + $0x1d00] ss:$16 sps:$4 sm:$0xff]   ;;  %v11198_v22 = vld [vmem:[%s14789_s1 + $0x1d08] ss:$16 sps:$4 sm:$0xff]  }
 0x36c   :  { %7253 = vmatprep.subr.bf16.mxu0 %v11119_v23  ;;  %8101 = vmatprep.subr.bf16.mxu1 %v11122_v24  ;;  %v11203_v23 = vld [vmem:[%s14789_s1 + $0x1d24] ss:$16 sps:$4 sm:$0xff]   ;;  %v11206_v24 = vld [vmem:[%s14789_s1 + $0x1d2c] ss:$16 sps:$4 sm:$0xff]  }
 0x36f   :  { %7254 = vmatpush1.bf16.msra.mxu0 %v11117_v26  ;;  %8102 = vmatpush1.bf16.msra.mxu1 %v11120_v25  ;;  %v11201_v26 = vld [vmem:[%s14789_s1 + $0x1d20] ss:$16 sps:$4 sm:$0xff]   ;;  %v11204_v25 = vld [vmem:[%s14789_s1 + $0x1d28] ss:$16 sps:$4 sm:$0xff]  }
 0x370   :  { %7255 = vmatprep.subr.bf16.mxu0 %v11125_v27  ;;  %8103 = vmatprep.subr.bf16.mxu1 %v11128_v28  ;;  %v11209_v27 = vld [vmem:[%s14789_s1 + $0x1d44] ss:$16 sps:$4 sm:$0xff]   ;;  %v11212_v28 = vld [vmem:[%s14789_s1 + $0x1d4c] ss:$16 sps:$4 sm:$0xff]  }
 0x373   :  { %7256 = vmatpush1.bf16.msra.mxu0 %v11123_v29  ;;  %8104 = vmatpush1.bf16.msra.mxu1 %v11126_v30  ;;  %v11207_v29 = vld [vmem:[%s14789_s1 + $0x1d40] ss:$16 sps:$4 sm:$0xff]   ;;  %v11210_v30 = vld [vmem:[%s14789_s1 + $0x1d48] ss:$16 sps:$4 sm:$0xff]  }
 0x374   :  { %7257 = vmatprep.subr.bf16.mxu0 %v11131_v31  ;;  %8105 = vmatprep.subr.bf16.mxu1 %v11134_v32  ;;  %v11215_v31 = vld [vmem:[%s14789_s1 + $0x1d64] ss:$16 sps:$4 sm:$0xff]   ;;  %v11218_v32 = vld [vmem:[%s14789_s1 + $0x1d6c] ss:$16 sps:$4 sm:$0xff]  }
 0x377   :  { %7258 = vmatpush1.bf16.msra.mxu0 %v11129_v34  ;;  %8106 = vmatpush1.bf16.msra.mxu1 %v11132_v36  ;;  %v11213_v34 = vld [vmem:[%s14789_s1 + $0x1d60] ss:$16 sps:$4 sm:$0xff]   ;;  %v11216_v36 = vld [vmem:[%s14789_s1 + $0x1d68] ss:$16 sps:$4 sm:$0xff]  }
 0x378   :  { %7259 = vmatprep.subr.bf16.mxu0 %v11137_v33  ;;  %8107 = vmatprep.subr.bf16.mxu1 %v11140_v35  ;;  %v11221_v33 = vld [vmem:[%s14789_s1 + $0x1d84] ss:$16 sps:$4 sm:$0xff]   ;;  %v11224_v35 = vld [vmem:[%s14789_s1 + $0x1d8c] ss:$16 sps:$4 sm:$0xff]  }
 0x37b   :  { %7260 = vmatpush1.bf16.msra.mxu0 %v11135_v37  ;;  %8108 = vmatpush1.bf16.msra.mxu1 %v11138_v38  ;;  %v11219_v37 = vld [vmem:[%s14789_s1 + $0x1d80] ss:$16 sps:$4 sm:$0xff]   ;;  %v11222_v38 = vld [vmem:[%s14789_s1 + $0x1d88] ss:$16 sps:$4 sm:$0xff]  }
 0x37c   :  { %7261 = vmatprep.subr.bf16.mxu0 %v11143_v39  ;;  %8109 = vmatprep.subr.bf16.mxu1 %v11146_v40  ;;  %v11227_v39 = vld [vmem:[%s14789_s1 + $0x1da4] ss:$16 sps:$4 sm:$0xff]   ;;  %v11230_v40 = vld [vmem:[%s14789_s1 + $0x1dac] ss:$16 sps:$4 sm:$0xff]  }
 0x37f   :  { %7262 = vmatpush1.bf16.msra.mxu0 %v11141_v42  ;;  %8110 = vmatpush1.bf16.msra.mxu1 %v11144_v44  ;;  %v11225_v42 = vld [vmem:[%s14789_s1 + $0x1da0] ss:$16 sps:$4 sm:$0xff]   ;;  %v11228_v44 = vld [vmem:[%s14789_s1 + $0x1da8] ss:$16 sps:$4 sm:$0xff]  }
 0x380   :  { %7284 = vmatprep.subr.bf16.mxu0 %v11149_v41  ;;  %8132 = vmatprep.subr.bf16.mxu1 %v11152_v43  ;;  %v11233_v41 = vld [vmem:[%s14789_s1 + $0x1dc4] ss:$16 sps:$4 sm:$0xff]   ;;  %v11236_v43 = vld [vmem:[%s14789_s1 + $0x1dcc] ss:$16 sps:$4 sm:$0xff]  }
 0x382   :  { %7264 = vmatmul.mubr.bf16.vlgmr.msra.gmra.mrb[0].mxu0 %v8484_v45  ;;  %8112 = vmatmul.mubr.bf16.vlgmr.msra.gmra.mrb[0].mxu1 %v8484_v45  ;;  %v11231_v45 = vld [vmem:[%s14789_s1 + $0x1dc0] ss:$16 sps:$4 sm:$0xff]  }
 0x383   :  { %7285 = vmatpush1.bf16.msra.mxu0 %v11147_v48  ;;  %8133 = vmatpush1.bf16.msra.mxu1 %v11150_v51  ;;  %v11242_v48 = vld [vmem:[%s14789_s1 + $0x1dec] ss:$16 sps:$4 sm:$0xff]   ;;  %v11237_v51 = vld [vmem:[%s14789_s1 + $0x1de0] ss:$16 sps:$4 sm:$0xff]  }
 0x384   :  { %7286 = vmatprep.subr.bf16.mxu0 %v11155_v52  ;;  %8134 = vmatprep.subr.bf16.mxu1 %v11158_v49  ;;  %v11240_v52 = vld [vmem:[%s14789_s1 + $0x1de8] ss:$16 sps:$4 sm:$0xff]   ;;  %v11245_v49 = vld [vmem:[%s14789_s1 + $0x1e04] ss:$16 sps:$4 sm:$0xff]  }
 0x385   :  { %7273 = vmatprep.mubr.bf16.mxu0 %v8517_v50  ;;  %8121 = vmatprep.mubr.bf16.mxu1 %v8517_v50  ;;  %v11248_v50 = vld [vmem:[%s14789_s1 + $0x1e0c] ss:$16 sps:$4 sm:$0xff]  }
 0x387   :  { %7287 = vmatpush1.bf16.msra.mxu0 %v11153_v53  ;;  %8135 = vmatpush1.bf16.msra.mxu1 %v11156_v54  ;;  %v8486_v53 = vcombine.low %v14358_v60, %v14363_v57  ;;  %v60_v54 = vld [vmem:[%s14790_s0 + $0x170] sm:$0xff]  ;;  %v11254_v57 = vld [vmem:[%s14789_s1 + $0x1e2c] ss:$16 sps:$4 sm:$0xff]  }
 0x388   :  { %7288 = vmatprep.subr.bf16.mxu0 %v11161_v55  ;;  %8136 = vmatprep.subr.bf16.mxu1 %v11164_v56  ;;  %v76_v55 = vld [vmem:[%s14790_s0 + $0x1f0] sm:$0xff] }
 0x389   :  { %v11243_v56 = vld [vmem:[%s14789_s1 + $0x1e00] ss:$16 sps:$4 sm:$0xff]   ;;  %v11251_v60 = vld [vmem:[%s14789_s1 + $0x1e24] ss:$16 sps:$4 sm:$0xff]  }
 0x38a   :  { %7274 = vmatmul.mubr.bf16.gmra.mrb[4].mxu0 %v8516_v59  ;;  %8122 = vmatmul.mubr.bf16.gmra.mrb[4].mxu1 %v8516_v59  ;;  %v11246_v59 = vld [vmem:[%s14789_s1 + $0x1e08] ss:$16 sps:$4 sm:$0xff]  }
 0x38b   :  { %7289 = vmatpush1.bf16.msra.mxu0 %v11159_v58  ;;  %8137 = vmatpush1.bf16.msra.mxu1 %v11162_v61  ;;  %v8519_v58 = vcombine.high %v60_v54, %v76_v55  ;;  %v11249_v61 = vld [vmem:[%s14789_s1 + $0x1e20] ss:$16 sps:$4 sm:$0xff]  }
 0x38c   :  { %7290 = vmatprep.subr.bf16.mxu0 %v11167_v62  ;;  %8138 = vmatprep.subr.bf16.mxu1 %v11170_v63  ;;  %v11252_v62 = vld [vmem:[%s14789_s1 + $0x1e28] ss:$16 sps:$4 sm:$0xff]   ;;  %v11257_v63 = vld [vmem:[%s14789_s1 + $0x1e44] ss:$16 sps:$4 sm:$0xff]  }
 0x38d   :  { %7316 = vmatprep.mubr.bf16.mxu0 %v8487_v0  ;;  %8164 = vmatprep.mubr.bf16.mxu1 %v8487_v0  ;;  %v11260_v0 = vld [vmem:[%s14789_s1 + $0x1e4c] ss:$16 sps:$4 sm:$0xff]  }
 0x38f   :  { %7291 = vmatpush1.bf16.msra.mxu0 %v11165_v3  ;;  %8139 = vmatpush1.bf16.msra.mxu1 %v11168_v4  ;;  %v8518_v3 = vcombine.low %v60_v54, %v76_v55  ;;  %v14570_v4 = vld [vmem:[%s14790_s0 + $0x78] sm:$0xff]  ;;  %v11335_v55 = vld [vmem:[%s14789_s1 + $0x1fe4] ss:$16 sps:$4 sm:$0xff]  }
 0x390   :  { %7292 = vmatprep.subr.bf16.mxu0 %v11173_v1  ;;  %8140 = vmatprep.subr.bf16.mxu1 %v11176_v2  ;;  %v14575_v1 = vld [vmem:[%s14790_s0 + $0xf8] sm:$0xff]  ;;  %v11255_v2 = vld [vmem:[%s14789_s1 + $0x1e40] ss:$16 sps:$4 sm:$0xff]  }
 0x391   :  { %v11330_v54 = vld [vmem:[%s14789_s1 + $0x1fc8] ss:$16 sps:$4 sm:$0xff]  }
 0x393   :  { %7293 = vmatpush1.bf16.msra.mxu0 %v11171_v5  ;;  %8141 = vmatpush1.bf16.msra.mxu1 %v11174_v6  ;;  %v11258_v5 = vld [vmem:[%s14789_s1 + $0x1e48] ss:$16 sps:$4 sm:$0xff]   ;;  %v11263_v6 = vld [vmem:[%s14789_s1 + $0x1e64] ss:$16 sps:$4 sm:$0xff]  }
 0x394   :  { %7294 = vmatprep.subr.bf16.mxu0 %v11179_v7  ;;  %8142 = vmatprep.subr.bf16.mxu1 %v11182_v8  ;;  %v11266_v7 = vld [vmem:[%s14789_s1 + $0x1e6c] ss:$16 sps:$4 sm:$0xff]   ;;  %v8489_v8 = vcombine.high %v14570_v4, %v14575_v1 }
 0x397   :  { %7295 = vmatpush1.bf16.msra.mxu0 %v11177_v11  ;;  %8143 = vmatpush1.bf16.msra.mxu1 %v11180_v12  ;;  %v11261_v11 = vld [vmem:[%s14789_s1 + $0x1e60] ss:$16 sps:$4 sm:$0xff]   ;;  %v11264_v12 = vld [vmem:[%s14789_s1 + $0x1e68] ss:$16 sps:$4 sm:$0xff]  }
 0x398   :  { %7296 = vmatprep.subr.bf16.mxu0 %v11185_v9  ;;  %8144 = vmatprep.subr.bf16.mxu1 %v11188_v10  ;;  %v11269_v9 = vld [vmem:[%s14789_s1 + $0x1e84] ss:$16 sps:$4 sm:$0xff]   ;;  %v11272_v10 = vld [vmem:[%s14789_s1 + $0x1e8c] ss:$16 sps:$4 sm:$0xff]  }
 0x39b   :  { %7297 = vmatpush1.bf16.msra.mxu0 %v11183_v13  ;;  %8145 = vmatpush1.bf16.msra.mxu1 %v11186_v14  ;;  %v11267_v13 = vld [vmem:[%s14789_s1 + $0x1e80] ss:$16 sps:$4 sm:$0xff]   ;;  %v11270_v14 = vld [vmem:[%s14789_s1 + $0x1e88] ss:$16 sps:$4 sm:$0xff]  }
 0x39c   :  { %7298 = vmatprep.subr.bf16.mxu0 %v11191_v15  ;;  %8146 = vmatprep.subr.bf16.mxu1 %v11194_v16  ;;  %v11275_v15 = vld [vmem:[%s14789_s1 + $0x1ea4] ss:$16 sps:$4 sm:$0xff]   ;;  %v11278_v16 = vld [vmem:[%s14789_s1 + $0x1eac] ss:$16 sps:$4 sm:$0xff]  }
 0x39f   :  { %7299 = vmatpush1.bf16.msra.mxu0 %v11189_v19  ;;  %8147 = vmatpush1.bf16.msra.mxu1 %v11192_v17  ;;  %v11273_v19 = vld [vmem:[%s14789_s1 + $0x1ea0] ss:$16 sps:$4 sm:$0xff]   ;;  %v11276_v17 = vld [vmem:[%s14789_s1 + $0x1ea8] ss:$16 sps:$4 sm:$0xff]  }
 0x3a0   :  { %7300 = vmatprep.subr.bf16.mxu0 %v11197_v18  ;;  %8148 = vmatprep.subr.bf16.mxu1 %v11200_v20  ;;  %v11281_v18 = vld [vmem:[%s14789_s1 + $0x1ec4] ss:$16 sps:$4 sm:$0xff]   ;;  %v11284_v20 = vld [vmem:[%s14789_s1 + $0x1ecc] ss:$16 sps:$4 sm:$0xff]  }
 0x3a3   :  { %7301 = vmatpush1.bf16.msra.mxu0 %v11195_v21  ;;  %8149 = vmatpush1.bf16.msra.mxu1 %v11198_v22  ;;  %v11279_v21 = vld [vmem:[%s14789_s1 + $0x1ec0] ss:$16 sps:$4 sm:$0xff]   ;;  %v11282_v22 = vld [vmem:[%s14789_s1 + $0x1ec8] ss:$16 sps:$4 sm:$0xff]  }
 0x3a4   :  { %7302 = vmatprep.subr.bf16.mxu0 %v11203_v23  ;;  %8150 = vmatprep.subr.bf16.mxu1 %v11206_v24  ;;  %v11287_v23 = vld [vmem:[%s14789_s1 + $0x1ee4] ss:$16 sps:$4 sm:$0xff]   ;;  %v11290_v24 = vld [vmem:[%s14789_s1 + $0x1eec] ss:$16 sps:$4 sm:$0xff]  }
 0x3a7   :  { %7303 = vmatpush1.bf16.msra.mxu0 %v11201_v26  ;;  %8151 = vmatpush1.bf16.msra.mxu1 %v11204_v25  ;;  %v11285_v26 = vld [vmem:[%s14789_s1 + $0x1ee0] ss:$16 sps:$4 sm:$0xff]   ;;  %v11288_v25 = vld [vmem:[%s14789_s1 + $0x1ee8] ss:$16 sps:$4 sm:$0xff]  }
 0x3a8   :  { %7304 = vmatprep.subr.bf16.mxu0 %v11209_v27  ;;  %8152 = vmatprep.subr.bf16.mxu1 %v11212_v28  ;;  %v11293_v27 = vld [vmem:[%s14789_s1 + $0x1f04] ss:$16 sps:$4 sm:$0xff]   ;;  %v11296_v28 = vld [vmem:[%s14789_s1 + $0x1f0c] ss:$16 sps:$4 sm:$0xff]  }
 0x3ab   :  { %7305 = vmatpush1.bf16.msra.mxu0 %v11207_v29  ;;  %8153 = vmatpush1.bf16.msra.mxu1 %v11210_v30  ;;  %v11291_v29 = vld [vmem:[%s14789_s1 + $0x1f00] ss:$16 sps:$4 sm:$0xff]   ;;  %v11294_v30 = vld [vmem:[%s14789_s1 + $0x1f08] ss:$16 sps:$4 sm:$0xff]  }
 0x3ac   :  { %7306 = vmatprep.subr.bf16.mxu0 %v11215_v31  ;;  %8154 = vmatprep.subr.bf16.mxu1 %v11218_v32  ;;  %v11299_v31 = vld [vmem:[%s14789_s1 + $0x1f24] ss:$16 sps:$4 sm:$0xff]   ;;  %v11302_v32 = vld [vmem:[%s14789_s1 + $0x1f2c] ss:$16 sps:$4 sm:$0xff]  }
 0x3af   :  { %7307 = vmatpush1.bf16.msra.mxu0 %v11213_v34  ;;  %8155 = vmatpush1.bf16.msra.mxu1 %v11216_v36  ;;  %v11297_v34 = vld [vmem:[%s14789_s1 + $0x1f20] ss:$16 sps:$4 sm:$0xff]   ;;  %v11300_v36 = vld [vmem:[%s14789_s1 + $0x1f28] ss:$16 sps:$4 sm:$0xff]  }
 0x3b0   :  { %7308 = vmatprep.subr.bf16.mxu0 %v11221_v33  ;;  %8156 = vmatprep.subr.bf16.mxu1 %v11224_v35  ;;  %v11305_v33 = vld [vmem:[%s14789_s1 + $0x1f44] ss:$16 sps:$4 sm:$0xff]   ;;  %v11308_v35 = vld [vmem:[%s14789_s1 + $0x1f4c] ss:$16 sps:$4 sm:$0xff]  }
 0x3b3   :  { %7309 = vmatpush1.bf16.msra.mxu0 %v11219_v37  ;;  %8157 = vmatpush1.bf16.msra.mxu1 %v11222_v38  ;;  %v11303_v37 = vld [vmem:[%s14789_s1 + $0x1f40] ss:$16 sps:$4 sm:$0xff]   ;;  %v11306_v38 = vld [vmem:[%s14789_s1 + $0x1f48] ss:$16 sps:$4 sm:$0xff]  }
 0x3b4   :  { %7310 = vmatprep.subr.bf16.mxu0 %v11227_v39  ;;  %8158 = vmatprep.subr.bf16.mxu1 %v11230_v40  ;;  %v11311_v39 = vld [vmem:[%s14789_s1 + $0x1f64] ss:$16 sps:$4 sm:$0xff]   ;;  %v11314_v40 = vld [vmem:[%s14789_s1 + $0x1f6c] ss:$16 sps:$4 sm:$0xff]  }
 0x3b7   :  { %7311 = vmatpush1.bf16.msra.mxu0 %v11225_v42  ;;  %8159 = vmatpush1.bf16.msra.mxu1 %v11228_v44  ;;  %v11309_v42 = vld [vmem:[%s14789_s1 + $0x1f60] ss:$16 sps:$4 sm:$0xff]   ;;  %v11312_v44 = vld [vmem:[%s14789_s1 + $0x1f68] ss:$16 sps:$4 sm:$0xff]  }
 0x3b8   :  { %7312 = vmatprep.subr.bf16.mxu0 %v11233_v41  ;;  %8160 = vmatprep.subr.bf16.mxu1 %v11236_v43  ;;  %v11317_v41 = vld [vmem:[%s14789_s1 + $0x1f84] ss:$16 sps:$4 sm:$0xff]   ;;  %v11320_v43 = vld [vmem:[%s14789_s1 + $0x1f8c] ss:$16 sps:$4 sm:$0xff]  }
 0x3bb   :  { %7313 = vmatpush1.bf16.msra.mxu0 %v11231_v45  ;;  %8161 = vmatpush1.bf16.msra.mxu1 %v11234_v46  ;;  %v11315_v45 = vld [vmem:[%s14789_s1 + $0x1f80] ss:$16 sps:$4 sm:$0xff]   ;;  %v11318_v46 = vld [vmem:[%s14789_s1 + $0x1f88] ss:$16 sps:$4 sm:$0xff]  }
 0x3bc   :  { %7314 = vmatprep.subr.bf16.mxu0 %v11239_v47  ;;  %8162 = vmatprep.subr.bf16.mxu1 %v11242_v48  ;;  %v11323_v47 = vld [vmem:[%s14789_s1 + $0x1fa4] ss:$16 sps:$4 sm:$0xff]   ;;  %v11326_v48 = vld [vmem:[%s14789_s1 + $0x1fac] ss:$16 sps:$4 sm:$0xff]  }
 0x3bf   :  { %7315 = vmatpush1.bf16.msra.mxu0 %v11237_v51  ;;  %8163 = vmatpush1.bf16.msra.mxu1 %v11240_v52  ;;  %v11321_v51 = vld [vmem:[%s14789_s1 + $0x1fa0] ss:$16 sps:$4 sm:$0xff]   ;;  %v11324_v52 = vld [vmem:[%s14789_s1 + $0x1fa8] ss:$16 sps:$4 sm:$0xff]  }
 0x3c0   :  { %7337 = vmatprep.subr.bf16.mxu0 %v11245_v49  ;;  %8185 = vmatprep.subr.bf16.mxu1 %v11248_v50  ;;  %v11329_v49 = vld [vmem:[%s14789_s1 + $0x1fc4] ss:$16 sps:$4 sm:$0xff]   ;;  %v11332_v50 = vld [vmem:[%s14789_s1 + $0x1fcc] ss:$16 sps:$4 sm:$0xff]  }
 0x3c2   :  { %7317 = vmatmul.mubr.bf16.vlgmr.msra.gmra.mrb[0].mxu0 %v8486_v53  ;;  %8165 = vmatmul.mubr.bf16.vlgmr.msra.gmra.mrb[0].mxu1 %v8486_v53  ;;  %v11327_v53 = vld [vmem:[%s14789_s1 + $0x1fc0] ss:$16 sps:$4 sm:$0xff]  }
 0x3c3   :  { %7338 = vmatpush1.bf16.msra.mxu0 %v11243_v56  ;;  %8186 = vmatpush1.bf16.msra.mxu1 %v11246_v59  ;;  %v11338_v56 = vld [vmem:[%s14789_s1 + $0x1fec] ss:$16 sps:$4 sm:$0xff]   ;;  %v11333_v59 = vld [vmem:[%s14789_s1 + $0x1fe0] ss:$16 sps:$4 sm:$0xff]  }
 0x3c4   :  { %7339 = vmatprep.subr.bf16.mxu0 %v11251_v60  ;;  %8187 = vmatprep.subr.bf16.mxu1 %v11254_v57  ;;  %v11336_v60 = vld [vmem:[%s14789_s1 + $0x1fe8] ss:$16 sps:$4 sm:$0xff]  }
 0x3c5   :  { %7326 = vmatprep.mubr.bf16.mxu0 %v8519_v58  ;;  %8174 = vmatprep.mubr.bf16.mxu1 %v8519_v58  ;;  %v61_v57 = vld [vmem:[%s14790_s0 + $0x178] sm:$0xff] }
 0x3c6   :  { %v77_v58 = vld [vmem:[%s14790_s0 + $0x1f8] sm:$0xff] }
 0x3c7   :  { %7340 = vmatpush1.bf16.msra.mxu0 %v11249_v61  ;;  %8188 = vmatpush1.bf16.msra.mxu1 %v11252_v62  ;;  %v8488_v61 = vcombine.low %v14570_v4, %v14575_v1  ;;  %v8521_v62 = vcombine.high %v61_v57, %v77_v58 }
 0x3c8   :  { %7341 = vmatprep.subr.bf16.mxu0 %v11257_v63  ;;  %8189 = vmatprep.subr.bf16.mxu1 %v11260_v0  ;;  %v8520_v63 = vcombine.low %v61_v57, %v77_v58  ;;  %v11339_v0 = vmov 1966171168  }
 0x3ca   :  { %7327 = vmatmul.mubr.bf16.gmra.mrb[4].mxu0 %v8518_v3  ;;  %8175 = vmatmul.mubr.bf16.gmra.mrb[4].mxu1 %v8518_v3  ;;  %v8337_v3 = vunpack.c.l.s4 %v11339_v0 }
 0x3cb   :  { %7342 = vmatpush1.bf16.msra.mxu0 %v11255_v2  ;;  %8190 = vmatpush1.bf16.msra.mxu1 %v11258_v5  ;;  %v8339_v2 = vlaneseq }
 0x3cc   :  { %7343 = vmatprep.subr.bf16.mxu0 %v11263_v6  ;;  %8191 = vmatprep.subr.bf16.mxu1 %v11266_v7  ;;  %v8338_v4 = vunpack.c.0.s8 %v8337_v3 }
 0x3cd   :  { %7369 = vmatprep.mubr.bf16.mxu0 %v8489_v8  ;;  %8217 = vmatprep.mubr.bf16.mxu1 %v8489_v8  ;;  %v8340_v1 = vshrl.u32 %v8339_v2, 7  ;;  %vm8361_vm0 = vcmp.lt.s32.totalorder %v8339_v2, 512 }
 0x3cf   :  { %7344 = vmatpush1.bf16.msra.mxu0 %v11261_v11  ;;  %8192 = vmatpush1.bf16.msra.mxu1 %v11264_v12 }
 0x3d0   :  { %7345 = vmatprep.subr.bf16.mxu0 %v11269_v9  ;;  %8193 = vmatprep.subr.bf16.mxu1 %v11272_v10 }
 0x3d3   :  { %7346 = vmatpush1.bf16.msra.mxu0 %v11267_v13  ;;  %8194 = vmatpush1.bf16.msra.mxu1 %v11270_v14 }
 0x3d4   :  { %7347 = vmatprep.subr.bf16.mxu0 %v11275_v15  ;;  %8195 = vmatprep.subr.bf16.mxu1 %v11278_v16 }
 0x3d7   :  { %7348 = vmatpush1.bf16.msra.mxu0 %v11273_v19  ;;  %8196 = vmatpush1.bf16.msra.mxu1 %v11276_v17 }
 0x3d8   :  { %7349 = vmatprep.subr.bf16.mxu0 %v11281_v18  ;;  %8197 = vmatprep.subr.bf16.mxu1 %v11284_v20 }
 0x3db   :  { %7350 = vmatpush1.bf16.msra.mxu0 %v11279_v21  ;;  %8198 = vmatpush1.bf16.msra.mxu1 %v11282_v22 }
 0x3dc   :  { %7351 = vmatprep.subr.bf16.mxu0 %v11287_v23  ;;  %8199 = vmatprep.subr.bf16.mxu1 %v11290_v24 }
 0x3df   :  { %7352 = vmatpush1.bf16.msra.mxu0 %v11285_v26  ;;  %8200 = vmatpush1.bf16.msra.mxu1 %v11288_v25 }
 0x3e0   :  { %7353 = vmatprep.subr.bf16.mxu0 %v11293_v27  ;;  %8201 = vmatprep.subr.bf16.mxu1 %v11296_v28 }
 0x3e3   :  { %7354 = vmatpush1.bf16.msra.mxu0 %v11291_v29  ;;  %8202 = vmatpush1.bf16.msra.mxu1 %v11294_v30 }
 0x3e4   :  { %7355 = vmatprep.subr.bf16.mxu0 %v11299_v31  ;;  %8203 = vmatprep.subr.bf16.mxu1 %v11302_v32 }
 0x3e7   :  { %7356 = vmatpush1.bf16.msra.mxu0 %v11297_v34  ;;  %8204 = vmatpush1.bf16.msra.mxu1 %v11300_v36 }
 0x3e8   :  { %7357 = vmatprep.subr.bf16.mxu0 %v11305_v33  ;;  %8205 = vmatprep.subr.bf16.mxu1 %v11308_v35  ;;  %v14762_v33 = vsub.s32 %v8338_v4, %v8340_v1 }
 0x3eb   :  { %7358 = vmatpush1.bf16.msra.mxu0 %v11303_v37  ;;  %8206 = vmatpush1.bf16.msra.mxu1 %v11306_v38 }
 0x3ec   :  { %7359 = vmatprep.subr.bf16.mxu0 %v11311_v39  ;;  %8207 = vmatprep.subr.bf16.mxu1 %v11314_v40 }
 0x3ef   :  { %7360 = vmatpush1.bf16.msra.mxu0 %v11309_v42  ;;  %8208 = vmatpush1.bf16.msra.mxu1 %v11312_v44 }
 0x3f0   :  { %7361 = vmatprep.subr.bf16.mxu0 %v11317_v41  ;;  %8209 = vmatprep.subr.bf16.mxu1 %v11320_v43 }
 0x3f3   :  { %7362 = vmatpush1.bf16.msra.mxu0 %v11315_v45  ;;  %8210 = vmatpush1.bf16.msra.mxu1 %v11318_v46 }
 0x3f4   :  { %7363 = vmatprep.subr.bf16.mxu0 %v11323_v47  ;;  %8211 = vmatprep.subr.bf16.mxu1 %v11326_v48 }
 0x3f7   :  { %7364 = vmatpush1.bf16.msra.mxu0 %v11321_v51  ;;  %8212 = vmatpush1.bf16.msra.mxu1 %v11324_v52 }
 0x3f8   :  { %7365 = vmatprep.subr.bf16.mxu0 %v11329_v49  ;;  %8213 = vmatprep.subr.bf16.mxu1 %v11332_v50 }
 0x3fb   :  { %7366 = vmatpush1.bf16.msra.mxu0 %v11327_v53  ;;  %8214 = vmatpush1.bf16.msra.mxu1 %v11330_v54 }
 0x3fc   :  { %7367 = vmatprep.subr.bf16.mxu0 %v11335_v55  ;;  %8215 = vmatprep.subr.bf16.mxu1 %v11338_v56 }
 0x3ff   :  { %7368 = vmatpush1.bf16.msra.mxu0 %v11333_v59  ;;  %8216 = vmatpush1.bf16.msra.mxu1 %v11336_v60 }
 0x402   :  { %7370 = vmatmul.mubr.bf16.vlgmr.msra.gmra.mrb[0].mxu0 %v8488_v61  ;;  %8218 = vmatmul.mubr.bf16.vlgmr.msra.gmra.mrb[0].mxu1 %v8488_v61 }
 0x403   :  { %7379 = vmatprep.mubr.bf16.mxu0 %v8521_v62  ;;  %8227 = vmatprep.mubr.bf16.mxu1 %v8521_v62 }
 0x40a   :  { %7380 = vmatmul.mubr.bf16.gmra.mrb[4].mxu0 %v8520_v63  ;;  %8228 = vmatmul.mubr.bf16.gmra.mrb[4].mxu1 %v8520_v63 }
 0x4d5   :  { %v7371_v5 = vpop.f32.mrb[0].mxu0  ;;  %v8219_v6 = vpop.f32.mrb[0].mxu1 }
 0x4d6   :  { %v8364_v7 = vmul.f32 %v7371_v5, %v7371_v5  ;;  %v8366_v8 = vmul.f32 %v8219_v6, %v8219_v6  ;;  %v7373_v11 = vpop.f32.mrb[1].mxu0  ;;  %v8221_v12 = vpop.f32.mrb[1].mxu1 }
 0x4d7   :  { %v9554_v9 = vpack.c.bf16 %v7373_v11, %v7371_v5  ;;  %v8365_v10 = vmul.f32 %v7373_v11, %v7373_v11  ;;  %v9555_v13 = vpack.c.bf16 %v8221_v12, %v8219_v6  ;;  %v8367_v14 = vmul.f32 %v8221_v12, %v8221_v12  ;;  %v7375_v15 = vpop.f32.mrb[2].mxu0  ;;  %v8223_v16 = vpop.f32.mrb[2].mxu1 }
 0x4d8   :  { %v8294_v19 = vadd.f32 %v7375_v15, %v7371_v5  ;;  %v8368_v17 = vmul.f32 %v7375_v15, %v7375_v15  ;;  %v8312_v18 = vadd.f32 %v8223_v16, %v8219_v6  ;;  %v8370_v20 = vmul.f32 %v8223_v16, %v8223_v16  ;;  %v7377_v21 = vpop.f32.mrb[3].mxu0  ;;  %v8225_v22 = vpop.f32.mrb[3].mxu1 }
 0x4d9   :  { %8286 = vst [vmem:[%s14791_s2] sm:$0xff] %v9554_v9  ;;  %8287 = vst [vmem:[%s14791_s2 + $0x8] sm:$0xff] %v9555_v13  ;;  %v9556_v23 = vpack.c.bf16 %v7377_v21, %v7375_v15  ;;  %v8303_v24 = vadd.f32 %v7377_v21, %v7373_v11  ;;  %v8369_v26 = vmul.f32 %v7377_v21, %v7377_v21 }
 0x4da   :  { %v9557_v25 = vpack.c.bf16 %v8225_v22, %v8223_v16  ;;  %v8380_v27 = vadd.f32 %v8368_v17, %v8364_v7  ;;  %v8398_v28 = vadd.f32 %v8370_v20, %v8366_v8  ;;  %v8321_v29 = vadd.f32 %v8225_v22, %v8221_v12 }
 0x4db   :  { %v8371_v30 = vmul.f32 %v8225_v22, %v8225_v22  ;;  %8288 = vst [vmem:[%s14791_s2 + $0x10] sm:$0xff] %v9556_v23  ;;  %v8389_v31 = vadd.f32 %v8369_v26, %v8365_v10 }
 0x4dc   :  { %8289 = vst [vmem:[%s14791_s2 + $0x18] sm:$0xff] %v9557_v25 }
 0x4dd   :  { %v8407_v32 = vadd.f32 %v8371_v30, %v8367_v14  ;;  %v7381_v34 = vpop.f32.mrb[4].mxu0  ;;  %v8229_v36 = vpop.f32.mrb[4].mxu1 }
 0x4de   :  { %v8295_v35 = vadd.f32 %v8294_v19, %v7381_v34  ;;  %v8372_v37 = vmul.f32 %v7381_v34, %v7381_v34  ;;  %v8313_v38 = vadd.f32 %v8312_v18, %v8229_v36  ;;  %v8374_v39 = vmul.f32 %v8229_v36, %v8229_v36  ;;  %v7383_v40 = vpop.f32.mrb[5].mxu0  ;;  %v8231_v42 = vpop.f32.mrb[5].mxu1 }
 0x4df   :  { %v9558_v44 = vpack.c.bf16 %v7383_v40, %v7381_v34  ;;  %v8304_v41 = vadd.f32 %v8303_v24, %v7383_v40  ;;  %v8373_v43 = vmul.f32 %v7383_v40, %v7383_v40  ;;  %v9559_v45 = vpack.c.bf16 %v8231_v42, %v8229_v36  ;;  %v7385_v46 = vpop.f32.mrb[6].mxu0  ;;  %v8233_v47 = vpop.f32.mrb[6].mxu1 }
 0x4e0   :  { %v8381_v48 = vadd.f32 %v8380_v27, %v8372_v37  ;;  %v8399_v51 = vadd.f32 %v8398_v28, %v8374_v39  ;;  %v8322_v52 = vadd.f32 %v8321_v29, %v8231_v42  ;;  %v8375_v49 = vmul.f32 %v8231_v42, %v8231_v42  ;;  %v7387_v50 = vpop.f32.mrb[7].mxu0  ;;  %v8235_v53 = vpop.f32.mrb[7].mxu1 }
 0x4e1   :  { %8290 = vst [vmem:[%s14791_s2 + $0x20] sm:$0xff] %v9558_v44  ;;  %v8390_v54 = vadd.f32 %v8389_v31, %v8373_v43  ;;  %8291 = vst [vmem:[%s14791_s2 + $0x28] sm:$0xff] %v9559_v45  ;;  %v8296_v55 = vadd.f32 %v8295_v35, %v7385_v46  ;;  %v8376_v56 = vmul.f32 %v7385_v46, %v7385_v46 }
 0x4e2   :  { %v8314_v59 = vadd.f32 %v8313_v38, %v8233_v47  ;;  %v8408_v60 = vadd.f32 %v8407_v32, %v8375_v49  ;;  %v8378_v57 = vmul.f32 %v8233_v47, %v8233_v47  ;;  %v9560_v58 = vpack.c.bf16 %v7387_v50, %v7385_v46 }
 0x4e3   :  { %v8305_v61 = vadd.f32 %v8304_v41, %v7387_v50  ;;  %v8297_v62 = vrot.slane %v8296_v55, 4  ;;  %v8382_v63 = vadd.f32 %v8381_v48, %v8376_v56  ;;  %v8377_v3 = vmul.f32 %v7387_v50, %v7387_v50 }
 0x4e4   :  { %v8315_v0 = vrot.slane %v8314_v59, 4  ;;  %v8400_v5 = vadd.f32 %v8399_v51, %v8378_v57  ;;  %8292 = vst [vmem:[%s14791_s2 + $0x30] sm:$0xff] %v9560_v58  ;;  %v9561_v7 = vpack.c.bf16 %v8235_v53, %v8233_v47  ;;  %v8323_v8 = vadd.f32 %v8322_v52, %v8235_v53 }
 0x4e5   :  { %v8306_v6 = vrot.slane %v8305_v61, 4  ;;  %v8298_v11 = vadd.f32 %v8297_v62, %v8296_v55  ;;  %v8383_v12 = vrot.slane %v8382_v63, 4  ;;  %v8391_v1 = vadd.f32 %v8390_v54, %v8377_v3 }
 0x4e6   :  { %v8316_v4 = vadd.f32 %v8315_v0, %v8314_v59  ;;  %v8401_v9 = vrot.slane %v8400_v5, 4  ;;  %8293 = vst [vmem:[%s14791_s2 + $0x38] sm:$0xff] %v9561_v7  ;;  %v8324_v13 = vrot.slane %v8323_v8, 4  ;;  %v8379_v14 = vmul.f32 %v8235_v53, %v8235_v53 }
 0x4e7   :  { %v8307_v10 = vadd.f32 %v8306_v6, %v8305_v61  ;;  %v8299_v15 = vrot.slane %v8298_v11, 2  ;;  %v8384_v16 = vadd.f32 %v8383_v12, %v8382_v63  ;;  %v8392_v17 = vrot.slane %v8391_v1, 4 }
 0x4e8   :  { %v8317_v19 = vrot.slane %v8316_v4, 2  ;;  %v8402_v18 = vadd.f32 %v8401_v9, %v8400_v5  ;;  %v8325_v21 = vadd.f32 %v8324_v13, %v8323_v8  ;;  %v8409_v22 = vadd.f32 %v8408_v60, %v8379_v14 }
 0x4e9   :  { %v8308_v20 = vrot.slane %v8307_v10, 2  ;;  %v8300_v23 = vadd.f32 %v8299_v15, %v8298_v11  ;;  %v8385_v24 = vrot.slane %v8384_v16, 2  ;;  %v8393_v25 = vadd.f32 %v8392_v17, %v8391_v1 }
 0x4ea   :  { %v8318_v26 = vadd.f32 %v8317_v19, %v8316_v4  ;;  %v8403_v27 = vrot.slane %v8402_v18, 2  ;;  %v8326_v29 = vrot.slane %v8325_v21, 2  ;;  %v8410_v30 = vrot.slane %v8409_v22, 4 }
 0x4eb   :  { %v8309_v28 = vadd.f32 %v8308_v20, %v8307_v10  ;;  %v8301_v31 = vrot.slane %v8300_v23, 1  ;;  %v8386_v32 = vadd.f32 %v8385_v24, %v8384_v16  ;;  %v8394_v36 = vrot.slane %v8393_v25, 2 }
 0x4ec   :  { %v8319_v34 = vrot.slane %v8318_v26, 1  ;;  %v8404_v35 = vadd.f32 %v8403_v27, %v8402_v18  ;;  %v8327_v38 = vadd.f32 %v8326_v29, %v8325_v21  ;;  %v8411_v39 = vadd.f32 %v8410_v30, %v8409_v22 }
 0x4ed   :  { %v8310_v37 = vrot.slane %v8309_v28, 1  ;;  %v8302_v40 = vadd.f32 %v8301_v31, %v8300_v23  ;;  %v8387_v42 = vrot.slane %v8386_v32, 1  ;;  %v8395_v41 = vadd.f32 %v8394_v36, %v8393_v25 }
 0x4ee   :  { %v8320_v44 = vadd.f32 %v8319_v34, %v8318_v26  ;;  %v8405_v43 = vrot.slane %v8404_v35, 1  ;;  %v8328_v46 = vrot.slane %v8327_v38, 1  ;;  %v8412_v47 = vrot.slane %v8411_v39, 2 }
 0x4ef   :  { %v8311_v45 = vadd.f32 %v8310_v37, %v8309_v28  ;;  %v8388_v48 = vadd.f32 %v8387_v42, %v8386_v32  ;;  %v8396_v51 = vrot.slane %v8395_v41, 1 }
 0x4f0   :  { %v8329_v49 = vadd.f32 %v8328_v46, %v8327_v38  ;;  %v8413_v50 = vadd.f32 %v8412_v47, %v8411_v39  ;;  %v8406_v54 = vadd.f32 %v8405_v43, %v8404_v35 }
 0x4f1   :  { %v8334_v52 = vcombine.low %v8302_v40, %v8311_v45  ;;  %v8397_v53 = vadd.f32 %v8396_v51, %v8395_v41 }
 0x4f2   :  { %v8335_v56 = vcombine.low %v8320_v44, %v8329_v49  ;;  %v8414_v59 = vrot.slane %v8413_v50, 1 }
 0x4f3   :  { %v8342_v55 = vrot.slane %v8334_v52, %v14762_v33  ;;  %v8420_v60 = vcombine.low %v8388_v48, %v8397_v53 }
 0x4f4   :  { %v8349_v57 = vrot.slane %v8335_v56, %v14762_v33  ;;  %v8415_v58 = vadd.f32 %v8414_v59, %v8413_v50 }
 0x4f5   :  { %v8428_v61 = vrot.slane %v8420_v60, %v14762_v33 }
 0x4f6   :  { %v8350_v62 = vcombine.low %v8342_v55, %v8349_v57  ;;  %v8421_v63 = vcombine.low %v8406_v54, %v8415_v58 }
 0x4f8   :  { %v8357_v0 = vrot.slane %v8350_v62, %v14762_v33  ;;  %v8435_v3 = vrot.slane %v8421_v63, %v14762_v33 }
 0x4fa   :  { %8363 = vst.msk [vmem:[%s14792_s3] sm:$0xf] %vm8361_vm0, %v8357_v0  ;;  %v8436_v5 = vcombine.low %v8428_v61, %v8435_v3 }
 0x4fc   :  { %v8443_v6 = vrot.slane %v8436_v5, %v14762_v33 }
 0x4fe   :  { %8445 = vst.msk [vmem:[%s14793_s4] sm:$0xf] %vm8361_vm0, %v8443_v6 }

</bundles_post_ra>
